<compile_context>
chip_gen: v7x
topology: tpu7x:2x2x1
jax: 0.10.0
libtpu: 0.0.40
codegen_flags: <defaults>
</compile_context>

<pallas_src>
import functools

import jax
import jax.numpy as jnp
from jax.experimental import pallas as pl
from jax.experimental.pallas import tpu as pltpu

NUM_JOINT = 17 - 1          # 16
IN_FEAT = 2 * NUM_JOINT     # 32
HIDDEN = 1024
OUT_FEAT = 3 * NUM_JOINT    # 48
OUT_PAD = 128               # lane-dense decode width (sliced back to 48)
BN_EPS = 1e-5
MAX_TILE_B = 128            # batch rows per grid step


def _round_up(n, m):
    return ((n + m - 1) // m) * m


def _bilinear_kernel(x_ref,
                     we_ref, be_ref,
                     w10_ref, b10_ref, w11_ref, b11_ref,
                     w20_ref, b20_ref, w21_ref, b21_ref,
                     wd_ref, bd_ref,
                     out_ref):
    """Fused forward for one batch tile.

    Each heavy_linear (Linear + BN(folded) + ReLU + Dropout(eval=id)) is
    relu(x @ W_eff + b_eff).  Weights are bf16, all matmuls accumulate in f32
    on the MXU; biases / ReLU / residual adds stay in f32.
    """
    f32 = jnp.float32
    bf16 = jnp.bfloat16

    def lin_relu(h, w_ref, b_ref):
        return jnp.maximum(
            jnp.dot(h.astype(bf16), w_ref[...], preferred_element_type=f32)
            + b_ref[...], 0.0)

    # encode: 32 -> 1024
    h = lin_relu(x_ref[...], we_ref, be_ref)

    # bilinear block 1 (residual)
    skip = h
    h = lin_relu(h, w10_ref, b10_ref)
    h = lin_relu(h, w11_ref, b11_ref)
    h = h + skip

    # bilinear block 2 (residual)
    skip = h
    h = lin_relu(h, w20_ref, b20_ref)
    h = lin_relu(h, w21_ref, b21_ref)
    h = h + skip

    # decode: 1024 -> 128 (zero-padded from 48), plain Linear, no activation
    out_ref[...] = (
        jnp.dot(h.astype(bf16), wd_ref[...], preferred_element_type=f32)
        + bd_ref[...]
    ).astype(out_ref.dtype)


def _fold_bn(w, b, gamma, beta, mean, var):
    """Fold BatchNorm1d (eval) into the preceding Linear.  w: (in, out)."""
    scale = gamma / jnp.sqrt(var + BN_EPS)              # (out,)
    w_eff = w * scale[None, :]                          # (in, out)
    b_eff = (b - mean) * scale + beta                   # (out,)
    return w_eff, b_eff.reshape(1, -1)


def init_params(key):
    """Deterministic synthetic f32 parameters matching BilinearUnit's shapes."""
    ks = jax.random.split(key, 32)
    it = iter(ks)

    def heavy(in_f, out_f):
        w = jax.random.normal(next(it), (in_f, out_f), jnp.float32) * 0.02
        b = jax.random.normal(next(it), (out_f,), jnp.float32) * 0.01
        gamma = 1.0 + 0.1 * jax.random.normal(next(it), (out_f,), jnp.float32)
        beta = 0.1 * jax.random.normal(next(it), (out_f,), jnp.float32)
        mean = 0.05 * jax.random.normal(next(it), (out_f,), jnp.float32)
        var = 1.0 + 0.1 * jax.random.uniform(next(it), (out_f,), jnp.float32)
        return _fold_bn(w, b, gamma, beta, mean, var)

    we, be = heavy(IN_FEAT, HIDDEN)                     # encode
    w10, b10 = heavy(HIDDEN, HIDDEN)                    # bilinear[0][0]
    w11, b11 = heavy(HIDDEN, HIDDEN)                    # bilinear[0][1]
    w20, b20 = heavy(HIDDEN, HIDDEN)                    # bilinear[1][0]
    w21, b21 = heavy(HIDDEN, HIDDEN)                    # bilinear[1][1]
    wd = jax.random.normal(next(it), (HIDDEN, OUT_FEAT), jnp.float32) * 0.02
    bd = (jax.random.normal(next(it), (OUT_FEAT,), jnp.float32) * 0.01
          ).reshape(1, -1)                              # decode
    return (we, be, w10, b10, w11, b11, w20, b20, w21, b21, wd, bd)


def prepare_params(params):
    """Cast weights to bf16 (halves HBM bytes) and lane-pad the decode to 128."""
    (we, be, w10, b10, w11, b11, w20, b20, w21, b21, wd, bd) = params
    wd_p = jnp.zeros((HIDDEN, OUT_PAD), jnp.float32).at[:, :OUT_FEAT].set(wd)
    bd_p = jnp.zeros((1, OUT_PAD), jnp.float32).at[:, :OUT_FEAT].set(bd)
    bf = lambda a: a.astype(jnp.bfloat16)
    return (bf(we), be, bf(w10), b10, bf(w11), b11,
            bf(w20), b20, bf(w21), b21, bf(wd_p), bd_p)


@jax.jit
def bilinear_unit_forward(x, prepared):
    B = x.shape[0]
    tile_b = min(MAX_TILE_B, _round_up(B, 8))
    padded_b = _round_up(B, tile_b)
    if padded_b != B:
        x = jnp.pad(x, ((0, padded_b - B), (0, 0)))
    grid = (padded_b // tile_b,)

    x_spec = pl.BlockSpec((tile_b, IN_FEAT), lambda i: (i, 0))
    out_spec = pl.BlockSpec((tile_b, OUT_PAD), lambda i: (i, 0))
    # Constant block index -> each weight/bias is DMA'd once and stays
    # VMEM-resident across all batch tiles.
    w_specs = [pl.BlockSpec(p.shape, lambda i: (0, 0)) for p in prepared]

    flops = 2 * padded_b * (IN_FEAT * HIDDEN + 4 * HIDDEN * HIDDEN
                            + HIDDEN * OUT_PAD)
    bytes_accessed = (x.size * x.dtype.itemsize
                      + sum(int(p.size) * p.dtype.itemsize for p in prepared)
                      + padded_b * OUT_PAD * 4)

    out = pl.pallas_call(
        _bilinear_kernel,
        out_shape=jax.ShapeDtypeStruct((padded_b, OUT_PAD), jnp.float32),
        grid=grid,
        in_specs=[x_spec] + w_specs,
        out_specs=out_spec,
        compiler_params=pltpu.CompilerParams(
            dimension_semantics=("parallel",),
            vmem_limit_bytes=40 * 1024 * 1024),
        cost_estimate=pl.CostEstimate(
            flops=flops, transcendentals=0, bytes_accessed=bytes_accessed),
    )(x, *prepared)
    return out[:B, :OUT_FEAT]


def _reference_forward_f32(x, params):
    """Original eval-mode semantics in f32."""
    (we, be, w10, b10, w11, b11, w20, b20, w21, b21, wd, bd) = params
    h = jnp.maximum(x @ we + be, 0.0)
    skip = h
    h = jnp.maximum(h @ w10 + b10, 0.0)
    h = jnp.maximum(h @ w11 + b11, 0.0)
    h = h + skip
    skip = h
    h = jnp.maximum(h @ w20 + b20, 0.0)
    h = jnp.maximum(h @ w21 + b21, 0.0)
    h = h + skip
    return h @ wd + bd


def _reference_forward_bf16(x, prepared):
    """Pure-JAX mirror of the kernel's bf16-weight / f32-accumulate math."""
    (we, be, w10, b10, w11, b11, w20, b20, w21, b21, wd, bd) = prepared
    f32, bf16 = jnp.float32, jnp.bfloat16

    def lin_relu(h, w, b):
        return jnp.maximum(
            jnp.dot(h.astype(bf16), w, preferred_element_type=f32) + b, 0.0)

    h = lin_relu(x, we, be)
    skip = h
    h = lin_relu(h, w10, b10)
    h = lin_relu(h, w11, b11)
    h = h + skip
    skip = h
    h = lin_relu(h, w20, b20)
    h = lin_relu(h, w21, b21)
    h = h + skip
    out = jnp.dot(h.astype(bf16), wd, preferred_element_type=f32) + bd
    return out[:, :OUT_FEAT]


if __name__ == "__main__":
    key = jax.random.PRNGKey(0)
    kx, kp, kx2 = jax.random.split(key, 3)

    params = init_params(kp)                 # f32, BN folded
    prepared = prepare_params(params)        # bf16 weights, padded decode

    # Small single-tile batch (grid = (1,)).
    B = 8
    x = jax.random.normal(kx, (B, IN_FEAT), jnp.float32)   # (batch, 2*16)
    out = jax.block_until_ready(bilinear_unit_forward(x, prepared))
    assert out.shape == (B, OUT_FEAT)

    ref_bf16 = _reference_forward_bf16(x, prepared)
    ref_f32 = _reference_forward_f32(x, params)
    assert jnp.allclose(out, ref_bf16, atol=1e-3, rtol=1e-3), \
        "kernel vs bf16 reference mismatch"
    assert jnp.allclose(out, ref_f32, atol=3e-2, rtol=3e-2), \
        "kernel vs f32 reference mismatch"

    # Larger batch exercising the batch grid + padding path (grid = (2,)).
    B2 = 200
    x2 = jax.random.normal(kx2, (B2, IN_FEAT), jnp.float32)
    out2 = jax.block_until_ready(bilinear_unit_forward(x2, prepared))
    assert out2.shape == (B2, OUT_FEAT)
    ref2 = _reference_forward_bf16(x2, prepared)
    assert jnp.allclose(out2, ref2, atol=1e-3, rtol=1e-3), \
        "batched kernel vs bf16 reference mismatch"

    print("KERNEL_OK")
</pallas_src>

<mosaic_0001>
module attributes {stable_mosaic.version = 11 : i64} {
  func.func @_bilinear_kernel(%arg0: i32, %arg1: memref<8x32xf32, #tpu.memory_space<vmem>>, %arg2: memref<32x1024xbf16, #tpu.memory_space<vmem>>, %arg3: memref<1x1024xf32, #tpu.memory_space<vmem>>, %arg4: memref<1024x1024xbf16, #tpu.memory_space<vmem>>, %arg5: memref<1x1024xf32, #tpu.memory_space<vmem>>, %arg6: memref<1024x1024xbf16, #tpu.memory_space<vmem>>, %arg7: memref<1x1024xf32, #tpu.memory_space<vmem>>, %arg8: memref<1024x1024xbf16, #tpu.memory_space<vmem>>, %arg9: memref<1x1024xf32, #tpu.memory_space<vmem>>, %arg10: memref<1024x1024xbf16, #tpu.memory_space<vmem>>, %arg11: memref<1x1024xf32, #tpu.memory_space<vmem>>, %arg12: memref<1024x128xbf16, #tpu.memory_space<vmem>>, %arg13: memref<1x128xf32, #tpu.memory_space<vmem>>, %arg14: memref<8x128xf32, #tpu.memory_space<vmem>>) attributes {dimension_semantics = [#tpu.dimension_semantics<parallel>], iteration_bounds = array<i64: 1>, scalar_prefetch = 0 : i64, scratch_operands = 0 : i64, tpu.core_type = #tpu.core_type<tc>, window_params = [{transform_indices = @transform_0, window_bounds = array<i64: 8, 32>}, {pipeline_mode = #tpu.pipeline_mode<synchronous>, transform_indices = @transform_1, window_bounds = array<i64: 32, 1024>}, {pipeline_mode = #tpu.pipeline_mode<synchronous>, transform_indices = @transform_2, window_bounds = array<i64: 1, 1024>}, {pipeline_mode = #tpu.pipeline_mode<synchronous>, transform_indices = @transform_3, window_bounds = array<i64: 1024, 1024>}, {pipeline_mode = #tpu.pipeline_mode<synchronous>, transform_indices = @transform_4, window_bounds = array<i64: 1, 1024>}, {pipeline_mode = #tpu.pipeline_mode<synchronous>, transform_indices = @transform_5, window_bounds = array<i64: 1024, 1024>}, {pipeline_mode = #tpu.pipeline_mode<synchronous>, transform_indices = @transform_6, window_bounds = array<i64: 1, 1024>}, {pipeline_mode = #tpu.pipeline_mode<synchronous>, transform_indices = @transform_7, window_bounds = array<i64: 1024, 1024>}, {pipeline_mode = #tpu.pipeline_mode<synchronous>, transform_indices = @transform_8, window_bounds = array<i64: 1, 1024>}, {pipeline_mode = #tpu.pipeline_mode<synchronous>, transform_indices = @transform_9, window_bounds = array<i64: 1024, 1024>}, {pipeline_mode = #tpu.pipeline_mode<synchronous>, transform_indices = @transform_10, window_bounds = array<i64: 1, 1024>}, {pipeline_mode = #tpu.pipeline_mode<synchronous>, transform_indices = @transform_11, window_bounds = array<i64: 1024, 128>}, {pipeline_mode = #tpu.pipeline_mode<synchronous>, transform_indices = @transform_12, window_bounds = array<i64: 1, 128>}, {transform_indices = @transform_13, window_bounds = array<i64: 8, 128>}]} {
    %c0 = arith.constant 0 : index
    %c0_0 = arith.constant 0 : index
    %0 = vector.load %arg1[%c0, %c0_0] : memref<8x32xf32, #tpu.memory_space<vmem>>, vector<8x32xf32>
    %1 = arith.truncf %0 : vector<8x32xf32> to vector<8x32xbf16>
    %c0_1 = arith.constant 0 : index
    %c0_2 = arith.constant 0 : index
    %2 = vector.load %arg2[%c0_1, %c0_2] : memref<32x1024xbf16, #tpu.memory_space<vmem>>, vector<32x1024xbf16>
    %cst = arith.constant dense<0.000000e+00> : vector<8x1024xf32>
    %3 = tpu.matmul %1, %2, %cst {dimension_numbers = #tpu.dot_dimension_numbers<[1], [0], [0], [1], [0, 0, 1, 1], [], []>} : vector<8x32xbf16>, vector<32x1024xbf16>, vector<8x1024xf32> -> vector<8x1024xf32>
    %c0_3 = arith.constant 0 : index
    %c0_4 = arith.constant 0 : index
    %4 = vector.load %arg3[%c0_3, %c0_4] : memref<1x1024xf32, #tpu.memory_space<vmem>>, vector<1x1024xf32>
    %5 = vector.broadcast %4 : vector<1x1024xf32> to vector<8x1024xf32>
    %6 = arith.addf %3, %5 : vector<8x1024xf32>
    %cst_5 = arith.constant 0.000000e+00 : f32
    %7 = vector.broadcast %cst_5 : f32 to vector<8x1024xf32>
    %8 = arith.maximumf %6, %7 : vector<8x1024xf32>
    %9 = arith.truncf %8 : vector<8x1024xf32> to vector<8x1024xbf16>
    %c0_6 = arith.constant 0 : index
    %c0_7 = arith.constant 0 : index
    %10 = vector.load %arg4[%c0_6, %c0_7] : memref<1024x1024xbf16, #tpu.memory_space<vmem>>, vector<1024x1024xbf16>
    %cst_8 = arith.constant dense<0.000000e+00> : vector<8x1024xf32>
    %11 = tpu.matmul %9, %10, %cst_8 {dimension_numbers = #tpu.dot_dimension_numbers<[1], [0], [0], [1], [0, 0, 1, 1], [], []>} : vector<8x1024xbf16>, vector<1024x1024xbf16>, vector<8x1024xf32> -> vector<8x1024xf32>
    %c0_9 = arith.constant 0 : index
    %c0_10 = arith.constant 0 : index
    %12 = vector.load %arg5[%c0_9, %c0_10] : memref<1x1024xf32, #tpu.memory_space<vmem>>, vector<1x1024xf32>
    %13 = vector.broadcast %12 : vector<1x1024xf32> to vector<8x1024xf32>
    %14 = arith.addf %11, %13 : vector<8x1024xf32>
    %cst_11 = arith.constant 0.000000e+00 : f32
    %15 = vector.broadcast %cst_11 : f32 to vector<8x1024xf32>
    %16 = arith.maximumf %14, %15 : vector<8x1024xf32>
    %17 = arith.truncf %16 : vector<8x1024xf32> to vector<8x1024xbf16>
    %c0_12 = arith.constant 0 : index
    %c0_13 = arith.constant 0 : index
    %18 = vector.load %arg6[%c0_12, %c0_13] : memref<1024x1024xbf16, #tpu.memory_space<vmem>>, vector<1024x1024xbf16>
    %cst_14 = arith.constant dense<0.000000e+00> : vector<8x1024xf32>
    %19 = tpu.matmul %17, %18, %cst_14 {dimension_numbers = #tpu.dot_dimension_numbers<[1], [0], [0], [1], [0, 0, 1, 1], [], []>} : vector<8x1024xbf16>, vector<1024x1024xbf16>, vector<8x1024xf32> -> vector<8x1024xf32>
    %c0_15 = arith.constant 0 : index
    %c0_16 = arith.constant 0 : index
    %20 = vector.load %arg7[%c0_15, %c0_16] : memref<1x1024xf32, #tpu.memory_space<vmem>>, vector<1x1024xf32>
    %21 = vector.broadcast %20 : vector<1x1024xf32> to vector<8x1024xf32>
    %22 = arith.addf %19, %21 : vector<8x1024xf32>
    %cst_17 = arith.constant 0.000000e+00 : f32
    %23 = vector.broadcast %cst_17 : f32 to vector<8x1024xf32>
    %24 = arith.maximumf %22, %23 : vector<8x1024xf32>
    %25 = arith.addf %24, %8 : vector<8x1024xf32>
    %26 = arith.truncf %25 : vector<8x1024xf32> to vector<8x1024xbf16>
    %c0_18 = arith.constant 0 : index
    %c0_19 = arith.constant 0 : index
    %27 = vector.load %arg8[%c0_18, %c0_19] : memref<1024x1024xbf16, #tpu.memory_space<vmem>>, vector<1024x1024xbf16>
    %cst_20 = arith.constant dense<0.000000e+00> : vector<8x1024xf32>
    %28 = tpu.matmul %26, %27, %cst_20 {dimension_numbers = #tpu.dot_dimension_numbers<[1], [0], [0], [1], [0, 0, 1, 1], [], []>} : vector<8x1024xbf16>, vector<1024x1024xbf16>, vector<8x1024xf32> -> vector<8x1024xf32>
    %c0_21 = arith.constant 0 : index
    %c0_22 = arith.constant 0 : index
    %29 = vector.load %arg9[%c0_21, %c0_22] : memref<1x1024xf32, #tpu.memory_space<vmem>>, vector<1x1024xf32>
    %30 = vector.broadcast %29 : vector<1x1024xf32> to vector<8x1024xf32>
    %31 = arith.addf %28, %30 : vector<8x1024xf32>
    %cst_23 = arith.constant 0.000000e+00 : f32
    %32 = vector.broadcast %cst_23 : f32 to vector<8x1024xf32>
    %33 = arith.maximumf %31, %32 : vector<8x1024xf32>
    %34 = arith.truncf %33 : vector<8x1024xf32> to vector<8x1024xbf16>
    %c0_24 = arith.constant 0 : index
    %c0_25 = arith.constant 0 : index
    %35 = vector.load %arg10[%c0_24, %c0_25] : memref<1024x1024xbf16, #tpu.memory_space<vmem>>, vector<1024x1024xbf16>
    %cst_26 = arith.constant dense<0.000000e+00> : vector<8x1024xf32>
    %36 = tpu.matmul %34, %35, %cst_26 {dimension_numbers = #tpu.dot_dimension_numbers<[1], [0], [0], [1], [0, 0, 1, 1], [], []>} : vector<8x1024xbf16>, vector<1024x1024xbf16>, vector<8x1024xf32> -> vector<8x1024xf32>
    %c0_27 = arith.constant 0 : index
    %c0_28 = arith.constant 0 : index
    %37 = vector.load %arg11[%c0_27, %c0_28] : memref<1x1024xf32, #tpu.memory_space<vmem>>, vector<1x1024xf32>
    %38 = vector.broadcast %37 : vector<1x1024xf32> to vector<8x1024xf32>
    %39 = arith.addf %36, %38 : vector<8x1024xf32>
    %cst_29 = arith.constant 0.000000e+00 : f32
    %40 = vector.broadcast %cst_29 : f32 to vector<8x1024xf32>
    %41 = arith.maximumf %39, %40 : vector<8x1024xf32>
    %42 = arith.addf %41, %25 : vector<8x1024xf32>
    %43 = arith.truncf %42 : vector<8x1024xf32> to vector<8x1024xbf16>
    %c0_30 = arith.constant 0 : index
    %c0_31 = arith.constant 0 : index
    %44 = vector.load %arg12[%c0_30, %c0_31] : memref<1024x128xbf16, #tpu.memory_space<vmem>>, vector<1024x128xbf16>
    %cst_32 = arith.constant dense<0.000000e+00> : vector<8x128xf32>
    %45 = tpu.matmul %43, %44, %cst_32 {dimension_numbers = #tpu.dot_dimension_numbers<[1], [0], [0], [1], [0, 0, 1, 1], [], []>} : vector<8x1024xbf16>, vector<1024x128xbf16>, vector<8x128xf32> -> vector<8x128xf32>
    %c0_33 = arith.constant 0 : index
    %c0_34 = arith.constant 0 : index
    %46 = vector.load %arg13[%c0_33, %c0_34] : memref<1x128xf32, #tpu.memory_space<vmem>>, vector<1x128xf32>
    %47 = vector.broadcast %46 : vector<1x128xf32> to vector<8x128xf32>
    %48 = arith.addf %45, %47 : vector<8x128xf32>
    %c0_35 = arith.constant 0 : index
    %c0_36 = arith.constant 0 : index
    %49 = vector.load %arg14[%c0_35, %c0_36] : memref<8x128xf32, #tpu.memory_space<vmem>>, vector<8x128xf32>
    tpu.vector_store %arg14[%c0_35, %c0_36], %48 {strides = array<i32>} : memref<8x128xf32, #tpu.memory_space<vmem>>, vector<8x128xf32>,
    return
  }
  func.func @transform_0(%arg0: i32) -> (i32, i32) {
    %c0_i32 = arith.constant 0 : i32
    %c0_i32_0 = arith.constant 0 : i32
    return %arg0, %c0_i32 : i32, i32
  }
  func.func @transform_1(%arg0: i32) -> (i32, i32) {
    %c0_i32 = arith.constant 0 : i32
    %c0_i32_0 = arith.constant 0 : i32
    %c0_i32_1 = arith.constant 0 : i32
    return %c0_i32, %c0_i32_0 : i32, i32
  }
  func.func @transform_2(%arg0: i32) -> (i32, i32) {
    %c0_i32 = arith.constant 0 : i32
    %c0_i32_0 = arith.constant 0 : i32
    %c0_i32_1 = arith.constant 0 : i32
    return %c0_i32, %c0_i32_0 : i32, i32
  }
  func.func @transform_3(%arg0: i32) -> (i32, i32) {
    %c0_i32 = arith.constant 0 : i32
    %c0_i32_0 = arith.constant 0 : i32
    %c0_i32_1 = arith.constant 0 : i32
    return %c0_i32, %c0_i32_0 : i32, i32
  }
  func.func @transform_4(%arg0: i32) -> (i32, i32) {
    %c0_i32 = arith.constant 0 : i32
    %c0_i32_0 = arith.constant 0 : i32
    %c0_i32_1 = arith.constant 0 : i32
    return %c0_i32, %c0_i32_0 : i32, i32
  }
  func.func @transform_5(%arg0: i32) -> (i32, i32) {
    %c0_i32 = arith.constant 0 : i32
    %c0_i32_0 = arith.constant 0 : i32
    %c0_i32_1 = arith.constant 0 : i32
    return %c0_i32, %c0_i32_0 : i32, i32
  }
  func.func @transform_6(%arg0: i32) -> (i32, i32) {
    %c0_i32 = arith.constant 0 : i32
    %c0_i32_0 = arith.constant 0 : i32
    %c0_i32_1 = arith.constant 0 : i32
    return %c0_i32, %c0_i32_0 : i32, i32
  }
  func.func @transform_7(%arg0: i32) -> (i32, i32) {
    %c0_i32 = arith.constant 0 : i32
    %c0_i32_0 = arith.constant 0 : i32
    %c0_i32_1 = arith.constant 0 : i32
    return %c0_i32, %c0_i32_0 : i32, i32
  }
  func.func @transform_8(%arg0: i32) -> (i32, i32) {
    %c0_i32 = arith.constant 0 : i32
    %c0_i32_0 = arith.constant 0 : i32
    %c0_i32_1 = arith.constant 0 : i32
    return %c0_i32, %c0_i32_0 : i32, i32
  }
  func.func @transform_9(%arg0: i32) -> (i32, i32) {
    %c0_i32 = arith.constant 0 : i32
    %c0_i32_0 = arith.constant 0 : i32
    %c0_i32_1 = arith.constant 0 : i32
    return %c0_i32, %c0_i32_0 : i32, i32
  }
  func.func @transform_10(%arg0: i32) -> (i32, i32) {
    %c0_i32 = arith.constant 0 : i32
    %c0_i32_0 = arith.constant 0 : i32
    %c0_i32_1 = arith.constant 0 : i32
    return %c0_i32, %c0_i32_0 : i32, i32
  }
  func.func @transform_11(%arg0: i32) -> (i32, i32) {
    %c0_i32 = arith.constant 0 : i32
    %c0_i32_0 = arith.constant 0 : i32
    %c0_i32_1 = arith.constant 0 : i32
    return %c0_i32, %c0_i32_0 : i32, i32
  }
  func.func @transform_12(%arg0: i32) -> (i32, i32) {
    %c0_i32 = arith.constant 0 : i32
    %c0_i32_0 = arith.constant 0 : i32
    %c0_i32_1 = arith.constant 0 : i32
    return %c0_i32, %c0_i32_0 : i32, i32
  }
  func.func @transform_13(%arg0: i32) -> (i32, i32) {
    %c0_i32 = arith.constant 0 : i32
    %c0_i32_0 = arith.constant 0 : i32
    return %arg0, %c0_i32 : i32, i32
  }
}

</mosaic_0001>

<bundles_post_ra>
// kernel: bilinear_unit_forward.1
= control target key start
LH: loop header
LB: loop body
LE: loop exit
PB: predicated region body
PF: predicated region fallthrough
CT: control target
= control target key end

     0   :  { %18 = vsyncpa [#allocation3], 0  ;;  %s19990_s0 = inlined_call_operand.hbm [shape: f32[8,32], index: 0, kind: input, shape index: {}]   ;;  %s19991_s1 = inlined_call_operand.hbm [shape: bf16[32,1024], index: 1, kind: input, shape index: {}]   ;;  %s19992_s2 = inlined_call_operand.hbm [shape: f32[1,1024], index: 2, kind: input, shape index: {}]   ;;  %s19993_s3 = inlined_call_operand.hbm [shape: bf16[1024,1024], index: 3, kind: input, shape index: {}]   ;;  %s19994_s4 = inlined_call_operand.hbm [shape: f32[1,1024], index: 4, kind: input, shape index: {}]   ;;  %s19995_s5 = inlined_call_operand.hbm [shape: bf16[1024,1024], index: 5, kind: input, shape index: {}]   ;;  %s19996_s6 = inlined_call_operand.hbm [shape: f32[1,1024], index: 6, kind: input, shape index: {}]   ;;  %s19997_s7 = inlined_call_operand.hbm [shape: bf16[1024,1024], index: 7, kind: input, shape index: {}]   ;;  %s19998_s8 = inlined_call_operand.hbm [shape: f32[1,1024], index: 8, kind: input, shape index: {}]   ;;  %s19999_s9 = inlined_call_operand.hbm [shape: bf16[1024,1024], index: 9, kind: input, shape index: {}]   ;;  %s20000_s10 = inlined_call_operand.hbm [shape: f32[1,1024], index: 10, kind: input, shape index: {}]   ;;  %s20001_s11 = inlined_call_operand.hbm [shape: bf16[1024,128], index: 11, kind: input, shape index: {}]   ;;  %s20002_s12 = inlined_call_operand.hbm [shape: f32[1,128], index: 12, kind: input, shape index: {}]   ;;  %s20003_s13 = inlined_call_operand.hbm [shape: f32[8,128], index: 13, kind: output, shape index: {}]  }
   0x1   :  { %19 = vsyncpa [#allocation6], 0 }
   0x2   :  { %20 = vsyncpa [#allocation9], 0 }
   0x3   :  { %21 = vsyncpa [#allocation12], 0 }
   0x4   :  { %22 = vsyncpa [#allocation15], 0 }
   0x5   :  { %23 = vsyncpa [#allocation18], 0 }
   0x6   :  { %24 = vsyncpa [#allocation21], 0 }
   0x7   :  { %25 = vsyncpa [#allocation4], 0  ;;  %s19249_s25 = smov [#allocation5]   ;;  %s18925_s29 = scalar_lea.hbm %s19991_s1, 2048 }
   0x8   :  { %s41_s26 = sshll.u32 %s19249_s25, 4  ;;  %p18926_p0 = scmp.ne.s32.totalorder %s19991_s1, %s18925_s29  ;;  %s42_s26 = int_to_ptr.vmem [resolvable:$true] %s41_s26 }
   0x9   :  { %p18929_p1 = scmp.lt.u32.totalorder %s18925_s29, %s19991_s1 }
   0xb   :  { %p18931_p2 = pnand %p18929_p1, %p18926_p0 }
   0xd   :  { %18934 = shalt.err (!%p18931_p2)
}
   0xe   :  { %s18935_s17 = scalar_lea.vmem %s42_s26, 2048  ;;  %p18940_p4 = scmp.lt.s32.totalorder %s42_s26, %s42_s26 }
   0xf   :  { %p18936_p3 = scmp.ne.s32.totalorder %s42_s26, %s18935_s17  ;;  %p18941_p5 = scmp.lt.s32.totalorder %s18935_s17, %s18935_s17 }
  0x11   :  { %p18942_p6 = por %p18941_p5, %p18940_p4 }
  0x13   :  { %p18943_p7 = pnand %p18942_p6, %p18936_p3 }
  0x15   :  { %18946 = shalt.err (!%p18943_p7)
}
  0x16   :  { %s19250_s18 = smov 512   ;;  %s19251_s19 = smov 32  }
  0x17   :  { %47 = dma.hbm_to_vmem [thread:$0]  %s19991_s1, 2048, %s42_s26, [#allocation6], %s19250_s18, %s19250_s18, %s19251_s19  }
  0x18   :  { %s19252_s22 = smov [#allocation8]   ;;  %s19253_s24 = smov [#allocation11]  }
  0x19   :  { %s63_s23 = sshll.u32 %s19252_s22, 4  ;;  %s85_s25 = sshll.u32 %s19253_s24, 4  ;;  %s64_s23 = int_to_ptr.vmem [resolvable:$true] %s63_s23  ;;  %s86_s25 = int_to_ptr.vmem [resolvable:$true] %s85_s25 }
  0x1a   :  { %s18947_s29 = scalar_lea.hbm %s19993_s3, 65536 }
  0x1b   :  { %p18948_p8 = scmp.ne.s32.totalorder %s19993_s3, %s18947_s29  ;;  %p18951_p9 = scmp.lt.u32.totalorder %s18947_s29, %s19993_s3 }
  0x1d   :  { %p18953_p10 = pnand %p18951_p9, %p18948_p8 }
  0x1f   :  { %18956 = shalt.err (!%p18953_p10)
}
  0x20   :  { %s18957_s1 = scalar_lea.vmem %s64_s23, 65536  ;;  %p18962_p12 = scmp.lt.s32.totalorder %s64_s23, %s64_s23 }
  0x21   :  { %p18958_p11 = scmp.ne.s32.totalorder %s64_s23, %s18957_s1  ;;  %p18963_p13 = scmp.lt.s32.totalorder %s18957_s1, %s18957_s1 }
  0x23   :  { %p18964_p0 = por %p18963_p13, %p18962_p12 }
  0x25   :  { %p18965_p1 = pnand %p18964_p0, %p18958_p11 }
  0x27   :  { %18968 = shalt.err (!%p18965_p1)
}
  0x28   :  { %69 = dma.hbm_to_vmem [thread:$0]  %s19993_s3, 65536, %s64_s23, [#allocation9], %s19250_s18, %s19250_s18, %s19251_s19  }
  0x29   :  { %s18969_s22 = scalar_lea.hbm %s19995_s5, 65536 }
  0x2a   :  { %p18970_p2 = scmp.ne.s32.totalorder %s19995_s5, %s18969_s22  ;;  %p18973_p3 = scmp.lt.u32.totalorder %s18969_s22, %s19995_s5 }
  0x2c   :  { %p18975_p4 = pnand %p18973_p3, %p18970_p2 }
  0x2e   :  { %18978 = shalt.err (!%p18975_p4)
}
  0x2f   :  { %s18979_s30 = scalar_lea.vmem %s86_s25, 65536  ;;  %p18984_p6 = scmp.lt.s32.totalorder %s86_s25, %s86_s25 }
  0x30   :  { %p18980_p5 = scmp.ne.s32.totalorder %s86_s25, %s18979_s30  ;;  %p18985_p7 = scmp.lt.s32.totalorder %s18979_s30, %s18979_s30 }
  0x32   :  { %p18986_p8 = por %p18985_p7, %p18984_p6 }
  0x34   :  { %p18987_p9 = pnand %p18986_p8, %p18980_p5 }
  0x36   :  { %18990 = shalt.err (!%p18987_p9)
}
  0x37   :  { %91 = dma.hbm_to_vmem [thread:$0]  %s19995_s5, 65536, %s86_s25, [#allocation12], %s19250_s18, %s19250_s18, %s19251_s19  }
  0x38   :  { %s19254_s14 = smov [#allocation14]   ;;  %s19255_s16 = smov [#allocation17]  }
  0x39   :  { %s107_s15 = sshll.u32 %s19254_s14, 4  ;;  %s129_s1 = sshll.u32 %s19255_s16, 4  ;;  %s108_s15 = int_to_ptr.vmem [resolvable:$true] %s107_s15  ;;  %s130_s1 = int_to_ptr.vmem [resolvable:$true] %s129_s1 }
  0x3a   :  { %s18991_s20 = scalar_lea.hbm %s19997_s7, 65536 }
  0x3b   :  { %p18992_p10 = scmp.ne.s32.totalorder %s19997_s7, %s18991_s20  ;;  %p18995_p11 = scmp.lt.u32.totalorder %s18991_s20, %s19997_s7 }
  0x3d   :  { %p18997_p12 = pnand %p18995_p11, %p18992_p10 }
  0x3f   :  { %19000 = shalt.err (!%p18997_p12)
}
  0x40   :  { %s19001_s5 = scalar_lea.vmem %s108_s15, 65536  ;;  %p19006_p0 = scmp.lt.s32.totalorder %s108_s15, %s108_s15 }
  0x41   :  { %p19002_p13 = scmp.ne.s32.totalorder %s108_s15, %s19001_s5  ;;  %p19007_p1 = scmp.lt.s32.totalorder %s19001_s5, %s19001_s5 }
  0x43   :  { %p19008_p2 = por %p19007_p1, %p19006_p0 }
  0x45   :  { %p19009_p3 = pnand %p19008_p2, %p19002_p13 }
  0x47   :  { %19012 = shalt.err (!%p19009_p3)
}
  0x48   :  { %113 = dma.hbm_to_vmem [thread:$0]  %s19997_s7, 65536, %s108_s15, [#allocation15], %s19250_s18, %s19250_s18, %s19251_s19  }
  0x49   :  { %s19013_s3 = scalar_lea.hbm %s19999_s9, 65536 }
  0x4a   :  { %p19014_p4 = scmp.ne.s32.totalorder %s19999_s9, %s19013_s3  ;;  %p19017_p5 = scmp.lt.u32.totalorder %s19013_s3, %s19999_s9 }
  0x4c   :  { %p19019_p6 = pnand %p19017_p5, %p19014_p4 }
  0x4e   :  { %19022 = shalt.err (!%p19019_p6)
}
  0x4f   :  { %s19023_s17 = scalar_lea.vmem %s130_s1, 65536  ;;  %p19028_p8 = scmp.lt.s32.totalorder %s130_s1, %s130_s1 }
  0x50   :  { %p19024_p7 = scmp.ne.s32.totalorder %s130_s1, %s19023_s17  ;;  %p19029_p9 = scmp.lt.s32.totalorder %s19023_s17, %s19023_s17 }
  0x52   :  { %p19030_p10 = por %p19029_p9, %p19028_p8 }
  0x54   :  { %p19031_p11 = pnand %p19030_p10, %p19024_p7 }
  0x56   :  { %19034 = shalt.err (!%p19031_p11)
}
  0x57   :  { %135 = dma.hbm_to_vmem [thread:$0]  %s19999_s9, 65536, %s130_s1, [#allocation18], %s19250_s18, %s19250_s18, %s19251_s19  }
  0x58   :  { %s19256_s20 = smov [#allocation20]   ;;  %s19035_s27 = scalar_lea.hbm %s20001_s11, 8192 }
  0x59   :  { %s151_s21 = sshll.u32 %s19256_s20, 4  ;;  %p19036_p12 = scmp.ne.s32.totalorder %s20001_s11, %s19035_s27  ;;  %s152_s21 = int_to_ptr.vmem [resolvable:$true] %s151_s21 }
  0x5a   :  { %p19039_p13 = scmp.lt.u32.totalorder %s19035_s27, %s20001_s11 }
  0x5c   :  { %p19041_p0 = pnand %p19039_p13, %p19036_p12 }
  0x5e   :  { %19044 = shalt.err (!%p19041_p0)
}
  0x5f   :  { %s19045_s30 = scalar_lea.vmem %s152_s21, 8192  ;;  %p19050_p2 = scmp.lt.s32.totalorder %s152_s21, %s152_s21 }
  0x60   :  { %p19046_p1 = scmp.ne.s32.totalorder %s152_s21, %s19045_s30  ;;  %p19051_p3 = scmp.lt.s32.totalorder %s19045_s30, %s19045_s30 }
  0x62   :  { %p19052_p4 = por %p19051_p3, %p19050_p2 }
  0x64   :  { %p19053_p5 = pnand %p19052_p4, %p19046_p1 }
  0x66   :  { %19056 = shalt.err (!%p19053_p5)
}
  0x67   :  { %s19257_s9 = smov 64   ;;  %s19258_s18 = smov 4  }
  0x68   :  { %157 = dma.hbm_to_vmem [thread:$0]  %s20001_s11, 8192, %s152_s21, [#allocation21], %s19257_s9, %s19257_s9, %s19258_s18  }
  0x69   :  { %s19259_s3 = smov [#allocation2]   ;;  %s19260_s14 = smov [#allocation7]  }
  0x6a   :  { %s32_s23 = sshll.u32 %s19259_s3, 4  ;;  %s54_s16 = sshll.u32 %s19260_s14, 4  ;;  %s33_s23 = int_to_ptr.vmem [resolvable:$true] %s32_s23  ;;  %s55_s16 = int_to_ptr.vmem [resolvable:$true] %s54_s16 }
  0x6b   :  { %s19057_s7 = scalar_lea.hbm %s19990_s0, 128 }
  0x6c   :  { %p19058_p6 = scmp.ne.s32.totalorder %s19990_s0, %s19057_s7  ;;  %p19061_p7 = scmp.lt.u32.totalorder %s19057_s7, %s19990_s0 }
  0x6e   :  { %p19063_p8 = pnand %p19061_p7, %p19058_p6 }
  0x70   :  { %19066 = shalt.err (!%p19063_p8)
}
  0x71   :  { %s19067_s11 = scalar_lea.vmem %s33_s23, 128  ;;  %p19072_p10 = scmp.lt.s32.totalorder %s33_s23, %s33_s23 }
  0x72   :  { %p19068_p9 = scmp.ne.s32.totalorder %s33_s23, %s19067_s11  ;;  %p19073_p11 = scmp.lt.s32.totalorder %s19067_s11, %s19067_s11 }
  0x74   :  { %p19074_p12 = por %p19073_p11, %p19072_p10 }
  0x76   :  { %p19075_p13 = pnand %p19074_p12, %p19068_p9 }
  0x78   :  { %19078 = shalt.err (!%p19075_p13)
}
  0x79   :  { %35 = dma.hbm_to_vmem [thread:$0]  %s19990_s0, 128, %s33_s23, [#allocation3]  }
  0x7a   :  { %s19079_s28 = scalar_lea.hbm %s19992_s2, 128 }
  0x7b   :  { %p19080_p0 = scmp.ne.s32.totalorder %s19992_s2, %s19079_s28  ;;  %p19083_p1 = scmp.lt.u32.totalorder %s19079_s28, %s19992_s2 }
  0x7d   :  { %p19085_p2 = pnand %p19083_p1, %p19080_p0 }
  0x7f   :  { %19088 = shalt.err (!%p19085_p2)
}
  0x80   :  { %s19089_s19 = scalar_lea.vmem %s55_s16, 128  ;;  %p19094_p4 = scmp.lt.s32.totalorder %s55_s16, %s55_s16 }
  0x81   :  { %p19090_p3 = scmp.ne.s32.totalorder %s55_s16, %s19089_s19  ;;  %p19095_p5 = scmp.lt.s32.totalorder %s19089_s19, %s19089_s19 }
  0x83   :  { %p19096_p6 = por %p19095_p5, %p19094_p4 }
  0x85   :  { %p19097_p7 = pnand %p19096_p6, %p19090_p3 }
  0x87   :  { %19100 = shalt.err (!%p19097_p7)
}
  0x88   :  { %57 = dma.hbm_to_vmem [thread:$0]  %s19992_s2, 128, %s55_s16, [#allocation6]  }
  0x89   :  { %s19261_s3 = smov [#allocation10]   ;;  %s19262_s14 = smov [#allocation13]  }
  0x8a   :  { %s76_s23 = sshll.u32 %s19261_s3, 4  ;;  %s98_s26 = sshll.u32 %s19262_s14, 4  ;;  %s77_s23 = int_to_ptr.vmem [resolvable:$true] %s76_s23  ;;  %s99_s26 = int_to_ptr.vmem [resolvable:$true] %s98_s26 }
  0x8b   :  { %s19101_s15 = scalar_lea.hbm %s19994_s4, 128 }
  0x8c   :  { %p19102_p8 = scmp.ne.s32.totalorder %s19994_s4, %s19101_s15  ;;  %p19105_p9 = scmp.lt.u32.totalorder %s19101_s15, %s19994_s4 }
  0x8e   :  { %p19107_p10 = pnand %p19105_p9, %p19102_p8 }
  0x90   :  { %19110 = shalt.err (!%p19107_p10)
}
  0x91   :  { %s19111_s2 = scalar_lea.vmem %s77_s23, 128  ;;  %p19116_p12 = scmp.lt.s32.totalorder %s77_s23, %s77_s23 }
  0x92   :  { %p19112_p11 = scmp.ne.s32.totalorder %s77_s23, %s19111_s2  ;;  %p19117_p13 = scmp.lt.s32.totalorder %s19111_s2, %s19111_s2 }
  0x94   :  { %p19118_p0 = por %p19117_p13, %p19116_p12 }
  0x96   :  { %p19119_p1 = pnand %p19118_p0, %p19112_p11 }
  0x98   :  { %19122 = shalt.err (!%p19119_p1)
}
  0x99   :  { %79 = dma.hbm_to_vmem [thread:$0]  %s19994_s4, 128, %s77_s23, [#allocation9]  }
  0x9a   :  { %s19123_s25 = scalar_lea.hbm %s19996_s6, 128 }
  0x9b   :  { %p19124_p2 = scmp.ne.s32.totalorder %s19996_s6, %s19123_s25  ;;  %p19127_p3 = scmp.lt.u32.totalorder %s19123_s25, %s19996_s6 }
  0x9d   :  { %p19129_p4 = pnand %p19127_p3, %p19124_p2 }
  0x9f   :  { %19132 = shalt.err (!%p19129_p4)
}
  0xa0   :  { %s19133_s18 = scalar_lea.vmem %s99_s26, 128  ;;  %p19138_p6 = scmp.lt.s32.totalorder %s99_s26, %s99_s26 }
  0xa1   :  { %p19134_p5 = scmp.ne.s32.totalorder %s99_s26, %s19133_s18  ;;  %p19139_p7 = scmp.lt.s32.totalorder %s19133_s18, %s19133_s18 }
  0xa3   :  { %p19140_p8 = por %p19139_p7, %p19138_p6 }
  0xa5   :  { %p19141_p9 = pnand %p19140_p8, %p19134_p5 }
  0xa7   :  { %19144 = shalt.err (!%p19141_p9)
}
  0xa8   :  { %101 = dma.hbm_to_vmem [thread:$0]  %s19996_s6, 128, %s99_s26, [#allocation12]  }
  0xa9   :  { %s19263_s0 = smov [#allocation16]   ;;  %s19264_s3 = smov [#allocation19]  }
  0xaa   :  { %s120_s1 = sshll.u32 %s19263_s0, 4  ;;  %s142_s23 = sshll.u32 %s19264_s3, 4  ;;  %s121_s1 = int_to_ptr.vmem [resolvable:$true] %s120_s1  ;;  %s143_s23 = int_to_ptr.vmem [resolvable:$true] %s142_s23 }
  0xab   :  { %s19145_s7 = scalar_lea.hbm %s19998_s8, 128 }
  0xac   :  { %p19146_p10 = scmp.ne.s32.totalorder %s19998_s8, %s19145_s7  ;;  %p19149_p11 = scmp.lt.u32.totalorder %s19145_s7, %s19998_s8 }
  0xae   :  { %p19151_p12 = pnand %p19149_p11, %p19146_p10 }
  0xb0   :  { %19154 = shalt.err (!%p19151_p12)
}
  0xb1   :  { %s19155_s6 = scalar_lea.vmem %s121_s1, 128  ;;  %p19160_p0 = scmp.lt.s32.totalorder %s121_s1, %s121_s1 }
  0xb2   :  { %p19156_p13 = scmp.ne.s32.totalorder %s121_s1, %s19155_s6  ;;  %p19161_p1 = scmp.lt.s32.totalorder %s19155_s6, %s19155_s6 }
  0xb4   :  { %p19162_p2 = por %p19161_p1, %p19160_p0 }
  0xb6   :  { %p19163_p3 = pnand %p19162_p2, %p19156_p13 }
  0xb8   :  { %19166 = shalt.err (!%p19163_p3)
}
  0xb9   :  { %123 = dma.hbm_to_vmem [thread:$0]  %s19998_s8, 128, %s121_s1, [#allocation15]  }
  0xba   :  { %s19167_s21 = scalar_lea.hbm %s20000_s10, 128 }
  0xbb   :  { %p19168_p4 = scmp.ne.s32.totalorder %s20000_s10, %s19167_s21  ;;  %p19171_p5 = scmp.lt.u32.totalorder %s19167_s21, %s20000_s10 }
  0xbd   :  { %p19173_p6 = pnand %p19171_p5, %p19168_p4 }
  0xbf   :  { %19176 = shalt.err (!%p19173_p6)
}
  0xc0   :  { %s19177_s29 = scalar_lea.vmem %s143_s23, 128  ;;  %p19182_p8 = scmp.lt.s32.totalorder %s143_s23, %s143_s23 }
  0xc1   :  { %p19178_p7 = scmp.ne.s32.totalorder %s143_s23, %s19177_s29  ;;  %p19183_p9 = scmp.lt.s32.totalorder %s19177_s29, %s19177_s29 }
  0xc3   :  { %p19184_p10 = por %p19183_p9, %p19182_p8 }
  0xc5   :  { %p19185_p11 = pnand %p19184_p10, %p19178_p7 }
  0xc7   :  { %19188 = shalt.err (!%p19185_p11)
}
  0xc8   :  { %145 = dma.hbm_to_vmem [thread:$0]  %s20000_s10, 128, %s143_s23, [#allocation18]  }
  0xc9   :  { %s19265_s9 = smov [#allocation22]   ;;  %s19189_s0 = scalar_lea.hbm %s20002_s12, 16 }
  0xca   :  { %s164_s18 = sshll.u32 %s19265_s9, 4  ;;  %p19190_p12 = scmp.ne.s32.totalorder %s20002_s12, %s19189_s0  ;;  %s165_s18 = int_to_ptr.vmem [resolvable:$true] %s164_s18 }
  0xcb   :  { %p19193_p13 = scmp.lt.u32.totalorder %s19189_s0, %s20002_s12 }
  0xcd   :  { %p19195_p0 = pnand %p19193_p13, %p19190_p12 }
  0xcf   :  { %19198 = shalt.err (!%p19195_p0)
}
  0xd0   :  { %s19199_s7 = scalar_lea.vmem %s165_s18, 16  ;;  %s19203_s10 = scalar_lea.vmem %s165_s18, 32 }
  0xd1   :  { %p19200_p1 = scmp.ne.s32.totalorder %s165_s18, %s19199_s7  ;;  %p19204_p2 = scmp.lt.s32.totalorder %s165_s18, %s165_s18 }
  0xd2   :  { %p19205_p3 = scmp.lt.s32.totalorder %s19203_s10, %s19199_s7 }
  0xd4   :  { %p19206_p4 = por %p19205_p3, %p19204_p2 }
  0xd6   :  { %p19207_p5 = pnand %p19206_p4, %p19200_p1 }
  0xd8   :  { %19210 = shalt.err (!%p19207_p5)
}
  0xd9   :  { %167 = dma.hbm_to_vmem [thread:$0]  %s20002_s12, 16, %s165_s18, [#allocation21]  }
  0xda   :  { %19233 = dma.done.wait [#allocation3], 128  }
  0xdb   :  { %19234 = vsyncadd [#allocation3], 4294967168 }
  0xdc   :  { %19235 = dma.done.wait [#allocation6], 2176  }
  0xdd   :  { %19236 = vsyncadd [#allocation6], 4294965120 }
  0xde   :  { %19237 = dma.done.wait [#allocation9], 65664  }
  0xdf   :  { %19238 = vsyncadd [#allocation9], 4294901632 }
  0xe0   :  { %19239 = dma.done.wait [#allocation12], 65664  }
  0xe1   :  { %19240 = vsyncadd [#allocation12], 4294901632 }
  0xe2   :  { %19241 = dma.done.wait [#allocation15], 65664  }
  0xe3   :  { %19242 = vsyncadd [#allocation15], 4294901632 }
  0xe4   :  { %19243 = dma.done.wait [#allocation18], 65664  }
  0xe5   :  { %19244 = vsyncadd [#allocation18], 4294901632 }
  0xe6   :  { %19245 = dma.done.wait [#allocation21], 8208  }
  0xe7   :  { %19246 = vsyncadd [#allocation21], 4294959088  ;;  %v19266_v0 = vmov 0   ;;  %v210_v1 = vld [vmem:[#allocation5] sm:$0xff]  ;;  %v211_v7 = vld [vmem:[#allocation5 + $0x8] sm:$0xff]  ;;  %vm348_vm0 = vcmask 261120  }
  0xe8   :  { %384 = vmatprep.mubr.bf16.mxu0 %v19266_v0  ;;  %425 = vmatprep.mubr.bf16.mxu1 %v19266_v0  ;;  %v214_v2 = vld [vmem:[#allocation5 + $0x20] sm:$0xff]  ;;  %v215_v9 = vld [vmem:[#allocation5 + $0x28] sm:$0xff]  ;;  %v212_v15 = vld [vmem:[#allocation5 + $0x10] sm:$0xff]  ;;  %s19267_s12 = smov [#allocation23]  }
  0xe9   :  { %v218_v3 = vld [vmem:[#allocation5 + $0x40] sm:$0xff]  ;;  %v16394_v4 = vcombine.high %v210_v1, %v214_v2  ;;  %v16393_v5 = vcombine.low %v210_v1, %v214_v2  ;;  %v219_v10 = vld [vmem:[#allocation5 + $0x48] sm:$0xff]  ;;  %v16396_v12 = vcombine.high %v211_v7, %v215_v9  ;;  %v16395_v13 = vcombine.low %v211_v7, %v215_v9  ;;  %v216_v16 = vld [vmem:[#allocation5 + $0x30] sm:$0xff]  ;;  %s16378_s20 = sshll.u32 %s19267_s12, 4  ;;  %s16379_s20 = int_to_ptr.vmem [resolvable:$true] %s16378_s20 }
  0xea   :  { %v222_v6 = vld [vmem:[#allocation5 + $0x60] sm:$0xff]  ;;  %v223_v11 = vld [vmem:[#allocation5 + $0x68] sm:$0xff]  ;;  %v208_v18 = vld [vmem:[#allocation2] sm:$0xff]  ;;  %v16398_v21 = vcombine.high %v212_v15, %v216_v16  ;;  %v16397_v27 = vcombine.low %v212_v15, %v216_v16  ;;  %s19211_s22 = scalar_lea.vmem %s16379_s20, 128  ;;  %p19216_p7 = scmp.lt.s32.totalorder %s16379_s20, %s16379_s20 }
  0xeb   :  { %v16402_v8 = vcombine.high %v218_v3, %v222_v6  ;;  %352 = vmatprep.subr.bf16.mxu0 %v16394_v4  ;;  %v16404_v14 = vcombine.high %v219_v10, %v223_v11  ;;  %v16401_v17 = vcombine.low %v218_v3, %v222_v6  ;;  %v213_v19 = vld [vmem:[#allocation5 + $0x18] sm:$0xff]  ;;  %393 = vmatprep.subr.bf16.mxu1 %v16396_v12  ;;  %v220_v23 = vld [vmem:[#allocation5 + $0x50] sm:$0xff]  ;;  %v532_v32 = vld [vmem:[#allocation8] sm:$0xff]  ;;  %p19212_p6 = scmp.ne.s32.totalorder %s16379_s20, %s19211_s22  ;;  %p19217_p8 = scmp.lt.s32.totalorder %s19211_s22, %s19211_s22 }
  0xec   :  { %353 = vmatpush1.bf16.msra.mxu0 %v16393_v5  ;;  %v217_v20 = vld [vmem:[#allocation5 + $0x38] sm:$0xff]  ;;  %394 = vmatpush1.bf16.msra.mxu1 %v16395_v13  ;;  %v16403_v22 = vcombine.low %v219_v10, %v223_v11  ;;  %v224_v24 = vld [vmem:[#allocation5 + $0x70] sm:$0xff]  ;;  %v209_v25 = vpack.c.bf16 %v208_v18, %v208_v18  ;;  %v536_v33 = vld [vmem:[#allocation8 + $0x20] sm:$0xff] }
  0xed   :  { %354 = vmatprep.subr.bf16.mxu0 %v16402_v8  ;;  %395 = vmatprep.subr.bf16.mxu1 %v16404_v14  ;;  %v16400_v26 = vcombine.high %v213_v19, %v217_v20  ;;  %v221_v28 = vld [vmem:[#allocation5 + $0x58] sm:$0xff]  ;;  %v16406_v30 = vcombine.high %v220_v23, %v224_v24  ;;  %v16399_v31 = vcombine.low %v213_v19, %v217_v20  ;;  %v533_v36 = vld [vmem:[#allocation8 + $0x8] sm:$0xff]  ;;  %v540_v40 = vld [vmem:[#allocation8 + $0x40] sm:$0xff]  ;;  %p19218_p9 = por %p19217_p8, %p19216_p7 }
  0xee   :  { %v225_v29 = vld [vmem:[#allocation5 + $0x78] sm:$0xff]  ;;  %v16405_v35 = vcombine.low %v220_v23, %v224_v24  ;;  %v537_v37 = vld [vmem:[#allocation8 + $0x28] sm:$0xff]  ;;  %v16414_v38 = vcombine.high %v532_v32, %v536_v33  ;;  %v544_v41 = vld [vmem:[#allocation8 + $0x60] sm:$0xff]  ;;  %v16413_v43 = vcombine.low %v532_v32, %v536_v33 }
  0xef   :  { %v16408_v34 = vcombine.high %v221_v28, %v225_v29  ;;  %v16407_v39 = vcombine.low %v221_v28, %v225_v29  ;;  %v16416_v42 = vcombine.high %v533_v36, %v537_v37  ;;  %v541_v44 = vld [vmem:[#allocation8 + $0x48] sm:$0xff]  ;;  %v16422_v46 = vcombine.high %v540_v40, %v544_v41  ;;  %v548_v48 = vld [vmem:[#allocation8 + $0x80] sm:$0xff]  ;;  %p19219_p10 = pnand %p19218_p9, %p19212_p6 }
  0xf0   :  { %355 = vmatpush1.bf16.msra.mxu0 %v16401_v17  ;;  %396 = vmatpush1.bf16.msra.mxu1 %v16403_v22  ;;  %v545_v45 = vld [vmem:[#allocation8 + $0x68] sm:$0xff]  ;;  %v16415_v47 = vcombine.low %v533_v36, %v537_v37  ;;  %v552_v49 = vld [vmem:[#allocation8 + $0xa0] sm:$0xff]  ;;  %v16421_v51 = vcombine.low %v540_v40, %v544_v41 }
  0xf1   :  { %434 = vmatprep.subr.bf16.mxu0 %v16398_v21  ;;  %475 = vmatprep.subr.bf16.mxu1 %v16400_v26  ;;  %v16424_v50 = vcombine.high %v541_v44, %v545_v45  ;;  %v549_v52 = vld [vmem:[#allocation8 + $0x88] sm:$0xff]  ;;  %v16430_v54 = vcombine.high %v548_v48, %v552_v49  ;;  %v16423_v55 = vcombine.low %v541_v44, %v545_v45  ;;  %v556_v56 = vld [vmem:[#allocation8 + $0xc0] sm:$0xff] }
  0xf2   :  { %v553_v53 = vld [vmem:[#allocation8 + $0xa8] sm:$0xff]  ;;  %v560_v57 = vld [vmem:[#allocation8 + $0xe0] sm:$0xff]  ;;  %v16429_v61 = vcombine.low %v548_v48, %v552_v49 }
  0xf3   :  { %16409 = vmatmul.mubr.msk.bf16.vlgmr.msra.gmra.mrb[0].mxu0 %vm348_vm0, %v209_v25  ;;  %16410 = vmatmul.mubr.msk.bf16.vlgmr.msra.gmra.mrb[0].mxu1 %vm348_vm0, %v209_v25  ;;  %v16432_v58 = vcombine.high %v549_v52, %v553_v53  ;;  %v557_v59 = vld [vmem:[#allocation8 + $0xc8] sm:$0xff]  ;;  %v564_v62 = vld [vmem:[#allocation8 + $0x100] sm:$0xff]  ;;  %v16431_v1 = vcombine.low %v549_v52, %v553_v53  ;;  %v16437_v5 = vcombine.low %v556_v56, %v560_v57 }
  0xf4   :  { %435 = vmatpush1.bf16.msra.mxu0 %v16397_v27  ;;  %466 = vmatprep.mubr.bf16.mxu0 %v19266_v0  ;;  %v561_v60 = vld [vmem:[#allocation8 + $0xe8] sm:$0xff]  ;;  %v568_v63 = vld [vmem:[#allocation8 + $0x120] sm:$0xff] }
  0xf5   :  { %436 = vmatprep.subr.bf16.mxu0 %v16406_v30  ;;  %476 = vmatpush1.bf16.msra.mxu1 %v16399_v31  ;;  %v565_v2 = vld [vmem:[#allocation8 + $0x108] sm:$0xff]  ;;  %v16440_v4 = vcombine.high %v557_v59, %v561_v60  ;;  %v572_v6 = vld [vmem:[#allocation8 + $0x140] sm:$0xff]  ;;  %v16446_v8 = vcombine.high %v564_v62, %v568_v63  ;;  %v16439_v9 = vcombine.low %v557_v59, %v561_v60 }
  0xf6   :  { %507 = vmatprep.mubr.bf16.mxu1 %v19266_v0  ;;  %477 = vmatprep.subr.bf16.mxu1 %v16408_v34  ;;  %v16438_v0 = vcombine.high %v556_v56, %v560_v57  ;;  %v569_v3 = vld [vmem:[#allocation8 + $0x128] sm:$0xff]  ;;  %v576_v7 = vld [vmem:[#allocation8 + $0x160] sm:$0xff]  ;;  %v16445_v13 = vcombine.low %v564_v62, %v568_v63 }
  0xf7   :  { %v573_v10 = vld [vmem:[#allocation8 + $0x148] sm:$0xff]  ;;  %v16448_v12 = vcombine.high %v565_v2, %v569_v3  ;;  %v580_v14 = vld [vmem:[#allocation8 + $0x180] sm:$0xff]  ;;  %v16454_v16 = vcombine.high %v572_v6, %v576_v7  ;;  %v16447_v17 = vcombine.low %v565_v2, %v569_v3  ;;  %v16453_v21 = vcombine.low %v572_v6, %v576_v7 }
  0xf8   :  { %437 = vmatpush1.bf16.msra.mxu0 %v16405_v35  ;;  %v577_v11 = vld [vmem:[#allocation8 + $0x168] sm:$0xff]  ;;  %v584_v15 = vld [vmem:[#allocation8 + $0x1a0] sm:$0xff] }
  0xf9   :  { %3646 = vmatprep.subr.bf16.mxu0 %v16414_v38  ;;  %478 = vmatpush1.bf16.msra.mxu1 %v16407_v39  ;;  %v581_v18 = vld [vmem:[#allocation8 + $0x188] sm:$0xff]  ;;  %v16456_v20 = vcombine.high %v573_v10, %v577_v11  ;;  %v588_v22 = vld [vmem:[#allocation8 + $0x1c0] sm:$0xff]  ;;  %v16462_v24 = vcombine.high %v580_v14, %v584_v15  ;;  %v16461_v29 = vcombine.low %v580_v14, %v584_v15 }
  0xfa   :  { %3810 = vmatprep.subr.bf16.mxu1 %v16416_v42  ;;  %v585_v19 = vld [vmem:[#allocation8 + $0x1a8] sm:$0xff]  ;;  %v592_v23 = vld [vmem:[#allocation8 + $0x1e0] sm:$0xff] }
  0xfb   :  { %16411 = vmatmul.mubr.msk.bf16.vlgmr.msra.gmra.mrb[4].mxu0 %vm348_vm0, %v209_v25  ;;  %v589_v26 = vld [vmem:[#allocation8 + $0x1c8] sm:$0xff]  ;;  %v16464_v28 = vcombine.high %v581_v18, %v585_v19  ;;  %v596_v30 = vld [vmem:[#allocation8 + $0x200] sm:$0xff]  ;;  %v16470_v32 = vcombine.high %v588_v22, %v592_v23  ;;  %v16463_v33 = vcombine.low %v581_v18, %v585_v19  ;;  %v16469_v37 = vcombine.low %v588_v22, %v592_v23 }
  0xfc   :  { %3647 = vmatpush1.bf16.msra.mxu0 %v16413_v43  ;;  %16412 = vmatmul.mubr.msk.bf16.vlgmr.msra.gmra.mrb[4].mxu1 %vm348_vm0, %v209_v25  ;;  %v16455_v25 = vcombine.low %v573_v10, %v577_v11  ;;  %v593_v27 = vld [vmem:[#allocation8 + $0x1e8] sm:$0xff]  ;;  %v600_v31 = vld [vmem:[#allocation8 + $0x220] sm:$0xff] }
  0xfd   :  { %3648 = vmatprep.subr.bf16.mxu0 %v16422_v46  ;;  %3811 = vmatpush1.bf16.msra.mxu1 %v16415_v47  ;;  %v597_v34 = vld [vmem:[#allocation8 + $0x208] sm:$0xff]  ;;  %v16472_v36 = vcombine.high %v589_v26, %v593_v27  ;;  %v604_v38 = vld [vmem:[#allocation8 + $0x240] sm:$0xff]  ;;  %v16478_v40 = vcombine.high %v596_v30, %v600_v31  ;;  %v16471_v41 = vcombine.low %v589_v26, %v593_v27 }
  0xfe   :  { %3812 = vmatprep.subr.bf16.mxu1 %v16424_v50  ;;  %v601_v35 = vld [vmem:[#allocation8 + $0x228] sm:$0xff]  ;;  %v608_v39 = vld [vmem:[#allocation8 + $0x260] sm:$0xff]  ;;  %v16477_v45 = vcombine.low %v596_v30, %v600_v31 }
  0xff   :  { %v605_v42 = vld [vmem:[#allocation8 + $0x248] sm:$0xff]  ;;  %v16480_v44 = vcombine.high %v597_v34, %v601_v35  ;;  %v612_v46 = vld [vmem:[#allocation8 + $0x280] sm:$0xff]  ;;  %v16486_v48 = vcombine.high %v604_v38, %v608_v39  ;;  %v16479_v49 = vcombine.low %v597_v34, %v601_v35  ;;  %v16485_v53 = vcombine.low %v604_v38, %v608_v39 }
 0x100   :  { %3649 = vmatpush1.bf16.msra.mxu0 %v16421_v51  ;;  %v609_v43 = vld [vmem:[#allocation8 + $0x268] sm:$0xff]  ;;  %v616_v47 = vld [vmem:[#allocation8 + $0x2a0] sm:$0xff] }
 0x101   :  { %3650 = vmatprep.subr.bf16.mxu0 %v16430_v54  ;;  %3813 = vmatpush1.bf16.msra.mxu1 %v16423_v55  ;;  %v613_v50 = vld [vmem:[#allocation8 + $0x288] sm:$0xff]  ;;  %v16488_v52 = vcombine.high %v605_v42, %v609_v43  ;;  %v620_v54 = vld [vmem:[#allocation8 + $0x2c0] sm:$0xff]  ;;  %v16494_v56 = vcombine.high %v612_v46, %v616_v47  ;;  %v16487_v57 = vcombine.low %v605_v42, %v609_v43  ;;  %v228_v43 = vlaneseq }
 0x102   :  { %3814 = vmatprep.subr.bf16.mxu1 %v16432_v58  ;;  %v617_v51 = vld [vmem:[#allocation8 + $0x2a8] sm:$0xff]  ;;  %v624_v55 = vld [vmem:[#allocation8 + $0x2e0] sm:$0xff] }
 0x103   :  { %v621_v58 = vld [vmem:[#allocation8 + $0x2c8] sm:$0xff]  ;;  %v16496_v60 = vcombine.high %v613_v50, %v617_v51  ;;  %v628_v62 = vld [vmem:[#allocation8 + $0x300] sm:$0xff] }
 0x104   :  { %3651 = vmatpush1.bf16.msra.mxu0 %v16429_v61  ;;  %v625_v59 = vld [vmem:[#allocation8 + $0x2e8] sm:$0xff]  ;;  %v16493_v61 = vcombine.low %v612_v46, %v616_v47  ;;  %v632_v63 = vld [vmem:[#allocation8 + $0x320] sm:$0xff]  ;;  %v19518_v46 = vld [vmem:[#allocation7] sm:$0xff] }
 0x105   :  { %3652 = vmatprep.subr.bf16.mxu0 %v16438_v0  ;;  %3815 = vmatpush1.bf16.msra.mxu1 %v16431_v1  ;;  %v16502_v0 = vcombine.high %v620_v54, %v624_v55  ;;  %v16495_v1 = vcombine.low %v613_v50, %v617_v51  ;;  %v629_v2 = vld [vmem:[#allocation8 + $0x308] sm:$0xff]  ;;  %v636_v6 = vld [vmem:[#allocation8 + $0x340] sm:$0xff] }
 0x106   :  { %3816 = vmatprep.subr.bf16.mxu1 %v16440_v4  ;;  %v633_v3 = vld [vmem:[#allocation8 + $0x328] sm:$0xff]  ;;  %v16504_v4 = vcombine.high %v621_v58, %v625_v59  ;;  %v640_v7 = vld [vmem:[#allocation8 + $0x360] sm:$0xff] }
 0x107   :  { %v637_v10 = vld [vmem:[#allocation8 + $0x348] sm:$0xff]  ;;  %v16518_v14 = vcombine.high %v636_v6, %v640_v7  ;;  %v16511_v15 = vcombine.low %v629_v2, %v633_v3  ;;  %v644_v19 = vld [vmem:[#allocation8 + $0x380] sm:$0xff] }
 0x108   :  { %3653 = vmatpush1.bf16.msra.mxu0 %v16437_v5  ;;  %v16501_v5 = vcombine.low %v620_v54, %v624_v55  ;;  %v641_v11 = vld [vmem:[#allocation8 + $0x368] sm:$0xff]  ;;  %v652_v27 = vld [vmem:[#allocation8 + $0x3c0] sm:$0xff] }
 0x109   :  { %3654 = vmatprep.subr.bf16.mxu0 %v16446_v8  ;;  %3817 = vmatpush1.bf16.msra.mxu1 %v16439_v9  ;;  %v16510_v8 = vcombine.high %v628_v62, %v632_v63  ;;  %v16503_v9 = vcombine.low %v621_v58, %v625_v59  ;;  %v16519_v18 = vcombine.low %v637_v10, %v641_v11  ;;  %v649_v23 = vld [vmem:[#allocation8 + $0x3a8] sm:$0xff]  ;;  %v660_v35 = vld [vmem:[#allocation8 + $0x400] sm:$0xff] }
 0x10a   :  { %3818 = vmatprep.subr.bf16.mxu1 %v16448_v12  ;;  %v16512_v12 = vcombine.high %v629_v2, %v633_v3  ;;  %v657_v31 = vld [vmem:[#allocation8 + $0x3e8] sm:$0xff] }
 0x10b   :  { %v665_v39 = vld [vmem:[#allocation8 + $0x428] sm:$0xff] }
 0x10c   :  { %3655 = vmatpush1.bf16.msra.mxu0 %v16445_v13  ;;  %v16509_v13 = vcombine.low %v628_v62, %v632_v63  ;;  %v672_v63 = vld [vmem:[#allocation8 + $0x460] sm:$0xff] }
 0x10d   :  { %3656 = vmatprep.subr.bf16.mxu0 %v16454_v16  ;;  %3819 = vmatpush1.bf16.msra.mxu1 %v16447_v17  ;;  %v16520_v16 = vcombine.high %v637_v10, %v641_v11  ;;  %v16517_v17 = vcombine.low %v636_v6, %v640_v7  ;;  %v676_v10 = vld [vmem:[#allocation8 + $0x480] sm:$0xff] }
 0x10e   :  { %3820 = vmatprep.subr.bf16.mxu1 %v16456_v20  ;;  %v648_v20 = vld [vmem:[#allocation8 + $0x3a0] sm:$0xff] }
 0x10f   :  { %v16526_v22 = vcombine.high %v644_v19, %v648_v20  ;;  %v680_v11 = vld [vmem:[#allocation8 + $0x4a0] sm:$0xff] }
 0x110   :  { %3657 = vmatpush1.bf16.msra.mxu0 %v16453_v21  ;;  %v645_v21 = vld [vmem:[#allocation8 + $0x388] sm:$0xff] }
 0x111   :  { %3658 = vmatprep.subr.bf16.mxu0 %v16462_v24  ;;  %3821 = vmatpush1.bf16.msra.mxu1 %v16455_v25  ;;  %v16525_v24 = vcombine.low %v644_v19, %v648_v20  ;;  %v16527_v25 = vcombine.low %v645_v21, %v649_v23  ;;  %v16528_v26 = vcombine.high %v645_v21, %v649_v23 }
 0x112   :  { %3822 = vmatprep.subr.bf16.mxu1 %v16464_v28  ;;  %v656_v28 = vld [vmem:[#allocation8 + $0x3e0] sm:$0xff]  ;;  %v16558_v20 = vcombine.high %v676_v10, %v680_v11 }
 0x113   :  { %v16534_v30 = vcombine.high %v652_v27, %v656_v28 }
 0x114   :  { %3659 = vmatpush1.bf16.msra.mxu0 %v16461_v29  ;;  %v653_v29 = vld [vmem:[#allocation8 + $0x3c8] sm:$0xff] }
 0x115   :  { %3660 = vmatprep.subr.bf16.mxu0 %v16470_v32  ;;  %3823 = vmatpush1.bf16.msra.mxu1 %v16463_v33  ;;  %v16533_v32 = vcombine.low %v652_v27, %v656_v28  ;;  %v16535_v33 = vcombine.low %v653_v29, %v657_v31  ;;  %v16536_v34 = vcombine.high %v653_v29, %v657_v31  ;;  %v692_v31 = vld [vmem:[#allocation8 + $0x500] sm:$0xff] }
 0x116   :  { %3824 = vmatprep.subr.bf16.mxu1 %v16472_v36  ;;  %v664_v36 = vld [vmem:[#allocation8 + $0x420] sm:$0xff]  ;;  %v16557_v27 = vcombine.low %v676_v10, %v680_v11 }
 0x117   :  { %v16542_v38 = vcombine.high %v660_v35, %v664_v36  ;;  %v724_v10 = vld [vmem:[#allocation8 + $0x600] sm:$0xff] }
 0x118   :  { %3661 = vmatpush1.bf16.msra.mxu0 %v16469_v37  ;;  %v661_v37 = vld [vmem:[#allocation8 + $0x408] sm:$0xff]  ;;  %v728_v11 = vld [vmem:[#allocation8 + $0x620] sm:$0xff] }
 0x119   :  { %3662 = vmatprep.subr.bf16.mxu0 %v16478_v40  ;;  %3825 = vmatpush1.bf16.msra.mxu1 %v16471_v41  ;;  %v16541_v40 = vcombine.low %v660_v35, %v664_v36  ;;  %v16543_v41 = vcombine.low %v661_v37, %v665_v39  ;;  %v16544_v42 = vcombine.high %v661_v37, %v665_v39  ;;  %v700_v39 = vld [vmem:[#allocation8 + $0x540] sm:$0xff] }
 0x11a   :  { %3826 = vmatprep.subr.bf16.mxu1 %v16480_v44  ;;  %v19513_v44 = vshrl.u32 %v228_v43, 7 }
 0x11c   :  { %3663 = vmatpush1.bf16.msra.mxu0 %v16477_v45  ;;  %v19516_v45 = vsub.s32 0, %v19513_v44  ;;  %v19521_v47 = vsub.s32 1, %v19513_v44 }
 0x11d   :  { %3664 = vmatprep.subr.bf16.mxu0 %v16486_v48  ;;  %3827 = vmatpush1.bf16.msra.mxu1 %v16479_v49  ;;  %v19524_v48 = vsub.s32 3, %v19513_v44 }
 0x11e   :  { %3828 = vmatprep.subr.bf16.mxu1 %v16488_v52  ;;  %v231_v49 = vrot.slane %v19518_v46, %v19516_v45  ;;  %v235_v50 = vrot.slane %v19518_v46, %v19521_v47 }
 0x11f   :  { %v243_v52 = vrot.slane %v19518_v46, %v19524_v48 }
 0x120   :  { %3665 = vmatpush1.bf16.msra.mxu0 %v16485_v53 }
 0x121   :  { %3666 = vmatprep.subr.bf16.mxu0 %v16494_v56  ;;  %3829 = vmatpush1.bf16.msra.mxu1 %v16487_v57 }
 0x122   :  { %3830 = vmatprep.subr.bf16.mxu1 %v16496_v60  ;;  %v668_v60 = vld [vmem:[#allocation8 + $0x440] sm:$0xff] }
 0x124   :  { %3667 = vmatpush1.bf16.msra.mxu0 %v16493_v61 }
 0x125   :  { %3668 = vmatprep.subr.bf16.mxu0 %v16502_v0  ;;  %3831 = vmatpush1.bf16.msra.mxu1 %v16495_v1  ;;  %v669_v0 = vld [vmem:[#allocation8 + $0x448] sm:$0xff] }
 0x126   :  { %3832 = vmatprep.subr.bf16.mxu1 %v16504_v4  ;;  %v673_v1 = vld [vmem:[#allocation8 + $0x468] sm:$0xff] }
 0x128   :  { %3669 = vmatpush1.bf16.msra.mxu0 %v16501_v5 }
 0x129   :  { %3670 = vmatprep.subr.bf16.mxu0 %v16510_v8  ;;  %3833 = vmatpush1.bf16.msra.mxu1 %v16503_v9  ;;  %v16550_v8 = vcombine.high %v668_v60, %v672_v63  ;;  %v16552_v9 = vcombine.high %v669_v0, %v673_v1 }
 0x12a   :  { %3834 = vmatprep.subr.bf16.mxu1 %v16512_v12  ;;  %v677_v12 = vld [vmem:[#allocation8 + $0x488] sm:$0xff] }
 0x12c   :  { %3671 = vmatpush1.bf16.msra.mxu0 %v16509_v13  ;;  %v681_v13 = vld [vmem:[#allocation8 + $0x4a8] sm:$0xff] }
 0x12d   :  { %3672 = vmatprep.subr.bf16.mxu0 %v16518_v14  ;;  %3835 = vmatpush1.bf16.msra.mxu1 %v16511_v15  ;;  %v16560_v21 = vcombine.high %v677_v12, %v681_v13  ;;  %v16559_v28 = vcombine.low %v677_v12, %v681_v13  ;;  %v725_v12 = vld [vmem:[#allocation8 + $0x608] sm:$0xff] }
 0x12e   :  { %3836 = vmatprep.subr.bf16.mxu1 %v16520_v16  ;;  %v729_v13 = vld [vmem:[#allocation8 + $0x628] sm:$0xff] }
 0x130   :  { %3673 = vmatpush1.bf16.msra.mxu0 %v16517_v17  ;;  %v16549_v17 = vcombine.low %v668_v60, %v672_v63  ;;  %v716_v63 = vld [vmem:[#allocation8 + $0x5c0] sm:$0xff] }
 0x131   :  { %3837 = vmatpush1.bf16.msra.mxu1 %v16519_v18  ;;  %3674 = vmatprep.subr.bf16.mxu0 %v16526_v22  ;;  %v16551_v18 = vcombine.low %v669_v0, %v673_v1  ;;  %v684_v22 = vld [vmem:[#allocation8 + $0x4c0] sm:$0xff]  ;;  %v717_v1 = vld [vmem:[#allocation8 + $0x5c8] sm:$0xff] }
 0x132   :  { %3838 = vmatprep.subr.bf16.mxu1 %v16528_v26  ;;  %v689_v26 = vld [vmem:[#allocation8 + $0x4e8] sm:$0xff]  ;;  %v720_v0 = vld [vmem:[#allocation8 + $0x5e0] sm:$0xff] }
 0x134   :  { %3675 = vmatpush1.bf16.msra.mxu0 %v16525_v24  ;;  %v688_v24 = vld [vmem:[#allocation8 + $0x4e0] sm:$0xff] }
 0x135   :  { %3839 = vmatpush1.bf16.msra.mxu1 %v16527_v25  ;;  %3676 = vmatprep.subr.bf16.mxu0 %v16534_v30  ;;  %v685_v25 = vld [vmem:[#allocation8 + $0x4c8] sm:$0xff]  ;;  %v16566_v29 = vcombine.high %v684_v22, %v688_v24  ;;  %v16565_v35 = vcombine.low %v684_v22, %v688_v24  ;;  %v736_v22 = vld [vmem:[#allocation8 + $0x660] sm:$0xff] }
 0x136   :  { %3840 = vmatprep.subr.bf16.mxu1 %v16536_v34  ;;  %v16568_v30 = vcombine.high %v685_v25, %v689_v26  ;;  %v697_v34 = vld [vmem:[#allocation8 + $0x528] sm:$0xff]  ;;  %v16567_v36 = vcombine.low %v685_v25, %v689_v26  ;;  %v16605_v25 = vcombine.low %v724_v10, %v728_v11  ;;  %v16607_v26 = vcombine.low %v725_v12, %v729_v13 }
 0x137   :  { %v737_v24 = vld [vmem:[#allocation8 + $0x668] sm:$0xff] }
 0x138   :  { %3677 = vmatpush1.bf16.msra.mxu0 %v16533_v32  ;;  %v696_v32 = vld [vmem:[#allocation8 + $0x520] sm:$0xff] }
 0x139   :  { %3841 = vmatpush1.bf16.msra.mxu1 %v16535_v33  ;;  %3687 = vmatprep.subr.bf16.mxu0 %v16542_v38  ;;  %v693_v33 = vld [vmem:[#allocation8 + $0x508] sm:$0xff]  ;;  %v16574_v37 = vcombine.high %v692_v31, %v696_v32  ;;  %v16573_v43 = vcombine.low %v692_v31, %v696_v32 }
 0x13a   :  { %3851 = vmatprep.subr.bf16.mxu1 %v16544_v42  ;;  %v16576_v38 = vcombine.high %v693_v33, %v697_v34  ;;  %v705_v42 = vld [vmem:[#allocation8 + $0x568] sm:$0xff] }
 0x13b   :  { %v741_v31 = vld [vmem:[#allocation8 + $0x688] sm:$0xff] }
 0x13c   :  { %v745_v32 = vld [vmem:[#allocation8 + $0x6a8] sm:$0xff] }
 0x1c6   :  { %v386_v51 = vpop.f32.mrb[0].mxu0  ;;  %v19532_v57 = vpop.f32.mrb[0].mxu1 }
 0x1c7   :  { %v387_v53 = vadd.f32 %v386_v51, %v231_v49  ;;  %v388_v54 = vpop.f32.mrb[1].mxu0  ;;  %v429_v61 = vpop.f32.mrb[1].mxu1  ;;  %v16575_v49 = vcombine.low %v693_v33, %v697_v34 }
 0x1c8   :  { %v389_v55 = vadd.f32 %v388_v54, %v235_v50  ;;  %v390_v56 = vpop.f32.mrb[2].mxu0  ;;  %v430_v2 = vadd.f32 %v429_v61, %v243_v52  ;;  %v431_v3 = vpop.f32.mrb[2].mxu1  ;;  %v708_v52 = vld [vmem:[#allocation8 + $0x580] sm:$0xff]  ;;  %v709_v54 = vld [vmem:[#allocation8 + $0x588] sm:$0xff] }
 0x1c9   :  { %v19534_v58 = vmax.f32 %v387_v53, 0.0  ;;  %v391_v59 = vpop.f32.mrb[3].mxu0  ;;  %v432_v4 = vpop.f32.mrb[3].mxu1  ;;  %v712_v53 = vld [vmem:[#allocation8 + $0x5a0] sm:$0xff] }
 0x1ca   :  { %v19536_v62 = vmax.f32 %v389_v55, 0.0  ;;  %v19542_v6 = vmax.f32 %v430_v2, 0.0  ;;  %v713_v55 = vld [vmem:[#allocation8 + $0x5a8] sm:$0xff]  ;;  %v16590_v60 = vcombine.high %v708_v52, %v712_v53  ;;  %v16589_v3 = vcombine.low %v708_v52, %v712_v53 }
 0x1cb   :  { %v19546_v7 = vpack.c.bf16 %v19534_v58, %v19534_v58  ;;  %v16592_v61 = vcombine.high %v709_v54, %v713_v55  ;;  %v721_v2 = vld [vmem:[#allocation8 + $0x5e8] sm:$0xff]  ;;  %v16591_v4 = vcombine.low %v709_v54, %v713_v55 }
 0x1cc   :  { %v19540_v5 = vpack.c.bf16 %v19536_v62, %v19536_v62  ;;  %v19552_v14 = vpack.c.bf16 %v19542_v6, %v19542_v6  ;;  %v757_v52 = vld [vmem:[#allocation8 + $0x708] sm:$0xff] }
 0x1cd   :  { %v761_v53 = vld [vmem:[#allocation8 + $0x728] sm:$0xff] }
 0x1ce   :  { %3678 = vmatprep.mubr.bf16.mxu0 %v19540_v5  ;;  %3842 = vmatprep.mubr.bf16.mxu1 %v19540_v5  ;;  %v19554_v15 = vpop.f32.mrb[4].mxu0 }
 0x1cf   :  { %3679 = vmatmul.mubr.bf16.vlgmr.msra.gmra.mrb[8].mxu0 %v19546_v7  ;;  %3843 = vmatmul.mubr.bf16.vlgmr.msra.gmra.mrb[8].mxu1 %v19546_v7  ;;  %v19558_v16 = vpop.f32.mrb[5].mxu0 }
 0x1d0   :  { %3688 = vmatpush1.bf16.msra.mxu0 %v16541_v40  ;;  %3852 = vmatpush1.bf16.msra.mxu1 %v16543_v41  ;;  %v472_v19 = vpop.f32.mrb[6].mxu0  ;;  %v704_v40 = vld [vmem:[#allocation8 + $0x560] sm:$0xff]  ;;  %v701_v41 = vld [vmem:[#allocation8 + $0x548] sm:$0xff] }
 0x1d1   :  { %3689 = vmatprep.subr.bf16.mxu0 %v16550_v8  ;;  %3853 = vmatprep.subr.bf16.mxu1 %v16552_v9  ;;  %v473_v23 = vpop.f32.mrb[7].mxu0  ;;  %v16582_v50 = vcombine.high %v700_v39, %v704_v40  ;;  %v16584_v51 = vcombine.high %v701_v41, %v705_v42  ;;  %v16581_v56 = vcombine.low %v700_v39, %v704_v40  ;;  %v749_v39 = vld [vmem:[#allocation8 + $0x6c8] sm:$0xff] }
 0x1d2   :  { %3719 = vmatprep.mubr.bf16.mxu0 %v19552_v14  ;;  %3883 = vmatprep.mubr.bf16.mxu1 %v19552_v14  ;;  %v16583_v59 = vcombine.low %v701_v41, %v705_v42  ;;  %v16598_v8 = vcombine.high %v716_v63, %v720_v0  ;;  %v16600_v9 = vcombine.high %v717_v1, %v721_v2  ;;  %v733_v23 = vld [vmem:[#allocation8 + $0x648] sm:$0xff] }
 0x1d3   :  { %v16606_v19 = vcombine.high %v724_v10, %v728_v11  ;;  %v16615_v34 = vcombine.low %v733_v23, %v737_v24  ;;  %v753_v40 = vld [vmem:[#allocation8 + $0x6e8] sm:$0xff]  ;;  %v16623_v42 = vcombine.low %v741_v31, %v745_v32  ;;  %v776_v10 = vld [vmem:[#allocation8 + $0x7a0] sm:$0xff] }
 0x1d4   :  { %3690 = vmatpush1.bf16.msra.mxu0 %v16549_v17  ;;  %3854 = vmatpush1.bf16.msra.mxu1 %v16551_v18  ;;  %v16597_v17 = vcombine.low %v716_v63, %v720_v0  ;;  %v16599_v18 = vcombine.low %v717_v1, %v721_v2  ;;  %v16631_v55 = vcombine.low %v749_v39, %v753_v40  ;;  %v765_v63 = vld [vmem:[#allocation8 + $0x748] sm:$0xff]  ;;  %v19563_v1 = vsub.s32 2, %v19513_v44 }
 0x1d5   :  { %3691 = vmatprep.subr.bf16.mxu0 %v16558_v20  ;;  %3855 = vmatprep.subr.bf16.mxu1 %v16560_v21  ;;  %v16608_v20 = vcombine.high %v725_v12, %v729_v13  ;;  %v732_v21 = vld [vmem:[#allocation8 + $0x640] sm:$0xff]  ;;  %v769_v0 = vld [vmem:[#allocation8 + $0x768] sm:$0xff]  ;;  %v19566_v13 = vsub.s32 5, %v19513_v44 }
 0x1d6   :  { %v16613_v33 = vcombine.low %v732_v21, %v736_v22  ;;  %v773_v11 = vld [vmem:[#allocation8 + $0x788] sm:$0xff] }
 0x1d7   :  { %v777_v12 = vld [vmem:[#allocation8 + $0x7a8] sm:$0xff] }
 0x1d8   :  { %3692 = vmatpush1.bf16.msra.mxu0 %v16557_v27  ;;  %3856 = vmatpush1.bf16.msra.mxu1 %v16559_v28  ;;  %v16614_v27 = vcombine.high %v732_v21, %v736_v22  ;;  %v16616_v28 = vcombine.high %v733_v23, %v737_v24  ;;  %v16656_v21 = vcombine.high %v773_v11, %v777_v12  ;;  %v780_v22 = vld [vmem:[#allocation8 + $0x7c0] sm:$0xff]  ;;  %v19570_v23 = vpop.f32.mrb[4].mxu1 }
 0x1d9   :  { %3693 = vmatprep.subr.bf16.mxu0 %v16566_v29  ;;  %3857 = vmatprep.subr.bf16.mxu1 %v16568_v30  ;;  %v740_v29 = vld [vmem:[#allocation8 + $0x680] sm:$0xff] }
 0x1da   :  { %v744_v30 = vld [vmem:[#allocation8 + $0x6a0] sm:$0xff] }
 0x1db   :  { %v16621_v41 = vcombine.low %v740_v29, %v744_v30  ;;  %v784_v24 = vld [vmem:[#allocation8 + $0x7e0] sm:$0xff] }
 0x1dc   :  { %3694 = vmatpush1.bf16.msra.mxu0 %v16565_v35  ;;  %3858 = vmatpush1.bf16.msra.mxu1 %v16567_v36  ;;  %v16622_v35 = vcombine.high %v740_v29, %v744_v30  ;;  %v16624_v36 = vcombine.high %v741_v31, %v745_v32  ;;  %v16655_v30 = vcombine.low %v773_v11, %v777_v12  ;;  %v19575_v31 = vpop.f32.mrb[5].mxu1  ;;  %v812_v11 = vld [vmem:[#allocation8 + $0x8c0] sm:$0xff] }
 0x1dd   :  { %3695 = vmatprep.subr.bf16.mxu0 %v16574_v37  ;;  %3859 = vmatprep.subr.bf16.mxu1 %v16576_v38  ;;  %v748_v37 = vld [vmem:[#allocation8 + $0x6c0] sm:$0xff]  ;;  %v16662_v32 = vcombine.high %v780_v22, %v784_v24 }
 0x1de   :  { %v752_v38 = vld [vmem:[#allocation8 + $0x6e0] sm:$0xff] }
 0x1df   :  { %v16629_v54 = vcombine.low %v748_v37, %v752_v38  ;;  %v816_v12 = vld [vmem:[#allocation8 + $0x8e0] sm:$0xff] }
 0x1e0   :  { %3696 = vmatpush1.bf16.msra.mxu0 %v16573_v43  ;;  %3860 = vmatpush1.bf16.msra.mxu1 %v16575_v49  ;;  %v16630_v43 = vcombine.high %v748_v37, %v752_v38  ;;  %v16632_v49 = vcombine.high %v749_v39, %v753_v40  ;;  %v789_v37 = vld [vmem:[#allocation8 + $0x808] sm:$0xff] }
 0x1e1   :  { %3697 = vmatprep.subr.bf16.mxu0 %v16582_v50  ;;  %3861 = vmatprep.subr.bf16.mxu1 %v16584_v51  ;;  %v756_v50 = vld [vmem:[#allocation8 + $0x700] sm:$0xff]  ;;  %v793_v38 = vld [vmem:[#allocation8 + $0x828] sm:$0xff] }
 0x1e2   :  { %v760_v51 = vld [vmem:[#allocation8 + $0x720] sm:$0xff] }
 0x1e3   :  { %v16637_v2 = vcombine.low %v756_v50, %v760_v51 }
 0x1e4   :  { %3698 = vmatpush1.bf16.msra.mxu0 %v16581_v56  ;;  %3862 = vmatpush1.bf16.msra.mxu1 %v16583_v59  ;;  %v16638_v56 = vcombine.high %v756_v50, %v760_v51  ;;  %v16640_v59 = vcombine.high %v757_v52, %v761_v53  ;;  %v796_v50 = vld [vmem:[#allocation8 + $0x840] sm:$0xff] }
 0x1e5   :  { %3699 = vmatprep.subr.bf16.mxu0 %v16590_v60  ;;  %3863 = vmatprep.subr.bf16.mxu1 %v16592_v61  ;;  %v764_v60 = vld [vmem:[#allocation8 + $0x740] sm:$0xff] }
 0x1e6   :  { %v768_v61 = vld [vmem:[#allocation8 + $0x760] sm:$0xff] }
 0x1e7   :  { %v800_v51 = vld [vmem:[#allocation8 + $0x860] sm:$0xff] }
 0x1e8   :  { %3700 = vmatpush1.bf16.msra.mxu0 %v16589_v3  ;;  %3864 = vmatpush1.bf16.msra.mxu1 %v16591_v4  ;;  %v16639_v3 = vcombine.low %v757_v52, %v761_v53  ;;  %v16646_v4 = vcombine.high %v764_v60, %v768_v61  ;;  %v797_v52 = vld [vmem:[#allocation8 + $0x848] sm:$0xff] }
 0x1e9   :  { %3701 = vmatprep.subr.bf16.mxu0 %v16598_v8  ;;  %3865 = vmatprep.subr.bf16.mxu1 %v16600_v9  ;;  %v16648_v8 = vcombine.high %v765_v63, %v769_v0  ;;  %v772_v9 = vld [vmem:[#allocation8 + $0x780] sm:$0xff]  ;;  %v801_v53 = vld [vmem:[#allocation8 + $0x868] sm:$0xff] }
 0x1ea   :  { %v16653_v29 = vcombine.low %v772_v9, %v776_v10 }
 0x1ec   :  { %3702 = vmatpush1.bf16.msra.mxu0 %v16597_v17  ;;  %3866 = vmatpush1.bf16.msra.mxu1 %v16599_v18  ;;  %v239_v17 = vrot.slane %v19518_v46, %v19563_v1  ;;  %v16645_v18 = vcombine.low %v764_v60, %v768_v61  ;;  %v16680_v60 = vcombine.high %v797_v52, %v801_v53  ;;  %v804_v61 = vld [vmem:[#allocation8 + $0x880] sm:$0xff] }
 0x1ed   :  { %3703 = vmatprep.subr.bf16.mxu0 %v16606_v19  ;;  %3867 = vmatprep.subr.bf16.mxu1 %v16608_v20  ;;  %v16647_v19 = vcombine.low %v765_v63, %v769_v0  ;;  %v16654_v20 = vcombine.high %v772_v9, %v776_v10  ;;  %v808_v63 = vld [vmem:[#allocation8 + $0x8a0] sm:$0xff]  ;;  %v805_v0 = vld [vmem:[#allocation8 + $0x888] sm:$0xff] }
 0x1ee   :  { %v16686_v9 = vcombine.high %v804_v61, %v808_v63 }
 0x1f0   :  { %3704 = vmatpush1.bf16.msra.mxu0 %v16605_v25  ;;  %3868 = vmatpush1.bf16.msra.mxu1 %v16607_v26  ;;  %v781_v25 = vld [vmem:[#allocation8 + $0x7c8] sm:$0xff] }
 0x1f1   :  { %3705 = vmatprep.subr.bf16.mxu0 %v16614_v27  ;;  %3869 = vmatprep.subr.bf16.mxu1 %v16616_v28  ;;  %v785_v26 = vld [vmem:[#allocation8 + $0x7e8] sm:$0xff]  ;;  %v251_v27 = vrot.slane %v19518_v46, %v19566_v13  ;;  %v428_v28 = vadd.f32 %v19532_v57, %v239_v17  ;;  %v16661_v57 = vcombine.low %v780_v22, %v784_v24  ;;  %v820_v24 = vld [vmem:[#allocation8 + $0x900] sm:$0xff] }
 0x1f2   :  { %v813_v17 = vld [vmem:[#allocation8 + $0x8c8] sm:$0xff] }
 0x1f3   :  { %v471_v39 = vadd.f32 %v19558_v16, %v251_v27  ;;  %v825_v27 = vld [vmem:[#allocation8 + $0x928] sm:$0xff] }
 0x1f4   :  { %3706 = vmatpush1.bf16.msra.mxu0 %v16613_v33  ;;  %3870 = vmatpush1.bf16.msra.mxu1 %v16615_v34  ;;  %v16664_v33 = vcombine.high %v781_v25, %v785_v26  ;;  %v788_v34 = vld [vmem:[#allocation8 + $0x800] sm:$0xff] }
 0x1f5   :  { %3707 = vmatprep.subr.bf16.mxu0 %v16622_v35  ;;  %3871 = vmatprep.subr.bf16.mxu1 %v16624_v36  ;;  %v513_v35 = vpop.f32.mrb[6].mxu1  ;;  %v792_v36 = vld [vmem:[#allocation8 + $0x820] sm:$0xff] }
 0x1f6   :  { %v514_v40 = vpop.f32.mrb[7].mxu1  ;;  %v829_v35 = vld [vmem:[#allocation8 + $0x948] sm:$0xff] }
 0x1f8   :  { %3708 = vmatpush1.bf16.msra.mxu0 %v16621_v41  ;;  %3872 = vmatpush1.bf16.msra.mxu1 %v16623_v42  ;;  %v19578_v41 = vmax.f32 %v428_v28, 0.0  ;;  %v16663_v42 = vcombine.low %v781_v25, %v785_v26  ;;  %v824_v25 = vld [vmem:[#allocation8 + $0x920] sm:$0xff]  ;;  %v821_v26 = vld [vmem:[#allocation8 + $0x908] sm:$0xff]  ;;  %v16693_v28 = vcombine.low %v812_v11, %v816_v12 }
 0x1f9   :  { %3709 = vmatprep.subr.bf16.mxu0 %v16630_v43  ;;  %3873 = vmatprep.subr.bf16.mxu1 %v16632_v49  ;;  %v16670_v43 = vcombine.high %v788_v34, %v792_v36  ;;  %v16672_v49 = vcombine.high %v789_v37, %v793_v38 }
 0x1fa   :  { %v19584_v16 = vpack.c.bf16 %v19578_v41, %v19578_v41 }
 0x1fc   :  { %3710 = vmatpush1.bf16.msra.mxu0 %v16629_v54  ;;  %3874 = vmatpush1.bf16.msra.mxu1 %v16631_v55  ;;  %v19580_v54 = vmax.f32 %v471_v39, 0.0  ;;  %v16669_v55 = vcombine.low %v788_v34, %v792_v36  ;;  %v832_v34 = vld [vmem:[#allocation8 + $0x960] sm:$0xff]  ;;  %v833_v36 = vld [vmem:[#allocation8 + $0x968] sm:$0xff] }
 0x1fd   :  { %3711 = vmatprep.subr.bf16.mxu0 %v16638_v56  ;;  %3875 = vmatprep.subr.bf16.mxu1 %v16640_v59  ;;  %v16671_v56 = vcombine.low %v789_v37, %v793_v38  ;;  %v16678_v59 = vcombine.high %v796_v50, %v800_v51  ;;  %v16701_v37 = vcombine.low %v820_v24, %v824_v25 }
 0x1fe   :  { %v16703_v38 = vcombine.low %v821_v26, %v825_v27  ;;  %v16712_v40 = vcombine.high %v829_v35, %v833_v36 }
 0x200   :  { %3712 = vmatpush1.bf16.msra.mxu0 %v16637_v2  ;;  %3876 = vmatpush1.bf16.msra.mxu1 %v16639_v3  ;;  %v809_v2 = vld [vmem:[#allocation8 + $0x8a8] sm:$0xff]  ;;  %v19588_v3 = vpack.c.bf16 %v19580_v54, %v19580_v54 }
 0x201   :  { %3713 = vmatprep.subr.bf16.mxu0 %v16646_v4  ;;  %3877 = vmatprep.subr.bf16.mxu1 %v16648_v8  ;;  %v16677_v4 = vcombine.low %v796_v50, %v800_v51  ;;  %v16679_v8 = vcombine.low %v797_v52, %v801_v53  ;;  %v16688_v10 = vcombine.high %v805_v0, %v809_v2 }
 0x202   :  { %v16711_v51 = vcombine.low %v829_v35, %v833_v36 }
 0x204   :  { %3714 = vmatpush1.bf16.msra.mxu0 %v16645_v18  ;;  %3878 = vmatpush1.bf16.msra.mxu1 %v16647_v19  ;;  %v817_v18 = vld [vmem:[#allocation8 + $0x8e8] sm:$0xff]  ;;  %v16685_v19 = vcombine.low %v804_v61, %v808_v63 }
 0x205   :  { %3715 = vmatprep.subr.bf16.mxu0 %v16654_v20  ;;  %3879 = vmatprep.subr.bf16.mxu1 %v16656_v21  ;;  %v16687_v20 = vcombine.low %v805_v0, %v809_v2  ;;  %v16694_v21 = vcombine.high %v812_v11, %v816_v12  ;;  %v16696_v22 = vcombine.high %v813_v17, %v817_v18 }
 0x208   :  { %3716 = vmatpush1.bf16.msra.mxu0 %v16653_v29  ;;  %3880 = vmatpush1.bf16.msra.mxu1 %v16655_v30  ;;  %v16695_v29 = vcombine.low %v813_v17, %v817_v18  ;;  %v16702_v30 = vcombine.high %v820_v24, %v824_v25 }
 0x209   :  { %3717 = vmatprep.subr.bf16.mxu0 %v16662_v32  ;;  %3881 = vmatprep.subr.bf16.mxu1 %v16664_v33  ;;  %v16704_v32 = vcombine.high %v821_v26, %v825_v27  ;;  %v828_v33 = vld [vmem:[#allocation8 + $0x940] sm:$0xff] }
 0x20a   :  { %v16710_v39 = vcombine.high %v828_v33, %v832_v34  ;;  %v16709_v50 = vcombine.low %v828_v33, %v832_v34 }
 0x20c   :  { %3718 = vmatpush1.bf16.msra.mxu0 %v16661_v57  ;;  %3882 = vmatpush1.bf16.msra.mxu1 %v16663_v42  ;;  %v836_v57 = vld [vmem:[#allocation8 + $0x980] sm:$0xff] }
 0x20d   :  { %3728 = vmatprep.subr.bf16.mxu0 %v16670_v43  ;;  %3892 = vmatprep.subr.bf16.mxu1 %v16672_v49  ;;  %v840_v42 = vld [vmem:[#allocation8 + $0x9a0] sm:$0xff]  ;;  %v837_v43 = vld [vmem:[#allocation8 + $0x988] sm:$0xff] }
 0x20e   :  { %v841_v49 = vld [vmem:[#allocation8 + $0x9a8] sm:$0xff]  ;;  %v16718_v52 = vcombine.high %v836_v57, %v840_v42  ;;  %v16717_v61 = vcombine.low %v836_v57, %v840_v42 }
 0x20f   :  { %3720 = vmatmul.mubr.bf16.vlgmr.msra.gmra.mrb[8].mxu0 %v19584_v16  ;;  %3884 = vmatmul.mubr.bf16.vlgmr.msra.gmra.mrb[8].mxu1 %v19584_v16  ;;  %v16720_v53 = vcombine.high %v837_v43, %v841_v49  ;;  %v16719_v63 = vcombine.low %v837_v43, %v841_v49 }
 0x210   :  { %3729 = vmatpush1.bf16.msra.mxu0 %v16669_v55  ;;  %3893 = vmatpush1.bf16.msra.mxu1 %v16671_v56  ;;  %v844_v55 = vld [vmem:[#allocation8 + $0x9c0] sm:$0xff] }
 0x211   :  { %3730 = vmatprep.subr.bf16.mxu0 %v16678_v59  ;;  %3894 = vmatprep.subr.bf16.mxu1 %v16680_v60  ;;  %v848_v56 = vld [vmem:[#allocation8 + $0x9e0] sm:$0xff]  ;;  %v845_v59 = vld [vmem:[#allocation8 + $0x9c8] sm:$0xff] }
 0x212   :  { %3760 = vmatprep.mubr.bf16.mxu0 %v19588_v3  ;;  %3924 = vmatprep.mubr.bf16.mxu1 %v19588_v3  ;;  %v849_v60 = vld [vmem:[#allocation8 + $0x9e8] sm:$0xff]  ;;  %v16726_v0 = vcombine.high %v844_v55, %v848_v56  ;;  %v16725_v11 = vcombine.low %v844_v55, %v848_v56 }
 0x213   :  { %v16728_v2 = vcombine.high %v845_v59, %v849_v60  ;;  %v16727_v12 = vcombine.low %v845_v59, %v849_v60 }
 0x214   :  { %3731 = vmatpush1.bf16.msra.mxu0 %v16677_v4  ;;  %3895 = vmatpush1.bf16.msra.mxu1 %v16679_v8  ;;  %v852_v4 = vld [vmem:[#allocation8 + $0xa00] sm:$0xff] }
 0x215   :  { %3732 = vmatprep.subr.bf16.mxu0 %v16686_v9  ;;  %3896 = vmatprep.subr.bf16.mxu1 %v16688_v10  ;;  %v856_v8 = vld [vmem:[#allocation8 + $0xa20] sm:$0xff]  ;;  %v853_v9 = vld [vmem:[#allocation8 + $0xa08] sm:$0xff] }
 0x216   :  { %v857_v10 = vld [vmem:[#allocation8 + $0xa28] sm:$0xff]  ;;  %v16734_v17 = vcombine.high %v852_v4, %v856_v8  ;;  %v16733_v24 = vcombine.low %v852_v4, %v856_v8  ;;  %v19595_v4 = vsub.s32 4, %v19513_v44 }
 0x217   :  { %v16736_v18 = vcombine.high %v853_v9, %v857_v10  ;;  %v16735_v25 = vcombine.low %v853_v9, %v857_v10 }
 0x218   :  { %3733 = vmatpush1.bf16.msra.mxu0 %v16685_v19  ;;  %3897 = vmatpush1.bf16.msra.mxu1 %v16687_v20  ;;  %v860_v19 = vld [vmem:[#allocation8 + $0xa40] sm:$0xff] }
 0x219   :  { %3734 = vmatprep.subr.bf16.mxu0 %v16694_v21  ;;  %3898 = vmatprep.subr.bf16.mxu1 %v16696_v22  ;;  %v864_v20 = vld [vmem:[#allocation8 + $0xa60] sm:$0xff]  ;;  %v861_v21 = vld [vmem:[#allocation8 + $0xa48] sm:$0xff] }
 0x21a   :  { %v865_v22 = vld [vmem:[#allocation8 + $0xa68] sm:$0xff]  ;;  %v16742_v26 = vcombine.high %v860_v19, %v864_v20  ;;  %v16741_v33 = vcombine.low %v860_v19, %v864_v20  ;;  %v19598_v20 = vsub.s32 7, %v19513_v44 }
 0x21b   :  { %v16744_v27 = vcombine.high %v861_v21, %v865_v22  ;;  %v16743_v34 = vcombine.low %v861_v21, %v865_v22  ;;  %v905_v19 = vld [vmem:[#allocation8 + $0xba8] sm:$0xff]  ;;  %v247_v21 = vrot.slane %v19518_v46, %v19595_v4 }
 0x21c   :  { %3735 = vmatpush1.bf16.msra.mxu0 %v16693_v28  ;;  %3899 = vmatpush1.bf16.msra.mxu1 %v16695_v29  ;;  %v868_v28 = vld [vmem:[#allocation8 + $0xa80] sm:$0xff] }
 0x21d   :  { %3736 = vmatprep.subr.bf16.mxu0 %v16702_v30  ;;  %3900 = vmatprep.subr.bf16.mxu1 %v16704_v32  ;;  %v872_v29 = vld [vmem:[#allocation8 + $0xaa0] sm:$0xff]  ;;  %v869_v30 = vld [vmem:[#allocation8 + $0xa88] sm:$0xff] }
 0x21e   :  { %v873_v32 = vld [vmem:[#allocation8 + $0xaa8] sm:$0xff]  ;;  %v16750_v35 = vcombine.high %v868_v28, %v872_v29  ;;  %v16749_v57 = vcombine.low %v868_v28, %v872_v29  ;;  %v912_v28 = vld [vmem:[#allocation8 + $0xbe0] sm:$0xff] }
 0x21f   :  { %v16752_v36 = vcombine.high %v869_v30, %v873_v32  ;;  %v16751_v42 = vcombine.low %v869_v30, %v873_v32  ;;  %v909_v29 = vld [vmem:[#allocation8 + $0xbc8] sm:$0xff]  ;;  %v259_v32 = vrot.slane %v19518_v46, %v19598_v20 }
 0x220   :  { %3737 = vmatpush1.bf16.msra.mxu0 %v16701_v37  ;;  %3901 = vmatpush1.bf16.msra.mxu1 %v16703_v38  ;;  %v876_v37 = vld [vmem:[#allocation8 + $0xac0] sm:$0xff]  ;;  %v913_v30 = vld [vmem:[#allocation8 + $0xbe8] sm:$0xff] }
 0x221   :  { %3738 = vmatprep.subr.bf16.mxu0 %v16710_v39  ;;  %3902 = vmatprep.subr.bf16.mxu1 %v16712_v40  ;;  %v880_v38 = vld [vmem:[#allocation8 + $0xae0] sm:$0xff]  ;;  %v877_v39 = vld [vmem:[#allocation8 + $0xac8] sm:$0xff] }
 0x222   :  { %v881_v40 = vld [vmem:[#allocation8 + $0xae8] sm:$0xff]  ;;  %v16758_v43 = vcombine.high %v876_v37, %v880_v38  ;;  %v16757_v55 = vcombine.low %v876_v37, %v880_v38  ;;  %v16792_v37 = vcombine.high %v909_v29, %v913_v30  ;;  %v916_v38 = vld [vmem:[#allocation8 + $0xc00] sm:$0xff] }
 0x223   :  { %v16760_v49 = vcombine.high %v877_v39, %v881_v40  ;;  %v16759_v56 = vcombine.low %v877_v39, %v881_v40  ;;  %v920_v39 = vld [vmem:[#allocation8 + $0xc20] sm:$0xff]  ;;  %v917_v40 = vld [vmem:[#allocation8 + $0xc08] sm:$0xff] }
 0x224   :  { %3739 = vmatpush1.bf16.msra.mxu0 %v16709_v50  ;;  %3903 = vmatpush1.bf16.msra.mxu1 %v16711_v51  ;;  %v884_v50 = vld [vmem:[#allocation8 + $0xb00] sm:$0xff] }
 0x225   :  { %3740 = vmatprep.subr.bf16.mxu0 %v16718_v52  ;;  %3904 = vmatprep.subr.bf16.mxu1 %v16720_v53  ;;  %v888_v51 = vld [vmem:[#allocation8 + $0xb20] sm:$0xff]  ;;  %v885_v52 = vld [vmem:[#allocation8 + $0xb08] sm:$0xff] }
 0x226   :  { %v889_v53 = vld [vmem:[#allocation8 + $0xb28] sm:$0xff]  ;;  %v16766_v59 = vcombine.high %v884_v50, %v888_v51  ;;  %v16765_v8 = vcombine.low %v884_v50, %v888_v51  ;;  %v924_v51 = vld [vmem:[#allocation8 + $0xc40] sm:$0xff] }
 0x227   :  { %v16768_v60 = vcombine.high %v885_v52, %v889_v53  ;;  %v16767_v9 = vcombine.low %v885_v52, %v889_v53  ;;  %v928_v52 = vld [vmem:[#allocation8 + $0xc60] sm:$0xff]  ;;  %v925_v53 = vld [vmem:[#allocation8 + $0xc48] sm:$0xff] }
 0x228   :  { %3741 = vmatpush1.bf16.msra.mxu0 %v16717_v61  ;;  %3905 = vmatpush1.bf16.msra.mxu1 %v16719_v63  ;;  %v892_v61 = vld [vmem:[#allocation8 + $0xb40] sm:$0xff] }
 0x229   :  { %3742 = vmatprep.subr.bf16.mxu0 %v16726_v0  ;;  %3906 = vmatprep.subr.bf16.mxu1 %v16728_v2  ;;  %v896_v63 = vld [vmem:[#allocation8 + $0xb60] sm:$0xff]  ;;  %v893_v0 = vld [vmem:[#allocation8 + $0xb48] sm:$0xff] }
 0x22a   :  { %v897_v2 = vld [vmem:[#allocation8 + $0xb68] sm:$0xff]  ;;  %v16774_v10 = vcombine.high %v892_v61, %v896_v63  ;;  %v16773_v22 = vcombine.low %v892_v61, %v896_v63  ;;  %v16806_v61 = vcombine.high %v924_v51, %v928_v52 }
 0x22c   :  { %3743 = vmatpush1.bf16.msra.mxu0 %v16725_v11  ;;  %3907 = vmatpush1.bf16.msra.mxu1 %v16727_v12  ;;  %v16776_v11 = vcombine.high %v893_v0, %v897_v2  ;;  %v900_v12 = vld [vmem:[#allocation8 + $0xb80] sm:$0xff] }
 0x22d   :  { %3744 = vmatprep.subr.bf16.mxu0 %v16734_v17  ;;  %3908 = vmatprep.subr.bf16.mxu1 %v16736_v18  ;;  %v904_v17 = vld [vmem:[#allocation8 + $0xba0] sm:$0xff]  ;;  %v901_v18 = vld [vmem:[#allocation8 + $0xb88] sm:$0xff] }
 0x230   :  { %3745 = vmatpush1.bf16.msra.mxu0 %v16733_v24  ;;  %3909 = vmatpush1.bf16.msra.mxu1 %v16735_v25  ;;  %v16775_v24 = vcombine.low %v893_v0, %v897_v2  ;;  %v16782_v25 = vcombine.high %v900_v12, %v904_v17  ;;  %v932_v0 = vld [vmem:[#allocation8 + $0xc80] sm:$0xff] }
 0x231   :  { %3746 = vmatprep.subr.bf16.mxu0 %v16742_v26  ;;  %3910 = vmatprep.subr.bf16.mxu1 %v16744_v27  ;;  %v16784_v26 = vcombine.high %v901_v18, %v905_v19  ;;  %v908_v27 = vld [vmem:[#allocation8 + $0xbc0] sm:$0xff] }
 0x232   :  { %v16789_v46 = vcombine.low %v908_v27, %v912_v28  ;;  %v936_v2 = vld [vmem:[#allocation8 + $0xca0] sm:$0xff] }
 0x234   :  { %3747 = vmatpush1.bf16.msra.mxu0 %v16741_v33  ;;  %3911 = vmatpush1.bf16.msra.mxu1 %v16743_v34  ;;  %v469_v33 = vadd.f32 %v19554_v15, %v247_v21  ;;  %v16781_v34 = vcombine.low %v900_v12, %v904_v17  ;;  %v16791_v15 = vcombine.low %v909_v29, %v913_v30  ;;  %v944_v21 = vld [vmem:[#allocation8 + $0xce0] sm:$0xff] }
 0x235   :  { %3748 = vmatprep.subr.bf16.mxu0 %v16750_v35  ;;  %3912 = vmatprep.subr.bf16.mxu1 %v16752_v36  ;;  %v16783_v35 = vcombine.low %v901_v18, %v905_v19  ;;  %v16790_v36 = vcombine.high %v908_v27, %v912_v28  ;;  %v16814_v17 = vcombine.high %v932_v0, %v936_v2  ;;  %v940_v19 = vld [vmem:[#allocation8 + $0xcc0] sm:$0xff] }
 0x236   :  { %v16822_v27 = vcombine.high %v940_v19, %v944_v21  ;;  %v948_v29 = vld [vmem:[#allocation8 + $0xd00] sm:$0xff] }
 0x237   :  { %v952_v30 = vld [vmem:[#allocation8 + $0xd20] sm:$0xff] }
 0x238   :  { %3749 = vmatpush1.bf16.msra.mxu0 %v16749_v57  ;;  %3913 = vmatpush1.bf16.msra.mxu1 %v16751_v42  ;;  %v921_v57 = vld [vmem:[#allocation8 + $0xc28] sm:$0xff]  ;;  %v512_v42 = vadd.f32 %v19575_v31, %v259_v32  ;;  %v16797_v31 = vcombine.low %v916_v38, %v920_v39 }
 0x239   :  { %3750 = vmatprep.subr.bf16.mxu0 %v16758_v43  ;;  %3914 = vmatprep.subr.bf16.mxu1 %v16760_v49  ;;  %v19606_v43 = vmax.f32 %v469_v33, 0.0  ;;  %v16798_v49 = vcombine.high %v916_v38, %v920_v39  ;;  %v16800_v50 = vcombine.high %v917_v40, %v921_v57  ;;  %v949_v32 = vld [vmem:[#allocation8 + $0xd08] sm:$0xff]  ;;  %v956_v38 = vld [vmem:[#allocation8 + $0xd40] sm:$0xff] }
 0x23a   :  { %v953_v33 = vld [vmem:[#allocation8 + $0xd28] sm:$0xff]  ;;  %v960_v39 = vld [vmem:[#allocation8 + $0xd60] sm:$0xff] }
 0x23c   :  { %3751 = vmatpush1.bf16.msra.mxu0 %v16757_v55  ;;  %3915 = vmatpush1.bf16.msra.mxu1 %v16759_v56  ;;  %v929_v55 = vld [vmem:[#allocation8 + $0xc68] sm:$0xff]  ;;  %v19608_v56 = vmax.f32 %v512_v42, 0.0  ;;  %v16829_v42 = vcombine.low %v948_v29, %v952_v30 }
 0x23d   :  { %3752 = vmatprep.subr.bf16.mxu0 %v16766_v59  ;;  %3916 = vmatprep.subr.bf16.mxu1 %v16768_v60  ;;  %v19612_v59 = vpack.c.bf16 %v19606_v43, %v19606_v43  ;;  %v16799_v60 = vcombine.low %v917_v40, %v921_v57  ;;  %v16808_v63 = vcombine.high %v925_v53, %v929_v55  ;;  %v957_v40 = vld [vmem:[#allocation8 + $0xd48] sm:$0xff] }
 0x23e   :  { %v16807_v12 = vcombine.low %v925_v53, %v929_v55  ;;  %v961_v57 = vld [vmem:[#allocation8 + $0xd68] sm:$0xff]  ;;  %v16837_v55 = vcombine.low %v956_v38, %v960_v39 }
 0x23f   :  { %v969_v53 = vld [vmem:[#allocation8 + $0xda8] sm:$0xff] }
 0x240   :  { %3753 = vmatpush1.bf16.msra.mxu0 %v16765_v8  ;;  %3917 = vmatpush1.bf16.msra.mxu1 %v16767_v9  ;;  %v933_v8 = vld [vmem:[#allocation8 + $0xc88] sm:$0xff] }
 0x241   :  { %3754 = vmatprep.subr.bf16.mxu0 %v16774_v10  ;;  %3918 = vmatprep.subr.bf16.mxu1 %v16776_v11  ;;  %v937_v9 = vld [vmem:[#allocation8 + $0xca8] sm:$0xff]  ;;  %v19616_v10 = vpack.c.bf16 %v19608_v56, %v19608_v56  ;;  %v16805_v11 = vcombine.low %v924_v51, %v928_v52  ;;  %v968_v51 = vld [vmem:[#allocation8 + $0xda0] sm:$0xff] }
 0x242   :  { %v16816_v18 = vcombine.high %v933_v8, %v937_v9  ;;  %v965_v52 = vld [vmem:[#allocation8 + $0xd88] sm:$0xff] }
 0x244   :  { %3755 = vmatpush1.bf16.msra.mxu0 %v16773_v22  ;;  %3919 = vmatpush1.bf16.msra.mxu1 %v16775_v24  ;;  %v941_v22 = vld [vmem:[#allocation8 + $0xcc8] sm:$0xff] }
 0x245   :  { %3756 = vmatprep.subr.bf16.mxu0 %v16782_v25  ;;  %3920 = vmatprep.subr.bf16.mxu1 %v16784_v26  ;;  %v945_v24 = vld [vmem:[#allocation8 + $0xce8] sm:$0xff]  ;;  %v16813_v25 = vcombine.low %v932_v0, %v936_v2  ;;  %v16815_v26 = vcombine.low %v933_v8, %v937_v9  ;;  %v976_v0 = vld [vmem:[#allocation8 + $0xde0] sm:$0xff] }
 0x246   :  { %v16824_v28 = vcombine.high %v941_v22, %v945_v24  ;;  %v973_v2 = vld [vmem:[#allocation8 + $0xdc8] sm:$0xff] }
 0x247   :  { %v977_v8 = vld [vmem:[#allocation8 + $0xde8] sm:$0xff] }
 0x248   :  { %3757 = vmatpush1.bf16.msra.mxu0 %v16781_v34  ;;  %3921 = vmatpush1.bf16.msra.mxu1 %v16783_v35  ;;  %v16821_v34 = vcombine.low %v940_v19, %v944_v21  ;;  %v16823_v35 = vcombine.low %v941_v22, %v945_v24  ;;  %v984_v19 = vld [vmem:[#allocation8 + $0xe20] sm:$0xff]  ;;  %v981_v21 = vld [vmem:[#allocation8 + $0xe08] sm:$0xff] }
 0x249   :  { %3758 = vmatprep.subr.bf16.mxu0 %v16790_v36  ;;  %3922 = vmatprep.subr.bf16.mxu1 %v16792_v37  ;;  %v16830_v36 = vcombine.high %v948_v29, %v952_v30  ;;  %v16832_v37 = vcombine.high %v949_v32, %v953_v33  ;;  %v985_v22 = vld [vmem:[#allocation8 + $0xe28] sm:$0xff]  ;;  %v992_v29 = vld [vmem:[#allocation8 + $0xe60] sm:$0xff] }
 0x24a   :  { %v989_v30 = vld [vmem:[#allocation8 + $0xe48] sm:$0xff] }
 0x24c   :  { %3759 = vmatpush1.bf16.msra.mxu0 %v16789_v46  ;;  %3923 = vmatpush1.bf16.msra.mxu1 %v16791_v15  ;;  %v16831_v46 = vcombine.low %v949_v32, %v953_v33  ;;  %v16838_v15 = vcombine.high %v956_v38, %v960_v39  ;;  %v993_v32 = vld [vmem:[#allocation8 + $0xe68] sm:$0xff]  ;;  %v1000_v38 = vld [vmem:[#allocation8 + $0xea0] sm:$0xff] }
 0x24d   :  { %3769 = vmatprep.subr.bf16.mxu0 %v16798_v49  ;;  %3933 = vmatprep.subr.bf16.mxu1 %v16800_v50  ;;  %v16840_v49 = vcombine.high %v957_v40, %v961_v57  ;;  %v964_v50 = vld [vmem:[#allocation8 + $0xd80] sm:$0xff]  ;;  %v997_v39 = vld [vmem:[#allocation8 + $0xe88] sm:$0xff] }
 0x24e   :  { %v16845_v9 = vcombine.low %v964_v50, %v968_v51 }
 0x24f   :  { %3761 = vmatmul.mubr.bf16.vlgmr.msra.gmra.mrb[8].mxu0 %v19612_v59  ;;  %3925 = vmatmul.mubr.bf16.vlgmr.msra.gmra.mrb[8].mxu1 %v19612_v59 }
 0x250   :  { %3770 = vmatpush1.bf16.msra.mxu0 %v16797_v31  ;;  %3934 = vmatpush1.bf16.msra.mxu1 %v16799_v60  ;;  %v16839_v31 = vcombine.low %v957_v40, %v961_v57  ;;  %v16846_v60 = vcombine.high %v964_v50, %v968_v51  ;;  %v1001_v40 = vld [vmem:[#allocation8 + $0xea8] sm:$0xff]  ;;  %v1008_v50 = vld [vmem:[#allocation8 + $0xee0] sm:$0xff] }
 0x251   :  { %3771 = vmatprep.subr.bf16.mxu0 %v16806_v61  ;;  %3935 = vmatprep.subr.bf16.mxu1 %v16808_v63  ;;  %v16848_v61 = vcombine.high %v965_v52, %v969_v53  ;;  %v972_v63 = vld [vmem:[#allocation8 + $0xdc0] sm:$0xff]  ;;  %v1005_v51 = vld [vmem:[#allocation8 + $0xec8] sm:$0xff] }
 0x252   :  { %3801 = vmatprep.mubr.bf16.mxu0 %v19616_v10  ;;  %3965 = vmatprep.mubr.bf16.mxu1 %v19616_v10  ;;  %v16853_v24 = vcombine.low %v972_v63, %v976_v0 }
 0x254   :  { %3772 = vmatpush1.bf16.msra.mxu0 %v16805_v11  ;;  %3936 = vmatpush1.bf16.msra.mxu1 %v16807_v12  ;;  %v16847_v11 = vcombine.low %v965_v52, %v969_v53  ;;  %v16854_v12 = vcombine.high %v972_v63, %v976_v0  ;;  %v1009_v52 = vld [vmem:[#allocation8 + $0xee8] sm:$0xff]  ;;  %v1016_v63 = vld [vmem:[#allocation8 + $0xf20] sm:$0xff] }
 0x255   :  { %3773 = vmatprep.subr.bf16.mxu0 %v16814_v17  ;;  %3937 = vmatprep.subr.bf16.mxu1 %v16816_v18  ;;  %v16856_v17 = vcombine.high %v973_v2, %v977_v8  ;;  %v980_v18 = vld [vmem:[#allocation8 + $0xe00] sm:$0xff]  ;;  %v1013_v0 = vld [vmem:[#allocation8 + $0xf08] sm:$0xff] }
 0x256   :  { %v16861_v33 = vcombine.low %v980_v18, %v984_v19 }
 0x258   :  { %3774 = vmatpush1.bf16.msra.mxu0 %v16813_v25  ;;  %3938 = vmatpush1.bf16.msra.mxu1 %v16815_v26  ;;  %v16855_v25 = vcombine.low %v973_v2, %v977_v8  ;;  %v16862_v26 = vcombine.high %v980_v18, %v984_v19  ;;  %v1017_v2 = vld [vmem:[#allocation8 + $0xf28] sm:$0xff]  ;;  %v1024_v18 = vld [vmem:[#allocation8 + $0xf60] sm:$0xff] }
 0x259   :  { %3775 = vmatprep.subr.bf16.mxu0 %v16822_v27  ;;  %3939 = vmatprep.subr.bf16.mxu1 %v16824_v28  ;;  %v16864_v27 = vcombine.high %v981_v21, %v985_v22  ;;  %v988_v28 = vld [vmem:[#allocation8 + $0xe40] sm:$0xff]  ;;  %v1021_v19 = vld [vmem:[#allocation8 + $0xf48] sm:$0xff] }
 0x25a   :  { %v16869_v57 = vcombine.low %v988_v28, %v992_v29 }
 0x25c   :  { %3776 = vmatpush1.bf16.msra.mxu0 %v16821_v34  ;;  %3940 = vmatpush1.bf16.msra.mxu1 %v16823_v35  ;;  %v16863_v34 = vcombine.low %v981_v21, %v985_v22  ;;  %v16870_v35 = vcombine.high %v988_v28, %v992_v29  ;;  %v1025_v21 = vld [vmem:[#allocation8 + $0xf68] sm:$0xff]  ;;  %v19623_v22 = vsub.s32 6, %v19513_v44  ;;  %v1028_v28 = vld [vmem:[#allocation8 + $0xf80] sm:$0xff] }
 0x25d   :  { %3777 = vmatprep.subr.bf16.mxu0 %v16830_v36  ;;  %3941 = vmatprep.subr.bf16.mxu1 %v16832_v37  ;;  %v16872_v36 = vcombine.high %v989_v30, %v993_v32  ;;  %v996_v37 = vld [vmem:[#allocation8 + $0xe80] sm:$0xff]  ;;  %v16903_v44 = vcombine.low %v1021_v19, %v1025_v21 }
 0x25e   :  { %v16877_v53 = vcombine.low %v996_v37, %v1000_v38  ;;  %v1032_v29 = vld [vmem:[#allocation8 + $0xfa0] sm:$0xff] }
 0x260   :  { %3778 = vmatpush1.bf16.msra.mxu0 %v16829_v42  ;;  %3942 = vmatpush1.bf16.msra.mxu1 %v16831_v46  ;;  %v16871_v42 = vcombine.low %v989_v30, %v993_v32  ;;  %v16878_v46 = vcombine.high %v996_v37, %v1000_v38  ;;  %v1029_v30 = vld [vmem:[#allocation8 + $0xf88] sm:$0xff]  ;;  %v1036_v38 = vld [vmem:[#allocation8 + $0xfc0] sm:$0xff] }
 0x261   :  { %3779 = vmatprep.subr.bf16.mxu0 %v16838_v15  ;;  %3943 = vmatprep.subr.bf16.mxu1 %v16840_v49  ;;  %v16880_v15 = vcombine.high %v997_v39, %v1001_v40  ;;  %v1004_v49 = vld [vmem:[#allocation8 + $0xec0] sm:$0xff]  ;;  %v1033_v32 = vld [vmem:[#allocation8 + $0xfa8] sm:$0xff] }
 0x262   :  { %v16885_v8 = vcombine.low %v1004_v49, %v1008_v50  ;;  %v16912_v37 = vcombine.high %v1029_v30, %v1033_v32 }
 0x264   :  { %3780 = vmatpush1.bf16.msra.mxu0 %v16837_v55  ;;  %3944 = vmatpush1.bf16.msra.mxu1 %v16839_v31  ;;  %v16879_v55 = vcombine.low %v997_v39, %v1001_v40  ;;  %v16886_v31 = vcombine.high %v1004_v49, %v1008_v50  ;;  %v1040_v39 = vld [vmem:[#allocation8 + $0xfe0] sm:$0xff]  ;;  %v1037_v40 = vld [vmem:[#allocation8 + $0xfc8] sm:$0xff] }
 0x265   :  { %3781 = vmatprep.subr.bf16.mxu0 %v16846_v60  ;;  %3945 = vmatprep.subr.bf16.mxu1 %v16848_v61  ;;  %v16888_v60 = vcombine.high %v1005_v51, %v1009_v52  ;;  %v1012_v61 = vld [vmem:[#allocation8 + $0xf00] sm:$0xff]  ;;  %v16918_v49 = vcombine.high %v1036_v38, %v1040_v39 }
 0x268   :  { %3782 = vmatpush1.bf16.msra.mxu0 %v16845_v9  ;;  %3946 = vmatpush1.bf16.msra.mxu1 %v16847_v11  ;;  %v16887_v9 = vcombine.low %v1005_v51, %v1009_v52  ;;  %v16894_v11 = vcombine.high %v1012_v61, %v1016_v63  ;;  %v534_v51 = vld [vmem:[#allocation8 + $0x10] sm:$0xff] }
 0x269   :  { %3783 = vmatprep.subr.bf16.mxu0 %v16854_v12  ;;  %3947 = vmatprep.subr.bf16.mxu1 %v16856_v17  ;;  %v16896_v12 = vcombine.high %v1013_v0, %v1017_v2  ;;  %v1020_v17 = vld [vmem:[#allocation8 + $0xf40] sm:$0xff]  ;;  %v538_v52 = vld [vmem:[#allocation8 + $0x30] sm:$0xff] }
 0x26c   :  { %3784 = vmatpush1.bf16.msra.mxu0 %v16853_v24  ;;  %3948 = vmatpush1.bf16.msra.mxu1 %v16855_v25  ;;  %v16893_v24 = vcombine.low %v1012_v61, %v1016_v63  ;;  %v16895_v25 = vcombine.low %v1013_v0, %v1017_v2  ;;  %v542_v0 = vld [vmem:[#allocation8 + $0x50] sm:$0xff] }
 0x26d   :  { %3785 = vmatprep.subr.bf16.mxu0 %v16862_v26  ;;  %3949 = vmatprep.subr.bf16.mxu1 %v16864_v27  ;;  %v16902_v26 = vcombine.high %v1020_v17, %v1024_v18  ;;  %v16904_v27 = vcombine.high %v1021_v19, %v1025_v21  ;;  %v550_v21 = vld [vmem:[#allocation8 + $0x90] sm:$0xff] }
 0x270   :  { %3786 = vmatpush1.bf16.msra.mxu0 %v16861_v33  ;;  %3950 = vmatpush1.bf16.msra.mxu1 %v16863_v34  ;;  %v18921_v33 = vld [vmem:[#allocation7] sm:$0xff] }
 0x271   :  { %3787 = vmatprep.subr.bf16.mxu0 %v16870_v35  ;;  %3951 = vmatprep.subr.bf16.mxu1 %v16872_v36  ;;  %v255_v34 = vrot.slane %v18921_v33, %v19623_v22  ;;  %v16901_v35 = vcombine.low %v1020_v17, %v1024_v18  ;;  %v16910_v36 = vcombine.high %v1028_v28, %v1032_v29  ;;  %v562_v33 = vld [vmem:[#allocation8 + $0xf0] sm:$0xff] }
 0x274   :  { %3788 = vmatpush1.bf16.msra.mxu0 %v16869_v57  ;;  %3952 = vmatpush1.bf16.msra.mxu1 %v16871_v42  ;;  %v1041_v57 = vld [vmem:[#allocation8 + $0xfe8] sm:$0xff]  ;;  %v510_v42 = vadd.f32 %v19570_v23, %v255_v34  ;;  %v16418_v23 = vcombine.high %v534_v51, %v538_v52  ;;  %v559_v34 = vld [vmem:[#allocation8 + $0xd8] sm:$0xff] }
 0x275   :  { %3789 = vmatprep.subr.bf16.mxu0 %v16878_v46  ;;  %3953 = vmatprep.subr.bf16.mxu1 %v16880_v15  ;;  %v16909_v46 = vcombine.low %v1028_v28, %v1032_v29  ;;  %v16911_v15 = vcombine.low %v1029_v30, %v1033_v32  ;;  %v16920_v50 = vcombine.high %v1037_v40, %v1041_v57  ;;  %v558_v32 = vld [vmem:[#allocation8 + $0xd0] sm:$0xff] }
 0x276   :  { %v16919_v61 = vcombine.low %v1037_v40, %v1041_v57  ;;  %v570_v40 = vld [vmem:[#allocation8 + $0x130] sm:$0xff]  ;;  %v571_v57 = vld [vmem:[#allocation8 + $0x138] sm:$0xff] }
 0x278   :  { %3790 = vmatpush1.bf16.msra.mxu0 %v16877_v53  ;;  %3954 = vmatpush1.bf16.msra.mxu1 %v16879_v55  ;;  %v535_v53 = vld [vmem:[#allocation8 + $0x18] sm:$0xff] }
 0x279   :  { %3791 = vmatprep.subr.bf16.mxu0 %v16886_v31  ;;  %3955 = vmatprep.subr.bf16.mxu1 %v16888_v60  ;;  %v539_v55 = vld [vmem:[#allocation8 + $0x38] sm:$0xff]  ;;  %v19627_v31 = vmax.f32 %v510_v42, 0.0  ;;  %v16917_v60 = vcombine.low %v1036_v38, %v1040_v39  ;;  %v566_v39 = vld [vmem:[#allocation8 + $0x110] sm:$0xff]  ;;  %v16441_v42 = vcombine.low %v558_v32, %v562_v33 }
 0x27a   :  { %v16420_v63 = vcombine.high %v535_v53, %v539_v55  ;;  %v16419_v17 = vcombine.low %v535_v53, %v539_v55  ;;  %v579_v53 = vld [vmem:[#allocation8 + $0x178] sm:$0xff]  ;;  %v16449_v55 = vcombine.low %v566_v39, %v570_v40 }
 0x27b   :  { %v19631_v2 = vpack.c.bf16 %v19627_v31, %v19627_v31 }
 0x27c   :  { %3792 = vmatpush1.bf16.msra.mxu0 %v16885_v8  ;;  %3956 = vmatpush1.bf16.msra.mxu1 %v16887_v9  ;;  %v546_v8 = vld [vmem:[#allocation8 + $0x70] sm:$0xff]  ;;  %v543_v9 = vld [vmem:[#allocation8 + $0x58] sm:$0xff] }
 0x27d   :  { %3793 = vmatprep.subr.bf16.mxu0 %v16894_v11  ;;  %3957 = vmatprep.subr.bf16.mxu1 %v16896_v12  ;;  %v547_v11 = vld [vmem:[#allocation8 + $0x78] sm:$0xff]  ;;  %v16417_v12 = vcombine.low %v534_v51, %v538_v52  ;;  %v16426_v18 = vcombine.high %v542_v0, %v546_v8  ;;  %v578_v51 = vld [vmem:[#allocation8 + $0x170] sm:$0xff] }
 0x27e   :  { %v16428_v19 = vcombine.high %v543_v9, %v547_v11  ;;  %v16427_v28 = vcombine.low %v543_v9, %v547_v11  ;;  %v575_v52 = vld [vmem:[#allocation8 + $0x158] sm:$0xff] }
 0x27f   :  { %v587_v9 = vld [vmem:[#allocation8 + $0x1b8] sm:$0xff] }
 0x280   :  { %3794 = vmatpush1.bf16.msra.mxu0 %v16893_v24  ;;  %3958 = vmatpush1.bf16.msra.mxu1 %v16895_v25  ;;  %v554_v24 = vld [vmem:[#allocation8 + $0xb0] sm:$0xff]  ;;  %v551_v25 = vld [vmem:[#allocation8 + $0x98] sm:$0xff] }
 0x281   :  { %3795 = vmatprep.subr.bf16.mxu0 %v16902_v26  ;;  %3959 = vmatprep.subr.bf16.mxu1 %v16904_v27  ;;  %v555_v26 = vld [vmem:[#allocation8 + $0xb8] sm:$0xff]  ;;  %v16425_v27 = vcombine.low %v542_v0, %v546_v8  ;;  %v16434_v29 = vcombine.high %v550_v21, %v554_v24  ;;  %v586_v0 = vld [vmem:[#allocation8 + $0x1b0] sm:$0xff] }
 0x282   :  { %v16436_v30 = vcombine.high %v551_v25, %v555_v26  ;;  %v583_v8 = vld [vmem:[#allocation8 + $0x198] sm:$0xff] }
 0x284   :  { %3796 = vmatpush1.bf16.msra.mxu0 %v16901_v35  ;;  %3960 = vmatpush1.bf16.msra.mxu1 %v16903_v44  ;;  %v563_v35 = vld [vmem:[#allocation8 + $0xf8] sm:$0xff]  ;;  %v16433_v44 = vcombine.low %v550_v21, %v554_v24  ;;  %v594_v21 = vld [vmem:[#allocation8 + $0x1f0] sm:$0xff] }
 0x285   :  { %3797 = vmatprep.subr.bf16.mxu0 %v16910_v36  ;;  %3961 = vmatprep.subr.bf16.mxu1 %v16912_v37  ;;  %v16435_v36 = vcombine.low %v551_v25, %v555_v26  ;;  %v16442_v37 = vcombine.high %v558_v32, %v562_v33  ;;  %v16444_v38 = vcombine.high %v559_v34, %v563_v35  ;;  %v591_v24 = vld [vmem:[#allocation8 + $0x1d8] sm:$0xff]  ;;  %v602_v32 = vld [vmem:[#allocation8 + $0x230] sm:$0xff] }
 0x286   :  { %v595_v25 = vld [vmem:[#allocation8 + $0x1f8] sm:$0xff] }
 0x287   :  { %v599_v33 = vld [vmem:[#allocation8 + $0x218] sm:$0xff] }
 0x288   :  { %3798 = vmatpush1.bf16.msra.mxu0 %v16909_v46  ;;  %3962 = vmatpush1.bf16.msra.mxu1 %v16911_v15  ;;  %v16443_v46 = vcombine.low %v559_v34, %v563_v35  ;;  %v16450_v15 = vcombine.high %v566_v39, %v570_v40  ;;  %v603_v34 = vld [vmem:[#allocation8 + $0x238] sm:$0xff]  ;;  %v610_v39 = vld [vmem:[#allocation8 + $0x270] sm:$0xff] }
 0x289   :  { %3799 = vmatprep.subr.bf16.mxu0 %v16918_v49  ;;  %3963 = vmatprep.subr.bf16.mxu1 %v16920_v50  ;;  %v574_v50 = vld [vmem:[#allocation8 + $0x150] sm:$0xff]  ;;  %v607_v40 = vld [vmem:[#allocation8 + $0x258] sm:$0xff] }
 0x28a   :  { %v16457_v11 = vcombine.low %v574_v50, %v578_v51 }
 0x28c   :  { %3800 = vmatpush1.bf16.msra.mxu0 %v16917_v60  ;;  %3964 = vmatpush1.bf16.msra.mxu1 %v16919_v61  ;;  %v16458_v61 = vcombine.high %v574_v50, %v578_v51  ;;  %v618_v50 = vld [vmem:[#allocation8 + $0x2b0] sm:$0xff]  ;;  %v615_v51 = vld [vmem:[#allocation8 + $0x298] sm:$0xff] }
 0x28d   :  { %3974 = vmatprep.subr.bf16.mxu0 %v16418_v23  ;;  %4138 = vmatprep.subr.bf16.mxu1 %v16420_v63  ;;  %v16460_v23 = vcombine.high %v575_v52, %v579_v53  ;;  %v582_v63 = vld [vmem:[#allocation8 + $0x190] sm:$0xff] }
 0x28e   :  { %v16465_v26 = vcombine.low %v582_v63, %v586_v0 }
 0x28f   :  { %3802 = vmatmul.mubr.bf16.vlgmr.msra.gmra.mrb[8].mxu0 %v19631_v2  ;;  %3966 = vmatmul.mubr.bf16.vlgmr.msra.gmra.mrb[8].mxu1 %v19631_v2 }
 0x290   :  { %3975 = vmatpush1.bf16.msra.mxu0 %v16417_v12  ;;  %4006 = vmatprep.mubr.bf16.mxu0 %v19540_v5  ;;  %v16459_v12 = vcombine.low %v575_v52, %v579_v53  ;;  %v619_v52 = vld [vmem:[#allocation8 + $0x2b8] sm:$0xff] }
 0x291   :  { %4139 = vmatpush1.bf16.msra.mxu1 %v16419_v17  ;;  %4170 = vmatprep.mubr.bf16.mxu1 %v19540_v5  ;;  %v567_v5 = vld [vmem:[#allocation8 + $0x118] sm:$0xff]  ;;  %v16466_v17 = vcombine.high %v582_v63, %v586_v0  ;;  %v626_v63 = vld [vmem:[#allocation8 + $0x2f0] sm:$0xff] }
 0x292   :  { %3976 = vmatprep.subr.bf16.mxu0 %v16426_v18  ;;  %4140 = vmatprep.subr.bf16.mxu1 %v16428_v19  ;;  %v16452_v49 = vcombine.high %v567_v5, %v571_v57  ;;  %v16451_v60 = vcombine.low %v567_v5, %v571_v57  ;;  %v16468_v18 = vcombine.high %v583_v8, %v587_v9  ;;  %v590_v19 = vld [vmem:[#allocation8 + $0x1d0] sm:$0xff]  ;;  %v611_v5 = vld [vmem:[#allocation8 + $0x278] sm:$0xff] }
 0x293   :  { %v16473_v35 = vcombine.low %v590_v19, %v594_v21  ;;  %v623_v0 = vld [vmem:[#allocation8 + $0x2d8] sm:$0xff] }
 0x294   :  { %3977 = vmatpush1.bf16.msra.mxu0 %v16425_v27  ;;  %v16467_v27 = vcombine.low %v583_v8, %v587_v9  ;;  %v627_v8 = vld [vmem:[#allocation8 + $0x2f8] sm:$0xff] }
 0x295   :  { %4141 = vmatpush1.bf16.msra.mxu1 %v16427_v28  ;;  %3978 = vmatprep.subr.bf16.mxu0 %v16434_v29  ;;  %v16474_v28 = vcombine.high %v590_v19, %v594_v21  ;;  %v16476_v29 = vcombine.high %v591_v24, %v595_v25  ;;  %v634_v19 = vld [vmem:[#allocation8 + $0x330] sm:$0xff]  ;;  %v631_v21 = vld [vmem:[#allocation8 + $0x318] sm:$0xff] }
 0x296   :  { %4142 = vmatprep.subr.bf16.mxu1 %v16436_v30  ;;  %v598_v30 = vld [vmem:[#allocation8 + $0x210] sm:$0xff] }
 0x297   :  { %v16481_v57 = vcombine.low %v598_v30, %v602_v32 }
 0x298   :  { %3979 = vmatpush1.bf16.msra.mxu0 %v16433_v44  ;;  %v16475_v44 = vcombine.low %v591_v24, %v595_v25  ;;  %v635_v24 = vld [vmem:[#allocation8 + $0x338] sm:$0xff] }
 0x299   :  { %4143 = vmatpush1.bf16.msra.mxu1 %v16435_v36  ;;  %3980 = vmatprep.subr.bf16.mxu0 %v16442_v37  ;;  %v16482_v36 = vcombine.high %v598_v30, %v602_v32  ;;  %v16484_v37 = vcombine.high %v599_v33, %v603_v34  ;;  %v642_v30 = vld [vmem:[#allocation8 + $0x370] sm:$0xff]  ;;  %v639_v32 = vld [vmem:[#allocation8 + $0x358] sm:$0xff] }
 0x29a   :  { %4144 = vmatprep.subr.bf16.mxu1 %v16444_v38  ;;  %v606_v38 = vld [vmem:[#allocation8 + $0x250] sm:$0xff] }
 0x29b   :  { %v16489_v53 = vcombine.low %v606_v38, %v610_v39 }
 0x29c   :  { %3981 = vmatpush1.bf16.msra.mxu0 %v16441_v42  ;;  %v16483_v42 = vcombine.low %v599_v33, %v603_v34  ;;  %v643_v33 = vld [vmem:[#allocation8 + $0x378] sm:$0xff] }
 0x29d   :  { %4145 = vmatpush1.bf16.msra.mxu1 %v16443_v46  ;;  %3982 = vmatprep.subr.bf16.mxu0 %v16450_v15  ;;  %v16490_v46 = vcombine.high %v606_v38, %v610_v39  ;;  %v16492_v15 = vcombine.high %v607_v40, %v611_v5  ;;  %v650_v38 = vld [vmem:[#allocation8 + $0x3b0] sm:$0xff]  ;;  %v647_v39 = vld [vmem:[#allocation8 + $0x398] sm:$0xff] }
 0x29e   :  { %4146 = vmatprep.subr.bf16.mxu1 %v16452_v49  ;;  %v614_v49 = vld [vmem:[#allocation8 + $0x290] sm:$0xff] }
 0x29f   :  { %v16497_v9 = vcombine.low %v614_v49, %v618_v50 }
 0x2a0   :  { %3983 = vmatpush1.bf16.msra.mxu0 %v16449_v55  ;;  %v16491_v55 = vcombine.low %v607_v40, %v611_v5  ;;  %v651_v40 = vld [vmem:[#allocation8 + $0x3b8] sm:$0xff] }
 0x2a1   :  { %4147 = vmatpush1.bf16.msra.mxu1 %v16451_v60  ;;  %3984 = vmatprep.subr.bf16.mxu0 %v16458_v61  ;;  %v16498_v60 = vcombine.high %v614_v49, %v618_v50  ;;  %v16500_v61 = vcombine.high %v615_v51, %v619_v52  ;;  %v658_v49 = vld [vmem:[#allocation8 + $0x3f0] sm:$0xff]  ;;  %v655_v50 = vld [vmem:[#allocation8 + $0x3d8] sm:$0xff] }
 0x2a2   :  { %4148 = vmatprep.subr.bf16.mxu1 %v16460_v23  ;;  %v622_v23 = vld [vmem:[#allocation8 + $0x2d0] sm:$0xff] }
 0x2a3   :  { %v16505_v25 = vcombine.low %v622_v23, %v626_v63 }
 0x2a4   :  { %3985 = vmatpush1.bf16.msra.mxu0 %v16457_v11  ;;  %v16499_v11 = vcombine.low %v615_v51, %v619_v52  ;;  %v659_v51 = vld [vmem:[#allocation8 + $0x3f8] sm:$0xff] }
 0x2a5   :  { %4149 = vmatpush1.bf16.msra.mxu1 %v16459_v12  ;;  %3986 = vmatprep.subr.bf16.mxu0 %v16466_v17  ;;  %v16506_v12 = vcombine.high %v622_v23, %v626_v63  ;;  %v16508_v17 = vcombine.high %v623_v0, %v627_v8  ;;  %v666_v23 = vld [vmem:[#allocation8 + $0x430] sm:$0xff]  ;;  %v663_v63 = vld [vmem:[#allocation8 + $0x418] sm:$0xff] }
 0x2a6   :  { %4150 = vmatprep.subr.bf16.mxu1 %v16468_v18  ;;  %v630_v18 = vld [vmem:[#allocation8 + $0x310] sm:$0xff] }
 0x2a7   :  { %v16513_v34 = vcombine.low %v630_v18, %v634_v19 }
 0x2a8   :  { %3987 = vmatpush1.bf16.msra.mxu0 %v16465_v26  ;;  %v16507_v26 = vcombine.low %v623_v0, %v627_v8  ;;  %v667_v0 = vld [vmem:[#allocation8 + $0x438] sm:$0xff] }
 0x2a9   :  { %4151 = vmatpush1.bf16.msra.mxu1 %v16467_v27  ;;  %3988 = vmatprep.subr.bf16.mxu0 %v16474_v28  ;;  %v16514_v27 = vcombine.high %v630_v18, %v634_v19  ;;  %v16516_v28 = vcombine.high %v631_v21, %v635_v24  ;;  %v674_v18 = vld [vmem:[#allocation8 + $0x470] sm:$0xff] }
 0x2aa   :  { %4152 = vmatprep.subr.bf16.mxu1 %v16476_v29  ;;  %v638_v29 = vld [vmem:[#allocation8 + $0x350] sm:$0xff] }
 0x2ab   :  { %v16521_v5 = vcombine.low %v638_v29, %v642_v30 }
 0x2ac   :  { %3989 = vmatpush1.bf16.msra.mxu0 %v16473_v35  ;;  %v16515_v35 = vcombine.low %v631_v21, %v635_v24  ;;  %v671_v21 = vld [vmem:[#allocation8 + $0x458] sm:$0xff] }
 0x2ad   :  { %4153 = vmatpush1.bf16.msra.mxu1 %v16475_v44  ;;  %3990 = vmatprep.subr.bf16.mxu0 %v16482_v36  ;;  %v16522_v44 = vcombine.high %v638_v29, %v642_v30  ;;  %v16524_v36 = vcombine.high %v639_v32, %v643_v33  ;;  %v675_v24 = vld [vmem:[#allocation8 + $0x478] sm:$0xff] }
 0x2ae   :  { %4154 = vmatprep.subr.bf16.mxu1 %v16484_v37  ;;  %v646_v37 = vld [vmem:[#allocation8 + $0x390] sm:$0xff]  ;;  %v16556_v29 = vcombine.high %v671_v21, %v675_v24  ;;  %v679_v30 = vld [vmem:[#allocation8 + $0x498] sm:$0xff] }
 0x2af   :  { %v16529_v52 = vcombine.low %v646_v37, %v650_v38 }
 0x2b0   :  { %3991 = vmatpush1.bf16.msra.mxu0 %v16481_v57  ;;  %v16523_v57 = vcombine.low %v639_v32, %v643_v33  ;;  %v683_v32 = vld [vmem:[#allocation8 + $0x4b8] sm:$0xff] }
 0x2b1   :  { %4155 = vmatpush1.bf16.msra.mxu1 %v16483_v42  ;;  %3992 = vmatprep.subr.bf16.mxu0 %v16490_v46  ;;  %v16530_v42 = vcombine.high %v646_v37, %v650_v38  ;;  %v16532_v46 = vcombine.high %v647_v39, %v651_v40  ;;  %v690_v37 = vld [vmem:[#allocation8 + $0x4f0] sm:$0xff]  ;;  %v687_v38 = vld [vmem:[#allocation8 + $0x4d8] sm:$0xff] }
 0x2b2   :  { %4156 = vmatprep.subr.bf16.mxu1 %v16492_v15  ;;  %v654_v15 = vld [vmem:[#allocation8 + $0x3d0] sm:$0xff] }
 0x2b3   :  { %v16537_v8 = vcombine.low %v654_v15, %v658_v49 }
 0x2b4   :  { %3993 = vmatpush1.bf16.msra.mxu0 %v16489_v53  ;;  %v16531_v53 = vcombine.low %v647_v39, %v651_v40  ;;  %v691_v39 = vld [vmem:[#allocation8 + $0x4f8] sm:$0xff] }
 0x2b5   :  { %4157 = vmatpush1.bf16.msra.mxu1 %v16491_v55  ;;  %3994 = vmatprep.subr.bf16.mxu0 %v16498_v60  ;;  %v16538_v55 = vcombine.high %v654_v15, %v658_v49  ;;  %v16540_v60 = vcombine.high %v655_v50, %v659_v51  ;;  %v695_v15 = vld [vmem:[#allocation8 + $0x518] sm:$0xff] }
 0x2b6   :  { %4158 = vmatprep.subr.bf16.mxu1 %v16500_v61  ;;  %v662_v61 = vld [vmem:[#allocation8 + $0x410] sm:$0xff]  ;;  %v699_v49 = vld [vmem:[#allocation8 + $0x538] sm:$0xff] }
 0x2b7   :  { %v16545_v19 = vcombine.low %v662_v61, %v666_v23 }
 0x2b8   :  { %3995 = vmatpush1.bf16.msra.mxu0 %v16497_v9  ;;  %v16539_v9 = vcombine.low %v655_v50, %v659_v51  ;;  %v16571_v50 = vcombine.low %v687_v38, %v691_v39 }
 0x2b9   :  { %4159 = vmatpush1.bf16.msra.mxu1 %v16499_v11  ;;  %3996 = vmatprep.subr.bf16.mxu0 %v16506_v12  ;;  %v16546_v11 = vcombine.high %v662_v61, %v666_v23  ;;  %v16548_v12 = vcombine.high %v663_v63, %v667_v0  ;;  %v707_v61 = vld [vmem:[#allocation8 + $0x578] sm:$0xff] }
 0x2ba   :  { %4160 = vmatprep.subr.bf16.mxu1 %v16508_v17  ;;  %v670_v17 = vld [vmem:[#allocation8 + $0x450] sm:$0xff] }
 0x2bb   :  { %v16553_v33 = vcombine.low %v670_v17, %v674_v18 }
 0x2bc   :  { %3997 = vmatpush1.bf16.msra.mxu0 %v16505_v25  ;;  %v16547_v25 = vcombine.low %v663_v63, %v667_v0  ;;  %v16579_v63 = vcombine.low %v695_v15, %v699_v49 }
 0x2bd   :  { %4161 = vmatpush1.bf16.msra.mxu1 %v16507_v26  ;;  %3998 = vmatprep.subr.bf16.mxu0 %v16514_v27  ;;  %v16554_v26 = vcombine.high %v670_v17, %v674_v18  ;;  %v678_v27 = vld [vmem:[#allocation8 + $0x490] sm:$0xff]  ;;  %v715_v17 = vld [vmem:[#allocation8 + $0x5b8] sm:$0xff] }
 0x2be   :  { %4162 = vmatprep.subr.bf16.mxu1 %v16516_v28  ;;  %v682_v28 = vld [vmem:[#allocation8 + $0x4b0] sm:$0xff] }
 0x2bf   :  { %v16561_v40 = vcombine.low %v678_v27, %v682_v28 }
 0x2c0   :  { %3999 = vmatpush1.bf16.msra.mxu0 %v16513_v34  ;;  %v16555_v34 = vcombine.low %v671_v21, %v675_v24 }
 0x2c1   :  { %4163 = vmatpush1.bf16.msra.mxu1 %v16515_v35  ;;  %4000 = vmatprep.subr.bf16.mxu0 %v16522_v44  ;;  %v16562_v35 = vcombine.high %v678_v27, %v682_v28  ;;  %v16564_v44 = vcombine.high %v679_v30, %v683_v32  ;;  %v719_v27 = vld [vmem:[#allocation8 + $0x5d8] sm:$0xff] }
 0x2c2   :  { %4164 = vmatprep.subr.bf16.mxu1 %v16524_v36  ;;  %v686_v36 = vld [vmem:[#allocation8 + $0x4d0] sm:$0xff]  ;;  %v723_v28 = vld [vmem:[#allocation8 + $0x5f8] sm:$0xff] }
 0x2c4   :  { %4001 = vmatpush1.bf16.msra.mxu0 %v16521_v5  ;;  %v16570_v5 = vcombine.high %v686_v36, %v690_v37 }
 0x2c5   :  { %4165 = vmatpush1.bf16.msra.mxu1 %v16523_v57  ;;  %4002 = vmatprep.subr.bf16.mxu0 %v16530_v42  ;;  %v16572_v57 = vcombine.high %v687_v38, %v691_v39  ;;  %v694_v42 = vld [vmem:[#allocation8 + $0x510] sm:$0xff]  ;;  %v16603_v38 = vcombine.low %v719_v27, %v723_v28 }
 0x2c6   :  { %4166 = vmatprep.subr.bf16.mxu1 %v16532_v46  ;;  %v698_v46 = vld [vmem:[#allocation8 + $0x530] sm:$0xff] }
 0x2c7   :  { %v16578_v51 = vcombine.high %v694_v42, %v698_v46  ;;  %v16577_v23 = vcombine.low %v694_v42, %v698_v46  ;;  %v739_v42 = vld [vmem:[#allocation8 + $0x678] sm:$0xff] }
 0x2c8   :  { %4003 = vmatpush1.bf16.msra.mxu0 %v16529_v52  ;;  %v16580_v52 = vcombine.high %v695_v15, %v699_v49 }
 0x2c9   :  { %4167 = vmatpush1.bf16.msra.mxu1 %v16531_v53  ;;  %4004 = vmatprep.subr.bf16.mxu0 %v16538_v55  ;;  %v702_v53 = vld [vmem:[#allocation8 + $0x550] sm:$0xff] }
 0x2ca   :  { %4168 = vmatprep.subr.bf16.mxu1 %v16540_v60  ;;  %v706_v55 = vld [vmem:[#allocation8 + $0x570] sm:$0xff]  ;;  %v703_v60 = vld [vmem:[#allocation8 + $0x558] sm:$0xff] }
 0x2cb   :  { %v16586_v0 = vcombine.high %v702_v53, %v706_v55  ;;  %v16585_v18 = vcombine.low %v702_v53, %v706_v55  ;;  %v747_v53 = vld [vmem:[#allocation8 + $0x6b8] sm:$0xff] }
 0x2cc   :  { %4005 = vmatpush1.bf16.msra.mxu0 %v16537_v8  ;;  %v16588_v8 = vcombine.high %v703_v60, %v707_v61 }
 0x2cd   :  { %4169 = vmatpush1.bf16.msra.mxu1 %v16539_v9  ;;  %4015 = vmatprep.subr.bf16.mxu0 %v16546_v11  ;;  %v710_v9 = vld [vmem:[#allocation8 + $0x590] sm:$0xff] }
 0x2ce   :  { %4179 = vmatprep.subr.bf16.mxu1 %v16548_v12  ;;  %v714_v11 = vld [vmem:[#allocation8 + $0x5b0] sm:$0xff]  ;;  %v711_v12 = vld [vmem:[#allocation8 + $0x598] sm:$0xff] }
 0x2cf   :  { %4007 = vmatmul.mubr.bf16.vlgmr.msra.gmra.mrb[12].mxu0 %v19546_v7  ;;  %v16594_v21 = vcombine.high %v710_v9, %v714_v11  ;;  %v16596_v24 = vcombine.high %v711_v12, %v715_v17 }
 0x2d0   :  { %4171 = vmatmul.mubr.bf16.vlgmr.msra.gmra.mrb[12].mxu1 %v19546_v7  ;;  %4016 = vmatpush1.bf16.msra.mxu0 %v16545_v19  ;;  %v16563_v7 = vcombine.low %v679_v30, %v683_v32  ;;  %v16587_v19 = vcombine.low %v703_v60, %v707_v61  ;;  %v16595_v30 = vcombine.low %v711_v12, %v715_v17 }
 0x2d1   :  { %4047 = vmatprep.mubr.bf16.mxu0 %v19552_v14  ;;  %4180 = vmatpush1.bf16.msra.mxu1 %v16547_v25  ;;  %v718_v25 = vld [vmem:[#allocation8 + $0x5d0] sm:$0xff] }
 0x2d2   :  { %4211 = vmatprep.mubr.bf16.mxu1 %v19552_v14  ;;  %4017 = vmatprep.subr.bf16.mxu0 %v16554_v26  ;;  %v16569_v14 = vcombine.low %v686_v36, %v690_v37  ;;  %v722_v26 = vld [vmem:[#allocation8 + $0x5f0] sm:$0xff]  ;;  %v731_v36 = vld [vmem:[#allocation8 + $0x638] sm:$0xff] }
 0x2d3   :  { %4181 = vmatprep.subr.bf16.mxu1 %v16556_v29  ;;  %v16593_v29 = vcombine.low %v710_v9, %v714_v11  ;;  %v16602_v32 = vcombine.high %v718_v25, %v722_v26  ;;  %v16601_v37 = vcombine.low %v718_v25, %v722_v26  ;;  %v755_v9 = vld [vmem:[#allocation8 + $0x6f8] sm:$0xff] }
 0x2d4   :  { %4018 = vmatpush1.bf16.msra.mxu0 %v16553_v33  ;;  %v16604_v33 = vcombine.high %v719_v27, %v723_v28  ;;  %v763_v25 = vld [vmem:[#allocation8 + $0x738] sm:$0xff] }
 0x2d5   :  { %4182 = vmatpush1.bf16.msra.mxu1 %v16555_v34  ;;  %4019 = vmatprep.subr.bf16.mxu0 %v16562_v35  ;;  %v726_v34 = vld [vmem:[#allocation8 + $0x610] sm:$0xff] }
 0x2d6   :  { %4183 = vmatprep.subr.bf16.mxu1 %v16564_v44  ;;  %v730_v35 = vld [vmem:[#allocation8 + $0x630] sm:$0xff]  ;;  %v727_v44 = vld [vmem:[#allocation8 + $0x618] sm:$0xff] }
 0x2d7   :  { %v16610_v39 = vcombine.high %v726_v34, %v730_v35  ;;  %v16609_v46 = vcombine.low %v726_v34, %v730_v35  ;;  %v16611_v15 = vcombine.low %v727_v44, %v731_v36  ;;  %v771_v34 = vld [vmem:[#allocation8 + $0x778] sm:$0xff] }
 0x2d8   :  { %4020 = vmatpush1.bf16.msra.mxu0 %v16561_v40  ;;  %v16612_v40 = vcombine.high %v727_v44, %v731_v36 }
 0x2d9   :  { %4184 = vmatpush1.bf16.msra.mxu1 %v16563_v7  ;;  %4021 = vmatprep.subr.bf16.mxu0 %v16570_v5  ;;  %v734_v7 = vld [vmem:[#allocation8 + $0x650] sm:$0xff] }
 0x2da   :  { %4185 = vmatprep.subr.bf16.mxu1 %v16572_v57  ;;  %v738_v5 = vld [vmem:[#allocation8 + $0x670] sm:$0xff]  ;;  %v735_v57 = vld [vmem:[#allocation8 + $0x658] sm:$0xff] }
 0x2db   :  { %v16618_v49 = vcombine.high %v734_v7, %v738_v5  ;;  %v16617_v55 = vcombine.low %v734_v7, %v738_v5  ;;  %v16619_v60 = vcombine.low %v735_v57, %v739_v42  ;;  %v779_v7 = vld [vmem:[#allocation8 + $0x7b8] sm:$0xff] }
 0x2dc   :  { %4022 = vmatpush1.bf16.msra.mxu0 %v16569_v14  ;;  %v16620_v14 = vcombine.high %v735_v57, %v739_v42 }
 0x2dd   :  { %4186 = vmatpush1.bf16.msra.mxu1 %v16571_v50  ;;  %4023 = vmatprep.subr.bf16.mxu0 %v16578_v51  ;;  %v742_v50 = vld [vmem:[#allocation8 + $0x690] sm:$0xff] }
 0x2de   :  { %4187 = vmatprep.subr.bf16.mxu1 %v16580_v52  ;;  %v746_v51 = vld [vmem:[#allocation8 + $0x6b0] sm:$0xff]  ;;  %v743_v52 = vld [vmem:[#allocation8 + $0x698] sm:$0xff] }
 0x2df   :  { %v16626_v61 = vcombine.high %v742_v50, %v746_v51  ;;  %v16625_v11 = vcombine.low %v742_v50, %v746_v51  ;;  %v16627_v12 = vcombine.low %v743_v52, %v747_v53  ;;  %v787_v50 = vld [vmem:[#allocation8 + $0x7f8] sm:$0xff] }
 0x2e0   :  { %4024 = vmatpush1.bf16.msra.mxu0 %v16577_v23  ;;  %v16628_v23 = vcombine.high %v743_v52, %v747_v53 }
 0x2e1   :  { %4188 = vmatpush1.bf16.msra.mxu1 %v16579_v63  ;;  %4025 = vmatprep.subr.bf16.mxu0 %v16586_v0  ;;  %v750_v63 = vld [vmem:[#allocation8 + $0x6d0] sm:$0xff] }
 0x2e2   :  { %4189 = vmatprep.subr.bf16.mxu1 %v16588_v8  ;;  %v754_v0 = vld [vmem:[#allocation8 + $0x6f0] sm:$0xff]  ;;  %v751_v8 = vld [vmem:[#allocation8 + $0x6d8] sm:$0xff] }
 0x2e3   :  { %v16634_v17 = vcombine.high %v750_v63, %v754_v0  ;;  %v16633_v26 = vcombine.low %v750_v63, %v754_v0  ;;  %v16635_v27 = vcombine.low %v751_v8, %v755_v9  ;;  %v795_v63 = vld [vmem:[#allocation8 + $0x838] sm:$0xff] }
 0x2e4   :  { %4026 = vmatpush1.bf16.msra.mxu0 %v16585_v18  ;;  %v16636_v18 = vcombine.high %v751_v8, %v755_v9 }
 0x2e5   :  { %4190 = vmatpush1.bf16.msra.mxu1 %v16587_v19  ;;  %4027 = vmatprep.subr.bf16.mxu0 %v16594_v21  ;;  %v758_v19 = vld [vmem:[#allocation8 + $0x710] sm:$0xff] }
 0x2e6   :  { %4191 = vmatprep.subr.bf16.mxu1 %v16596_v24  ;;  %v762_v21 = vld [vmem:[#allocation8 + $0x730] sm:$0xff]  ;;  %v759_v24 = vld [vmem:[#allocation8 + $0x718] sm:$0xff] }
 0x2e7   :  { %v16642_v28 = vcombine.high %v758_v19, %v762_v21  ;;  %v16641_v35 = vcombine.low %v758_v19, %v762_v21  ;;  %v16643_v44 = vcombine.low %v759_v24, %v763_v25  ;;  %v799_v19 = vld [vmem:[#allocation8 + $0x858] sm:$0xff] }
 0x2e8   :  { %4028 = vmatpush1.bf16.msra.mxu0 %v16593_v29  ;;  %v16644_v29 = vcombine.high %v759_v24, %v763_v25  ;;  %v803_v21 = vld [vmem:[#allocation8 + $0x878] sm:$0xff] }
 0x2e9   :  { %4192 = vmatpush1.bf16.msra.mxu1 %v16595_v30  ;;  %4029 = vmatprep.subr.bf16.mxu0 %v16602_v32  ;;  %v766_v30 = vld [vmem:[#allocation8 + $0x750] sm:$0xff] }
 0x2ea   :  { %4193 = vmatprep.subr.bf16.mxu1 %v16604_v33  ;;  %v770_v32 = vld [vmem:[#allocation8 + $0x770] sm:$0xff]  ;;  %v767_v33 = vld [vmem:[#allocation8 + $0x758] sm:$0xff] }
 0x2eb   :  { %v16650_v36 = vcombine.high %v766_v30, %v770_v32  ;;  %v16649_v5 = vcombine.low %v766_v30, %v770_v32  ;;  %v16651_v57 = vcombine.low %v767_v33, %v771_v34  ;;  %v811_v30 = vld [vmem:[#allocation8 + $0x8b8] sm:$0xff] }
 0x2ec   :  { %4030 = vmatpush1.bf16.msra.mxu0 %v16601_v37  ;;  %v16652_v37 = vcombine.high %v767_v33, %v771_v34  ;;  %v16683_v33 = vcombine.low %v799_v19, %v803_v21 }
 0x2ed   :  { %4194 = vmatpush1.bf16.msra.mxu1 %v16603_v38  ;;  %4031 = vmatprep.subr.bf16.mxu0 %v16610_v39  ;;  %v774_v38 = vld [vmem:[#allocation8 + $0x790] sm:$0xff] }
 0x2ee   :  { %4195 = vmatprep.subr.bf16.mxu1 %v16612_v40  ;;  %v778_v39 = vld [vmem:[#allocation8 + $0x7b0] sm:$0xff]  ;;  %v775_v40 = vld [vmem:[#allocation8 + $0x798] sm:$0xff] }
 0x2ef   :  { %v16658_v42 = vcombine.high %v774_v38, %v778_v39  ;;  %v16657_v51 = vcombine.low %v774_v38, %v778_v39  ;;  %v16659_v52 = vcombine.low %v775_v40, %v779_v7  ;;  %v819_v38 = vld [vmem:[#allocation8 + $0x8f8] sm:$0xff] }
 0x2f0   :  { %4032 = vmatpush1.bf16.msra.mxu0 %v16609_v46  ;;  %v16660_v46 = vcombine.high %v775_v40, %v779_v7 }
 0x2f1   :  { %4196 = vmatpush1.bf16.msra.mxu1 %v16611_v15  ;;  %4033 = vmatprep.subr.bf16.mxu0 %v16618_v49  ;;  %v782_v15 = vld [vmem:[#allocation8 + $0x7d0] sm:$0xff] }
 0x2f2   :  { %4197 = vmatprep.subr.bf16.mxu1 %v16620_v14  ;;  %v786_v49 = vld [vmem:[#allocation8 + $0x7f0] sm:$0xff]  ;;  %v783_v14 = vld [vmem:[#allocation8 + $0x7d8] sm:$0xff] }
 0x2f3   :  { %v16666_v53 = vcombine.high %v782_v15, %v786_v49  ;;  %v16665_v0 = vcombine.low %v782_v15, %v786_v49  ;;  %v16667_v8 = vcombine.low %v783_v14, %v787_v50 }
 0x2f4   :  { %4034 = vmatpush1.bf16.msra.mxu0 %v16617_v55  ;;  %v16668_v55 = vcombine.high %v783_v14, %v787_v50  ;;  %v830_v50 = vld [vmem:[#allocation8 + $0x950] sm:$0xff] }
 0x2f5   :  { %4198 = vmatpush1.bf16.msra.mxu1 %v16619_v60  ;;  %4035 = vmatprep.subr.bf16.mxu0 %v16626_v61  ;;  %v790_v60 = vld [vmem:[#allocation8 + $0x810] sm:$0xff] }
 0x2f6   :  { %4199 = vmatprep.subr.bf16.mxu1 %v16628_v23  ;;  %v794_v61 = vld [vmem:[#allocation8 + $0x830] sm:$0xff]  ;;  %v791_v23 = vld [vmem:[#allocation8 + $0x818] sm:$0xff] }
 0x2f7   :  { %v16674_v9 = vcombine.high %v790_v60, %v794_v61  ;;  %v16675_v24 = vcombine.low %v791_v23, %v795_v63 }
 0x2f8   :  { %4036 = vmatpush1.bf16.msra.mxu0 %v16625_v11  ;;  %v16676_v11 = vcombine.high %v791_v23, %v795_v63  ;;  %v838_v63 = vld [vmem:[#allocation8 + $0x990] sm:$0xff] }
 0x2f9   :  { %4200 = vmatpush1.bf16.msra.mxu1 %v16627_v12  ;;  %4037 = vmatprep.subr.bf16.mxu0 %v16634_v17  ;;  %v798_v12 = vld [vmem:[#allocation8 + $0x850] sm:$0xff] }
 0x2fa   :  { %4201 = vmatprep.subr.bf16.mxu1 %v16636_v18  ;;  %v802_v17 = vld [vmem:[#allocation8 + $0x870] sm:$0xff]  ;;  %v16673_v18 = vcombine.low %v790_v60, %v794_v61 }
 0x2fb   :  { %v16682_v25 = vcombine.high %v798_v12, %v802_v17  ;;  %v16681_v32 = vcombine.low %v798_v12, %v802_v17 }
 0x2fc   :  { %4038 = vmatpush1.bf16.msra.mxu0 %v16633_v26  ;;  %v806_v26 = vld [vmem:[#allocation8 + $0x890] sm:$0xff] }
 0x2fd   :  { %4202 = vmatpush1.bf16.msra.mxu1 %v16635_v27  ;;  %4039 = vmatprep.subr.bf16.mxu0 %v16642_v28  ;;  %v810_v27 = vld [vmem:[#allocation8 + $0x8b0] sm:$0xff]  ;;  %v16684_v28 = vcombine.high %v799_v19, %v803_v21 }
 0x2fe   :  { %4203 = vmatprep.subr.bf16.mxu1 %v16644_v29  ;;  %v807_v29 = vld [vmem:[#allocation8 + $0x898] sm:$0xff]  ;;  %v16690_v34 = vcombine.high %v806_v26, %v810_v27  ;;  %v16689_v39 = vcombine.low %v806_v26, %v810_v27  ;;  %v846_v19 = vld [vmem:[#allocation8 + $0x9d0] sm:$0xff] }
 0x2ff   :  { %v850_v21 = vld [vmem:[#allocation8 + $0x9f0] sm:$0xff] }
 0x300   :  { %4040 = vmatpush1.bf16.msra.mxu0 %v16641_v35  ;;  %v16692_v35 = vcombine.high %v807_v29, %v811_v30 }
 0x301   :  { %4204 = vmatpush1.bf16.msra.mxu1 %v16643_v44  ;;  %4041 = vmatprep.subr.bf16.mxu0 %v16650_v36  ;;  %v814_v44 = vld [vmem:[#allocation8 + $0x8d0] sm:$0xff] }
 0x302   :  { %4205 = vmatprep.subr.bf16.mxu1 %v16652_v37  ;;  %v818_v36 = vld [vmem:[#allocation8 + $0x8f0] sm:$0xff]  ;;  %v815_v37 = vld [vmem:[#allocation8 + $0x8d8] sm:$0xff] }
 0x303   :  { %v16698_v40 = vcombine.high %v814_v44, %v818_v36  ;;  %v16700_v7 = vcombine.high %v815_v37, %v819_v38  ;;  %v16699_v15 = vcombine.low %v815_v37, %v819_v38  ;;  %v862_v38 = vld [vmem:[#allocation8 + $0xa50] sm:$0xff] }
 0x304   :  { %4042 = vmatpush1.bf16.msra.mxu0 %v16649_v5  ;;  %v822_v5 = vld [vmem:[#allocation8 + $0x910] sm:$0xff] }
 0x305   :  { %4206 = vmatpush1.bf16.msra.mxu1 %v16651_v57  ;;  %4043 = vmatprep.subr.bf16.mxu0 %v16658_v42  ;;  %v826_v57 = vld [vmem:[#allocation8 + $0x930] sm:$0xff]  ;;  %v823_v42 = vld [vmem:[#allocation8 + $0x918] sm:$0xff] }
 0x306   :  { %4207 = vmatprep.subr.bf16.mxu1 %v16660_v46  ;;  %v827_v46 = vld [vmem:[#allocation8 + $0x938] sm:$0xff]  ;;  %v16706_v49 = vcombine.high %v822_v5, %v826_v57 }
 0x307   :  { %v16708_v14 = vcombine.high %v823_v42, %v827_v46  ;;  %v16707_v60 = vcombine.low %v823_v42, %v827_v46  ;;  %v870_v46 = vld [vmem:[#allocation8 + $0xa90] sm:$0xff] }
 0x308   :  { %4044 = vmatpush1.bf16.msra.mxu0 %v16657_v51  ;;  %v834_v51 = vld [vmem:[#allocation8 + $0x970] sm:$0xff] }
 0x309   :  { %4208 = vmatpush1.bf16.msra.mxu1 %v16659_v52  ;;  %4045 = vmatprep.subr.bf16.mxu0 %v16666_v53  ;;  %v831_v52 = vld [vmem:[#allocation8 + $0x958] sm:$0xff]  ;;  %v16714_v61 = vcombine.high %v830_v50, %v834_v51 }
 0x30a   :  { %4209 = vmatprep.subr.bf16.mxu1 %v16668_v55  ;;  %v835_v53 = vld [vmem:[#allocation8 + $0x978] sm:$0xff]  ;;  %v16705_v55 = vcombine.low %v822_v5, %v826_v57 }
 0x30b   :  { %v16716_v23 = vcombine.high %v831_v52, %v835_v53  ;;  %v16715_v12 = vcombine.low %v831_v52, %v835_v53  ;;  %v878_v53 = vld [vmem:[#allocation8 + $0xad0] sm:$0xff] }
 0x30c   :  { %4046 = vmatpush1.bf16.msra.mxu0 %v16665_v0  ;;  %v842_v0 = vld [vmem:[#allocation8 + $0x9b0] sm:$0xff] }
 0x30d   :  { %4210 = vmatpush1.bf16.msra.mxu1 %v16667_v8  ;;  %4056 = vmatprep.subr.bf16.mxu0 %v16674_v9  ;;  %v839_v8 = vld [vmem:[#allocation8 + $0x998] sm:$0xff]  ;;  %v16722_v17 = vcombine.high %v838_v63, %v842_v0  ;;  %v16721_v26 = vcombine.low %v838_v63, %v842_v0 }
 0x30e   :  { %4220 = vmatprep.subr.bf16.mxu1 %v16676_v11  ;;  %v843_v9 = vld [vmem:[#allocation8 + $0x9b8] sm:$0xff]  ;;  %v16713_v11 = vcombine.low %v830_v50, %v834_v51 }
 0x30f   :  { %4048 = vmatmul.mubr.bf16.vlgmr.msra.gmra.mrb[12].mxu0 %v19584_v16  ;;  %v16723_v27 = vcombine.low %v839_v8, %v843_v9 }
 0x310   :  { %4212 = vmatmul.mubr.bf16.vlgmr.msra.gmra.mrb[12].mxu1 %v19584_v16  ;;  %4057 = vmatpush1.bf16.msra.mxu0 %v16673_v18  ;;  %v16691_v16 = vcombine.low %v807_v29, %v811_v30  ;;  %v16724_v18 = vcombine.high %v839_v8, %v843_v9  ;;  %v854_v30 = vld [vmem:[#allocation8 + $0xa10] sm:$0xff] }
 0x311   :  { %4088 = vmatprep.mubr.bf16.mxu0 %v19588_v3  ;;  %4221 = vmatpush1.bf16.msra.mxu1 %v16675_v24  ;;  %v847_v24 = vld [vmem:[#allocation8 + $0x9d8] sm:$0xff]  ;;  %v886_v9 = vld [vmem:[#allocation8 + $0xb10] sm:$0xff] }
 0x312   :  { %4252 = vmatprep.mubr.bf16.mxu1 %v19588_v3  ;;  %4058 = vmatprep.subr.bf16.mxu0 %v16682_v25  ;;  %v16697_v3 = vcombine.low %v814_v44, %v818_v36  ;;  %v851_v25 = vld [vmem:[#allocation8 + $0x9f8] sm:$0xff] }
 0x313   :  { %4222 = vmatprep.subr.bf16.mxu1 %v16684_v28  ;;  %v16730_v28 = vcombine.high %v846_v19, %v850_v21  ;;  %v16732_v29 = vcombine.high %v847_v24, %v851_v25  ;;  %v16731_v44 = vcombine.low %v847_v24, %v851_v25  ;;  %v894_v25 = vld [vmem:[#allocation8 + $0xb50] sm:$0xff] }
 0x314   :  { %4059 = vmatpush1.bf16.msra.mxu0 %v16681_v32  ;;  %v858_v32 = vld [vmem:[#allocation8 + $0xa30] sm:$0xff] }
 0x315   :  { %4223 = vmatpush1.bf16.msra.mxu1 %v16683_v33  ;;  %4060 = vmatprep.subr.bf16.mxu0 %v16690_v34  ;;  %v855_v33 = vld [vmem:[#allocation8 + $0xa18] sm:$0xff]  ;;  %v16738_v36 = vcombine.high %v854_v30, %v858_v32 }
 0x316   :  { %4224 = vmatprep.subr.bf16.mxu1 %v16692_v35  ;;  %v859_v34 = vld [vmem:[#allocation8 + $0xa38] sm:$0xff]  ;;  %v16729_v35 = vcombine.low %v846_v19, %v850_v21 }
 0x317   :  { %v16740_v37 = vcombine.high %v855_v33, %v859_v34  ;;  %v16739_v5 = vcombine.low %v855_v33, %v859_v34  ;;  %v902_v34 = vld [vmem:[#allocation8 + $0xb90] sm:$0xff] }
 0x318   :  { %4061 = vmatpush1.bf16.msra.mxu0 %v16689_v39  ;;  %v866_v39 = vld [vmem:[#allocation8 + $0xa70] sm:$0xff] }
 0x319   :  { %4225 = vmatpush1.bf16.msra.mxu1 %v16691_v16  ;;  %4062 = vmatprep.subr.bf16.mxu0 %v16698_v40  ;;  %v863_v16 = vld [vmem:[#allocation8 + $0xa58] sm:$0xff]  ;;  %v16746_v57 = vcombine.high %v862_v38, %v866_v39 }
 0x31a   :  { %4226 = vmatprep.subr.bf16.mxu1 %v16700_v7  ;;  %v867_v40 = vld [vmem:[#allocation8 + $0xa78] sm:$0xff]  ;;  %v16737_v7 = vcombine.low %v854_v30, %v858_v32 }
 0x31b   :  { %v16748_v42 = vcombine.high %v863_v16, %v867_v40  ;;  %v16747_v50 = vcombine.low %v863_v16, %v867_v40  ;;  %v910_v40 = vld [vmem:[#allocation8 + $0xbd0] sm:$0xff] }
 0x31c   :  { %4063 = vmatpush1.bf16.msra.mxu0 %v16697_v3  ;;  %v874_v3 = vld [vmem:[#allocation8 + $0xab0] sm:$0xff] }
 0x31d   :  { %4227 = vmatpush1.bf16.msra.mxu1 %v16699_v15  ;;  %4064 = vmatprep.subr.bf16.mxu0 %v16706_v49  ;;  %v871_v15 = vld [vmem:[#allocation8 + $0xa98] sm:$0xff]  ;;  %v16754_v51 = vcombine.high %v870_v46, %v874_v3 }
 0x31e   :  { %4228 = vmatprep.subr.bf16.mxu1 %v16708_v14  ;;  %v875_v49 = vld [vmem:[#allocation8 + $0xab8] sm:$0xff]  ;;  %v16745_v14 = vcombine.low %v862_v38, %v866_v39 }
 0x31f   :  { %v16756_v52 = vcombine.high %v871_v15, %v875_v49  ;;  %v16755_v63 = vcombine.low %v871_v15, %v875_v49  ;;  %v918_v49 = vld [vmem:[#allocation8 + $0xc10] sm:$0xff] }
 0x320   :  { %4065 = vmatpush1.bf16.msra.mxu0 %v16705_v55  ;;  %v882_v55 = vld [vmem:[#allocation8 + $0xaf0] sm:$0xff] }
 0x321   :  { %4229 = vmatpush1.bf16.msra.mxu1 %v16707_v60  ;;  %4066 = vmatprep.subr.bf16.mxu0 %v16714_v61  ;;  %v879_v60 = vld [vmem:[#allocation8 + $0xad8] sm:$0xff]  ;;  %v16762_v0 = vcombine.high %v878_v53, %v882_v55 }
 0x322   :  { %4230 = vmatprep.subr.bf16.mxu1 %v16716_v23  ;;  %v883_v61 = vld [vmem:[#allocation8 + $0xaf8] sm:$0xff]  ;;  %v16753_v23 = vcombine.low %v870_v46, %v874_v3 }
 0x323   :  { %v16764_v8 = vcombine.high %v879_v60, %v883_v61  ;;  %v16763_v19 = vcombine.low %v879_v60, %v883_v61  ;;  %v926_v61 = vld [vmem:[#allocation8 + $0xc50] sm:$0xff] }
 0x324   :  { %4067 = vmatpush1.bf16.msra.mxu0 %v16713_v11  ;;  %v890_v11 = vld [vmem:[#allocation8 + $0xb30] sm:$0xff] }
 0x325   :  { %4231 = vmatpush1.bf16.msra.mxu1 %v16715_v12  ;;  %4068 = vmatprep.subr.bf16.mxu0 %v16722_v17  ;;  %v887_v12 = vld [vmem:[#allocation8 + $0xb18] sm:$0xff]  ;;  %v16770_v21 = vcombine.high %v886_v9, %v890_v11 }
 0x326   :  { %4232 = vmatprep.subr.bf16.mxu1 %v16724_v18  ;;  %v891_v17 = vld [vmem:[#allocation8 + $0xb38] sm:$0xff]  ;;  %v16761_v18 = vcombine.low %v878_v53, %v882_v55 }
 0x327   :  { %v16772_v24 = vcombine.high %v887_v12, %v891_v17  ;;  %v16771_v30 = vcombine.low %v887_v12, %v891_v17  ;;  %v934_v12 = vld [vmem:[#allocation8 + $0xc90] sm:$0xff] }
 0x328   :  { %4069 = vmatpush1.bf16.msra.mxu0 %v16721_v26  ;;  %v898_v26 = vld [vmem:[#allocation8 + $0xb70] sm:$0xff] }
 0x329   :  { %4233 = vmatpush1.bf16.msra.mxu1 %v16723_v27  ;;  %4070 = vmatprep.subr.bf16.mxu0 %v16730_v28  ;;  %v895_v27 = vld [vmem:[#allocation8 + $0xb58] sm:$0xff]  ;;  %v16778_v32 = vcombine.high %v894_v25, %v898_v26  ;;  %v938_v17 = vld [vmem:[#allocation8 + $0xcb0] sm:$0xff] }
 0x32a   :  { %4234 = vmatprep.subr.bf16.mxu1 %v16732_v29  ;;  %v899_v28 = vld [vmem:[#allocation8 + $0xb78] sm:$0xff]  ;;  %v16769_v29 = vcombine.low %v886_v9, %v890_v11 }
 0x32b   :  { %v16780_v33 = vcombine.high %v895_v27, %v899_v28  ;;  %v16779_v38 = vcombine.low %v895_v27, %v899_v28  ;;  %v942_v28 = vld [vmem:[#allocation8 + $0xcd0] sm:$0xff] }
 0x32c   :  { %4071 = vmatpush1.bf16.msra.mxu0 %v16729_v35  ;;  %v906_v35 = vld [vmem:[#allocation8 + $0xbb0] sm:$0xff] }
 0x32d   :  { %4235 = vmatpush1.bf16.msra.mxu1 %v16731_v44  ;;  %4072 = vmatprep.subr.bf16.mxu0 %v16738_v36  ;;  %v903_v44 = vld [vmem:[#allocation8 + $0xb98] sm:$0xff]  ;;  %v16786_v39 = vcombine.high %v902_v34, %v906_v35 }
 0x32e   :  { %4236 = vmatprep.subr.bf16.mxu1 %v16740_v37  ;;  %v907_v36 = vld [vmem:[#allocation8 + $0xbb8] sm:$0xff]  ;;  %v16777_v37 = vcombine.low %v894_v25, %v898_v26  ;;  %v16818_v26 = vcombine.high %v934_v12, %v938_v17 }
 0x32f   :  { %v16788_v16 = vcombine.high %v903_v44, %v907_v36  ;;  %v16787_v46 = vcombine.low %v903_v44, %v907_v36  ;;  %v950_v44 = vld [vmem:[#allocation8 + $0xd10] sm:$0xff] }
 0x330   :  { %4073 = vmatpush1.bf16.msra.mxu0 %v16737_v7  ;;  %v914_v7 = vld [vmem:[#allocation8 + $0xbf0] sm:$0xff] }
 0x331   :  { %4237 = vmatpush1.bf16.msra.mxu1 %v16739_v5  ;;  %4074 = vmatprep.subr.bf16.mxu0 %v16746_v57  ;;  %v911_v5 = vld [vmem:[#allocation8 + $0xbd8] sm:$0xff]  ;;  %v16794_v3 = vcombine.high %v910_v40, %v914_v7  ;;  %v954_v36 = vld [vmem:[#allocation8 + $0xd30] sm:$0xff] }
 0x332   :  { %4238 = vmatprep.subr.bf16.mxu1 %v16748_v42  ;;  %v915_v57 = vld [vmem:[#allocation8 + $0xbf8] sm:$0xff]  ;;  %v16785_v42 = vcombine.low %v902_v34, %v906_v35 }
 0x333   :  { %v16796_v15 = vcombine.high %v911_v5, %v915_v57  ;;  %v16795_v53 = vcombine.low %v911_v5, %v915_v57  ;;  %v962_v5 = vld [vmem:[#allocation8 + $0xd70] sm:$0xff]  ;;  %v959_v57 = vld [vmem:[#allocation8 + $0xd58] sm:$0xff] }
 0x334   :  { %4075 = vmatpush1.bf16.msra.mxu0 %v16745_v14  ;;  %v922_v14 = vld [vmem:[#allocation8 + $0xc30] sm:$0xff] }
 0x335   :  { %4239 = vmatpush1.bf16.msra.mxu1 %v16747_v50  ;;  %4076 = vmatprep.subr.bf16.mxu0 %v16754_v51  ;;  %v919_v50 = vld [vmem:[#allocation8 + $0xc18] sm:$0xff]  ;;  %v16802_v55 = vcombine.high %v918_v49, %v922_v14 }
 0x336   :  { %4240 = vmatprep.subr.bf16.mxu1 %v16756_v52  ;;  %v923_v51 = vld [vmem:[#allocation8 + $0xc38] sm:$0xff]  ;;  %v16793_v52 = vcombine.low %v910_v40, %v914_v7  ;;  %v958_v7 = vld [vmem:[#allocation8 + $0xd50] sm:$0xff] }
 0x337   :  { %v16804_v60 = vcombine.high %v919_v50, %v923_v51  ;;  %v16803_v9 = vcombine.low %v919_v50, %v923_v51  ;;  %v970_v50 = vld [vmem:[#allocation8 + $0xdb0] sm:$0xff]  ;;  %v967_v51 = vld [vmem:[#allocation8 + $0xd98] sm:$0xff] }
 0x338   :  { %4077 = vmatpush1.bf16.msra.mxu0 %v16753_v23  ;;  %v930_v23 = vld [vmem:[#allocation8 + $0xc70] sm:$0xff] }
 0x339   :  { %4241 = vmatpush1.bf16.msra.mxu1 %v16755_v63  ;;  %4078 = vmatprep.subr.bf16.mxu0 %v16762_v0  ;;  %v16801_v63 = vcombine.low %v918_v49, %v922_v14  ;;  %v927_v0 = vld [vmem:[#allocation8 + $0xc58] sm:$0xff]  ;;  %v16810_v11 = vcombine.high %v926_v61, %v930_v23  ;;  %v966_v14 = vld [vmem:[#allocation8 + $0xd90] sm:$0xff] }
 0x33a   :  { %4242 = vmatprep.subr.bf16.mxu1 %v16764_v8  ;;  %v931_v8 = vld [vmem:[#allocation8 + $0xc78] sm:$0xff] }
 0x33b   :  { %v16811_v25 = vcombine.low %v927_v0, %v931_v8 }
 0x33c   :  { %4079 = vmatpush1.bf16.msra.mxu0 %v16761_v18  ;;  %v16812_v18 = vcombine.high %v927_v0, %v931_v8  ;;  %v974_v0 = vld [vmem:[#allocation8 + $0xdd0] sm:$0xff] }
 0x33d   :  { %4243 = vmatpush1.bf16.msra.mxu1 %v16763_v19  ;;  %4080 = vmatprep.subr.bf16.mxu0 %v16770_v21  ;;  %v935_v19 = vld [vmem:[#allocation8 + $0xc98] sm:$0xff]  ;;  %v978_v8 = vld [vmem:[#allocation8 + $0xdf0] sm:$0xff] }
 0x33e   :  { %4244 = vmatprep.subr.bf16.mxu1 %v16772_v24  ;;  %v939_v21 = vld [vmem:[#allocation8 + $0xcb8] sm:$0xff]  ;;  %v16809_v24 = vcombine.low %v926_v61, %v930_v23 }
 0x33f   :  { %v16820_v27 = vcombine.high %v935_v19, %v939_v21 }
 0x340   :  { %4081 = vmatpush1.bf16.msra.mxu0 %v16769_v29  ;;  %v946_v29 = vld [vmem:[#allocation8 + $0xcf0] sm:$0xff] }
 0x341   :  { %4245 = vmatpush1.bf16.msra.mxu1 %v16771_v30  ;;  %4082 = vmatprep.subr.bf16.mxu0 %v16778_v32  ;;  %v943_v30 = vld [vmem:[#allocation8 + $0xcd8] sm:$0xff]  ;;  %v16826_v34 = vcombine.high %v942_v28, %v946_v29 }
 0x342   :  { %4246 = vmatprep.subr.bf16.mxu1 %v16780_v33  ;;  %v947_v32 = vld [vmem:[#allocation8 + $0xcf8] sm:$0xff]  ;;  %v16817_v33 = vcombine.low %v934_v12, %v938_v17 }
 0x343   :  { %v16828_v35 = vcombine.high %v943_v30, %v947_v32  ;;  %v975_v12 = vld [vmem:[#allocation8 + $0xdd8] sm:$0xff] }
 0x344   :  { %4083 = vmatpush1.bf16.msra.mxu0 %v16777_v37  ;;  %v951_v37 = vld [vmem:[#allocation8 + $0xd18] sm:$0xff] }
 0x345   :  { %4247 = vmatpush1.bf16.msra.mxu1 %v16779_v38  ;;  %4084 = vmatprep.subr.bf16.mxu0 %v16786_v39  ;;  %v955_v38 = vld [vmem:[#allocation8 + $0xd38] sm:$0xff]  ;;  %v16827_v39 = vcombine.low %v943_v30, %v947_v32  ;;  %v986_v30 = vld [vmem:[#allocation8 + $0xe30] sm:$0xff] }
 0x346   :  { %4248 = vmatprep.subr.bf16.mxu1 %v16788_v16  ;;  %v16834_v16 = vcombine.high %v950_v44, %v954_v36  ;;  %v16836_v40 = vcombine.high %v951_v37, %v955_v38  ;;  %v979_v17 = vld [vmem:[#allocation8 + $0xdf8] sm:$0xff] }
 0x347   :  { %v983_v32 = vld [vmem:[#allocation8 + $0xe18] sm:$0xff] }
 0x348   :  { %4085 = vmatpush1.bf16.msra.mxu0 %v16785_v42  ;;  %v963_v42 = vld [vmem:[#allocation8 + $0xd78] sm:$0xff] }
 0x349   :  { %4249 = vmatpush1.bf16.msra.mxu1 %v16787_v46  ;;  %4086 = vmatprep.subr.bf16.mxu0 %v16794_v3  ;;  %v16833_v46 = vcombine.low %v950_v44, %v954_v36  ;;  %v16835_v3 = vcombine.low %v951_v37, %v955_v38  ;;  %v16844_v49 = vcombine.high %v959_v57, %v963_v42  ;;  %v990_v36 = vld [vmem:[#allocation8 + $0xe50] sm:$0xff]  ;;  %v991_v38 = vld [vmem:[#allocation8 + $0xe58] sm:$0xff] }
 0x34a   :  { %4250 = vmatprep.subr.bf16.mxu1 %v16796_v15  ;;  %v16842_v15 = vcombine.high %v958_v7, %v962_v5  ;;  %v994_v37 = vld [vmem:[#allocation8 + $0xe70] sm:$0xff] }
 0x34c   :  { %4087 = vmatpush1.bf16.msra.mxu0 %v16793_v52  ;;  %v971_v52 = vld [vmem:[#allocation8 + $0xdb8] sm:$0xff] }
 0x34d   :  { %4251 = vmatpush1.bf16.msra.mxu1 %v16795_v53  ;;  %4097 = vmatprep.subr.bf16.mxu0 %v16802_v55  ;;  %v16841_v53 = vcombine.low %v958_v7, %v962_v5  ;;  %v16843_v55 = vcombine.low %v959_v57, %v963_v42  ;;  %v998_v5 = vld [vmem:[#allocation8 + $0xe90] sm:$0xff]  ;;  %v999_v42 = vld [vmem:[#allocation8 + $0xe98] sm:$0xff] }
 0x34e   :  { %4261 = vmatprep.subr.bf16.mxu1 %v16804_v60  ;;  %v16850_v60 = vcombine.high %v966_v14, %v970_v50  ;;  %v1002_v57 = vld [vmem:[#allocation8 + $0xeb0] sm:$0xff] }
 0x34f   :  { %4089 = vmatmul.mubr.bf16.vlgmr.msra.gmra.mrb[12].mxu0 %v19612_v59 }
 0x350   :  { %4253 = vmatmul.mubr.bf16.vlgmr.msra.gmra.mrb[12].mxu1 %v19612_v59  ;;  %4098 = vmatpush1.bf16.msra.mxu0 %v16801_v63  ;;  %v16819_v59 = vcombine.low %v935_v19, %v939_v21  ;;  %v16852_v63 = vcombine.high %v967_v51, %v971_v52  ;;  %v16849_v21 = vcombine.low %v966_v14, %v970_v50  ;;  %v1006_v50 = vld [vmem:[#allocation8 + $0xed0] sm:$0xff] }
 0x351   :  { %4129 = vmatprep.mubr.bf16.mxu0 %v19616_v10  ;;  %4262 = vmatpush1.bf16.msra.mxu1 %v16803_v9 }
 0x352   :  { %4293 = vmatprep.mubr.bf16.mxu1 %v19616_v10  ;;  %4099 = vmatprep.subr.bf16.mxu0 %v16810_v11  ;;  %v16825_v10 = vcombine.low %v942_v28, %v946_v29  ;;  %v16860_v28 = vcombine.high %v975_v12, %v979_v17  ;;  %v982_v29 = vld [vmem:[#allocation8 + $0xe10] sm:$0xff] }
 0x353   :  { %4263 = vmatprep.subr.bf16.mxu1 %v16812_v18 }
 0x354   :  { %4100 = vmatpush1.bf16.msra.mxu0 %v16809_v24 }
 0x355   :  { %4264 = vmatpush1.bf16.msra.mxu1 %v16811_v25  ;;  %4101 = vmatprep.subr.bf16.mxu0 %v16818_v26  ;;  %v16851_v26 = vcombine.low %v967_v51, %v971_v52  ;;  %v1010_v51 = vld [vmem:[#allocation8 + $0xef0] sm:$0xff]  ;;  %v1007_v52 = vld [vmem:[#allocation8 + $0xed8] sm:$0xff] }
 0x356   :  { %4265 = vmatprep.subr.bf16.mxu1 %v16820_v27  ;;  %v16858_v27 = vcombine.high %v974_v0, %v978_v8 }
 0x358   :  { %4102 = vmatpush1.bf16.msra.mxu0 %v16817_v33  ;;  %v987_v33 = vld [vmem:[#allocation8 + $0xe38] sm:$0xff] }
 0x359   :  { %4266 = vmatpush1.bf16.msra.mxu1 %v16819_v59  ;;  %4103 = vmatprep.subr.bf16.mxu0 %v16826_v34  ;;  %v16857_v59 = vcombine.low %v974_v0, %v978_v8  ;;  %v16859_v34 = vcombine.low %v975_v12, %v979_v17  ;;  %v16868_v44 = vcombine.high %v983_v32, %v987_v33  ;;  %v1014_v8 = vld [vmem:[#allocation8 + $0xf10] sm:$0xff]  ;;  %v1015_v17 = vld [vmem:[#allocation8 + $0xf18] sm:$0xff] }
 0x35a   :  { %4267 = vmatprep.subr.bf16.mxu1 %v16828_v35  ;;  %v16866_v35 = vcombine.high %v982_v29, %v986_v30  ;;  %v1018_v12 = vld [vmem:[#allocation8 + $0xf30] sm:$0xff] }
 0x35c   :  { %4104 = vmatpush1.bf16.msra.mxu0 %v16825_v10  ;;  %v995_v10 = vld [vmem:[#allocation8 + $0xe78] sm:$0xff] }
 0x35d   :  { %4268 = vmatpush1.bf16.msra.mxu1 %v16827_v39  ;;  %4105 = vmatprep.subr.bf16.mxu0 %v16834_v16  ;;  %v16865_v39 = vcombine.low %v982_v29, %v986_v30  ;;  %v16867_v16 = vcombine.low %v983_v32, %v987_v33  ;;  %v16876_v7 = vcombine.high %v991_v38, %v995_v10  ;;  %v1027_v29 = vld [vmem:[#allocation8 + $0xf78] sm:$0xff] }
 0x35e   :  { %4269 = vmatprep.subr.bf16.mxu1 %v16836_v40  ;;  %v16874_v40 = vcombine.high %v990_v36, %v994_v37  ;;  %v16897_v30 = vcombine.low %v1014_v8, %v1018_v12 }
 0x360   :  { %4106 = vmatpush1.bf16.msra.mxu0 %v16833_v46  ;;  %v1003_v46 = vld [vmem:[#allocation8 + $0xeb8] sm:$0xff] }
 0x361   :  { %4270 = vmatpush1.bf16.msra.mxu1 %v16835_v3  ;;  %4107 = vmatprep.subr.bf16.mxu0 %v16842_v15  ;;  %v16873_v3 = vcombine.low %v990_v36, %v994_v37  ;;  %v16875_v15 = vcombine.low %v991_v38, %v995_v10  ;;  %v16884_v14 = vcombine.high %v999_v42, %v1003_v46  ;;  %v1035_v36 = vld [vmem:[#allocation8 + $0xfb8] sm:$0xff]  ;;  %v19657_v37 = vld [vmem:[#allocation10] sm:$0xff] }
 0x362   :  { %v19649_v61 = vpop.f32.mrb[8].mxu0  ;;  %v19651_v23 = vpop.f32.mrb[8].mxu1  ;;  %4271 = vmatprep.subr.bf16.mxu1 %v16844_v49  ;;  %v16882_v49 = vcombine.high %v998_v5, %v1002_v57 }
 0x363   :  { %v19653_v9 = vpop.f32.mrb[9].mxu0  ;;  %v19655_v11 = vpop.f32.mrb[9].mxu1 }
 0x364   :  { %v3807_v18 = vpop.f32.mrb[10].mxu0  ;;  %v3971_v19 = vpop.f32.mrb[10].mxu1  ;;  %4108 = vmatpush1.bf16.msra.mxu0 %v16841_v53  ;;  %v1011_v53 = vld [vmem:[#allocation8 + $0xef8] sm:$0xff] }
 0x365   :  { %4272 = vmatpush1.bf16.msra.mxu1 %v16843_v55  ;;  %v3808_v24 = vpop.f32.mrb[11].mxu0  ;;  %v3972_v25 = vpop.f32.mrb[11].mxu1  ;;  %4109 = vmatprep.subr.bf16.mxu0 %v16850_v60  ;;  %v16881_v55 = vcombine.low %v998_v5, %v1002_v57  ;;  %v16883_v60 = vcombine.low %v999_v42, %v1003_v46  ;;  %v16892_v0 = vcombine.high %v1007_v52, %v1011_v53  ;;  %v1019_v18 = vld [vmem:[#allocation8 + $0xf38] sm:$0xff] }
 0x366   :  { %4273 = vmatprep.subr.bf16.mxu1 %v16852_v63  ;;  %v16890_v63 = vcombine.high %v1006_v50, %v1010_v51  ;;  %v16889_v19 = vcombine.low %v1006_v50, %v1010_v51  ;;  %v16898_v24 = vcombine.high %v1014_v8, %v1018_v12  ;;  %v16900_v25 = vcombine.high %v1015_v17, %v1019_v18  ;;  %v1039_v57 = vld [vmem:[#allocation8 + $0xfd8] sm:$0xff]  ;;  %v4322_v50 = vld [vmem:[#allocation11 + $0x20] sm:$0xff] }
 0x367   :  { %v16899_v32 = vcombine.low %v1015_v17, %v1019_v18  ;;  %v1053_v5 = vrot.slane %v19657_v37, %v19521_v47  ;;  %v1043_v42 = vld [vmem:[#allocation8 + $0xff8] sm:$0xff]  ;;  %v4326_v12 = vld [vmem:[#allocation11 + $0x40] sm:$0xff] }
 0x368   :  { %4110 = vmatpush1.bf16.msra.mxu0 %v16849_v21  ;;  %v16891_v21 = vcombine.low %v1007_v52, %v1011_v53  ;;  %v4319_v52 = vld [vmem:[#allocation11 + $0x8] sm:$0xff]  ;;  %v4330_v17 = vld [vmem:[#allocation11 + $0x60] sm:$0xff] }
 0x369   :  { %4274 = vmatpush1.bf16.msra.mxu1 %v16851_v26  ;;  %4111 = vmatprep.subr.bf16.mxu0 %v16858_v27  ;;  %v1022_v26 = vld [vmem:[#allocation8 + $0xf50] sm:$0xff]  ;;  %v18615_v51 = vadd.f32 %v19653_v9, %v1053_v5 }
 0x36a   :  { %4275 = vmatprep.subr.bf16.mxu1 %v16860_v28  ;;  %v1026_v27 = vld [vmem:[#allocation8 + $0xf70] sm:$0xff]  ;;  %v1023_v28 = vld [vmem:[#allocation8 + $0xf58] sm:$0xff] }
 0x36b   :  { %v16906_v33 = vcombine.high %v1022_v26, %v1026_v27  ;;  %v16905_v38 = vcombine.low %v1022_v26, %v1026_v27  ;;  %v16907_v10 = vcombine.low %v1023_v28, %v1027_v29  ;;  %v4323_v53 = vld [vmem:[#allocation11 + $0x28] sm:$0xff]  ;;  %v4303_v8 = vmax.f32 %v18615_v51, 0.0  ;;  %v4338_v26 = vld [vmem:[#allocation11 + $0xa0] sm:$0xff] }
 0x36c   :  { %4112 = vmatpush1.bf16.msra.mxu0 %v16857_v59  ;;  %v16908_v59 = vcombine.high %v1023_v28, %v1027_v29  ;;  %v16927_v9 = vcombine.low %v4319_v52, %v4323_v53  ;;  %v4335_v29 = vld [vmem:[#allocation11 + $0x88] sm:$0xff] }
 0x36d   :  { %4276 = vmatpush1.bf16.msra.mxu1 %v16859_v34  ;;  %4113 = vmatprep.subr.bf16.mxu0 %v16866_v35  ;;  %v1030_v34 = vld [vmem:[#allocation8 + $0xf90] sm:$0xff]  ;;  %v19662_v27 = vpack.c.bf16 %v4303_v8, %v4303_v8 }
 0x36e   :  { %4277 = vmatprep.subr.bf16.mxu1 %v16868_v44  ;;  %v1034_v35 = vld [vmem:[#allocation8 + $0xfb0] sm:$0xff]  ;;  %v1031_v44 = vld [vmem:[#allocation8 + $0xf98] sm:$0xff] }
 0x36f   :  { %v16913_v46 = vcombine.low %v1030_v34, %v1034_v35  ;;  %v4351_v5 = vld [vmem:[#allocation11 + $0x108] sm:$0xff] }
 0x370   :  { %4114 = vmatpush1.bf16.msra.mxu0 %v16865_v39  ;;  %v16914_v39 = vcombine.high %v1030_v34, %v1034_v35  ;;  %v4342_v35 = vld [vmem:[#allocation11 + $0xc0] sm:$0xff]  ;;  %v4363_v51 = vld [vmem:[#allocation11 + $0x168] sm:$0xff] }
 0x371   :  { %4278 = vmatpush1.bf16.msra.mxu1 %v16867_v16  ;;  %4115 = vmatprep.subr.bf16.mxu0 %v16874_v40  ;;  %v16916_v16 = vcombine.high %v1031_v44, %v1035_v36  ;;  %v1038_v40 = vld [vmem:[#allocation8 + $0xfd0] sm:$0xff] }
 0x372   :  { %4279 = vmatprep.subr.bf16.mxu1 %v16876_v7  ;;  %v1042_v7 = vld [vmem:[#allocation8 + $0xff0] sm:$0xff] }
 0x373   :  { %v4367_v8 = vld [vmem:[#allocation11 + $0x188] sm:$0xff] }
 0x374   :  { %4116 = vmatpush1.bf16.msra.mxu0 %v16873_v3  ;;  %v16915_v3 = vcombine.low %v1031_v44, %v1035_v36  ;;  %v4346_v44 = vld [vmem:[#allocation11 + $0xe0] sm:$0xff]  ;;  %v4343_v36 = vld [vmem:[#allocation11 + $0xc8] sm:$0xff] }
 0x375   :  { %4280 = vmatpush1.bf16.msra.mxu1 %v16875_v15  ;;  %4117 = vmatprep.subr.bf16.mxu0 %v16882_v49  ;;  %v16922_v15 = vcombine.high %v1038_v40, %v1042_v7  ;;  %v16924_v49 = vcombine.high %v1039_v57, %v1043_v42 }
 0x376   :  { %4281 = vmatprep.subr.bf16.mxu1 %v16884_v14  ;;  %v4318_v14 = vld [vmem:[#allocation11] sm:$0xff] }
 0x377   :  { %v16925_v18 = vcombine.low %v4318_v14, %v4322_v50 }
 0x378   :  { %4118 = vmatpush1.bf16.msra.mxu0 %v16881_v55  ;;  %v16921_v55 = vcombine.low %v1038_v40, %v1042_v7  ;;  %v4350_v40 = vld [vmem:[#allocation11 + $0x100] sm:$0xff] }
 0x379   :  { %4282 = vmatpush1.bf16.msra.mxu1 %v16883_v60  ;;  %4119 = vmatprep.subr.bf16.mxu0 %v16890_v63  ;;  %v16923_v60 = vcombine.low %v1039_v57, %v1043_v42  ;;  %v16926_v63 = vcombine.high %v4318_v14, %v4322_v50  ;;  %v4354_v7 = vld [vmem:[#allocation11 + $0x120] sm:$0xff]  ;;  %v4355_v57 = vld [vmem:[#allocation11 + $0x128] sm:$0xff]  ;;  %v16949_v42 = vcombine.low %v4342_v35, %v4346_v44 }
 0x37a   :  { %4283 = vmatprep.subr.bf16.mxu1 %v16892_v0  ;;  %v16928_v0 = vcombine.high %v4319_v52, %v4323_v53  ;;  %v4362_v14 = vld [vmem:[#allocation11 + $0x160] sm:$0xff]  ;;  %v4359_v50 = vld [vmem:[#allocation11 + $0x148] sm:$0xff]  ;;  %v16957_v52 = vcombine.low %v4350_v40, %v4354_v7  ;;  %v16959_v53 = vcombine.low %v4351_v5, %v4355_v57 }
 0x37c   :  { %4120 = vmatpush1.bf16.msra.mxu0 %v16889_v19  ;;  %v4327_v19 = vld [vmem:[#allocation11 + $0x48] sm:$0xff] }
 0x37d   :  { %4284 = vmatpush1.bf16.msra.mxu1 %v16891_v21  ;;  %4121 = vmatprep.subr.bf16.mxu0 %v16898_v24  ;;  %v4331_v21 = vld [vmem:[#allocation11 + $0x68] sm:$0xff]  ;;  %v16934_v24 = vcombine.high %v4326_v12, %v4330_v17 }
 0x37e   :  { %4285 = vmatprep.subr.bf16.mxu1 %v16900_v25  ;;  %v4334_v25 = vld [vmem:[#allocation11 + $0x80] sm:$0xff]  ;;  %v16936_v28 = vcombine.high %v4327_v19, %v4331_v21 }
 0x380   :  { %4122 = vmatpush1.bf16.msra.mxu0 %v16897_v30  ;;  %v4339_v30 = vld [vmem:[#allocation11 + $0xa8] sm:$0xff] }
 0x381   :  { %4286 = vmatpush1.bf16.msra.mxu1 %v16899_v32  ;;  %4123 = vmatprep.subr.bf16.mxu0 %v16906_v33  ;;  %v16933_v32 = vcombine.low %v4326_v12, %v4330_v17  ;;  %v16935_v33 = vcombine.low %v4327_v19, %v4331_v21  ;;  %v16944_v34 = vcombine.high %v4335_v29, %v4339_v30  ;;  %v4371_v12 = vld [vmem:[#allocation11 + $0x1a8] sm:$0xff] }
 0x382   :  { %4287 = vmatprep.subr.bf16.mxu1 %v16908_v59  ;;  %v16942_v59 = vcombine.high %v4334_v25, %v4338_v26  ;;  %v16976_v21 = vcombine.high %v4367_v8, %v4371_v12 }
 0x384   :  { %4124 = vmatpush1.bf16.msra.mxu0 %v16905_v38  ;;  %v4347_v38 = vld [vmem:[#allocation11 + $0xe8] sm:$0xff] }
 0x385   :  { %4288 = vmatpush1.bf16.msra.mxu1 %v16907_v10  ;;  %4125 = vmatprep.subr.bf16.mxu0 %v16914_v39  ;;  %v16941_v10 = vcombine.low %v4334_v25, %v4338_v26  ;;  %v16950_v39 = vcombine.high %v4342_v35, %v4346_v44  ;;  %v4375_v25 = vld [vmem:[#allocation11 + $0x1c8] sm:$0xff] }
 0x386   :  { %4289 = vmatprep.subr.bf16.mxu1 %v16916_v16  ;;  %v16952_v16 = vcombine.high %v4343_v36, %v4347_v38  ;;  %v4379_v26 = vld [vmem:[#allocation11 + $0x1e8] sm:$0xff] }
 0x387   :  { %v4387_v35 = vld [vmem:[#allocation11 + $0x228] sm:$0xff] }
 0x388   :  { %4126 = vmatpush1.bf16.msra.mxu0 %v16913_v46  ;;  %v16951_v46 = vcombine.low %v4343_v36, %v4347_v38  ;;  %v16983_v36 = vcombine.low %v4375_v25, %v4379_v26 }
 0x389   :  { %4290 = vmatpush1.bf16.msra.mxu1 %v16915_v3  ;;  %4127 = vmatprep.subr.bf16.mxu0 %v16922_v15  ;;  %v16958_v3 = vcombine.high %v4350_v40, %v4354_v7  ;;  %v16960_v15 = vcombine.high %v4351_v5, %v4355_v57  ;;  %v4395_v40 = vld [vmem:[#allocation11 + $0x268] sm:$0xff] }
 0x38a   :  { %4291 = vmatprep.subr.bf16.mxu1 %v16924_v49  ;;  %v4358_v49 = vld [vmem:[#allocation11 + $0x140] sm:$0xff] }
 0x38b   :  { %v16965_v17 = vcombine.low %v4358_v49, %v4362_v14 }
 0x38c   :  { %4128 = vmatpush1.bf16.msra.mxu0 %v16921_v55  ;;  %v16966_v55 = vcombine.high %v4358_v49, %v4362_v14  ;;  %v4403_v49 = vld [vmem:[#allocation11 + $0x2a8] sm:$0xff] }
 0x38d   :  { %4292 = vmatpush1.bf16.msra.mxu1 %v16923_v60  ;;  %7432 = vmatprep.subr.bf16.mxu0 %v16926_v63  ;;  %v16968_v60 = vcombine.high %v4359_v50, %v4363_v51  ;;  %v4366_v63 = vld [vmem:[#allocation11 + $0x180] sm:$0xff] }
 0x38e   :  { %7596 = vmatprep.subr.bf16.mxu1 %v16928_v0  ;;  %v4370_v0 = vld [vmem:[#allocation11 + $0x1a0] sm:$0xff] }
 0x38f   :  { %4130 = vmatmul.mubr.bf16.vlgmr.msra.gmra.mrb[12].mxu0 %v19631_v2  ;;  %v16974_v19 = vcombine.high %v4366_v63, %v4370_v0 }
 0x390   :  { %4294 = vmatmul.mubr.bf16.vlgmr.msra.gmra.mrb[12].mxu1 %v19631_v2  ;;  %7433 = vmatpush1.bf16.msra.mxu0 %v16925_v18  ;;  %v16943_v2 = vcombine.low %v4335_v29, %v4339_v30  ;;  %v16967_v18 = vcombine.low %v4359_v50, %v4363_v51  ;;  %v16975_v29 = vcombine.low %v4367_v8, %v4371_v12 }
 0x391   :  { %7464 = vmatprep.mubr.bf16.mxu0 %v19662_v27  ;;  %7597 = vmatpush1.bf16.msra.mxu1 %v16927_v9  ;;  %v4374_v9 = vld [vmem:[#allocation11 + $0x1c0] sm:$0xff] }
 0x392   :  { %7628 = vmatprep.mubr.bf16.mxu1 %v19662_v27  ;;  %7434 = vmatprep.subr.bf16.mxu0 %v16934_v24  ;;  %v4378_v24 = vld [vmem:[#allocation11 + $0x1e0] sm:$0xff] }
 0x393   :  { %7598 = vmatprep.subr.bf16.mxu1 %v16936_v28  ;;  %v16973_v28 = vcombine.low %v4366_v63, %v4370_v0  ;;  %v16982_v30 = vcombine.high %v4374_v9, %v4378_v24  ;;  %v16981_v44 = vcombine.low %v4374_v9, %v4378_v24  ;;  %v4411_v63 = vld [vmem:[#allocation11 + $0x2e8] sm:$0xff] }
 0x394   :  { %7435 = vmatpush1.bf16.msra.mxu0 %v16933_v32  ;;  %v16984_v32 = vcombine.high %v4375_v25, %v4379_v26  ;;  %v4419_v9 = vld [vmem:[#allocation11 + $0x328] sm:$0xff] }
 0x395   :  { %7599 = vmatpush1.bf16.msra.mxu1 %v16935_v33  ;;  %7436 = vmatprep.subr.bf16.mxu0 %v16942_v59  ;;  %v4382_v33 = vld [vmem:[#allocation11 + $0x200] sm:$0xff] }
 0x396   :  { %7600 = vmatprep.subr.bf16.mxu1 %v16944_v34  ;;  %v4386_v59 = vld [vmem:[#allocation11 + $0x220] sm:$0xff]  ;;  %v4383_v34 = vld [vmem:[#allocation11 + $0x208] sm:$0xff] }
 0x397   :  { %v16990_v38 = vcombine.high %v4382_v33, %v4386_v59  ;;  %v16989_v7 = vcombine.low %v4382_v33, %v4386_v59  ;;  %v16991_v5 = vcombine.low %v4383_v34, %v4387_v35  ;;  %v4427_v33 = vld [vmem:[#allocation11 + $0x368] sm:$0xff] }
 0x398   :  { %7437 = vmatpush1.bf16.msra.mxu0 %v16941_v10  ;;  %v16992_v10 = vcombine.high %v4383_v34, %v4387_v35 }
 0x399   :  { %7601 = vmatpush1.bf16.msra.mxu1 %v16943_v2  ;;  %7438 = vmatprep.subr.bf16.mxu0 %v16950_v39  ;;  %v4390_v2 = vld [vmem:[#allocation11 + $0x240] sm:$0xff] }
 0x39a   :  { %7602 = vmatprep.subr.bf16.mxu1 %v16952_v16  ;;  %v4394_v39 = vld [vmem:[#allocation11 + $0x260] sm:$0xff]  ;;  %v4391_v16 = vld [vmem:[#allocation11 + $0x248] sm:$0xff] }
 0x39b   :  { %v16998_v57 = vcombine.high %v4390_v2, %v4394_v39  ;;  %v16997_v14 = vcombine.low %v4390_v2, %v4394_v39  ;;  %v16999_v50 = vcombine.low %v4391_v16, %v4395_v40  ;;  %v4435_v2 = vld [vmem:[#allocation11 + $0x3a8] sm:$0xff] }
 0x39c   :  { %7439 = vmatpush1.bf16.msra.mxu0 %v16949_v42  ;;  %v17000_v42 = vcombine.high %v4391_v16, %v4395_v40  ;;  %v1049_v16 = vrot.slane %v19657_v37, %v19516_v45 }
 0x39d   :  { %7603 = vmatpush1.bf16.msra.mxu1 %v16951_v46  ;;  %7440 = vmatprep.subr.bf16.mxu0 %v16958_v3  ;;  %v4398_v46 = vld [vmem:[#allocation11 + $0x280] sm:$0xff] }
 0x39e   :  { %7604 = vmatprep.subr.bf16.mxu1 %v16960_v15  ;;  %v4402_v3 = vld [vmem:[#allocation11 + $0x2a0] sm:$0xff]  ;;  %v4399_v15 = vld [vmem:[#allocation11 + $0x288] sm:$0xff] }
 0x39f   :  { %v17006_v51 = vcombine.high %v4398_v46, %v4402_v3  ;;  %v17005_v0 = vcombine.low %v4398_v46, %v4402_v3  ;;  %v17007_v8 = vcombine.low %v4399_v15, %v4403_v49  ;;  %v1061_v46 = vrot.slane %v19657_v37, %v19524_v48  ;;  %v4439_v3 = vld [vmem:[#allocation11 + $0x3c8] sm:$0xff] }
 0x3a0   :  { %7441 = vmatpush1.bf16.msra.mxu0 %v16957_v52  ;;  %v17008_v52 = vcombine.high %v4399_v15, %v4403_v49  ;;  %v4443_v15 = vld [vmem:[#allocation11 + $0x3e8] sm:$0xff] }
 0x3a1   :  { %7605 = vmatpush1.bf16.msra.mxu1 %v16959_v53  ;;  %7442 = vmatprep.subr.bf16.mxu0 %v16966_v55  ;;  %v4406_v53 = vld [vmem:[#allocation11 + $0x2c0] sm:$0xff] }
 0x3a2   :  { %7606 = vmatprep.subr.bf16.mxu1 %v16968_v60  ;;  %v4410_v55 = vld [vmem:[#allocation11 + $0x2e0] sm:$0xff]  ;;  %v4407_v60 = vld [vmem:[#allocation11 + $0x2c8] sm:$0xff] }
 0x3a3   :  { %v17014_v12 = vcombine.high %v4406_v53, %v4410_v55  ;;  %v17013_v24 = vcombine.low %v4406_v53, %v4410_v55  ;;  %v17015_v25 = vcombine.low %v4407_v60, %v4411_v63  ;;  %v4446_v53 = vld [vmem:[#allocation11 + $0x400] sm:$0xff] }
 0x3a4   :  { %7443 = vmatpush1.bf16.msra.mxu0 %v16965_v17  ;;  %v17016_v17 = vcombine.high %v4407_v60, %v4411_v63  ;;  %v4450_v55 = vld [vmem:[#allocation11 + $0x420] sm:$0xff]  ;;  %v18617_v60 = vadd.f32 %v19655_v11, %v1061_v46  ;;  %v4447_v63 = vld [vmem:[#allocation11 + $0x408] sm:$0xff] }
 0x3a5   :  { %7607 = vmatpush1.bf16.msra.mxu1 %v16967_v18  ;;  %7444 = vmatprep.subr.bf16.mxu0 %v16974_v19  ;;  %v4414_v18 = vld [vmem:[#allocation11 + $0x300] sm:$0xff] }
 0x3a6   :  { %7608 = vmatprep.subr.bf16.mxu1 %v16976_v21  ;;  %v4418_v19 = vld [vmem:[#allocation11 + $0x320] sm:$0xff]  ;;  %v4415_v21 = vld [vmem:[#allocation11 + $0x308] sm:$0xff] }
 0x3a7   :  { %v17022_v26 = vcombine.high %v4414_v18, %v4418_v19  ;;  %v17021_v59 = vcombine.low %v4414_v18, %v4418_v19  ;;  %v17023_v34 = vcombine.low %v4415_v21, %v4419_v9  ;;  %v17054_v18 = vcombine.high %v4446_v53, %v4450_v55  ;;  %v4478_v46 = vld [vmem:[#allocation11 + $0x500] sm:$0xff] }
 0x3a8   :  { %7445 = vmatpush1.bf16.msra.mxu0 %v16973_v28  ;;  %v17024_v28 = vcombine.high %v4415_v21, %v4419_v9  ;;  %v4305_v19 = vmax.f32 %v18617_v60, 0.0  ;;  %v4454_v21 = vld [vmem:[#allocation11 + $0x440] sm:$0xff]  ;;  %v4487_v60 = vld [vmem:[#allocation11 + $0x548] sm:$0xff] }
 0x3a9   :  { %7609 = vmatpush1.bf16.msra.mxu1 %v16975_v29  ;;  %7446 = vmatprep.subr.bf16.mxu0 %v16982_v30  ;;  %v4422_v29 = vld [vmem:[#allocation11 + $0x340] sm:$0xff] }
 0x3aa   :  { %7610 = vmatprep.subr.bf16.mxu1 %v16984_v32  ;;  %v4426_v30 = vld [vmem:[#allocation11 + $0x360] sm:$0xff]  ;;  %v4423_v32 = vld [vmem:[#allocation11 + $0x348] sm:$0xff] }
 0x3ab   :  { %v17030_v35 = vcombine.high %v4422_v29, %v4426_v30  ;;  %v17029_v39 = vcombine.low %v4422_v29, %v4426_v30  ;;  %v17031_v40 = vcombine.low %v4423_v32, %v4427_v33  ;;  %v4458_v9 = vld [vmem:[#allocation11 + $0x460] sm:$0xff] }
 0x3ac   :  { %7447 = vmatpush1.bf16.msra.mxu0 %v16981_v44  ;;  %v17032_v44 = vcombine.high %v4423_v32, %v4427_v33  ;;  %v17062_v29 = vcombine.high %v4454_v21, %v4458_v9  ;;  %v4462_v30 = vld [vmem:[#allocation11 + $0x480] sm:$0xff]  ;;  %v19676_v33 = vpack.c.bf16 %v4305_v19, %v4305_v19  ;;  %v4495_v19 = vld [vmem:[#allocation11 + $0x588] sm:$0xff] }
 0x3ad   :  { %7611 = vmatpush1.bf16.msra.mxu1 %v16983_v36  ;;  %7448 = vmatprep.subr.bf16.mxu0 %v16990_v38  ;;  %v4430_v36 = vld [vmem:[#allocation11 + $0x380] sm:$0xff] }
 0x3ae   :  { %7612 = vmatprep.subr.bf16.mxu1 %v16992_v10  ;;  %v4434_v38 = vld [vmem:[#allocation11 + $0x3a0] sm:$0xff]  ;;  %v4431_v10 = vld [vmem:[#allocation11 + $0x388] sm:$0xff] }
 0x3af   :  { %v17037_v49 = vcombine.low %v4430_v36, %v4434_v38  ;;  %v4466_v32 = vld [vmem:[#allocation11 + $0x4a0] sm:$0xff] }
 0x3b0   :  { %7449 = vmatpush1.bf16.msra.mxu0 %v16989_v7  ;;  %v17038_v7 = vcombine.high %v4430_v36, %v4434_v38  ;;  %v17070_v38 = vcombine.high %v4462_v30, %v4466_v32 }
 0x3b1   :  { %7613 = vmatpush1.bf16.msra.mxu1 %v16991_v5  ;;  %7450 = vmatprep.subr.bf16.mxu0 %v16998_v57  ;;  %v17040_v5 = vcombine.high %v4431_v10, %v4435_v2  ;;  %v4438_v57 = vld [vmem:[#allocation11 + $0x3c0] sm:$0xff] }
 0x3b2   :  { %7614 = vmatprep.subr.bf16.mxu1 %v17000_v42  ;;  %v4442_v42 = vld [vmem:[#allocation11 + $0x3e0] sm:$0xff] }
 0x3b4   :  { %7451 = vmatpush1.bf16.msra.mxu0 %v16997_v14  ;;  %v18614_v14 = vadd.f32 %v19649_v61, %v1049_v16  ;;  %v4471_v16 = vld [vmem:[#allocation11 + $0x4c8] sm:$0xff] }
 0x3b5   :  { %7615 = vmatpush1.bf16.msra.mxu1 %v16999_v50  ;;  %7452 = vmatprep.subr.bf16.mxu0 %v17006_v51  ;;  %v17039_v50 = vcombine.low %v4431_v10, %v4435_v2  ;;  %v17046_v51 = vcombine.high %v4438_v57, %v4442_v42  ;;  %v4470_v2 = vld [vmem:[#allocation11 + $0x4c0] sm:$0xff] }
 0x3b6   :  { %7616 = vmatprep.subr.bf16.mxu1 %v17008_v52  ;;  %v17048_v52 = vcombine.high %v4439_v3, %v4443_v15 }
 0x3b8   :  { %7453 = vmatpush1.bf16.msra.mxu0 %v17005_v0  ;;  %v4451_v0 = vld [vmem:[#allocation11 + $0x428] sm:$0xff] }
 0x3b9   :  { %7617 = vmatpush1.bf16.msra.mxu1 %v17007_v8  ;;  %7454 = vmatprep.subr.bf16.mxu0 %v17014_v12  ;;  %v17045_v8 = vcombine.low %v4438_v57, %v4442_v42  ;;  %v4302_v12 = vmax.f32 %v18614_v14, 0.0  ;;  %v17056_v61 = vcombine.high %v4447_v63, %v4451_v0  ;;  %v17055_v11 = vcombine.low %v4447_v63, %v4451_v0  ;;  %v4491_v63 = vld [vmem:[#allocation11 + $0x568] sm:$0xff] }
 0x3ba   :  { %7618 = vmatprep.subr.bf16.mxu1 %v17016_v17  ;;  %v17047_v17 = vcombine.low %v4439_v3, %v4443_v15  ;;  %v4482_v3 = vld [vmem:[#allocation11 + $0x520] sm:$0xff]  ;;  %v4479_v15 = vld [vmem:[#allocation11 + $0x508] sm:$0xff] }
 0x3bb   :  { %v17085_v0 = vcombine.low %v4478_v46, %v4482_v3 }
 0x3bc   :  { %7455 = vmatpush1.bf16.msra.mxu0 %v17013_v24  ;;  %v17053_v24 = vcombine.low %v4446_v53, %v4450_v55  ;;  %v4486_v53 = vld [vmem:[#allocation11 + $0x540] sm:$0xff] }
 0x3bd   :  { %7619 = vmatpush1.bf16.msra.mxu1 %v17015_v25  ;;  %7456 = vmatprep.subr.bf16.mxu0 %v17022_v26  ;;  %v4455_v25 = vld [vmem:[#allocation11 + $0x448] sm:$0xff]  ;;  %v4490_v55 = vld [vmem:[#allocation11 + $0x560] sm:$0xff] }
 0x3be   :  { %7620 = vmatprep.subr.bf16.mxu1 %v17024_v28  ;;  %v4459_v26 = vld [vmem:[#allocation11 + $0x468] sm:$0xff]  ;;  %v19674_v28 = vpack.c.bf16 %v4302_v12, %v4302_v12  ;;  %v17094_v12 = vcombine.high %v4486_v53, %v4490_v55 }
 0x3bf   :  { %v17063_v36 = vcombine.low %v4455_v25, %v4459_v26 }
 0x3c0   :  { %7457 = vmatpush1.bf16.msra.mxu0 %v17021_v59  ;;  %v17064_v59 = vcombine.high %v4455_v25, %v4459_v26 }
 0x3c1   :  { %7621 = vmatpush1.bf16.msra.mxu1 %v17023_v34  ;;  %7458 = vmatprep.subr.bf16.mxu0 %v17030_v35  ;;  %v4463_v34 = vld [vmem:[#allocation11 + $0x488] sm:$0xff] }
 0x3c2   :  { %7622 = vmatprep.subr.bf16.mxu1 %v17032_v44  ;;  %v4467_v35 = vld [vmem:[#allocation11 + $0x4a8] sm:$0xff]  ;;  %v17061_v44 = vcombine.low %v4454_v21, %v4458_v9  ;;  %v17093_v9 = vcombine.low %v4486_v53, %v4490_v55 }
 0x3c3   :  { %v17072_v10 = vcombine.high %v4463_v34, %v4467_v35  ;;  %v4499_v21 = vld [vmem:[#allocation11 + $0x5a8] sm:$0xff] }
 0x3c4   :  { %7459 = vmatpush1.bf16.msra.mxu0 %v17029_v39  ;;  %v4474_v39 = vld [vmem:[#allocation11 + $0x4e0] sm:$0xff]  ;;  %v17104_v26 = vcombine.high %v4495_v19, %v4499_v21  ;;  %v4531_v53 = vld [vmem:[#allocation11 + $0x6a8] sm:$0xff] }
 0x3c5   :  { %7623 = vmatpush1.bf16.msra.mxu1 %v17031_v40  ;;  %7460 = vmatprep.subr.bf16.mxu0 %v17038_v7  ;;  %v4475_v40 = vld [vmem:[#allocation11 + $0x4e8] sm:$0xff]  ;;  %v17069_v7 = vcombine.low %v4462_v30, %v4466_v32  ;;  %v17078_v57 = vcombine.high %v4470_v2, %v4474_v39  ;;  %v17077_v14 = vcombine.low %v4470_v2, %v4474_v39 }
 0x3c6   :  { %7624 = vmatprep.subr.bf16.mxu1 %v17040_v5  ;;  %v17071_v5 = vcombine.low %v4463_v34, %v4467_v35  ;;  %v17080_v42 = vcombine.high %v4471_v16, %v4475_v40  ;;  %v4503_v30 = vld [vmem:[#allocation11 + $0x5c8] sm:$0xff]  ;;  %v17103_v34 = vcombine.low %v4495_v19, %v4499_v21 }
 0x3c7   :  { %v4507_v32 = vld [vmem:[#allocation11 + $0x5e8] sm:$0xff] }
 0x3c8   :  { %7461 = vmatpush1.bf16.msra.mxu0 %v17037_v49  ;;  %v4483_v49 = vld [vmem:[#allocation11 + $0x528] sm:$0xff] }
 0x3c9   :  { %7625 = vmatpush1.bf16.msra.mxu1 %v17039_v50  ;;  %7462 = vmatprep.subr.bf16.mxu0 %v17046_v51  ;;  %v17079_v50 = vcombine.low %v4471_v16, %v4475_v40  ;;  %v17086_v51 = vcombine.high %v4478_v46, %v4482_v3  ;;  %v4515_v2 = vld [vmem:[#allocation11 + $0x628] sm:$0xff]  ;;  %v17111_v16 = vcombine.low %v4503_v30, %v4507_v32 }
 0x3ca   :  { %7626 = vmatprep.subr.bf16.mxu1 %v17048_v52  ;;  %v17088_v52 = vcombine.high %v4479_v15, %v4483_v49  ;;  %v4523_v46 = vld [vmem:[#allocation11 + $0x668] sm:$0xff] }
 0x3cc   :  { %7463 = vmatpush1.bf16.msra.mxu0 %v17045_v8  ;;  %v17087_v8 = vcombine.low %v4479_v15, %v4483_v49 }
 0x3cd   :  { %7627 = vmatpush1.bf16.msra.mxu1 %v17047_v17  ;;  %7473 = vmatprep.subr.bf16.mxu0 %v17054_v18  ;;  %v17096_v17 = vcombine.high %v4487_v60, %v4491_v63  ;;  %v4494_v18 = vld [vmem:[#allocation11 + $0x580] sm:$0xff] }
 0x3ce   :  { %7637 = vmatprep.subr.bf16.mxu1 %v17056_v61  ;;  %v4498_v61 = vld [vmem:[#allocation11 + $0x5a0] sm:$0xff] }
 0x3cf   :  { %7465 = vmatmul.mubr.bf16.vlgmr.msra.gmra.mrb[16].mxu0 %v19674_v28  ;;  %v17102_v25 = vcombine.high %v4494_v18, %v4498_v61 }
 0x3d0   :  { %7629 = vmatmul.mubr.bf16.vlgmr.msra.gmra.mrb[16].mxu1 %v19674_v28  ;;  %7474 = vmatpush1.bf16.msra.mxu0 %v17053_v24  ;;  %v17095_v24 = vcombine.low %v4487_v60, %v4491_v63 }
 0x3d1   :  { %7505 = vmatprep.mubr.bf16.mxu0 %v19676_v33  ;;  %7638 = vmatpush1.bf16.msra.mxu1 %v17055_v11  ;;  %v4502_v11 = vld [vmem:[#allocation11 + $0x5c0] sm:$0xff] }
 0x3d2   :  { %7669 = vmatprep.mubr.bf16.mxu1 %v19676_v33  ;;  %7475 = vmatprep.subr.bf16.mxu0 %v17062_v29  ;;  %v4506_v29 = vld [vmem:[#allocation11 + $0x5e0] sm:$0xff] }
 0x3d3   :  { %7639 = vmatprep.subr.bf16.mxu1 %v17064_v59  ;;  %v17101_v59 = vcombine.low %v4494_v18, %v4498_v61  ;;  %v17110_v35 = vcombine.high %v4502_v11, %v4506_v29  ;;  %v17109_v39 = vcombine.low %v4502_v11, %v4506_v29  ;;  %v4539_v18 = vld [vmem:[#allocation11 + $0x6e8] sm:$0xff] }
 0x3d4   :  { %7476 = vmatpush1.bf16.msra.mxu0 %v17061_v44  ;;  %v17112_v44 = vcombine.high %v4503_v30, %v4507_v32  ;;  %v4547_v11 = vld [vmem:[#allocation11 + $0x728] sm:$0xff] }
 0x3d5   :  { %7640 = vmatpush1.bf16.msra.mxu1 %v17063_v36  ;;  %7477 = vmatprep.subr.bf16.mxu0 %v17070_v38  ;;  %v4510_v36 = vld [vmem:[#allocation11 + $0x600] sm:$0xff] }
 0x3d6   :  { %7641 = vmatprep.subr.bf16.mxu1 %v17072_v10  ;;  %v4514_v38 = vld [vmem:[#allocation11 + $0x620] sm:$0xff]  ;;  %v4511_v10 = vld [vmem:[#allocation11 + $0x608] sm:$0xff] }
 0x3d7   :  { %v17118_v40 = vcombine.high %v4510_v36, %v4514_v38  ;;  %v17117_v3 = vcombine.low %v4510_v36, %v4514_v38  ;;  %v17119_v15 = vcombine.low %v4511_v10, %v4515_v2  ;;  %v4555_v36 = vld [vmem:[#allocation11 + $0x768] sm:$0xff] }
 0x3d8   :  { %7478 = vmatpush1.bf16.msra.mxu0 %v17069_v7  ;;  %v17120_v7 = vcombine.high %v4511_v10, %v4515_v2 }
 0x3d9   :  { %7642 = vmatpush1.bf16.msra.mxu1 %v17071_v5  ;;  %7479 = vmatprep.subr.bf16.mxu0 %v17078_v57  ;;  %v4518_v5 = vld [vmem:[#allocation11 + $0x640] sm:$0xff] }
 0x3da   :  { %7643 = vmatprep.subr.bf16.mxu1 %v17080_v42  ;;  %v4522_v57 = vld [vmem:[#allocation11 + $0x660] sm:$0xff]  ;;  %v4519_v42 = vld [vmem:[#allocation11 + $0x648] sm:$0xff] }
 0x3db   :  { %v17126_v49 = vcombine.high %v4518_v5, %v4522_v57  ;;  %v17125_v55 = vcombine.low %v4518_v5, %v4522_v57  ;;  %v17127_v60 = vcombine.low %v4519_v42, %v4523_v46  ;;  %v4563_v5 = vld [vmem:[#allocation11 + $0x7a8] sm:$0xff] }
 0x3dc   :  { %7480 = vmatpush1.bf16.msra.mxu0 %v17077_v14  ;;  %v17128_v14 = vcombine.high %v4519_v42, %v4523_v46  ;;  %v1057_v42 = vrot.slane %v19657_v37, %v19563_v1 }
 0x3dd   :  { %7644 = vmatpush1.bf16.msra.mxu1 %v17079_v50  ;;  %7481 = vmatprep.subr.bf16.mxu0 %v17086_v51  ;;  %v4526_v50 = vld [vmem:[#allocation11 + $0x680] sm:$0xff] }
 0x3de   :  { %7645 = vmatprep.subr.bf16.mxu1 %v17088_v52  ;;  %v4530_v51 = vld [vmem:[#allocation11 + $0x6a0] sm:$0xff]  ;;  %v4527_v52 = vld [vmem:[#allocation11 + $0x688] sm:$0xff] }
 0x3df   :  { %v17134_v63 = vcombine.high %v4526_v50, %v4530_v51  ;;  %v17133_v61 = vcombine.low %v4526_v50, %v4530_v51  ;;  %v17135_v19 = vcombine.low %v4527_v52, %v4531_v53  ;;  %v4567_v50 = vld [vmem:[#allocation11 + $0x7c8] sm:$0xff] }
 0x3e0   :  { %7482 = vmatpush1.bf16.msra.mxu0 %v17085_v0  ;;  %v17136_v0 = vcombine.high %v4527_v52, %v4531_v53  ;;  %v4571_v51 = vld [vmem:[#allocation11 + $0x7e8] sm:$0xff]  ;;  %v18616_v53 = vadd.f32 %v19651_v23, %v1057_v42  ;;  %v4582_v23 = vld [vmem:[#allocation11 + $0x840] sm:$0xff] }
 0x3e1   :  { %7646 = vmatpush1.bf16.msra.mxu1 %v17087_v8  ;;  %7483 = vmatprep.subr.bf16.mxu0 %v17094_v12  ;;  %v4534_v8 = vld [vmem:[#allocation11 + $0x6c0] sm:$0xff]  ;;  %v17176_v37 = vcombine.high %v4567_v50, %v4571_v51 }
 0x3e2   :  { %7647 = vmatprep.subr.bf16.mxu1 %v17096_v17  ;;  %v4538_v12 = vld [vmem:[#allocation11 + $0x6e0] sm:$0xff]  ;;  %v4535_v17 = vld [vmem:[#allocation11 + $0x6c8] sm:$0xff] }
 0x3e3   :  { %v17142_v21 = vcombine.high %v4534_v8, %v4538_v12  ;;  %v17141_v29 = vcombine.low %v4534_v8, %v4538_v12  ;;  %v17143_v30 = vcombine.low %v4535_v17, %v4539_v18  ;;  %v4575_v8 = vld [vmem:[#allocation11 + $0x808] sm:$0xff] }
 0x3e4   :  { %7484 = vmatpush1.bf16.msra.mxu0 %v17093_v9  ;;  %v17144_v9 = vcombine.high %v4535_v17, %v4539_v18  ;;  %v4579_v12 = vld [vmem:[#allocation11 + $0x828] sm:$0xff]  ;;  %v4304_v18 = vmax.f32 %v18616_v53, 0.0 }
 0x3e5   :  { %7648 = vmatpush1.bf16.msra.mxu1 %v17095_v24  ;;  %7485 = vmatprep.subr.bf16.mxu0 %v17102_v25  ;;  %v4542_v24 = vld [vmem:[#allocation11 + $0x700] sm:$0xff] }
 0x3e6   :  { %7649 = vmatprep.subr.bf16.mxu1 %v17104_v26  ;;  %v4546_v25 = vld [vmem:[#allocation11 + $0x720] sm:$0xff]  ;;  %v4543_v26 = vld [vmem:[#allocation11 + $0x708] sm:$0xff] }
 0x3e7   :  { %v17150_v32 = vcombine.high %v4542_v24, %v4546_v25  ;;  %v17149_v38 = vcombine.low %v4542_v24, %v4546_v25  ;;  %v17151_v10 = vcombine.low %v4543_v26, %v4547_v11  ;;  %v4583_v24 = vld [vmem:[#allocation11 + $0x848] sm:$0xff] }
 0x3e8   :  { %7486 = vmatpush1.bf16.msra.mxu0 %v17101_v59  ;;  %v17152_v59 = vcombine.high %v4543_v26, %v4547_v11  ;;  %v4587_v25 = vld [vmem:[#allocation11 + $0x868] sm:$0xff]  ;;  %v19685_v11 = vpack.c.bf16 %v4304_v18, %v4304_v18  ;;  %v4622_v18 = vld [vmem:[#allocation11 + $0x980] sm:$0xff] }
 0x3e9   :  { %7650 = vmatpush1.bf16.msra.mxu1 %v17103_v34  ;;  %7487 = vmatprep.subr.bf16.mxu0 %v17110_v35  ;;  %v4550_v34 = vld [vmem:[#allocation11 + $0x740] sm:$0xff] }
 0x3ea   :  { %7651 = vmatprep.subr.bf16.mxu1 %v17112_v44  ;;  %v4554_v35 = vld [vmem:[#allocation11 + $0x760] sm:$0xff]  ;;  %v4551_v44 = vld [vmem:[#allocation11 + $0x748] sm:$0xff] }
 0x3eb   :  { %v17158_v2 = vcombine.high %v4550_v34, %v4554_v35  ;;  %v17157_v57 = vcombine.low %v4550_v34, %v4554_v35  ;;  %v17159_v46 = vcombine.low %v4551_v44, %v4555_v36  ;;  %v4594_v34 = vld [vmem:[#allocation11 + $0x8a0] sm:$0xff]  ;;  %v4591_v35 = vld [vmem:[#allocation11 + $0x888] sm:$0xff] }
 0x3ec   :  { %7488 = vmatpush1.bf16.msra.mxu0 %v17109_v39  ;;  %v17160_v39 = vcombine.high %v4551_v44, %v4555_v36  ;;  %v4595_v44 = vld [vmem:[#allocation11 + $0x8a8] sm:$0xff] }
 0x3ed   :  { %7652 = vmatpush1.bf16.msra.mxu1 %v17111_v16  ;;  %7489 = vmatprep.subr.bf16.mxu0 %v17118_v40  ;;  %v4558_v16 = vld [vmem:[#allocation11 + $0x780] sm:$0xff] }
 0x3ee   :  { %7653 = vmatprep.subr.bf16.mxu1 %v17120_v7  ;;  %v4562_v40 = vld [vmem:[#allocation11 + $0x7a0] sm:$0xff]  ;;  %v4559_v7 = vld [vmem:[#allocation11 + $0x788] sm:$0xff] }
 0x3ef   :  { %v17165_v52 = vcombine.low %v4558_v16, %v4562_v40 }
 0x3f0   :  { %7490 = vmatpush1.bf16.msra.mxu0 %v17117_v3  ;;  %v17166_v3 = vcombine.high %v4558_v16, %v4562_v40  ;;  %v4602_v16 = vld [vmem:[#allocation11 + $0x8e0] sm:$0xff]  ;;  %v4599_v40 = vld [vmem:[#allocation11 + $0x8c8] sm:$0xff] }
 0x3f1   :  { %7654 = vmatpush1.bf16.msra.mxu1 %v17119_v15  ;;  %7491 = vmatprep.subr.bf16.mxu0 %v17126_v49  ;;  %v17168_v15 = vcombine.high %v4559_v7, %v4563_v5  ;;  %v4566_v49 = vld [vmem:[#allocation11 + $0x7c0] sm:$0xff] }
 0x3f2   :  { %7655 = vmatprep.subr.bf16.mxu1 %v17128_v14  ;;  %v4570_v14 = vld [vmem:[#allocation11 + $0x7e0] sm:$0xff] }
 0x3f3   :  { %v17173_v17 = vcombine.low %v4566_v49, %v4570_v14 }
 0x3f4   :  { %7492 = vmatpush1.bf16.msra.mxu0 %v17125_v55  ;;  %v17167_v55 = vcombine.low %v4559_v7, %v4563_v5  ;;  %v4603_v7 = vld [vmem:[#allocation11 + $0x8e8] sm:$0xff] }
 0x3f5   :  { %7656 = vmatpush1.bf16.msra.mxu1 %v17127_v60  ;;  %7493 = vmatprep.subr.bf16.mxu0 %v17134_v63  ;;  %v17174_v60 = vcombine.high %v4566_v49, %v4570_v14  ;;  %v4574_v63 = vld [vmem:[#allocation11 + $0x800] sm:$0xff]  ;;  %v4607_v49 = vld [vmem:[#allocation11 + $0x908] sm:$0xff] }
 0x3f6   :  { %7657 = vmatprep.subr.bf16.mxu1 %v17136_v0  ;;  %v4578_v0 = vld [vmem:[#allocation11 + $0x820] sm:$0xff]  ;;  %v4611_v14 = vld [vmem:[#allocation11 + $0x928] sm:$0xff] }
 0x3f7   :  { %v17181_v26 = vcombine.low %v4574_v63, %v4578_v0  ;;  %v17216_v53 = vcombine.high %v4607_v49, %v4611_v14 }
 0x3f8   :  { %7494 = vmatpush1.bf16.msra.mxu0 %v17133_v61  ;;  %v17175_v61 = vcombine.low %v4567_v50, %v4571_v51  ;;  %v17207_v51 = vcombine.low %v4599_v40, %v4603_v7 }
 0x3f9   :  { %7658 = vmatpush1.bf16.msra.mxu1 %v17135_v19  ;;  %7495 = vmatprep.subr.bf16.mxu0 %v17142_v21  ;;  %v17182_v19 = vcombine.high %v4574_v63, %v4578_v0  ;;  %v17184_v21 = vcombine.high %v4575_v8, %v4579_v12  ;;  %v4619_v63 = vld [vmem:[#allocation11 + $0x968] sm:$0xff] }
 0x3fa   :  { %7659 = vmatprep.subr.bf16.mxu1 %v17144_v9  ;;  %v4586_v9 = vld [vmem:[#allocation11 + $0x860] sm:$0xff] }
 0x3fb   :  { %v17189_v36 = vcombine.low %v4582_v23, %v4586_v9 }
 0x3fc   :  { %7496 = vmatpush1.bf16.msra.mxu0 %v17141_v29  ;;  %v17183_v29 = vcombine.low %v4575_v8, %v4579_v12  ;;  %v17215_v8 = vcombine.low %v4607_v49, %v4611_v14 }
 0x3fd   :  { %7660 = vmatpush1.bf16.msra.mxu1 %v17143_v30  ;;  %7497 = vmatprep.subr.bf16.mxu0 %v17150_v32  ;;  %v17190_v30 = vcombine.high %v4582_v23, %v4586_v9  ;;  %v17192_v32 = vcombine.high %v4583_v24, %v4587_v25 }
 0x3fe   :  { %7661 = vmatprep.subr.bf16.mxu1 %v17152_v59  ;;  %v4590_v59 = vld [vmem:[#allocation11 + $0x880] sm:$0xff] }
 0x3ff   :  { %v17197_v5 = vcombine.low %v4590_v59, %v4594_v34 }
 0x400   :  { %7498 = vmatpush1.bf16.msra.mxu0 %v17149_v38  ;;  %v17191_v38 = vcombine.low %v4583_v24, %v4587_v25 }
 0x401   :  { %7662 = vmatpush1.bf16.msra.mxu1 %v17151_v10  ;;  %7499 = vmatprep.subr.bf16.mxu0 %v17158_v2  ;;  %v17198_v10 = vcombine.high %v4590_v59, %v4594_v34  ;;  %v17200_v2 = vcombine.high %v4591_v35, %v4595_v44 }
 0x402   :  { %7663 = vmatprep.subr.bf16.mxu1 %v17160_v39  ;;  %v4598_v39 = vld [vmem:[#allocation11 + $0x8c0] sm:$0xff] }
 0x403   :  { %v17206_v42 = vcombine.high %v4598_v39, %v4602_v16  ;;  %v17205_v50 = vcombine.low %v4598_v39, %v4602_v16 }
 0x404   :  { %7500 = vmatpush1.bf16.msra.mxu0 %v17157_v57  ;;  %v17199_v57 = vcombine.low %v4591_v35, %v4595_v44 }
 0x405   :  { %7664 = vmatpush1.bf16.msra.mxu1 %v17159_v46  ;;  %7501 = vmatprep.subr.bf16.mxu0 %v17166_v3  ;;  %v17208_v46 = vcombine.high %v4599_v40, %v4603_v7  ;;  %v4606_v3 = vld [vmem:[#allocation11 + $0x900] sm:$0xff] }
 0x406   :  { %7665 = vmatprep.subr.bf16.mxu1 %v17168_v15  ;;  %v4610_v15 = vld [vmem:[#allocation11 + $0x920] sm:$0xff] }
 0x407   :  { %v17213_v0 = vcombine.low %v4606_v3, %v4610_v15 }
 0x408   :  { %7502 = vmatpush1.bf16.msra.mxu0 %v17165_v52  ;;  %v17214_v52 = vcombine.high %v4606_v3, %v4610_v15 }
 0x409   :  { %7666 = vmatpush1.bf16.msra.mxu1 %v17167_v55  ;;  %7503 = vmatprep.subr.bf16.mxu0 %v17174_v60  ;;  %v4614_v55 = vld [vmem:[#allocation11 + $0x940] sm:$0xff] }
 0x40a   :  { %7667 = vmatprep.subr.bf16.mxu1 %v17176_v37  ;;  %v4618_v60 = vld [vmem:[#allocation11 + $0x960] sm:$0xff]  ;;  %v4615_v37 = vld [vmem:[#allocation11 + $0x948] sm:$0xff] }
 0x40b   :  { %v17222_v12 = vcombine.high %v4614_v55, %v4618_v60  ;;  %v17221_v23 = vcombine.low %v4614_v55, %v4618_v60  ;;  %v17223_v9 = vcombine.low %v4615_v37, %v4619_v63 }
 0x40c   :  { %7504 = vmatpush1.bf16.msra.mxu0 %v17173_v17  ;;  %v17224_v17 = vcombine.high %v4615_v37, %v4619_v63 }
 0x40d   :  { %7668 = vmatpush1.bf16.msra.mxu1 %v17175_v61  ;;  %7514 = vmatprep.subr.bf16.mxu0 %v17182_v19  ;;  %v4626_v61 = vld [vmem:[#allocation11 + $0x9a0] sm:$0xff]  ;;  %v4623_v19 = vld [vmem:[#allocation11 + $0x988] sm:$0xff] }
 0x40e   :  { %7678 = vmatprep.subr.bf16.mxu1 %v17184_v21  ;;  %v4627_v21 = vld [vmem:[#allocation11 + $0x9a8] sm:$0xff]  ;;  %v17230_v24 = vcombine.high %v4622_v18, %v4626_v61  ;;  %v17229_v59 = vcombine.low %v4622_v18, %v4626_v61 }
 0x40f   :  { %7506 = vmatmul.mubr.bf16.vlgmr.msra.gmra.mrb[16].mxu0 %v19685_v11  ;;  %v17232_v25 = vcombine.high %v4623_v19, %v4627_v21  ;;  %v17231_v34 = vcombine.low %v4623_v19, %v4627_v21 }
 0x410   :  { %7670 = vmatmul.mubr.bf16.vlgmr.msra.gmra.mrb[16].mxu1 %v19685_v11  ;;  %7515 = vmatpush1.bf16.msra.mxu0 %v17181_v26  ;;  %v4630_v26 = vld [vmem:[#allocation11 + $0x9c0] sm:$0xff] }
 0x411   :  { %7679 = vmatpush1.bf16.msra.mxu1 %v17183_v29  ;;  %7516 = vmatprep.subr.bf16.mxu0 %v17190_v30  ;;  %v4634_v29 = vld [vmem:[#allocation11 + $0x9e0] sm:$0xff]  ;;  %v4631_v30 = vld [vmem:[#allocation11 + $0x9c8] sm:$0xff] }
 0x412   :  { %7680 = vmatprep.subr.bf16.mxu1 %v17192_v32  ;;  %v4635_v32 = vld [vmem:[#allocation11 + $0x9e8] sm:$0xff]  ;;  %v17238_v35 = vcombine.high %v4630_v26, %v4634_v29  ;;  %v17237_v39 = vcombine.low %v4630_v26, %v4634_v29 }
 0x413   :  { %v17240_v44 = vcombine.high %v4631_v30, %v4635_v32  ;;  %v17239_v16 = vcombine.low %v4631_v30, %v4635_v32 }
 0x414   :  { %7517 = vmatpush1.bf16.msra.mxu0 %v17189_v36  ;;  %v4638_v36 = vld [vmem:[#allocation11 + $0xa00] sm:$0xff] }
 0x415   :  { %7681 = vmatpush1.bf16.msra.mxu1 %v17191_v38  ;;  %7518 = vmatprep.subr.bf16.mxu0 %v17198_v10  ;;  %v4642_v38 = vld [vmem:[#allocation11 + $0xa20] sm:$0xff]  ;;  %v4639_v10 = vld [vmem:[#allocation11 + $0xa08] sm:$0xff] }
 0x416   :  { %7682 = vmatprep.subr.bf16.mxu1 %v17200_v2  ;;  %v4643_v2 = vld [vmem:[#allocation11 + $0xa28] sm:$0xff]  ;;  %v17246_v40 = vcombine.high %v4638_v36, %v4642_v38  ;;  %v17245_v3 = vcombine.low %v4638_v36, %v4642_v38 }
 0x417   :  { %v17248_v7 = vcombine.high %v4639_v10, %v4643_v2  ;;  %v17247_v15 = vcombine.low %v4639_v10, %v4643_v2 }
 0x418   :  { %7519 = vmatpush1.bf16.msra.mxu0 %v17197_v5  ;;  %v4646_v5 = vld [vmem:[#allocation11 + $0xa40] sm:$0xff] }
 0x419   :  { %7683 = vmatpush1.bf16.msra.mxu1 %v17199_v57  ;;  %7520 = vmatprep.subr.bf16.mxu0 %v17206_v42  ;;  %v4650_v57 = vld [vmem:[#allocation11 + $0xa60] sm:$0xff]  ;;  %v4647_v42 = vld [vmem:[#allocation11 + $0xa48] sm:$0xff] }
 0x41a   :  { %7684 = vmatprep.subr.bf16.mxu1 %v17208_v46  ;;  %v4651_v46 = vld [vmem:[#allocation11 + $0xa68] sm:$0xff]  ;;  %v17254_v49 = vcombine.high %v4646_v5, %v4650_v57  ;;  %v17253_v55 = vcombine.low %v4646_v5, %v4650_v57 }
 0x41b   :  { %v17256_v14 = vcombine.high %v4647_v42, %v4651_v46  ;;  %v17255_v60 = vcombine.low %v4647_v42, %v4651_v46 }
 0x41c   :  { %7521 = vmatpush1.bf16.msra.mxu0 %v17205_v50  ;;  %v4654_v50 = vld [vmem:[#allocation11 + $0xa80] sm:$0xff] }
 0x41d   :  { %7685 = vmatpush1.bf16.msra.mxu1 %v17207_v51  ;;  %7522 = vmatprep.subr.bf16.mxu0 %v17214_v52  ;;  %v4658_v51 = vld [vmem:[#allocation11 + $0xaa0] sm:$0xff]  ;;  %v4655_v52 = vld [vmem:[#allocation11 + $0xa88] sm:$0xff] }
 0x41e   :  { %7686 = vmatprep.subr.bf16.mxu1 %v17216_v53  ;;  %v4659_v53 = vld [vmem:[#allocation11 + $0xaa8] sm:$0xff]  ;;  %v17262_v37 = vcombine.high %v4654_v50, %v4658_v51  ;;  %v17261_v18 = vcombine.low %v4654_v50, %v4658_v51 }
 0x41f   :  { %v17264_v63 = vcombine.high %v4655_v52, %v4659_v53  ;;  %v17263_v61 = vcombine.low %v4655_v52, %v4659_v53 }
 0x420   :  { %7523 = vmatpush1.bf16.msra.mxu0 %v17213_v0  ;;  %v4662_v0 = vld [vmem:[#allocation11 + $0xac0] sm:$0xff] }
 0x421   :  { %7687 = vmatpush1.bf16.msra.mxu1 %v17215_v8  ;;  %7524 = vmatprep.subr.bf16.mxu0 %v17222_v12  ;;  %v4666_v8 = vld [vmem:[#allocation11 + $0xae0] sm:$0xff]  ;;  %v4663_v12 = vld [vmem:[#allocation11 + $0xac8] sm:$0xff] }
 0x422   :  { %7688 = vmatprep.subr.bf16.mxu1 %v17224_v17  ;;  %v4667_v17 = vld [vmem:[#allocation11 + $0xae8] sm:$0xff]  ;;  %v17270_v19 = vcombine.high %v4662_v0, %v4666_v8  ;;  %v17269_v26 = vcombine.low %v4662_v0, %v4666_v8 }
 0x423   :  { %v17272_v21 = vcombine.high %v4663_v12, %v4667_v17  ;;  %v17271_v29 = vcombine.low %v4663_v12, %v4667_v17 }
 0x424   :  { %7525 = vmatpush1.bf16.msra.mxu0 %v17221_v23  ;;  %v4670_v23 = vld [vmem:[#allocation11 + $0xb00] sm:$0xff] }
 0x425   :  { %7689 = vmatpush1.bf16.msra.mxu1 %v17223_v9  ;;  %7526 = vmatprep.subr.bf16.mxu0 %v17230_v24  ;;  %v4674_v9 = vld [vmem:[#allocation11 + $0xb20] sm:$0xff]  ;;  %v4671_v24 = vld [vmem:[#allocation11 + $0xb08] sm:$0xff] }
 0x426   :  { %7690 = vmatprep.subr.bf16.mxu1 %v17232_v25  ;;  %v4675_v25 = vld [vmem:[#allocation11 + $0xb28] sm:$0xff]  ;;  %v17278_v30 = vcombine.high %v4670_v23, %v4674_v9  ;;  %v17277_v36 = vcombine.low %v4670_v23, %v4674_v9 }
 0x427   :  { %v17280_v32 = vcombine.high %v4671_v24, %v4675_v25  ;;  %v17279_v38 = vcombine.low %v4671_v24, %v4675_v25 }
 0x428   :  { %7527 = vmatpush1.bf16.msra.mxu0 %v17229_v59  ;;  %v4678_v59 = vld [vmem:[#allocation11 + $0xb40] sm:$0xff] }
 0x429   :  { %7691 = vmatpush1.bf16.msra.mxu1 %v17231_v34  ;;  %7528 = vmatprep.subr.bf16.mxu0 %v17238_v35  ;;  %v4682_v34 = vld [vmem:[#allocation11 + $0xb60] sm:$0xff]  ;;  %v4679_v35 = vld [vmem:[#allocation11 + $0xb48] sm:$0xff] }
 0x42a   :  { %7692 = vmatprep.subr.bf16.mxu1 %v17240_v44  ;;  %v4683_v44 = vld [vmem:[#allocation11 + $0xb68] sm:$0xff]  ;;  %v17286_v10 = vcombine.high %v4678_v59, %v4682_v34  ;;  %v17285_v5 = vcombine.low %v4678_v59, %v4682_v34 }
 0x42b   :  { %v17288_v2 = vcombine.high %v4679_v35, %v4683_v44  ;;  %v17287_v57 = vcombine.low %v4679_v35, %v4683_v44 }
 0x42c   :  { %7529 = vmatpush1.bf16.msra.mxu0 %v17237_v39  ;;  %v4686_v39 = vld [vmem:[#allocation11 + $0xb80] sm:$0xff] }
 0x42d   :  { %7693 = vmatpush1.bf16.msra.mxu1 %v17239_v16  ;;  %7530 = vmatprep.subr.bf16.mxu0 %v17246_v40  ;;  %v4690_v16 = vld [vmem:[#allocation11 + $0xba0] sm:$0xff]  ;;  %v4687_v40 = vld [vmem:[#allocation11 + $0xb88] sm:$0xff] }
 0x42e   :  { %7694 = vmatprep.subr.bf16.mxu1 %v17248_v7  ;;  %v4691_v7 = vld [vmem:[#allocation11 + $0xba8] sm:$0xff]  ;;  %v17294_v42 = vcombine.high %v4686_v39, %v4690_v16  ;;  %v17293_v50 = vcombine.low %v4686_v39, %v4690_v16 }
 0x42f   :  { %v17296_v46 = vcombine.high %v4687_v40, %v4691_v7  ;;  %v17295_v51 = vcombine.low %v4687_v40, %v4691_v7  ;;  %v4711_v39 = vld [vmem:[#allocation11 + $0xc48] sm:$0xff] }
 0x430   :  { %7531 = vmatpush1.bf16.msra.mxu0 %v17245_v3  ;;  %v4694_v3 = vld [vmem:[#allocation11 + $0xbc0] sm:$0xff]  ;;  %v4715_v16 = vld [vmem:[#allocation11 + $0xc68] sm:$0xff] }
 0x431   :  { %7695 = vmatpush1.bf16.msra.mxu1 %v17247_v15  ;;  %7532 = vmatprep.subr.bf16.mxu0 %v17254_v49  ;;  %v4698_v15 = vld [vmem:[#allocation11 + $0xbe0] sm:$0xff]  ;;  %v4695_v49 = vld [vmem:[#allocation11 + $0xbc8] sm:$0xff] }
 0x432   :  { %7696 = vmatprep.subr.bf16.mxu1 %v17256_v14  ;;  %v4699_v14 = vld [vmem:[#allocation11 + $0xbe8] sm:$0xff]  ;;  %v17302_v52 = vcombine.high %v4694_v3, %v4698_v15  ;;  %v17301_v0 = vcombine.low %v4694_v3, %v4698_v15  ;;  %v17320_v3 = vcombine.high %v4711_v39, %v4715_v16  ;;  %v4722_v15 = vld [vmem:[#allocation11 + $0xca0] sm:$0xff] }
 0x433   :  { %v17304_v53 = vcombine.high %v4695_v49, %v4699_v14  ;;  %v17303_v8 = vcombine.low %v4695_v49, %v4699_v14  ;;  %v4719_v49 = vld [vmem:[#allocation11 + $0xc88] sm:$0xff] }
 0x434   :  { %7533 = vmatpush1.bf16.msra.mxu0 %v17253_v55  ;;  %v4702_v55 = vld [vmem:[#allocation11 + $0xc00] sm:$0xff]  ;;  %v4723_v14 = vld [vmem:[#allocation11 + $0xca8] sm:$0xff] }
 0x435   :  { %7697 = vmatpush1.bf16.msra.mxu1 %v17255_v60  ;;  %7534 = vmatprep.subr.bf16.mxu0 %v17262_v37  ;;  %v4706_v60 = vld [vmem:[#allocation11 + $0xc20] sm:$0xff]  ;;  %v4703_v37 = vld [vmem:[#allocation11 + $0xc08] sm:$0xff] }
 0x436   :  { %7698 = vmatprep.subr.bf16.mxu1 %v17264_v63  ;;  %v4707_v63 = vld [vmem:[#allocation11 + $0xc28] sm:$0xff]  ;;  %v17310_v12 = vcombine.high %v4702_v55, %v4706_v60  ;;  %v17309_v7 = vcombine.low %v4702_v55, %v4706_v60  ;;  %v17328_v55 = vcombine.high %v4719_v49, %v4723_v14  ;;  %v4726_v60 = vld [vmem:[#allocation11 + $0xcc0] sm:$0xff] }
 0x437   :  { %v17312_v17 = vcombine.high %v4703_v37, %v4707_v63 }
 0x438   :  { %7535 = vmatpush1.bf16.msra.mxu0 %v17261_v18  ;;  %v19689_v18 = vld [vmem:[#allocation10] sm:$0xff] }
 0x439   :  { %7699 = vmatpush1.bf16.msra.mxu1 %v17263_v61  ;;  %7536 = vmatprep.subr.bf16.mxu0 %v17270_v19  ;;  %v1065_v61 = vrot.slane %v19689_v18, %v19595_v4  ;;  %v1069_v19 = vrot.slane %v19689_v18, %v19566_v13 }
 0x43a   :  { %7700 = vmatprep.subr.bf16.mxu1 %v17272_v21  ;;  %v1077_v21 = vrot.slane %v19689_v18, %v19598_v20 }
 0x43c   :  { %7537 = vmatpush1.bf16.msra.mxu0 %v17269_v26 }
 0x43d   :  { %7701 = vmatpush1.bf16.msra.mxu1 %v17271_v29  ;;  %7538 = vmatprep.subr.bf16.mxu0 %v17278_v30 }
 0x43e   :  { %7702 = vmatprep.subr.bf16.mxu1 %v17280_v32 }
 0x440   :  { %7539 = vmatpush1.bf16.msra.mxu0 %v17277_v36 }
 0x441   :  { %7703 = vmatpush1.bf16.msra.mxu1 %v17279_v38  ;;  %7540 = vmatprep.subr.bf16.mxu0 %v17286_v10  ;;  %v4710_v38 = vld [vmem:[#allocation11 + $0xc40] sm:$0xff] }
 0x442   :  { %7704 = vmatprep.subr.bf16.mxu1 %v17288_v2  ;;  %v4714_v2 = vld [vmem:[#allocation11 + $0xc60] sm:$0xff] }
 0x444   :  { %7541 = vmatpush1.bf16.msra.mxu0 %v17285_v5  ;;  %v17311_v5 = vcombine.low %v4703_v37, %v4707_v63  ;;  %v4730_v37 = vld [vmem:[#allocation11 + $0xce0] sm:$0xff]  ;;  %v4727_v63 = vld [vmem:[#allocation11 + $0xcc8] sm:$0xff] }
 0x445   :  { %7705 = vmatpush1.bf16.msra.mxu1 %v17287_v57  ;;  %7542 = vmatprep.subr.bf16.mxu0 %v17294_v42  ;;  %v4718_v42 = vld [vmem:[#allocation11 + $0xc80] sm:$0xff] }
 0x446   :  { %7706 = vmatprep.subr.bf16.mxu1 %v17296_v46  ;;  %v17318_v46 = vcombine.high %v4710_v38, %v4714_v2 }
 0x448   :  { %7543 = vmatpush1.bf16.msra.mxu0 %v17293_v50 }
 0x449   :  { %7707 = vmatpush1.bf16.msra.mxu1 %v17295_v51  ;;  %7544 = vmatprep.subr.bf16.mxu0 %v17302_v52  ;;  %v17317_v51 = vcombine.low %v4710_v38, %v4714_v2  ;;  %v17319_v52 = vcombine.low %v4711_v39, %v4715_v16  ;;  %v4750_v2 = vld [vmem:[#allocation11 + $0xd80] sm:$0xff]  ;;  %v4751_v16 = vld [vmem:[#allocation11 + $0xd88] sm:$0xff] }
 0x44a   :  { %7708 = vmatprep.subr.bf16.mxu1 %v17304_v53  ;;  %v17326_v53 = vcombine.high %v4718_v42, %v4722_v15  ;;  %v4754_v39 = vld [vmem:[#allocation11 + $0xda0] sm:$0xff] }
 0x44c   :  { %7545 = vmatpush1.bf16.msra.mxu0 %v17301_v0  ;;  %v4731_v0 = vld [vmem:[#allocation11 + $0xce8] sm:$0xff] }
 0x44d   :  { %7709 = vmatpush1.bf16.msra.mxu1 %v17303_v8  ;;  %7555 = vmatprep.subr.bf16.mxu0 %v17310_v12  ;;  %v17325_v8 = vcombine.low %v4718_v42, %v4722_v15  ;;  %v17327_v12 = vcombine.low %v4719_v49, %v4723_v14  ;;  %v4758_v15 = vld [vmem:[#allocation11 + $0xdc0] sm:$0xff]  ;;  %v4759_v14 = vld [vmem:[#allocation11 + $0xdc8] sm:$0xff] }
 0x44e   :  { %7719 = vmatprep.subr.bf16.mxu1 %v17312_v17  ;;  %v17334_v17 = vcombine.high %v4726_v60, %v4730_v37  ;;  %v4762_v49 = vld [vmem:[#allocation11 + $0xde0] sm:$0xff] }
 0x462   :  { %v4131_v23 = vpop.f32.mrb[12].mxu0 }
 0x463   :  { %v18618_v9 = vadd.f32 %v4131_v23, %v1065_v61  ;;  %v19697_v24 = vpop.f32.mrb[12].mxu1  ;;  %v4133_v25 = vpop.f32.mrb[13].mxu0  ;;  %v17336_v61 = vcombine.high %v4727_v63, %v4731_v0  ;;  %v4735_v23 = vld [vmem:[#allocation11 + $0xd08] sm:$0xff] }
 0x464   :  { %v18619_v26 = vadd.f32 %v4133_v25, %v1069_v19  ;;  %v4297_v29 = vpop.f32.mrb[13].mxu1  ;;  %v4135_v30 = vpop.f32.mrb[14].mxu0  ;;  %v4734_v19 = vld [vmem:[#allocation11 + $0xd00] sm:$0xff]  ;;  %v17333_v25 = vcombine.low %v4726_v60, %v4730_v37 }
 0x465   :  { %v4306_v32 = vmax.f32 %v18618_v9, 0.0  ;;  %v18621_v59 = vadd.f32 %v4297_v29, %v1077_v21  ;;  %v4299_v34 = vpop.f32.mrb[14].mxu1  ;;  %v4136_v35 = vpop.f32.mrb[15].mxu0  ;;  %v4738_v21 = vld [vmem:[#allocation11 + $0xd20] sm:$0xff]  ;;  %v4739_v9 = vld [vmem:[#allocation11 + $0xd28] sm:$0xff] }
 0x466   :  { %v4307_v44 = vmax.f32 %v18619_v26, 0.0  ;;  %v4300_v36 = vpop.f32.mrb[15].mxu1  ;;  %v17335_v26 = vcombine.low %v4727_v63, %v4731_v0  ;;  %v17342_v29 = vcombine.high %v4734_v19, %v4738_v21  ;;  %v17344_v30 = vcombine.high %v4735_v23, %v4739_v9  ;;  %v4743_v34 = vld [vmem:[#allocation11 + $0xd48] sm:$0xff]  ;;  %v4766_v37 = vld [vmem:[#allocation11 + $0xe00] sm:$0xff] }
 0x467   :  { %v4309_v10 = vmax.f32 %v18621_v59, 0.0  ;;  %v19701_v57 = vpack.c.bf16 %v4306_v32, %v4306_v32  ;;  %v4742_v32 = vld [vmem:[#allocation11 + $0xd40] sm:$0xff]  ;;  %v4747_v35 = vld [vmem:[#allocation11 + $0xd68] sm:$0xff]  ;;  %v17343_v36 = vcombine.low %v4735_v23, %v4739_v9 }
 0x468   :  { %v19699_v40 = vpack.c.bf16 %v4307_v44, %v4307_v44  ;;  %v4746_v59 = vld [vmem:[#allocation11 + $0xd60] sm:$0xff]  ;;  %v17341_v44 = vcombine.low %v4734_v19, %v4738_v21  ;;  %v17351_v42 = vcombine.low %v4743_v34, %v4747_v35  ;;  %v4767_v0 = vld [vmem:[#allocation11 + $0xe08] sm:$0xff] }
 0x469   :  { %v19705_v50 = vpack.c.bf16 %v4309_v10, %v4309_v10  ;;  %v17350_v38 = vcombine.high %v4742_v32, %v4746_v59  ;;  %v17352_v10 = vcombine.high %v4743_v34, %v4747_v35  ;;  %v4770_v63 = vld [vmem:[#allocation11 + $0xe20] sm:$0xff]  ;;  %v4775_v9 = vld [vmem:[#allocation11 + $0xe48] sm:$0xff] }
 0x46a   :  { %7546 = vmatprep.mubr.bf16.mxu0 %v19699_v40  ;;  %7710 = vmatprep.mubr.bf16.mxu1 %v19699_v40  ;;  %v4774_v21 = vld [vmem:[#allocation11 + $0xe40] sm:$0xff]  ;;  %v4783_v35 = vld [vmem:[#allocation11 + $0xe88] sm:$0xff] }
 0x46b   :  { %7547 = vmatmul.mubr.bf16.vlgmr.msra.gmra.mrb[16].mxu0 %v19701_v57  ;;  %7711 = vmatmul.mubr.bf16.vlgmr.msra.gmra.mrb[16].mxu1 %v19701_v57  ;;  %v4778_v23 = vld [vmem:[#allocation11 + $0xe60] sm:$0xff] }
 0x46c   :  { %7556 = vmatpush1.bf16.msra.mxu0 %v17309_v7  ;;  %7720 = vmatpush1.bf16.msra.mxu1 %v17311_v5  ;;  %v4755_v7 = vld [vmem:[#allocation11 + $0xda8] sm:$0xff]  ;;  %v17349_v5 = vcombine.low %v4742_v32, %v4746_v59  ;;  %v4782_v59 = vld [vmem:[#allocation11 + $0xe80] sm:$0xff] }
 0x46d   :  { %7587 = vmatprep.mubr.bf16.mxu0 %v19705_v50  ;;  %7751 = vmatprep.mubr.bf16.mxu1 %v19705_v50  ;;  %v4786_v34 = vld [vmem:[#allocation11 + $0xea0] sm:$0xff] }
 0x46e   :  { %7557 = vmatprep.subr.bf16.mxu0 %v17318_v46  ;;  %7721 = vmatprep.subr.bf16.mxu1 %v17320_v3  ;;  %v17358_v46 = vcombine.high %v4750_v2, %v4754_v39  ;;  %v17360_v3 = vcombine.high %v4751_v16, %v4755_v7 }
 0x470   :  { %7558 = vmatpush1.bf16.msra.mxu0 %v17317_v51  ;;  %7722 = vmatpush1.bf16.msra.mxu1 %v17319_v52  ;;  %v4763_v51 = vld [vmem:[#allocation11 + $0xde8] sm:$0xff]  ;;  %v17357_v52 = vcombine.low %v4750_v2, %v4754_v39  ;;  %v4790_v39 = vld [vmem:[#allocation11 + $0xec0] sm:$0xff] }
 0x471   :  { %7559 = vmatprep.subr.bf16.mxu0 %v17326_v53  ;;  %7723 = vmatprep.subr.bf16.mxu1 %v17328_v55  ;;  %v17359_v53 = vcombine.low %v4751_v16, %v4755_v7  ;;  %v17366_v55 = vcombine.high %v4758_v15, %v4762_v49  ;;  %v17368_v60 = vcombine.high %v4759_v14, %v4763_v51  ;;  %v4794_v16 = vld [vmem:[#allocation11 + $0xee0] sm:$0xff]  ;;  %v4791_v7 = vld [vmem:[#allocation11 + $0xec8] sm:$0xff] }
 0x474   :  { %7560 = vmatpush1.bf16.msra.mxu0 %v17325_v8  ;;  %7724 = vmatpush1.bf16.msra.mxu1 %v17327_v12  ;;  %v4771_v8 = vld [vmem:[#allocation11 + $0xe28] sm:$0xff]  ;;  %v17365_v12 = vcombine.low %v4758_v15, %v4762_v49  ;;  %v4798_v49 = vld [vmem:[#allocation11 + $0xf00] sm:$0xff] }
 0x475   :  { %7561 = vmatprep.subr.bf16.mxu0 %v17334_v17  ;;  %7725 = vmatprep.subr.bf16.mxu1 %v17336_v61  ;;  %v17367_v17 = vcombine.low %v4759_v14, %v4763_v51  ;;  %v17374_v61 = vcombine.high %v4766_v37, %v4770_v63  ;;  %v17376_v19 = vcombine.high %v4767_v0, %v4771_v8  ;;  %v4802_v14 = vld [vmem:[#allocation11 + $0xf20] sm:$0xff]  ;;  %v4799_v51 = vld [vmem:[#allocation11 + $0xf08] sm:$0xff] }
 0x478   :  { %7562 = vmatpush1.bf16.msra.mxu0 %v17333_v25  ;;  %7726 = vmatpush1.bf16.msra.mxu1 %v17335_v26  ;;  %v4779_v25 = vld [vmem:[#allocation11 + $0xe68] sm:$0xff]  ;;  %v17373_v26 = vcombine.low %v4766_v37, %v4770_v63  ;;  %v4806_v63 = vld [vmem:[#allocation11 + $0xf40] sm:$0xff] }
 0x479   :  { %7563 = vmatprep.subr.bf16.mxu0 %v17342_v29  ;;  %7727 = vmatprep.subr.bf16.mxu1 %v17344_v30  ;;  %v17375_v29 = vcombine.low %v4767_v0, %v4771_v8  ;;  %v17382_v30 = vcombine.high %v4774_v21, %v4778_v23  ;;  %v17384_v32 = vcombine.high %v4775_v9, %v4779_v25  ;;  %v4810_v0 = vld [vmem:[#allocation11 + $0xf60] sm:$0xff]  ;;  %v4807_v8 = vld [vmem:[#allocation11 + $0xf48] sm:$0xff] }
 0x47c   :  { %7564 = vmatpush1.bf16.msra.mxu0 %v17341_v44  ;;  %7728 = vmatpush1.bf16.msra.mxu1 %v17343_v36  ;;  %v4787_v44 = vld [vmem:[#allocation11 + $0xea8] sm:$0xff]  ;;  %v17381_v36 = vcombine.low %v4774_v21, %v4778_v23  ;;  %v4814_v23 = vld [vmem:[#allocation11 + $0xf80] sm:$0xff] }
 0x47d   :  { %7565 = vmatprep.subr.bf16.mxu0 %v17350_v38  ;;  %7729 = vmatprep.subr.bf16.mxu1 %v17352_v10  ;;  %v17383_v38 = vcombine.low %v4775_v9, %v4779_v25  ;;  %v17390_v10 = vcombine.high %v4782_v59, %v4786_v34  ;;  %v17392_v2 = vcombine.high %v4783_v35, %v4787_v44  ;;  %v4818_v9 = vld [vmem:[#allocation11 + $0xfa0] sm:$0xff]  ;;  %v4815_v25 = vld [vmem:[#allocation11 + $0xf88] sm:$0xff] }
 0x480   :  { %7566 = vmatpush1.bf16.msra.mxu0 %v17349_v5  ;;  %7730 = vmatpush1.bf16.msra.mxu1 %v17351_v42  ;;  %v4795_v5 = vld [vmem:[#allocation11 + $0xee8] sm:$0xff]  ;;  %v17389_v42 = vcombine.low %v4782_v59, %v4786_v34  ;;  %v17422_v59 = vcombine.high %v4814_v23, %v4818_v9 }
 0x481   :  { %7567 = vmatprep.subr.bf16.mxu0 %v17358_v46  ;;  %7731 = vmatprep.subr.bf16.mxu1 %v17360_v3  ;;  %v17391_v46 = vcombine.low %v4783_v35, %v4787_v44  ;;  %v17398_v3 = vcombine.high %v4790_v39, %v4794_v16  ;;  %v17400_v15 = vcombine.high %v4791_v7, %v4795_v5  ;;  %v4822_v35 = vld [vmem:[#allocation11 + $0xfc0] sm:$0xff] }
 0x482   :  { %v4826_v44 = vld [vmem:[#allocation11 + $0xfe0] sm:$0xff] }
 0x484   :  { %7568 = vmatpush1.bf16.msra.mxu0 %v17357_v52  ;;  %7732 = vmatpush1.bf16.msra.mxu1 %v17359_v53  ;;  %v4803_v52 = vld [vmem:[#allocation11 + $0xf28] sm:$0xff]  ;;  %v17397_v53 = vcombine.low %v4790_v39, %v4794_v16  ;;  %v17430_v16 = vcombine.high %v4822_v35, %v4826_v44 }
 0x485   :  { %7569 = vmatprep.subr.bf16.mxu0 %v17366_v55  ;;  %7733 = vmatprep.subr.bf16.mxu1 %v17368_v60  ;;  %v17399_v55 = vcombine.low %v4791_v7, %v4795_v5  ;;  %v17406_v60 = vcombine.high %v4798_v49, %v4802_v14  ;;  %v17408_v37 = vcombine.high %v4799_v51, %v4803_v52  ;;  %v4320_v5 = vld [vmem:[#allocation11 + $0x10] sm:$0xff] }
 0x488   :  { %7570 = vmatpush1.bf16.msra.mxu0 %v17365_v12  ;;  %7734 = vmatpush1.bf16.msra.mxu1 %v17367_v17  ;;  %v4811_v12 = vld [vmem:[#allocation11 + $0xf68] sm:$0xff]  ;;  %v17405_v17 = vcombine.low %v4798_v49, %v4802_v14 }
 0x489   :  { %7571 = vmatprep.subr.bf16.mxu0 %v17374_v61  ;;  %7735 = vmatprep.subr.bf16.mxu1 %v17376_v19  ;;  %v17407_v61 = vcombine.low %v4799_v51, %v4803_v52  ;;  %v17414_v19 = vcombine.high %v4806_v63, %v4810_v0  ;;  %v17416_v21 = vcombine.high %v4807_v8, %v4811_v12  ;;  %v4328_v52 = vld [vmem:[#allocation11 + $0x50] sm:$0xff] }
 0x48c   :  { %7572 = vmatpush1.bf16.msra.mxu0 %v17373_v26  ;;  %7736 = vmatpush1.bf16.msra.mxu1 %v17375_v29  ;;  %v4819_v26 = vld [vmem:[#allocation11 + $0xfa8] sm:$0xff]  ;;  %v17413_v29 = vcombine.low %v4806_v63, %v4810_v0 }
 0x48d   :  { %7573 = vmatprep.subr.bf16.mxu0 %v17382_v30  ;;  %7737 = vmatprep.subr.bf16.mxu1 %v17384_v32  ;;  %v17415_v30 = vcombine.low %v4807_v8, %v4811_v12  ;;  %v1073_v32 = vrot.slane %v19689_v18, %v19623_v22  ;;  %v17424_v34 = vcombine.high %v4815_v25, %v4819_v26  ;;  %v4324_v18 = vld [vmem:[#allocation11 + $0x30] sm:$0xff] }
 0x48e   :  { %v16930_v14 = vcombine.high %v4320_v5, %v4324_v18  ;;  %v4336_v12 = vld [vmem:[#allocation11 + $0x90] sm:$0xff] }
 0x48f   :  { %v18620_v39 = vadd.f32 %v19697_v24, %v1073_v32  ;;  %v4329_v24 = vld [vmem:[#allocation11 + $0x58] sm:$0xff] }
 0x490   :  { %7574 = vmatpush1.bf16.msra.mxu0 %v17381_v36  ;;  %7738 = vmatpush1.bf16.msra.mxu1 %v17383_v38  ;;  %v4823_v36 = vld [vmem:[#allocation11 + $0xfc8] sm:$0xff]  ;;  %v4349_v32 = vld [vmem:[#allocation11 + $0xf8] sm:$0xff] }
 0x491   :  { %7575 = vmatprep.subr.bf16.mxu0 %v17390_v10  ;;  %7739 = vmatprep.subr.bf16.mxu1 %v17392_v2  ;;  %v4827_v38 = vld [vmem:[#allocation11 + $0xfe8] sm:$0xff]  ;;  %v17421_v10 = vcombine.low %v4814_v23, %v4818_v9  ;;  %v17423_v2 = vcombine.low %v4815_v25, %v4819_v26  ;;  %v4308_v49 = vmax.f32 %v18620_v39, 0.0  ;;  %v4344_v26 = vld [vmem:[#allocation11 + $0xd0] sm:$0xff] }
 0x492   :  { %v17432_v7 = vcombine.high %v4823_v36, %v4827_v38 }
 0x494   :  { %7576 = vmatpush1.bf16.msra.mxu0 %v17389_v42  ;;  %7740 = vmatpush1.bf16.msra.mxu1 %v17391_v46  ;;  %v4321_v42 = vld [vmem:[#allocation11 + $0x18] sm:$0xff] }
 0x495   :  { %7577 = vmatprep.subr.bf16.mxu0 %v17398_v3  ;;  %7741 = vmatprep.subr.bf16.mxu1 %v17400_v15  ;;  %v4325_v46 = vld [vmem:[#allocation11 + $0x38] sm:$0xff]  ;;  %v17429_v3 = vcombine.low %v4822_v35, %v4826_v44  ;;  %v17431_v15 = vcombine.low %v4823_v36, %v4827_v38  ;;  %v4352_v36 = vld [vmem:[#allocation11 + $0x110] sm:$0xff] }
 0x496   :  { %v16932_v51 = vcombine.high %v4321_v42, %v4325_v46  ;;  %v16931_v63 = vcombine.low %v4321_v42, %v4325_v46  ;;  %v4356_v38 = vld [vmem:[#allocation11 + $0x130] sm:$0xff]  ;;  %v4361_v42 = vld [vmem:[#allocation11 + $0x158] sm:$0xff] }
 0x497   :  { %v4365_v46 = vld [vmem:[#allocation11 + $0x178] sm:$0xff] }
 0x498   :  { %7578 = vmatpush1.bf16.msra.mxu0 %v17397_v53  ;;  %7742 = vmatpush1.bf16.msra.mxu1 %v17399_v55  ;;  %v4332_v53 = vld [vmem:[#allocation11 + $0x70] sm:$0xff]  ;;  %v4333_v55 = vld [vmem:[#allocation11 + $0x78] sm:$0xff] }
 0x499   :  { %7579 = vmatprep.subr.bf16.mxu0 %v17406_v60  ;;  %7743 = vmatprep.subr.bf16.mxu1 %v17408_v37  ;;  %v16929_v60 = vcombine.low %v4320_v5, %v4324_v18  ;;  %v19714_v37 = vpack.c.bf16 %v4308_v49, %v4308_v49  ;;  %v16938_v0 = vcombine.high %v4328_v52, %v4332_v53  ;;  %v4360_v5 = vld [vmem:[#allocation11 + $0x150] sm:$0xff] }
 0x49a   :  { %v16940_v8 = vcombine.high %v4329_v24, %v4333_v55  ;;  %v16939_v23 = vcombine.low %v4329_v24, %v4333_v55  ;;  %v4364_v18 = vld [vmem:[#allocation11 + $0x170] sm:$0xff]  ;;  %v4373_v24 = vld [vmem:[#allocation11 + $0x1b8] sm:$0xff] }
 0x49b   :  { %v16970_v49 = vcombine.high %v4360_v5, %v4364_v18  ;;  %v16969_v55 = vcombine.low %v4360_v5, %v4364_v18  ;;  %v4404_v5 = vld [vmem:[#allocation11 + $0x2b0] sm:$0xff]  ;;  %v4401_v18 = vld [vmem:[#allocation11 + $0x298] sm:$0xff] }
 0x49c   :  { %7580 = vmatpush1.bf16.msra.mxu0 %v17405_v17  ;;  %7744 = vmatpush1.bf16.msra.mxu1 %v17407_v61  ;;  %v4340_v17 = vld [vmem:[#allocation11 + $0xb0] sm:$0xff]  ;;  %v4337_v61 = vld [vmem:[#allocation11 + $0x98] sm:$0xff] }
 0x49d   :  { %7581 = vmatprep.subr.bf16.mxu0 %v17414_v19  ;;  %7745 = vmatprep.subr.bf16.mxu1 %v17416_v21  ;;  %v4341_v19 = vld [vmem:[#allocation11 + $0xb8] sm:$0xff]  ;;  %v16937_v21 = vcombine.low %v4328_v52, %v4332_v53  ;;  %v16946_v9 = vcombine.high %v4336_v12, %v4340_v17  ;;  %v4372_v52 = vld [vmem:[#allocation11 + $0x1b0] sm:$0xff] }
 0x49e   :  { %v16948_v25 = vcombine.high %v4337_v61, %v4341_v19  ;;  %v4369_v53 = vld [vmem:[#allocation11 + $0x198] sm:$0xff] }
 0x4a0   :  { %7582 = vmatpush1.bf16.msra.mxu0 %v17413_v29  ;;  %7746 = vmatpush1.bf16.msra.mxu1 %v17415_v30  ;;  %v4348_v29 = vld [vmem:[#allocation11 + $0xf0] sm:$0xff]  ;;  %v4345_v30 = vld [vmem:[#allocation11 + $0xd8] sm:$0xff] }
 0x4a1   :  { %7583 = vmatprep.subr.bf16.mxu0 %v17422_v59  ;;  %7747 = vmatprep.subr.bf16.mxu1 %v17424_v34  ;;  %v16945_v59 = vcombine.low %v4336_v12, %v4340_v17  ;;  %v16947_v34 = vcombine.low %v4337_v61, %v4341_v19  ;;  %v16954_v35 = vcombine.high %v4344_v26, %v4348_v29  ;;  %v4380_v12 = vld [vmem:[#allocation11 + $0x1f0] sm:$0xff]  ;;  %v4377_v17 = vld [vmem:[#allocation11 + $0x1d8] sm:$0xff] }
 0x4a2   :  { %v16956_v44 = vcombine.high %v4345_v30, %v4349_v32  ;;  %v16955_v39 = vcombine.low %v4345_v30, %v4349_v32  ;;  %v4381_v61 = vld [vmem:[#allocation11 + $0x1f8] sm:$0xff] }
 0x4a3   :  { %v4389_v30 = vld [vmem:[#allocation11 + $0x238] sm:$0xff] }
 0x4a4   :  { %7584 = vmatpush1.bf16.msra.mxu0 %v17421_v10  ;;  %7748 = vmatpush1.bf16.msra.mxu1 %v17423_v2  ;;  %v4357_v10 = vld [vmem:[#allocation11 + $0x138] sm:$0xff]  ;;  %v16953_v2 = vcombine.low %v4344_v26, %v4348_v29  ;;  %v4388_v26 = vld [vmem:[#allocation11 + $0x230] sm:$0xff] }
 0x4a5   :  { %7585 = vmatprep.subr.bf16.mxu0 %v17430_v16  ;;  %7749 = vmatprep.subr.bf16.mxu1 %v17432_v7  ;;  %v16962_v16 = vcombine.high %v4352_v36, %v4356_v38  ;;  %v4385_v29 = vld [vmem:[#allocation11 + $0x218] sm:$0xff] }
 0x4a8   :  { %7586 = vmatpush1.bf16.msra.mxu0 %v17429_v3  ;;  %7750 = vmatpush1.bf16.msra.mxu1 %v17431_v15  ;;  %v16961_v3 = vcombine.low %v4352_v36, %v4356_v38  ;;  %v4396_v36 = vld [vmem:[#allocation11 + $0x270] sm:$0xff]  ;;  %v4393_v38 = vld [vmem:[#allocation11 + $0x258] sm:$0xff] }
 0x4a9   :  { %7760 = vmatprep.subr.bf16.mxu0 %v16930_v14  ;;  %7924 = vmatprep.subr.bf16.mxu1 %v16932_v51  ;;  %v16972_v14 = vcombine.high %v4361_v42, %v4365_v46  ;;  %v4368_v51 = vld [vmem:[#allocation11 + $0x190] sm:$0xff] }
 0x4aa   :  { %v16977_v19 = vcombine.low %v4368_v51, %v4372_v52 }
 0x4ab   :  { %7588 = vmatmul.mubr.bf16.vlgmr.msra.gmra.mrb[16].mxu0 %v19714_v37  ;;  %7752 = vmatmul.mubr.bf16.vlgmr.msra.gmra.mrb[16].mxu1 %v19714_v37 }
 0x4ac   :  { %7761 = vmatpush1.bf16.msra.mxu0 %v16929_v60  ;;  %7792 = vmatprep.mubr.bf16.mxu0 %v19662_v27  ;;  %v16971_v60 = vcombine.low %v4361_v42, %v4365_v46  ;;  %v4405_v42 = vld [vmem:[#allocation11 + $0x2b8] sm:$0xff] }
 0x4ad   :  { %7925 = vmatpush1.bf16.msra.mxu1 %v16931_v63  ;;  %7956 = vmatprep.mubr.bf16.mxu1 %v19662_v27  ;;  %v4353_v27 = vld [vmem:[#allocation11 + $0x118] sm:$0xff]  ;;  %v16978_v63 = vcombine.high %v4368_v51, %v4372_v52  ;;  %v4412_v51 = vld [vmem:[#allocation11 + $0x2f0] sm:$0xff] }
 0x4ae   :  { %7762 = vmatprep.subr.bf16.mxu0 %v16938_v0  ;;  %7926 = vmatprep.subr.bf16.mxu1 %v16940_v8  ;;  %v16964_v7 = vcombine.high %v4353_v27, %v4357_v10  ;;  %v16963_v15 = vcombine.low %v4353_v27, %v4357_v10  ;;  %v16980_v0 = vcombine.high %v4369_v53, %v4373_v24  ;;  %v4376_v8 = vld [vmem:[#allocation11 + $0x1d0] sm:$0xff]  ;;  %v4397_v27 = vld [vmem:[#allocation11 + $0x278] sm:$0xff] }
 0x4af   :  { %v16985_v32 = vcombine.low %v4376_v8, %v4380_v12  ;;  %v4409_v52 = vld [vmem:[#allocation11 + $0x2d8] sm:$0xff] }
 0x4b0   :  { %7763 = vmatpush1.bf16.msra.mxu0 %v16937_v21  ;;  %v16979_v21 = vcombine.low %v4369_v53, %v4373_v24  ;;  %v4413_v53 = vld [vmem:[#allocation11 + $0x2f8] sm:$0xff] }
 0x4b1   :  { %7927 = vmatpush1.bf16.msra.mxu1 %v16939_v23  ;;  %7764 = vmatprep.subr.bf16.mxu0 %v16946_v9  ;;  %v16986_v23 = vcombine.high %v4376_v8, %v4380_v12  ;;  %v16988_v9 = vcombine.high %v4377_v17, %v4381_v61  ;;  %v4420_v8 = vld [vmem:[#allocation11 + $0x330] sm:$0xff]  ;;  %v4417_v12 = vld [vmem:[#allocation11 + $0x318] sm:$0xff] }
 0x4b2   :  { %7928 = vmatprep.subr.bf16.mxu1 %v16948_v25  ;;  %v4384_v25 = vld [vmem:[#allocation11 + $0x210] sm:$0xff] }
 0x4b3   :  { %v16993_v10 = vcombine.low %v4384_v25, %v4388_v26 }
 0x4b4   :  { %7765 = vmatpush1.bf16.msra.mxu0 %v16945_v59  ;;  %v16987_v59 = vcombine.low %v4377_v17, %v4381_v61  ;;  %v4421_v17 = vld [vmem:[#allocation11 + $0x338] sm:$0xff] }
 0x4b5   :  { %7929 = vmatpush1.bf16.msra.mxu1 %v16947_v34  ;;  %7766 = vmatprep.subr.bf16.mxu0 %v16954_v35  ;;  %v16994_v34 = vcombine.high %v4384_v25, %v4388_v26  ;;  %v16996_v35 = vcombine.high %v4385_v29, %v4389_v30  ;;  %v4428_v25 = vld [vmem:[#allocation11 + $0x370] sm:$0xff]  ;;  %v4425_v26 = vld [vmem:[#allocation11 + $0x358] sm:$0xff] }
 0x4b6   :  { %7930 = vmatprep.subr.bf16.mxu1 %v16956_v44  ;;  %v4392_v44 = vld [vmem:[#allocation11 + $0x250] sm:$0xff] }
 0x4b7   :  { %v17001_v46 = vcombine.low %v4392_v44, %v4396_v36 }
 0x4b8   :  { %7767 = vmatpush1.bf16.msra.mxu0 %v16953_v2  ;;  %v16995_v2 = vcombine.low %v4385_v29, %v4389_v30  ;;  %v4429_v29 = vld [vmem:[#allocation11 + $0x378] sm:$0xff] }
 0x4b9   :  { %7931 = vmatpush1.bf16.msra.mxu1 %v16955_v39  ;;  %7768 = vmatprep.subr.bf16.mxu0 %v16962_v16  ;;  %v17002_v39 = vcombine.high %v4392_v44, %v4396_v36  ;;  %v17004_v16 = vcombine.high %v4393_v38, %v4397_v27  ;;  %v4436_v44 = vld [vmem:[#allocation11 + $0x3b0] sm:$0xff]  ;;  %v4433_v36 = vld [vmem:[#allocation11 + $0x398] sm:$0xff] }
 0x4ba   :  { %7932 = vmatprep.subr.bf16.mxu1 %v16964_v7  ;;  %v4400_v7 = vld [vmem:[#allocation11 + $0x290] sm:$0xff] }
 0x4bb   :  { %v17009_v24 = vcombine.low %v4400_v7, %v4404_v5 }
 0x4bc   :  { %7769 = vmatpush1.bf16.msra.mxu0 %v16961_v3  ;;  %v17003_v3 = vcombine.low %v4393_v38, %v4397_v27  ;;  %v4437_v38 = vld [vmem:[#allocation11 + $0x3b8] sm:$0xff] }
 0x4bd   :  { %7933 = vmatpush1.bf16.msra.mxu1 %v16963_v15  ;;  %7770 = vmatprep.subr.bf16.mxu0 %v16970_v49  ;;  %v17010_v15 = vcombine.high %v4400_v7, %v4404_v5  ;;  %v17012_v49 = vcombine.high %v4401_v18, %v4405_v42  ;;  %v4444_v7 = vld [vmem:[#allocation11 + $0x3f0] sm:$0xff]  ;;  %v4441_v5 = vld [vmem:[#allocation11 + $0x3d8] sm:$0xff] }
 0x4be   :  { %7934 = vmatprep.subr.bf16.mxu1 %v16972_v14  ;;  %v4408_v14 = vld [vmem:[#allocation11 + $0x2d0] sm:$0xff] }
 0x4bf   :  { %v17017_v61 = vcombine.low %v4408_v14, %v4412_v51 }
 0x4c0   :  { %7771 = vmatpush1.bf16.msra.mxu0 %v16969_v55  ;;  %v17011_v55 = vcombine.low %v4401_v18, %v4405_v42  ;;  %v4445_v18 = vld [vmem:[#allocation11 + $0x3f8] sm:$0xff] }
 0x4c1   :  { %7935 = vmatpush1.bf16.msra.mxu1 %v16971_v60  ;;  %7772 = vmatprep.subr.bf16.mxu0 %v16978_v63  ;;  %v17018_v60 = vcombine.high %v4408_v14, %v4412_v51  ;;  %v17020_v63 = vcombine.high %v4409_v52, %v4413_v53  ;;  %v4452_v14 = vld [vmem:[#allocation11 + $0x430] sm:$0xff]  ;;  %v4449_v51 = vld [vmem:[#allocation11 + $0x418] sm:$0xff] }
 0x4c2   :  { %7936 = vmatprep.subr.bf16.mxu1 %v16980_v0  ;;  %v4416_v0 = vld [vmem:[#allocation11 + $0x310] sm:$0xff] }
 0x4c3   :  { %v17025_v30 = vcombine.low %v4416_v0, %v4420_v8 }
 0x4c4   :  { %7773 = vmatpush1.bf16.msra.mxu0 %v16977_v19  ;;  %v17019_v19 = vcombine.low %v4409_v52, %v4413_v53  ;;  %v4453_v52 = vld [vmem:[#allocation11 + $0x438] sm:$0xff] }
 0x4c5   :  { %7937 = vmatpush1.bf16.msra.mxu1 %v16979_v21  ;;  %7774 = vmatprep.subr.bf16.mxu0 %v16986_v23  ;;  %v17026_v21 = vcombine.high %v4416_v0, %v4420_v8  ;;  %v17028_v23 = vcombine.high %v4417_v12, %v4421_v17  ;;  %v4460_v0 = vld [vmem:[#allocation11 + $0x470] sm:$0xff] }
 0x4c6   :  { %7938 = vmatprep.subr.bf16.mxu1 %v16988_v9  ;;  %v4424_v9 = vld [vmem:[#allocation11 + $0x350] sm:$0xff] }
 0x4c7   :  { %v17033_v27 = vcombine.low %v4424_v9, %v4428_v25 }
 0x4c8   :  { %7775 = vmatpush1.bf16.msra.mxu0 %v16985_v32  ;;  %v17027_v32 = vcombine.low %v4417_v12, %v4421_v17  ;;  %v4457_v12 = vld [vmem:[#allocation11 + $0x458] sm:$0xff] }
 0x4c9   :  { %7939 = vmatpush1.bf16.msra.mxu1 %v16987_v59  ;;  %7776 = vmatprep.subr.bf16.mxu0 %v16994_v34  ;;  %v17034_v59 = vcombine.high %v4424_v9, %v4428_v25  ;;  %v17036_v34 = vcombine.high %v4425_v26, %v4429_v29  ;;  %v4461_v17 = vld [vmem:[#allocation11 + $0x478] sm:$0xff] }
 0x4ca   :  { %7940 = vmatprep.subr.bf16.mxu1 %v16996_v35  ;;  %v4432_v35 = vld [vmem:[#allocation11 + $0x390] sm:$0xff]  ;;  %v17068_v9 = vcombine.high %v4457_v12, %v4461_v17  ;;  %v4465_v25 = vld [vmem:[#allocation11 + $0x498] sm:$0xff] }
 0x4cb   :  { %v17041_v42 = vcombine.low %v4432_v35, %v4436_v44 }
 0x4cc   :  { %7777 = vmatpush1.bf16.msra.mxu0 %v16993_v10  ;;  %v17035_v10 = vcombine.low %v4425_v26, %v4429_v29  ;;  %v4469_v26 = vld [vmem:[#allocation11 + $0x4b8] sm:$0xff] }
 0x4cd   :  { %7941 = vmatpush1.bf16.msra.mxu1 %v16995_v2  ;;  %7778 = vmatprep.subr.bf16.mxu0 %v17002_v39  ;;  %v17042_v2 = vcombine.high %v4432_v35, %v4436_v44  ;;  %v17044_v39 = vcombine.high %v4433_v36, %v4437_v38  ;;  %v4476_v35 = vld [vmem:[#allocation11 + $0x4f0] sm:$0xff]  ;;  %v4473_v44 = vld [vmem:[#allocation11 + $0x4d8] sm:$0xff] }
 0x4ce   :  { %7942 = vmatprep.subr.bf16.mxu1 %v17004_v16  ;;  %v4440_v16 = vld [vmem:[#allocation11 + $0x3d0] sm:$0xff] }
 0x4cf   :  { %v17049_v53 = vcombine.low %v4440_v16, %v4444_v7 }
 0x4d0   :  { %7779 = vmatpush1.bf16.msra.mxu0 %v17001_v46  ;;  %v17043_v46 = vcombine.low %v4433_v36, %v4437_v38  ;;  %v4477_v36 = vld [vmem:[#allocation11 + $0x4f8] sm:$0xff] }
 0x4d1   :  { %7943 = vmatpush1.bf16.msra.mxu1 %v17003_v3  ;;  %7780 = vmatprep.subr.bf16.mxu0 %v17010_v15  ;;  %v17050_v3 = vcombine.high %v4440_v16, %v4444_v7  ;;  %v17052_v15 = vcombine.high %v4441_v5, %v4445_v18  ;;  %v4481_v16 = vld [vmem:[#allocation11 + $0x518] sm:$0xff] }
 0x4d2   :  { %7944 = vmatprep.subr.bf16.mxu1 %v17012_v49  ;;  %v4448_v49 = vld [vmem:[#allocation11 + $0x410] sm:$0xff]  ;;  %v4485_v7 = vld [vmem:[#allocation11 + $0x538] sm:$0xff] }
 0x4d3   :  { %v17057_v8 = vcombine.low %v4448_v49, %v4452_v14 }
 0x4d4   :  { %7781 = vmatpush1.bf16.msra.mxu0 %v17009_v24  ;;  %v17051_v24 = vcombine.low %v4441_v5, %v4445_v18  ;;  %v17083_v5 = vcombine.low %v4473_v44, %v4477_v36 }
 0x4d5   :  { %7945 = vmatpush1.bf16.msra.mxu1 %v17011_v55  ;;  %7782 = vmatprep.subr.bf16.mxu0 %v17018_v60  ;;  %v17058_v55 = vcombine.high %v4448_v49, %v4452_v14  ;;  %v17060_v60 = vcombine.high %v4449_v51, %v4453_v52  ;;  %v4493_v49 = vld [vmem:[#allocation11 + $0x578] sm:$0xff] }
 0x4d6   :  { %7946 = vmatprep.subr.bf16.mxu1 %v17020_v63  ;;  %v4456_v63 = vld [vmem:[#allocation11 + $0x450] sm:$0xff] }
 0x4d7   :  { %v17065_v29 = vcombine.low %v4456_v63, %v4460_v0 }
 0x4d8   :  { %7783 = vmatpush1.bf16.msra.mxu0 %v17017_v61  ;;  %v17059_v61 = vcombine.low %v4449_v51, %v4453_v52  ;;  %v17091_v51 = vcombine.low %v4481_v16, %v4485_v7 }
 0x4d9   :  { %7947 = vmatpush1.bf16.msra.mxu1 %v17019_v19  ;;  %7784 = vmatprep.subr.bf16.mxu0 %v17026_v21  ;;  %v17066_v19 = vcombine.high %v4456_v63, %v4460_v0  ;;  %v4464_v21 = vld [vmem:[#allocation11 + $0x490] sm:$0xff]  ;;  %v4501_v63 = vld [vmem:[#allocation11 + $0x5b8] sm:$0xff] }
 0x4da   :  { %7948 = vmatprep.subr.bf16.mxu1 %v17028_v23  ;;  %v4468_v23 = vld [vmem:[#allocation11 + $0x4b0] sm:$0xff] }
 0x4db   :  { %v17073_v38 = vcombine.low %v4464_v21, %v4468_v23 }
 0x4dc   :  { %7785 = vmatpush1.bf16.msra.mxu0 %v17025_v30  ;;  %v17067_v30 = vcombine.low %v4457_v12, %v4461_v17 }
 0x4dd   :  { %7949 = vmatpush1.bf16.msra.mxu1 %v17027_v32  ;;  %7786 = vmatprep.subr.bf16.mxu0 %v17034_v59  ;;  %v17074_v32 = vcombine.high %v4464_v21, %v4468_v23  ;;  %v17076_v59 = vcombine.high %v4465_v25, %v4469_v26  ;;  %v4505_v21 = vld [vmem:[#allocation11 + $0x5d8] sm:$0xff] }
 0x4de   :  { %7950 = vmatprep.subr.bf16.mxu1 %v17036_v34  ;;  %v4472_v34 = vld [vmem:[#allocation11 + $0x4d0] sm:$0xff]  ;;  %v4509_v23 = vld [vmem:[#allocation11 + $0x5f8] sm:$0xff] }
 0x4e0   :  { %7787 = vmatpush1.bf16.msra.mxu0 %v17033_v27  ;;  %v17082_v27 = vcombine.high %v4472_v34, %v4476_v35 }
 0x4e1   :  { %7951 = vmatpush1.bf16.msra.mxu1 %v17035_v10  ;;  %7788 = vmatprep.subr.bf16.mxu0 %v17042_v2  ;;  %v17084_v10 = vcombine.high %v4473_v44, %v4477_v36  ;;  %v4480_v2 = vld [vmem:[#allocation11 + $0x510] sm:$0xff]  ;;  %v17115_v44 = vcombine.low %v4505_v21, %v4509_v23 }
 0x4e2   :  { %7952 = vmatprep.subr.bf16.mxu1 %v17044_v39  ;;  %v4484_v39 = vld [vmem:[#allocation11 + $0x530] sm:$0xff] }
 0x4e3   :  { %v17090_v18 = vcombine.high %v4480_v2, %v4484_v39  ;;  %v17089_v14 = vcombine.low %v4480_v2, %v4484_v39  ;;  %v4525_v2 = vld [vmem:[#allocation11 + $0x678] sm:$0xff] }
 0x4e4   :  { %7789 = vmatpush1.bf16.msra.mxu0 %v17041_v42  ;;  %v17092_v42 = vcombine.high %v4481_v16, %v4485_v7 }
 0x4e5   :  { %7953 = vmatpush1.bf16.msra.mxu1 %v17043_v46  ;;  %7790 = vmatprep.subr.bf16.mxu0 %v17050_v3  ;;  %v4488_v46 = vld [vmem:[#allocation11 + $0x550] sm:$0xff] }
 0x4e6   :  { %7954 = vmatprep.subr.bf16.mxu1 %v17052_v15  ;;  %v4492_v3 = vld [vmem:[#allocation11 + $0x570] sm:$0xff]  ;;  %v4489_v15 = vld [vmem:[#allocation11 + $0x558] sm:$0xff] }
 0x4e7   :  { %v17098_v52 = vcombine.high %v4488_v46, %v4492_v3  ;;  %v17097_v0 = vcombine.low %v4488_v46, %v4492_v3  ;;  %v4533_v46 = vld [vmem:[#allocation11 + $0x6b8] sm:$0xff] }
 0x4e8   :  { %7791 = vmatpush1.bf16.msra.mxu0 %v17049_v53  ;;  %v17100_v53 = vcombine.high %v4489_v15, %v4493_v49 }
 0x4e9   :  { %7955 = vmatpush1.bf16.msra.mxu1 %v17051_v24  ;;  %7801 = vmatprep.subr.bf16.mxu0 %v17058_v55  ;;  %v4496_v24 = vld [vmem:[#allocation11 + $0x590] sm:$0xff] }
 0x4ea   :  { %7965 = vmatprep.subr.bf16.mxu1 %v17060_v60  ;;  %v4500_v55 = vld [vmem:[#allocation11 + $0x5b0] sm:$0xff]  ;;  %v4497_v60 = vld [vmem:[#allocation11 + $0x598] sm:$0xff] }
 0x4eb   :  { %7793 = vmatmul.mubr.bf16.vlgmr.msra.gmra.mrb[20].mxu0 %v19674_v28  ;;  %v17106_v12 = vcombine.high %v4496_v24, %v4500_v55  ;;  %v17108_v17 = vcombine.high %v4497_v60, %v4501_v63 }
 0x4ec   :  { %7957 = vmatmul.mubr.bf16.vlgmr.msra.gmra.mrb[20].mxu1 %v19674_v28  ;;  %7802 = vmatpush1.bf16.msra.mxu0 %v17057_v8  ;;  %v17075_v28 = vcombine.low %v4465_v25, %v4469_v26  ;;  %v17099_v8 = vcombine.low %v4489_v15, %v4493_v49  ;;  %v17107_v25 = vcombine.low %v4497_v60, %v4501_v63 }
 0x4ed   :  { %7833 = vmatprep.mubr.bf16.mxu0 %v19676_v33  ;;  %7966 = vmatpush1.bf16.msra.mxu1 %v17059_v61  ;;  %v4504_v61 = vld [vmem:[#allocation11 + $0x5d0] sm:$0xff] }
 0x4ee   :  { %7997 = vmatprep.mubr.bf16.mxu1 %v19676_v33  ;;  %7803 = vmatprep.subr.bf16.mxu0 %v17066_v19  ;;  %v17081_v33 = vcombine.low %v4472_v34, %v4476_v35  ;;  %v4508_v19 = vld [vmem:[#allocation11 + $0x5f0] sm:$0xff]  ;;  %v4517_v34 = vld [vmem:[#allocation11 + $0x638] sm:$0xff] }
 0x4ef   :  { %7967 = vmatprep.subr.bf16.mxu1 %v17068_v9  ;;  %v17105_v9 = vcombine.low %v4496_v24, %v4500_v55  ;;  %v17114_v26 = vcombine.high %v4504_v61, %v4508_v19  ;;  %v17113_v35 = vcombine.low %v4504_v61, %v4508_v19  ;;  %v4541_v24 = vld [vmem:[#allocation11 + $0x6f8] sm:$0xff] }
 0x4f0   :  { %7804 = vmatpush1.bf16.msra.mxu0 %v17065_v29  ;;  %v17116_v29 = vcombine.high %v4505_v21, %v4509_v23  ;;  %v4549_v61 = vld [vmem:[#allocation11 + $0x738] sm:$0xff] }
 0x4f1   :  { %7968 = vmatpush1.bf16.msra.mxu1 %v17067_v30  ;;  %7805 = vmatprep.subr.bf16.mxu0 %v17074_v32  ;;  %v4512_v30 = vld [vmem:[#allocation11 + $0x610] sm:$0xff] }
 0x4f2   :  { %7969 = vmatprep.subr.bf16.mxu1 %v17076_v59  ;;  %v4516_v32 = vld [vmem:[#allocation11 + $0x630] sm:$0xff]  ;;  %v4513_v59 = vld [vmem:[#allocation11 + $0x618] sm:$0xff] }
 0x4f3   :  { %v17122_v36 = vcombine.high %v4512_v30, %v4516_v32  ;;  %v17121_v39 = vcombine.low %v4512_v30, %v4516_v32  ;;  %v17123_v16 = vcombine.low %v4513_v59, %v4517_v34  ;;  %v4557_v30 = vld [vmem:[#allocation11 + $0x778] sm:$0xff] }
 0x4f4   :  { %7806 = vmatpush1.bf16.msra.mxu0 %v17073_v38  ;;  %v17124_v38 = vcombine.high %v4513_v59, %v4517_v34 }
 0x4f5   :  { %7970 = vmatpush1.bf16.msra.mxu1 %v17075_v28  ;;  %7807 = vmatprep.subr.bf16.mxu0 %v17082_v27  ;;  %v4520_v28 = vld [vmem:[#allocation11 + $0x650] sm:$0xff] }
 0x4f6   :  { %7971 = vmatprep.subr.bf16.mxu1 %v17084_v10  ;;  %v4524_v27 = vld [vmem:[#allocation11 + $0x670] sm:$0xff]  ;;  %v4521_v10 = vld [vmem:[#allocation11 + $0x658] sm:$0xff] }
 0x4f7   :  { %v17130_v7 = vcombine.high %v4520_v28, %v4524_v27  ;;  %v17129_v3 = vcombine.low %v4520_v28, %v4524_v27  ;;  %v17131_v15 = vcombine.low %v4521_v10, %v4525_v2  ;;  %v4565_v28 = vld [vmem:[#allocation11 + $0x7b8] sm:$0xff] }
 0x4f8   :  { %7808 = vmatpush1.bf16.msra.mxu0 %v17081_v33  ;;  %v17132_v33 = vcombine.high %v4521_v10, %v4525_v2 }
 0x4f9   :  { %7972 = vmatpush1.bf16.msra.mxu1 %v17083_v5  ;;  %7809 = vmatprep.subr.bf16.mxu0 %v17090_v18  ;;  %v4528_v5 = vld [vmem:[#allocation11 + $0x690] sm:$0xff] }
 0x4fa   :  { %7973 = vmatprep.subr.bf16.mxu1 %v17092_v42  ;;  %v4532_v18 = vld [vmem:[#allocation11 + $0x6b0] sm:$0xff]  ;;  %v4529_v42 = vld [vmem:[#allocation11 + $0x698] sm:$0xff] }
 0x4fb   :  { %v17138_v49 = vcombine.high %v4528_v5, %v4532_v18  ;;  %v17137_v55 = vcombine.low %v4528_v5, %v4532_v18  ;;  %v17139_v60 = vcombine.low %v4529_v42, %v4533_v46  ;;  %v4573_v5 = vld [vmem:[#allocation11 + $0x7f8] sm:$0xff] }
 0x4fc   :  { %7810 = vmatpush1.bf16.msra.mxu0 %v17089_v14  ;;  %v17140_v14 = vcombine.high %v4529_v42, %v4533_v46 }
 0x4fd   :  { %7974 = vmatpush1.bf16.msra.mxu1 %v17091_v51  ;;  %7811 = vmatprep.subr.bf16.mxu0 %v17098_v52  ;;  %v4536_v51 = vld [vmem:[#allocation11 + $0x6d0] sm:$0xff] }
 0x4fe   :  { %7975 = vmatprep.subr.bf16.mxu1 %v17100_v53  ;;  %v4540_v52 = vld [vmem:[#allocation11 + $0x6f0] sm:$0xff]  ;;  %v4537_v53 = vld [vmem:[#allocation11 + $0x6d8] sm:$0xff] }
 0x4ff   :  { %v17146_v63 = vcombine.high %v4536_v51, %v4540_v52  ;;  %v17145_v19 = vcombine.low %v4536_v51, %v4540_v52  ;;  %v17147_v21 = vcombine.low %v4537_v53, %v4541_v24  ;;  %v4581_v51 = vld [vmem:[#allocation11 + $0x838] sm:$0xff] }
 0x500   :  { %7812 = vmatpush1.bf16.msra.mxu0 %v17097_v0  ;;  %v17148_v0 = vcombine.high %v4537_v53, %v4541_v24 }
 0x501   :  { %7976 = vmatpush1.bf16.msra.mxu1 %v17099_v8  ;;  %7813 = vmatprep.subr.bf16.mxu0 %v17106_v12  ;;  %v4544_v8 = vld [vmem:[#allocation11 + $0x710] sm:$0xff] }
 0x502   :  { %7977 = vmatprep.subr.bf16.mxu1 %v17108_v17  ;;  %v4548_v12 = vld [vmem:[#allocation11 + $0x730] sm:$0xff]  ;;  %v4545_v17 = vld [vmem:[#allocation11 + $0x718] sm:$0xff] }
 0x503   :  { %v17154_v23 = vcombine.high %v4544_v8, %v4548_v12  ;;  %v17153_v32 = vcombine.low %v4544_v8, %v4548_v12  ;;  %v17155_v59 = vcombine.low %v4545_v17, %v4549_v61  ;;  %v4585_v8 = vld [vmem:[#allocation11 + $0x858] sm:$0xff] }
 0x504   :  { %7814 = vmatpush1.bf16.msra.mxu0 %v17105_v9  ;;  %v17156_v9 = vcombine.high %v4545_v17, %v4549_v61  ;;  %v4589_v12 = vld [vmem:[#allocation11 + $0x878] sm:$0xff] }
 0x505   :  { %7978 = vmatpush1.bf16.msra.mxu1 %v17107_v25  ;;  %7815 = vmatprep.subr.bf16.mxu0 %v17114_v26  ;;  %v4552_v25 = vld [vmem:[#allocation11 + $0x750] sm:$0xff] }
 0x506   :  { %7979 = vmatprep.subr.bf16.mxu1 %v17116_v29  ;;  %v4556_v26 = vld [vmem:[#allocation11 + $0x770] sm:$0xff]  ;;  %v4553_v29 = vld [vmem:[#allocation11 + $0x758] sm:$0xff] }
 0x507   :  { %v17162_v34 = vcombine.high %v4552_v25, %v4556_v26  ;;  %v17161_v27 = vcombine.low %v4552_v25, %v4556_v26  ;;  %v17163_v10 = vcombine.low %v4553_v29, %v4557_v30  ;;  %v4597_v25 = vld [vmem:[#allocation11 + $0x8b8] sm:$0xff] }
 0x508   :  { %7816 = vmatpush1.bf16.msra.mxu0 %v17113_v35  ;;  %v17164_v35 = vcombine.high %v4553_v29, %v4557_v30  ;;  %v17195_v29 = vcombine.low %v4585_v8, %v4589_v12 }
 0x509   :  { %7980 = vmatpush1.bf16.msra.mxu1 %v17115_v44  ;;  %7817 = vmatprep.subr.bf16.mxu0 %v17122_v36  ;;  %v4560_v44 = vld [vmem:[#allocation11 + $0x790] sm:$0xff] }
 0x50a   :  { %7981 = vmatprep.subr.bf16.mxu1 %v17124_v38  ;;  %v4564_v36 = vld [vmem:[#allocation11 + $0x7b0] sm:$0xff]  ;;  %v4561_v38 = vld [vmem:[#allocation11 + $0x798] sm:$0xff] }
 0x50b   :  { %v17170_v2 = vcombine.high %v4560_v44, %v4564_v36  ;;  %v17169_v18 = vcombine.low %v4560_v44, %v4564_v36  ;;  %v17171_v42 = vcombine.low %v4561_v38, %v4565_v28  ;;  %v4605_v44 = vld [vmem:[#allocation11 + $0x8f8] sm:$0xff] }
 0x50c   :  { %7818 = vmatpush1.bf16.msra.mxu0 %v17121_v39  ;;  %v17172_v39 = vcombine.high %v4561_v38, %v4565_v28 }
 0x50d   :  { %7982 = vmatpush1.bf16.msra.mxu1 %v17123_v16  ;;  %7819 = vmatprep.subr.bf16.mxu0 %v17130_v7  ;;  %v4568_v16 = vld [vmem:[#allocation11 + $0x7d0] sm:$0xff] }
 0x50e   :  { %7983 = vmatprep.subr.bf16.mxu1 %v17132_v33  ;;  %v4572_v7 = vld [vmem:[#allocation11 + $0x7f0] sm:$0xff]  ;;  %v4569_v33 = vld [vmem:[#allocation11 + $0x7d8] sm:$0xff] }
 0x50f   :  { %v17178_v46 = vcombine.high %v4568_v16, %v4572_v7  ;;  %v17177_v52 = vcombine.low %v4568_v16, %v4572_v7  ;;  %v17179_v53 = vcombine.low %v4569_v33, %v4573_v5 }
 0x510   :  { %7820 = vmatpush1.bf16.msra.mxu0 %v17129_v3  ;;  %v17180_v3 = vcombine.high %v4569_v33, %v4573_v5  ;;  %v4616_v5 = vld [vmem:[#allocation11 + $0x950] sm:$0xff] }
 0x511   :  { %7984 = vmatpush1.bf16.msra.mxu1 %v17131_v15  ;;  %7821 = vmatprep.subr.bf16.mxu0 %v17138_v49  ;;  %v4576_v15 = vld [vmem:[#allocation11 + $0x810] sm:$0xff] }
 0x512   :  { %7985 = vmatprep.subr.bf16.mxu1 %v17140_v14  ;;  %v4580_v49 = vld [vmem:[#allocation11 + $0x830] sm:$0xff]  ;;  %v4577_v14 = vld [vmem:[#allocation11 + $0x818] sm:$0xff] }
 0x513   :  { %v17186_v24 = vcombine.high %v4576_v15, %v4580_v49  ;;  %v17187_v17 = vcombine.low %v4577_v14, %v4581_v51 }
 0x514   :  { %7822 = vmatpush1.bf16.msra.mxu0 %v17137_v55  ;;  %v17188_v55 = vcombine.high %v4577_v14, %v4581_v51  ;;  %v4624_v51 = vld [vmem:[#allocation11 + $0x990] sm:$0xff] }
 0x515   :  { %7986 = vmatpush1.bf16.msra.mxu1 %v17139_v60  ;;  %7823 = vmatprep.subr.bf16.mxu0 %v17146_v63  ;;  %v4584_v60 = vld [vmem:[#allocation11 + $0x850] sm:$0xff] }
 0x516   :  { %7987 = vmatprep.subr.bf16.mxu1 %v17148_v0  ;;  %v4588_v63 = vld [vmem:[#allocation11 + $0x870] sm:$0xff]  ;;  %v17185_v0 = vcombine.low %v4576_v15, %v4580_v49 }
 0x517   :  { %v17194_v61 = vcombine.high %v4584_v60, %v4588_v63  ;;  %v17193_v26 = vcombine.low %v4584_v60, %v4588_v63 }
 0x518   :  { %7824 = vmatpush1.bf16.msra.mxu0 %v17145_v19  ;;  %v4592_v19 = vld [vmem:[#allocation11 + $0x890] sm:$0xff] }
 0x519   :  { %7988 = vmatpush1.bf16.msra.mxu1 %v17147_v21  ;;  %7825 = vmatprep.subr.bf16.mxu0 %v17154_v23  ;;  %v4596_v21 = vld [vmem:[#allocation11 + $0x8b0] sm:$0xff]  ;;  %v17196_v23 = vcombine.high %v4585_v8, %v4589_v12 }
 0x51a   :  { %7989 = vmatprep.subr.bf16.mxu1 %v17156_v9  ;;  %v4593_v9 = vld [vmem:[#allocation11 + $0x898] sm:$0xff]  ;;  %v17202_v30 = vcombine.high %v4592_v19, %v4596_v21  ;;  %v17201_v36 = vcombine.low %v4592_v19, %v4596_v21  ;;  %v4632_v8 = vld [vmem:[#allocation11 + $0x9d0] sm:$0xff] }
 0x51b   :  { %v4636_v12 = vld [vmem:[#allocation11 + $0x9f0] sm:$0xff] }
 0x51c   :  { %7826 = vmatpush1.bf16.msra.mxu0 %v17153_v32  ;;  %v17204_v32 = vcombine.high %v4593_v9, %v4597_v25 }
 0x51d   :  { %7990 = vmatpush1.bf16.msra.mxu1 %v17155_v59  ;;  %7827 = vmatprep.subr.bf16.mxu0 %v17162_v34  ;;  %v4600_v59 = vld [vmem:[#allocation11 + $0x8d0] sm:$0xff] }
 0x51e   :  { %7991 = vmatprep.subr.bf16.mxu1 %v17164_v35  ;;  %v4604_v34 = vld [vmem:[#allocation11 + $0x8f0] sm:$0xff]  ;;  %v4601_v35 = vld [vmem:[#allocation11 + $0x8d8] sm:$0xff] }
 0x51f   :  { %v17210_v38 = vcombine.high %v4600_v59, %v4604_v34  ;;  %v17212_v28 = vcombine.high %v4601_v35, %v4605_v44  ;;  %v17211_v16 = vcombine.low %v4601_v35, %v4605_v44  ;;  %v4648_v44 = vld [vmem:[#allocation11 + $0xa50] sm:$0xff] }
 0x520   :  { %7828 = vmatpush1.bf16.msra.mxu0 %v17161_v27  ;;  %v4608_v27 = vld [vmem:[#allocation11 + $0x910] sm:$0xff] }
 0x521   :  { %7992 = vmatpush1.bf16.msra.mxu1 %v17163_v10  ;;  %7829 = vmatprep.subr.bf16.mxu0 %v17170_v2  ;;  %v4612_v10 = vld [vmem:[#allocation11 + $0x930] sm:$0xff]  ;;  %v4609_v2 = vld [vmem:[#allocation11 + $0x918] sm:$0xff] }
 0x522   :  { %7993 = vmatprep.subr.bf16.mxu1 %v17172_v39  ;;  %v4613_v39 = vld [vmem:[#allocation11 + $0x938] sm:$0xff]  ;;  %v17218_v7 = vcombine.high %v4608_v27, %v4612_v10 }
 0x523   :  { %v17220_v33 = vcombine.high %v4609_v2, %v4613_v39  ;;  %v17219_v15 = vcombine.low %v4609_v2, %v4613_v39  ;;  %v4656_v39 = vld [vmem:[#allocation11 + $0xa90] sm:$0xff] }
 0x524   :  { %7830 = vmatpush1.bf16.msra.mxu0 %v17169_v18  ;;  %v4620_v18 = vld [vmem:[#allocation11 + $0x970] sm:$0xff] }
 0x525   :  { %7994 = vmatpush1.bf16.msra.mxu1 %v17171_v42  ;;  %7831 = vmatprep.subr.bf16.mxu0 %v17178_v46  ;;  %v4617_v42 = vld [vmem:[#allocation11 + $0x958] sm:$0xff]  ;;  %v17226_v49 = vcombine.high %v4616_v5, %v4620_v18 }
 0x526   :  { %7995 = vmatprep.subr.bf16.mxu1 %v17180_v3  ;;  %v4621_v46 = vld [vmem:[#allocation11 + $0x978] sm:$0xff]  ;;  %v17217_v3 = vcombine.low %v4608_v27, %v4612_v10 }
 0x527   :  { %v17228_v14 = vcombine.high %v4617_v42, %v4621_v46  ;;  %v17227_v60 = vcombine.low %v4617_v42, %v4621_v46  ;;  %v4664_v46 = vld [vmem:[#allocation11 + $0xad0] sm:$0xff] }
 0x528   :  { %7832 = vmatpush1.bf16.msra.mxu0 %v17177_v52  ;;  %v4628_v52 = vld [vmem:[#allocation11 + $0x9b0] sm:$0xff] }
 0x529   :  { %7996 = vmatpush1.bf16.msra.mxu1 %v17179_v53  ;;  %7842 = vmatprep.subr.bf16.mxu0 %v17186_v24  ;;  %v4625_v53 = vld [vmem:[#allocation11 + $0x998] sm:$0xff]  ;;  %v17234_v63 = vcombine.high %v4624_v51, %v4628_v52  ;;  %v17233_v19 = vcombine.low %v4624_v51, %v4628_v52 }
 0x52a   :  { %8006 = vmatprep.subr.bf16.mxu1 %v17188_v55  ;;  %v4629_v24 = vld [vmem:[#allocation11 + $0x9b8] sm:$0xff]  ;;  %v17225_v55 = vcombine.low %v4616_v5, %v4620_v18 }
 0x52b   :  { %7834 = vmatmul.mubr.bf16.vlgmr.msra.gmra.mrb[20].mxu0 %v19685_v11  ;;  %v17235_v21 = vcombine.low %v4625_v53, %v4629_v24 }
 0x52c   :  { %7998 = vmatmul.mubr.bf16.vlgmr.msra.gmra.mrb[20].mxu1 %v19685_v11  ;;  %7843 = vmatpush1.bf16.msra.mxu0 %v17185_v0  ;;  %v17203_v11 = vcombine.low %v4593_v9, %v4597_v25  ;;  %v17236_v0 = vcombine.high %v4625_v53, %v4629_v24  ;;  %v4640_v25 = vld [vmem:[#allocation11 + $0xa10] sm:$0xff] }
 0x52d   :  { %7874 = vmatprep.mubr.bf16.mxu0 %v19699_v40  ;;  %8007 = vmatpush1.bf16.msra.mxu1 %v17187_v17  ;;  %v4633_v17 = vld [vmem:[#allocation11 + $0x9d8] sm:$0xff]  ;;  %v4672_v24 = vld [vmem:[#allocation11 + $0xb10] sm:$0xff] }
 0x52e   :  { %8038 = vmatprep.mubr.bf16.mxu1 %v19699_v40  ;;  %7844 = vmatprep.subr.bf16.mxu0 %v17194_v61  ;;  %v17209_v40 = vcombine.low %v4600_v59, %v4604_v34  ;;  %v4637_v61 = vld [vmem:[#allocation11 + $0x9f8] sm:$0xff] }
 0x52f   :  { %8008 = vmatprep.subr.bf16.mxu1 %v17196_v23  ;;  %v17242_v23 = vcombine.high %v4632_v8, %v4636_v12  ;;  %v17244_v9 = vcombine.high %v4633_v17, %v4637_v61  ;;  %v17243_v59 = vcombine.low %v4633_v17, %v4637_v61  ;;  %v4680_v61 = vld [vmem:[#allocation11 + $0xb50] sm:$0xff] }
 0x530   :  { %7845 = vmatpush1.bf16.msra.mxu0 %v17193_v26  ;;  %v4644_v26 = vld [vmem:[#allocation11 + $0xa30] sm:$0xff] }
 0x531   :  { %8009 = vmatpush1.bf16.msra.mxu1 %v17195_v29  ;;  %7846 = vmatprep.subr.bf16.mxu0 %v17202_v30  ;;  %v4641_v29 = vld [vmem:[#allocation11 + $0xa18] sm:$0xff]  ;;  %v17250_v34 = vcombine.high %v4640_v25, %v4644_v26 }
 0x532   :  { %8010 = vmatprep.subr.bf16.mxu1 %v17204_v32  ;;  %v4645_v30 = vld [vmem:[#allocation11 + $0xa38] sm:$0xff]  ;;  %v17241_v32 = vcombine.low %v4632_v8, %v4636_v12 }
 0x533   :  { %v17252_v35 = vcombine.high %v4641_v29, %v4645_v30  ;;  %v17251_v27 = vcombine.low %v4641_v29, %v4645_v30  ;;  %v4688_v30 = vld [vmem:[#allocation11 + $0xb90] sm:$0xff] }
 0x534   :  { %7847 = vmatpush1.bf16.msra.mxu0 %v17201_v36  ;;  %v4652_v36 = vld [vmem:[#allocation11 + $0xa70] sm:$0xff] }
 0x535   :  { %8011 = vmatpush1.bf16.msra.mxu1 %v17203_v11  ;;  %7848 = vmatprep.subr.bf16.mxu0 %v17210_v38  ;;  %v4649_v11 = vld [vmem:[#allocation11 + $0xa58] sm:$0xff]  ;;  %v17258_v10 = vcombine.high %v4648_v44, %v4652_v36 }
 0x536   :  { %8012 = vmatprep.subr.bf16.mxu1 %v17212_v28  ;;  %v4653_v38 = vld [vmem:[#allocation11 + $0xa78] sm:$0xff]  ;;  %v17249_v28 = vcombine.low %v4640_v25, %v4644_v26 }
 0x537   :  { %v17260_v2 = vcombine.high %v4649_v11, %v4653_v38  ;;  %v17259_v5 = vcombine.low %v4649_v11, %v4653_v38  ;;  %v4696_v38 = vld [vmem:[#allocation11 + $0xbd0] sm:$0xff] }
 0x538   :  { %7849 = vmatpush1.bf16.msra.mxu0 %v17209_v40  ;;  %v4660_v40 = vld [vmem:[#allocation11 + $0xab0] sm:$0xff] }
 0x539   :  { %8013 = vmatpush1.bf16.msra.mxu1 %v17211_v16  ;;  %7850 = vmatprep.subr.bf16.mxu0 %v17218_v7  ;;  %v4657_v16 = vld [vmem:[#allocation11 + $0xa98] sm:$0xff]  ;;  %v17266_v18 = vcombine.high %v4656_v39, %v4660_v40 }
 0x53a   :  { %8014 = vmatprep.subr.bf16.mxu1 %v17220_v33  ;;  %v4661_v7 = vld [vmem:[#allocation11 + $0xab8] sm:$0xff]  ;;  %v17257_v33 = vcombine.low %v4648_v44, %v4652_v36 }
 0x53b   :  { %v17268_v42 = vcombine.high %v4657_v16, %v4661_v7  ;;  %v17267_v51 = vcombine.low %v4657_v16, %v4661_v7  ;;  %v4704_v7 = vld [vmem:[#allocation11 + $0xc10] sm:$0xff] }
 0x53c   :  { %7851 = vmatpush1.bf16.msra.mxu0 %v17217_v3  ;;  %v4668_v3 = vld [vmem:[#allocation11 + $0xaf0] sm:$0xff] }
 0x53d   :  { %8015 = vmatpush1.bf16.msra.mxu1 %v17219_v15  ;;  %7852 = vmatprep.subr.bf16.mxu0 %v17226_v49  ;;  %v4665_v15 = vld [vmem:[#allocation11 + $0xad8] sm:$0xff]  ;;  %v17274_v52 = vcombine.high %v4664_v46, %v4668_v3 }
 0x53e   :  { %8016 = vmatprep.subr.bf16.mxu1 %v17228_v14  ;;  %v4669_v49 = vld [vmem:[#allocation11 + $0xaf8] sm:$0xff]  ;;  %v17265_v14 = vcombine.low %v4656_v39, %v4660_v40 }
 0x53f   :  { %v17276_v53 = vcombine.high %v4665_v15, %v4669_v49  ;;  %v17275_v8 = vcombine.low %v4665_v15, %v4669_v49  ;;  %v4712_v49 = vld [vmem:[#allocation11 + $0xc50] sm:$0xff] }
 0x540   :  { %7853 = vmatpush1.bf16.msra.mxu0 %v17225_v55  ;;  %v4676_v55 = vld [vmem:[#allocation11 + $0xb30] sm:$0xff] }
 0x541   :  { %8017 = vmatpush1.bf16.msra.mxu1 %v17227_v60  ;;  %7854 = vmatprep.subr.bf16.mxu0 %v17234_v63  ;;  %v4673_v60 = vld [vmem:[#allocation11 + $0xb18] sm:$0xff]  ;;  %v17282_v12 = vcombine.high %v4672_v24, %v4676_v55 }
 0x542   :  { %8018 = vmatprep.subr.bf16.mxu1 %v17236_v0  ;;  %v4677_v63 = vld [vmem:[#allocation11 + $0xb38] sm:$0xff]  ;;  %v17273_v0 = vcombine.low %v4664_v46, %v4668_v3 }
 0x543   :  { %v17284_v17 = vcombine.high %v4673_v60, %v4677_v63  ;;  %v17283_v25 = vcombine.low %v4673_v60, %v4677_v63  ;;  %v4720_v60 = vld [vmem:[#allocation11 + $0xc90] sm:$0xff] }
 0x544   :  { %7855 = vmatpush1.bf16.msra.mxu0 %v17233_v19  ;;  %v4684_v19 = vld [vmem:[#allocation11 + $0xb70] sm:$0xff] }
 0x545   :  { %8019 = vmatpush1.bf16.msra.mxu1 %v17235_v21  ;;  %7856 = vmatprep.subr.bf16.mxu0 %v17242_v23  ;;  %v4681_v21 = vld [vmem:[#allocation11 + $0xb58] sm:$0xff]  ;;  %v17290_v26 = vcombine.high %v4680_v61, %v4684_v19  ;;  %v4724_v63 = vld [vmem:[#allocation11 + $0xcb0] sm:$0xff] }
 0x546   :  { %8020 = vmatprep.subr.bf16.mxu1 %v17244_v9  ;;  %v4685_v23 = vld [vmem:[#allocation11 + $0xb78] sm:$0xff]  ;;  %v17281_v9 = vcombine.low %v4672_v24, %v4676_v55 }
 0x547   :  { %v17292_v29 = vcombine.high %v4681_v21, %v4685_v23  ;;  %v17291_v44 = vcombine.low %v4681_v21, %v4685_v23  ;;  %v4728_v23 = vld [vmem:[#allocation11 + $0xcd0] sm:$0xff] }
 0x548   :  { %7857 = vmatpush1.bf16.msra.mxu0 %v17241_v32  ;;  %v4692_v32 = vld [vmem:[#allocation11 + $0xbb0] sm:$0xff] }
 0x549   :  { %8021 = vmatpush1.bf16.msra.mxu1 %v17243_v59  ;;  %7858 = vmatprep.subr.bf16.mxu0 %v17250_v34  ;;  %v4689_v59 = vld [vmem:[#allocation11 + $0xb98] sm:$0xff]  ;;  %v17298_v36 = vcombine.high %v4688_v30, %v4692_v32 }
 0x54a   :  { %8022 = vmatprep.subr.bf16.mxu1 %v17252_v35  ;;  %v4693_v34 = vld [vmem:[#allocation11 + $0xbb8] sm:$0xff]  ;;  %v17289_v35 = vcombine.low %v4680_v61, %v4684_v19  ;;  %v17330_v19 = vcombine.high %v4720_v60, %v4724_v63 }
 0x54b   :  { %v17300_v11 = vcombine.high %v4689_v59, %v4693_v34  ;;  %v17299_v39 = vcombine.low %v4689_v59, %v4693_v34  ;;  %v4736_v59 = vld [vmem:[#allocation11 + $0xd10] sm:$0xff] }
 0x54c   :  { %7859 = vmatpush1.bf16.msra.mxu0 %v17249_v28  ;;  %v4700_v28 = vld [vmem:[#allocation11 + $0xbf0] sm:$0xff] }
 0x54d   :  { %8023 = vmatpush1.bf16.msra.mxu1 %v17251_v27  ;;  %7860 = vmatprep.subr.bf16.mxu0 %v17258_v10  ;;  %v4697_v27 = vld [vmem:[#allocation11 + $0xbd8] sm:$0xff]  ;;  %v17306_v40 = vcombine.high %v4696_v38, %v4700_v28  ;;  %v4740_v34 = vld [vmem:[#allocation11 + $0xd30] sm:$0xff] }
 0x54e   :  { %8024 = vmatprep.subr.bf16.mxu1 %v17260_v2  ;;  %v4701_v10 = vld [vmem:[#allocation11 + $0xbf8] sm:$0xff]  ;;  %v17297_v2 = vcombine.low %v4688_v30, %v4692_v32 }
 0x54f   :  { %v17308_v16 = vcombine.high %v4697_v27, %v4701_v10  ;;  %v17307_v46 = vcombine.low %v4697_v27, %v4701_v10  ;;  %v4748_v27 = vld [vmem:[#allocation11 + $0xd70] sm:$0xff]  ;;  %v4745_v10 = vld [vmem:[#allocation11 + $0xd58] sm:$0xff] }
 0x550   :  { %7861 = vmatpush1.bf16.msra.mxu0 %v17257_v33  ;;  %v4708_v33 = vld [vmem:[#allocation11 + $0xc30] sm:$0xff] }
 0x551   :  { %8025 = vmatpush1.bf16.msra.mxu1 %v17259_v5  ;;  %7862 = vmatprep.subr.bf16.mxu0 %v17266_v18  ;;  %v4705_v5 = vld [vmem:[#allocation11 + $0xc18] sm:$0xff]  ;;  %v17314_v3 = vcombine.high %v4704_v7, %v4708_v33 }
 0x552   :  { %8026 = vmatprep.subr.bf16.mxu1 %v17268_v42  ;;  %v4709_v18 = vld [vmem:[#allocation11 + $0xc38] sm:$0xff]  ;;  %v17305_v42 = vcombine.low %v4696_v38, %v4700_v28  ;;  %v4744_v28 = vld [vmem:[#allocation11 + $0xd50] sm:$0xff] }
 0x553   :  { %v17316_v15 = vcombine.high %v4705_v5, %v4709_v18  ;;  %v17315_v24 = vcombine.low %v4705_v5, %v4709_v18  ;;  %v4756_v5 = vld [vmem:[#allocation11 + $0xdb0] sm:$0xff]  ;;  %v4753_v18 = vld [vmem:[#allocation11 + $0xd98] sm:$0xff] }
 0x554   :  { %7863 = vmatpush1.bf16.msra.mxu0 %v17265_v14  ;;  %v4716_v14 = vld [vmem:[#allocation11 + $0xc70] sm:$0xff] }
 0x555   :  { %8027 = vmatpush1.bf16.msra.mxu1 %v17267_v51  ;;  %7864 = vmatprep.subr.bf16.mxu0 %v17274_v52  ;;  %v17313_v51 = vcombine.low %v4704_v7, %v4708_v33  ;;  %v4713_v52 = vld [vmem:[#allocation11 + $0xc58] sm:$0xff]  ;;  %v17322_v55 = vcombine.high %v4712_v49, %v4716_v14  ;;  %v4752_v33 = vld [vmem:[#allocation11 + $0xd90] sm:$0xff] }
 0x556   :  { %8028 = vmatprep.subr.bf16.mxu1 %v17276_v53  ;;  %v4717_v53 = vld [vmem:[#allocation11 + $0xc78] sm:$0xff] }
 0x557   :  { %v17323_v61 = vcombine.low %v4713_v52, %v4717_v53 }
 0x558   :  { %7865 = vmatpush1.bf16.msra.mxu0 %v17273_v0  ;;  %v17324_v0 = vcombine.high %v4713_v52, %v4717_v53  ;;  %v4760_v52 = vld [vmem:[#allocation11 + $0xdd0] sm:$0xff] }
 0x559   :  { %8029 = vmatpush1.bf16.msra.mxu1 %v17275_v8  ;;  %7866 = vmatprep.subr.bf16.mxu0 %v17282_v12  ;;  %v4721_v8 = vld [vmem:[#allocation11 + $0xc98] sm:$0xff]  ;;  %v4764_v53 = vld [vmem:[#allocation11 + $0xdf0] sm:$0xff] }
 0x55a   :  { %8030 = vmatprep.subr.bf16.mxu1 %v17284_v17  ;;  %v4725_v12 = vld [vmem:[#allocation11 + $0xcb8] sm:$0xff]  ;;  %v17321_v17 = vcombine.low %v4712_v49, %v4716_v14 }
 0x55b   :  { %v17332_v21 = vcombine.high %v4721_v8, %v4725_v12 }
 0x55c   :  { %7867 = vmatpush1.bf16.msra.mxu0 %v17281_v9  ;;  %v4732_v9 = vld [vmem:[#allocation11 + $0xcf0] sm:$0xff] }
 0x55d   :  { %8031 = vmatpush1.bf16.msra.mxu1 %v17283_v25  ;;  %7868 = vmatprep.subr.bf16.mxu0 %v17290_v26  ;;  %v4729_v25 = vld [vmem:[#allocation11 + $0xcd8] sm:$0xff]  ;;  %v17338_v30 = vcombine.high %v4728_v23, %v4732_v9 }
 0x55e   :  { %8032 = vmatprep.subr.bf16.mxu1 %v17292_v29  ;;  %v4733_v26 = vld [vmem:[#allocation11 + $0xcf8] sm:$0xff]  ;;  %v17329_v29 = vcombine.low %v4720_v60, %v4724_v63 }
 0x55f   :  { %v17340_v32 = vcombine.high %v4729_v25, %v4733_v26  ;;  %v4761_v60 = vld [vmem:[#allocation11 + $0xdd8] sm:$0xff] }
 0x560   :  { %7869 = vmatpush1.bf16.msra.mxu0 %v17289_v35  ;;  %v4737_v35 = vld [vmem:[#allocation11 + $0xd18] sm:$0xff] }
 0x561   :  { %8033 = vmatpush1.bf16.msra.mxu1 %v17291_v44  ;;  %7870 = vmatprep.subr.bf16.mxu0 %v17298_v36  ;;  %v4741_v44 = vld [vmem:[#allocation11 + $0xd38] sm:$0xff]  ;;  %v17339_v36 = vcombine.low %v4729_v25, %v4733_v26  ;;  %v4772_v25 = vld [vmem:[#allocation11 + $0xe30] sm:$0xff] }
 0x562   :  { %8034 = vmatprep.subr.bf16.mxu1 %v17300_v11  ;;  %v17346_v11 = vcombine.high %v4736_v59, %v4740_v34  ;;  %v17348_v38 = vcombine.high %v4737_v35, %v4741_v44  ;;  %v4765_v63 = vld [vmem:[#allocation11 + $0xdf8] sm:$0xff] }
 0x563   :  { %v4769_v26 = vld [vmem:[#allocation11 + $0xe18] sm:$0xff] }
 0x564   :  { %7871 = vmatpush1.bf16.msra.mxu0 %v17297_v2  ;;  %v4749_v2 = vld [vmem:[#allocation11 + $0xd78] sm:$0xff] }
 0x565   :  { %8035 = vmatpush1.bf16.msra.mxu1 %v17299_v39  ;;  %7872 = vmatprep.subr.bf16.mxu0 %v17306_v40  ;;  %v17345_v39 = vcombine.low %v4736_v59, %v4740_v34  ;;  %v17347_v40 = vcombine.low %v4737_v35, %v4741_v44  ;;  %v17356_v7 = vcombine.high %v4745_v10, %v4749_v2  ;;  %v4776_v34 = vld [vmem:[#allocation11 + $0xe50] sm:$0xff]  ;;  %v4777_v44 = vld [vmem:[#allocation11 + $0xe58] sm:$0xff] }
 0x566   :  { %8036 = vmatprep.subr.bf16.mxu1 %v17308_v16  ;;  %v17354_v16 = vcombine.high %v4744_v28, %v4748_v27  ;;  %v4780_v35 = vld [vmem:[#allocation11 + $0xe70] sm:$0xff] }
 0x568   :  { %7873 = vmatpush1.bf16.msra.mxu0 %v17305_v42  ;;  %v4757_v42 = vld [vmem:[#allocation11 + $0xdb8] sm:$0xff] }
 0x569   :  { %8037 = vmatpush1.bf16.msra.mxu1 %v17307_v46  ;;  %7883 = vmatprep.subr.bf16.mxu0 %v17314_v3  ;;  %v17353_v46 = vcombine.low %v4744_v28, %v4748_v27  ;;  %v17355_v3 = vcombine.low %v4745_v10, %v4749_v2  ;;  %v4784_v27 = vld [vmem:[#allocation11 + $0xe90] sm:$0xff]  ;;  %v4785_v2 = vld [vmem:[#allocation11 + $0xe98] sm:$0xff] }
 0x56a   :  { %8047 = vmatprep.subr.bf16.mxu1 %v17316_v15  ;;  %v17362_v15 = vcombine.high %v4752_v33, %v4756_v5  ;;  %v4788_v10 = vld [vmem:[#allocation11 + $0xeb0] sm:$0xff] }
 0x56b   :  { %7875 = vmatmul.mubr.bf16.vlgmr.msra.gmra.mrb[20].mxu0 %v19701_v57 }
 0x56c   :  { %8039 = vmatmul.mubr.bf16.vlgmr.msra.gmra.mrb[20].mxu1 %v19701_v57  ;;  %7884 = vmatpush1.bf16.msra.mxu0 %v17313_v51  ;;  %v17331_v57 = vcombine.low %v4721_v8, %v4725_v12  ;;  %v17364_v51 = vcombine.high %v4753_v18, %v4757_v42  ;;  %v17361_v12 = vcombine.low %v4752_v33, %v4756_v5  ;;  %v4792_v5 = vld [vmem:[#allocation11 + $0xed0] sm:$0xff] }
 0x56d   :  { %7915 = vmatprep.mubr.bf16.mxu0 %v19705_v50  ;;  %8048 = vmatpush1.bf16.msra.mxu1 %v17315_v24 }
 0x56e   :  { %8079 = vmatprep.mubr.bf16.mxu1 %v19705_v50  ;;  %7885 = vmatprep.subr.bf16.mxu0 %v17322_v55  ;;  %v17337_v50 = vcombine.low %v4728_v23, %v4732_v9  ;;  %v17372_v23 = vcombine.high %v4761_v60, %v4765_v63  ;;  %v4768_v9 = vld [vmem:[#allocation11 + $0xe10] sm:$0xff] }
 0x56f   :  { %8049 = vmatprep.subr.bf16.mxu1 %v17324_v0 }
 0x570   :  { %7886 = vmatpush1.bf16.msra.mxu0 %v17321_v17 }
 0x571   :  { %8050 = vmatpush1.bf16.msra.mxu1 %v17323_v61  ;;  %7887 = vmatprep.subr.bf16.mxu0 %v17330_v19  ;;  %v17363_v19 = vcombine.low %v4753_v18, %v4757_v42  ;;  %v4796_v18 = vld [vmem:[#allocation11 + $0xef0] sm:$0xff]  ;;  %v4793_v42 = vld [vmem:[#allocation11 + $0xed8] sm:$0xff] }
 0x572   :  { %8051 = vmatprep.subr.bf16.mxu1 %v17332_v21  ;;  %v17370_v21 = vcombine.high %v4760_v52, %v4764_v53 }
 0x574   :  { %7888 = vmatpush1.bf16.msra.mxu0 %v17329_v29  ;;  %v4773_v29 = vld [vmem:[#allocation11 + $0xe38] sm:$0xff] }
 0x575   :  { %8052 = vmatpush1.bf16.msra.mxu1 %v17331_v57  ;;  %7889 = vmatprep.subr.bf16.mxu0 %v17338_v30  ;;  %v17369_v57 = vcombine.low %v4760_v52, %v4764_v53  ;;  %v17371_v30 = vcombine.low %v4761_v60, %v4765_v63  ;;  %v17380_v59 = vcombine.high %v4769_v26, %v4773_v29  ;;  %v4800_v53 = vld [vmem:[#allocation11 + $0xf10] sm:$0xff]  ;;  %v4801_v63 = vld [vmem:[#allocation11 + $0xf18] sm:$0xff] }
 0x576   :  { %8053 = vmatprep.subr.bf16.mxu1 %v17340_v32  ;;  %v17378_v32 = vcombine.high %v4768_v9, %v4772_v25  ;;  %v4804_v60 = vld [vmem:[#allocation11 + $0xf30] sm:$0xff] }
 0x578   :  { %7890 = vmatpush1.bf16.msra.mxu0 %v17337_v50  ;;  %v4781_v50 = vld [vmem:[#allocation11 + $0xe78] sm:$0xff] }
 0x579   :  { %8054 = vmatpush1.bf16.msra.mxu1 %v17339_v36  ;;  %7891 = vmatprep.subr.bf16.mxu0 %v17346_v11  ;;  %v17377_v36 = vcombine.low %v4768_v9, %v4772_v25  ;;  %v17379_v11 = vcombine.low %v4769_v26, %v4773_v29  ;;  %v17388_v28 = vcombine.high %v4777_v44, %v4781_v50  ;;  %v4813_v9 = vld [vmem:[#allocation11 + $0xf78] sm:$0xff]  ;;  %v19740_v25 = vld [vmem:[#allocation13] sm:$0xff] }
 0x57a   :  { %8055 = vmatprep.subr.bf16.mxu1 %v17348_v38  ;;  %v17386_v38 = vcombine.high %v4776_v34, %v4780_v35  ;;  %v17409_v26 = vcombine.low %v4800_v53, %v4804_v60 }
 0x57c   :  { %7892 = vmatpush1.bf16.msra.mxu0 %v17345_v39  ;;  %v4789_v39 = vld [vmem:[#allocation11 + $0xeb8] sm:$0xff] }
 0x57d   :  { %8056 = vmatpush1.bf16.msra.mxu1 %v17347_v40  ;;  %7893 = vmatprep.subr.bf16.mxu0 %v17354_v16  ;;  %v17385_v40 = vcombine.low %v4776_v34, %v4780_v35  ;;  %v17387_v16 = vcombine.low %v4777_v44, %v4781_v50  ;;  %v17396_v33 = vcombine.high %v4785_v2, %v4789_v39  ;;  %v4817_v35 = vld [vmem:[#allocation11 + $0xf98] sm:$0xff] }
 0x57e   :  { %v19732_v49 = vpop.f32.mrb[16].mxu0  ;;  %v19734_v14 = vpop.f32.mrb[16].mxu1  ;;  %8057 = vmatprep.subr.bf16.mxu1 %v17356_v7  ;;  %v17394_v7 = vcombine.high %v4784_v27, %v4788_v10  ;;  %v4839_v34 = vrot.slane %v19740_v25, %v19521_v47  ;;  %v4821_v44 = vld [vmem:[#allocation11 + $0xfb8] sm:$0xff] }
 0x57f   :  { %v19736_v24 = vpop.f32.mrb[17].mxu0  ;;  %v19738_v55 = vpop.f32.mrb[17].mxu1 }
 0x580   :  { %v7593_v0 = vpop.f32.mrb[18].mxu0  ;;  %v7757_v8 = vpop.f32.mrb[18].mxu1  ;;  %7894 = vmatpush1.bf16.msra.mxu0 %v17353_v46  ;;  %v4797_v46 = vld [vmem:[#allocation11 + $0xef8] sm:$0xff] }
 0x581   :  { %8058 = vmatpush1.bf16.msra.mxu1 %v17355_v3  ;;  %v7594_v17 = vpop.f32.mrb[19].mxu0  ;;  %v7758_v61 = vpop.f32.mrb[19].mxu1  ;;  %7895 = vmatprep.subr.bf16.mxu0 %v17362_v15  ;;  %v17393_v3 = vcombine.low %v4784_v27, %v4788_v10  ;;  %v17395_v15 = vcombine.low %v4785_v2, %v4789_v39  ;;  %v17404_v52 = vcombine.high %v4793_v42, %v4797_v46  ;;  %v4805_v0 = vld [vmem:[#allocation11 + $0xf38] sm:$0xff]  ;;  %v4828_v27 = vld [vmem:[#allocation11 + $0xff0] sm:$0xff] }
 0x582   :  { %8059 = vmatprep.subr.bf16.mxu1 %v17364_v51  ;;  %v17402_v51 = vcombine.high %v4792_v5, %v4796_v18  ;;  %v17401_v8 = vcombine.low %v4792_v5, %v4796_v18  ;;  %v17410_v17 = vcombine.high %v4800_v53, %v4804_v60  ;;  %v17412_v61 = vcombine.high %v4801_v63, %v4805_v0  ;;  %v4825_v2 = vld [vmem:[#allocation11 + $0xfd8] sm:$0xff]  ;;  %v8112_v5 = vld [vmem:[#allocation14] sm:$0xff] }
 0x583   :  { %v17411_v29 = vcombine.low %v4801_v63, %v4805_v0  ;;  %v18623_v10 = vadd.f32 %v19736_v24, %v4839_v34  ;;  %v4829_v39 = vld [vmem:[#allocation11 + $0xff8] sm:$0xff]  ;;  %v8116_v18 = vld [vmem:[#allocation14 + $0x20] sm:$0xff] }
 0x584   :  { %7896 = vmatpush1.bf16.msra.mxu0 %v17361_v12  ;;  %v17403_v12 = vcombine.low %v4793_v42, %v4797_v46  ;;  %v8113_v46 = vld [vmem:[#allocation14 + $0x8] sm:$0xff]  ;;  %v17435_v24 = vcombine.low %v4825_v2, %v4829_v39  ;;  %v8120_v60 = vld [vmem:[#allocation14 + $0x40] sm:$0xff]  ;;  %v17437_v0 = vcombine.low %v8112_v5, %v8116_v18 }
 0x585   :  { %8060 = vmatpush1.bf16.msra.mxu1 %v17363_v19  ;;  %7897 = vmatprep.subr.bf16.mxu0 %v17370_v21  ;;  %v4808_v19 = vld [vmem:[#allocation11 + $0xf50] sm:$0xff]  ;;  %v8089_v42 = vmax.f32 %v18623_v10, 0.0  ;;  %v8124_v63 = vld [vmem:[#allocation14 + $0x60] sm:$0xff] }
 0x586   :  { %8061 = vmatprep.subr.bf16.mxu1 %v17372_v23  ;;  %v4812_v21 = vld [vmem:[#allocation11 + $0xf70] sm:$0xff]  ;;  %v4809_v23 = vld [vmem:[#allocation11 + $0xf58] sm:$0xff]  ;;  %v8140_v34 = vld [vmem:[#allocation14 + $0xe0] sm:$0xff] }
 0x587   :  { %v17417_v50 = vcombine.low %v4808_v19, %v4812_v21  ;;  %v19746_v53 = vadd.f32 %v8089_v42, %v19536_v62  ;;  %v8149_v10 = vld [vmem:[#allocation14 + $0x128] sm:$0xff] }
 0x588   :  { %7898 = vmatpush1.bf16.msra.mxu0 %v17369_v57  ;;  %v17418_v57 = vcombine.high %v4808_v19, %v4812_v21  ;;  %v8128_v19 = vld [vmem:[#allocation14 + $0x80] sm:$0xff] }
 0x589   :  { %8062 = vmatpush1.bf16.msra.mxu1 %v17371_v30  ;;  %7899 = vmatprep.subr.bf16.mxu0 %v17378_v32  ;;  %v17420_v30 = vcombine.high %v4809_v23, %v4813_v9  ;;  %v4816_v32 = vld [vmem:[#allocation11 + $0xf90] sm:$0xff]  ;;  %v8132_v21 = vld [vmem:[#allocation14 + $0xa0] sm:$0xff] }
 0x58a   :  { %8063 = vmatprep.subr.bf16.mxu1 %v17380_v59  ;;  %v4820_v59 = vld [vmem:[#allocation11 + $0xfb0] sm:$0xff] }
 0x58c   :  { %7900 = vmatpush1.bf16.msra.mxu0 %v17377_v36  ;;  %v17419_v36 = vcombine.low %v4809_v23, %v4813_v9  ;;  %v19750_v23 = vpack.c.bf16 %v19746_v53, %v19746_v53  ;;  %v8129_v9 = vld [vmem:[#allocation14 + $0x88] sm:$0xff] }
 0x58d   :  { %8064 = vmatpush1.bf16.msra.mxu1 %v17379_v11  ;;  %7901 = vmatprep.subr.bf16.mxu0 %v17386_v38  ;;  %v17426_v11 = vcombine.high %v4816_v32, %v4820_v59  ;;  %v17428_v38 = vcombine.high %v4817_v35, %v4821_v44 }
 0x58e   :  { %8065 = vmatprep.subr.bf16.mxu1 %v17388_v28  ;;  %v4824_v28 = vld [vmem:[#allocation11 + $0xfd0] sm:$0xff] }
 0x590   :  { %7902 = vmatpush1.bf16.msra.mxu0 %v17385_v40  ;;  %v17425_v40 = vcombine.low %v4816_v32, %v4820_v59  ;;  %v8136_v59 = vld [vmem:[#allocation14 + $0xc0] sm:$0xff] }
 0x591   :  { %8066 = vmatpush1.bf16.msra.mxu1 %v17387_v16  ;;  %7903 = vmatprep.subr.bf16.mxu0 %v17394_v7  ;;  %v17427_v16 = vcombine.low %v4817_v35, %v4821_v44  ;;  %v17434_v7 = vcombine.high %v4824_v28, %v4828_v27  ;;  %v8137_v35 = vld [vmem:[#allocation14 + $0xc8] sm:$0xff] }
 0x592   :  { %8067 = vmatprep.subr.bf16.mxu1 %v17396_v33  ;;  %v17436_v33 = vcombine.high %v4825_v2, %v4829_v39  ;;  %v8141_v44 = vld [vmem:[#allocation14 + $0xe8] sm:$0xff]  ;;  %v17461_v2 = vcombine.low %v8136_v59, %v8140_v34 }
 0x593   :  { %v17463_v39 = vcombine.low %v8137_v35, %v8141_v44 }
 0x594   :  { %7904 = vmatpush1.bf16.msra.mxu0 %v17393_v3  ;;  %v8117_v3 = vld [vmem:[#allocation14 + $0x28] sm:$0xff] }
 0x595   :  { %8068 = vmatpush1.bf16.msra.mxu1 %v17395_v15  ;;  %7905 = vmatprep.subr.bf16.mxu0 %v17402_v51  ;;  %v17433_v15 = vcombine.low %v4824_v28, %v4828_v27  ;;  %v17438_v51 = vcombine.high %v8112_v5, %v8116_v18  ;;  %v8148_v28 = vld [vmem:[#allocation14 + $0x120] sm:$0xff]  ;;  %v8145_v27 = vld [vmem:[#allocation14 + $0x108] sm:$0xff] }
 0x596   :  { %8069 = vmatprep.subr.bf16.mxu1 %v17404_v52  ;;  %v17440_v52 = vcombine.high %v8113_v46, %v8117_v3  ;;  %v8153_v5 = vld [vmem:[#allocation14 + $0x148] sm:$0xff] }
 0x597   :  { %v8157_v18 = vld [vmem:[#allocation14 + $0x168] sm:$0xff] }
 0x598   :  { %7906 = vmatpush1.bf16.msra.mxu0 %v17401_v8  ;;  %v8121_v8 = vld [vmem:[#allocation14 + $0x48] sm:$0xff] }
 0x599   :  { %8070 = vmatpush1.bf16.msra.mxu1 %v17403_v12  ;;  %7907 = vmatprep.subr.bf16.mxu0 %v17410_v17  ;;  %v8125_v12 = vld [vmem:[#allocation14 + $0x68] sm:$0xff]  ;;  %v17439_v17 = vcombine.low %v8113_v46, %v8117_v3  ;;  %v17471_v46 = vcombine.low %v8145_v27, %v8149_v10 }
 0x59a   :  { %8071 = vmatprep.subr.bf16.mxu1 %v17412_v61  ;;  %v17446_v61 = vcombine.high %v8120_v60, %v8124_v63  ;;  %v17448_v62 = vcombine.high %v8121_v8, %v8125_v12 }
 0x59c   :  { %7908 = vmatpush1.bf16.msra.mxu0 %v17409_v26  ;;  %v8133_v26 = vld [vmem:[#allocation14 + $0xa8] sm:$0xff] }
 0x59d   :  { %8072 = vmatpush1.bf16.msra.mxu1 %v17411_v29  ;;  %7909 = vmatprep.subr.bf16.mxu0 %v17418_v57  ;;  %v17445_v29 = vcombine.low %v8120_v60, %v8124_v63  ;;  %v17447_v57 = vcombine.low %v8121_v8, %v8125_v12  ;;  %v17456_v32 = vcombine.high %v8129_v9, %v8133_v26  ;;  %v8165_v60 = vld [vmem:[#allocation14 + $0x1a8] sm:$0xff] }
 0x59e   :  { %8073 = vmatprep.subr.bf16.mxu1 %v17420_v30  ;;  %v17454_v30 = vcombine.high %v8128_v19, %v8132_v21 }
 0x5a0   :  { %7910 = vmatpush1.bf16.msra.mxu0 %v17417_v50  ;;  %v17453_v50 = vcombine.low %v8128_v19, %v8132_v21  ;;  %v8169_v19 = vld [vmem:[#allocation14 + $0x1c8] sm:$0xff] }
 0x5a1   :  { %8074 = vmatpush1.bf16.msra.mxu1 %v17419_v36  ;;  %7911 = vmatprep.subr.bf16.mxu0 %v17426_v11  ;;  %v17462_v36 = vcombine.high %v8136_v59, %v8140_v34  ;;  %v17464_v11 = vcombine.high %v8137_v35, %v8141_v44  ;;  %v8173_v21 = vld [vmem:[#allocation14 + $0x1e8] sm:$0xff] }
 0x5a2   :  { %8075 = vmatprep.subr.bf16.mxu1 %v17428_v38  ;;  %v8144_v38 = vld [vmem:[#allocation14 + $0x100] sm:$0xff]  ;;  %v8181_v59 = vld [vmem:[#allocation14 + $0x228] sm:$0xff]  ;;  %v17495_v35 = vcombine.low %v8169_v19, %v8173_v21 }
 0x5a3   :  { %v17469_v42 = vcombine.low %v8144_v38, %v8148_v28 }
 0x5a4   :  { %7912 = vmatpush1.bf16.msra.mxu0 %v17425_v40  ;;  %v17470_v40 = vcombine.high %v8144_v38, %v8148_v28  ;;  %v8189_v38 = vld [vmem:[#allocation14 + $0x268] sm:$0xff] }
 0x5a5   :  { %8076 = vmatpush1.bf16.msra.mxu1 %v17427_v16  ;;  %7913 = vmatprep.subr.bf16.mxu0 %v17434_v7  ;;  %v17472_v16 = vcombine.high %v8145_v27, %v8149_v10  ;;  %v8152_v7 = vld [vmem:[#allocation14 + $0x140] sm:$0xff] }
 0x5a6   :  { %8077 = vmatprep.subr.bf16.mxu1 %v17436_v33  ;;  %v8156_v33 = vld [vmem:[#allocation14 + $0x160] sm:$0xff] }
 0x5a7   :  { %v17478_v3 = vcombine.high %v8152_v7, %v8156_v33  ;;  %v17477_v63 = vcombine.low %v8152_v7, %v8156_v33  ;;  %v8197_v7 = vld [vmem:[#allocation14 + $0x2a8] sm:$0xff] }
 0x5a8   :  { %7914 = vmatpush1.bf16.msra.mxu0 %v17433_v15  ;;  %v17480_v15 = vcombine.high %v8153_v5, %v8157_v18 }
 0x5a9   :  { %8078 = vmatpush1.bf16.msra.mxu1 %v17435_v24  ;;  %11226 = vmatprep.subr.bf16.mxu0 %v17438_v51  ;;  %v8160_v24 = vld [vmem:[#allocation14 + $0x180] sm:$0xff] }
 0x5aa   :  { %11390 = vmatprep.subr.bf16.mxu1 %v17440_v52  ;;  %v8164_v51 = vld [vmem:[#allocation14 + $0x1a0] sm:$0xff]  ;;  %v8161_v52 = vld [vmem:[#allocation14 + $0x188] sm:$0xff] }
 0x5ab   :  { %7916 = vmatmul.mubr.bf16.vlgmr.msra.gmra.mrb[20].mxu0 %v19714_v37  ;;  %v17486_v8 = vcombine.high %v8160_v24, %v8164_v51  ;;  %v17488_v12 = vcombine.high %v8161_v52, %v8165_v60 }
 0x5ac   :  { %8080 = vmatmul.mubr.bf16.vlgmr.msra.gmra.mrb[20].mxu1 %v19714_v37  ;;  %11227 = vmatpush1.bf16.msra.mxu0 %v17437_v0  ;;  %v17455_v37 = vcombine.low %v8129_v9, %v8133_v26  ;;  %v17479_v0 = vcombine.low %v8153_v5, %v8157_v18  ;;  %v17487_v9 = vcombine.low %v8161_v52, %v8165_v60 }
 0x5ad   :  { %11258 = vmatprep.mubr.bf16.mxu0 %v19750_v23  ;;  %11391 = vmatpush1.bf16.msra.mxu1 %v17439_v17  ;;  %v8168_v17 = vld [vmem:[#allocation14 + $0x1c0] sm:$0xff] }
 0x5ae   :  { %11422 = vmatprep.mubr.bf16.mxu1 %v19750_v23  ;;  %11228 = vmatprep.subr.bf16.mxu0 %v17446_v61  ;;  %v8172_v61 = vld [vmem:[#allocation14 + $0x1e0] sm:$0xff] }
 0x5af   :  { %11392 = vmatprep.subr.bf16.mxu1 %v17448_v62  ;;  %v17485_v62 = vcombine.low %v8160_v24, %v8164_v51  ;;  %v17494_v26 = vcombine.high %v8168_v17, %v8172_v61  ;;  %v17493_v34 = vcombine.low %v8168_v17, %v8172_v61  ;;  %v8205_v24 = vld [vmem:[#allocation14 + $0x2e8] sm:$0xff] }
 0x5b0   :  { %11229 = vmatpush1.bf16.msra.mxu0 %v17445_v29  ;;  %v17496_v29 = vcombine.high %v8169_v19, %v8173_v21  ;;  %v8213_v17 = vld [vmem:[#allocation14 + $0x328] sm:$0xff] }
 0x5b1   :  { %11393 = vmatpush1.bf16.msra.mxu1 %v17447_v57  ;;  %11230 = vmatprep.subr.bf16.mxu0 %v17454_v30  ;;  %v8176_v57 = vld [vmem:[#allocation14 + $0x200] sm:$0xff] }
 0x5b2   :  { %11394 = vmatprep.subr.bf16.mxu1 %v17456_v32  ;;  %v8180_v30 = vld [vmem:[#allocation14 + $0x220] sm:$0xff]  ;;  %v8177_v32 = vld [vmem:[#allocation14 + $0x208] sm:$0xff] }
 0x5b3   :  { %v17502_v44 = vcombine.high %v8176_v57, %v8180_v30  ;;  %v17501_v28 = vcombine.low %v8176_v57, %v8180_v30  ;;  %v17503_v27 = vcombine.low %v8177_v32, %v8181_v59  ;;  %v8221_v57 = vld [vmem:[#allocation14 + $0x368] sm:$0xff] }
 0x5b4   :  { %11231 = vmatpush1.bf16.msra.mxu0 %v17453_v50  ;;  %v17504_v50 = vcombine.high %v8177_v32, %v8181_v59  ;;  %v4835_v32 = vrot.slane %v19740_v25, %v19516_v45 }
 0x5b5   :  { %11395 = vmatpush1.bf16.msra.mxu1 %v17455_v37  ;;  %11232 = vmatprep.subr.bf16.mxu0 %v17462_v36  ;;  %v8184_v37 = vld [vmem:[#allocation14 + $0x240] sm:$0xff] }
 0x5b6   :  { %11396 = vmatprep.subr.bf16.mxu1 %v17464_v11  ;;  %v8188_v36 = vld [vmem:[#allocation14 + $0x260] sm:$0xff]  ;;  %v8185_v11 = vld [vmem:[#allocation14 + $0x248] sm:$0xff] }
 0x5b7   :  { %v17510_v10 = vcombine.high %v8184_v37, %v8188_v36  ;;  %v17509_v33 = vcombine.low %v8184_v37, %v8188_v36  ;;  %v17511_v5 = vcombine.low %v8185_v11, %v8189_v38  ;;  %v4847_v37 = vrot.slane %v19740_v25, %v19524_v48  ;;  %v8225_v36 = vld [vmem:[#allocation14 + $0x388] sm:$0xff] }
 0x5b8   :  { %11233 = vmatpush1.bf16.msra.mxu0 %v17461_v2  ;;  %v17512_v2 = vcombine.high %v8185_v11, %v8189_v38  ;;  %v8229_v11 = vld [vmem:[#allocation14 + $0x3a8] sm:$0xff] }
 0x5b9   :  { %11397 = vmatpush1.bf16.msra.mxu1 %v17463_v39  ;;  %11234 = vmatprep.subr.bf16.mxu0 %v17470_v40  ;;  %v8192_v39 = vld [vmem:[#allocation14 + $0x280] sm:$0xff] }
 0x5ba   :  { %11398 = vmatprep.subr.bf16.mxu1 %v17472_v16  ;;  %v8196_v40 = vld [vmem:[#allocation14 + $0x2a0] sm:$0xff]  ;;  %v8193_v16 = vld [vmem:[#allocation14 + $0x288] sm:$0xff] }
 0x5bb   :  { %v17518_v18 = vcombine.high %v8192_v39, %v8196_v40  ;;  %v17517_v51 = vcombine.low %v8192_v39, %v8196_v40  ;;  %v17519_v52 = vcombine.low %v8193_v16, %v8197_v7  ;;  %v8232_v39 = vld [vmem:[#allocation14 + $0x3c0] sm:$0xff] }
 0x5bc   :  { %11235 = vmatpush1.bf16.msra.mxu0 %v17469_v42  ;;  %v17520_v42 = vcombine.high %v8193_v16, %v8197_v7  ;;  %v8236_v40 = vld [vmem:[#allocation14 + $0x3e0] sm:$0xff]  ;;  %v18625_v16 = vadd.f32 %v19738_v55, %v4847_v37  ;;  %v8233_v7 = vld [vmem:[#allocation14 + $0x3c8] sm:$0xff] }
 0x5bd   :  { %11399 = vmatpush1.bf16.msra.mxu1 %v17471_v46  ;;  %11236 = vmatprep.subr.bf16.mxu0 %v17478_v3  ;;  %v8200_v46 = vld [vmem:[#allocation14 + $0x2c0] sm:$0xff] }
 0x5be   :  { %11400 = vmatprep.subr.bf16.mxu1 %v17480_v15  ;;  %v8204_v3 = vld [vmem:[#allocation14 + $0x2e0] sm:$0xff]  ;;  %v8201_v15 = vld [vmem:[#allocation14 + $0x2c8] sm:$0xff] }
 0x5bf   :  { %v17526_v60 = vcombine.high %v8200_v46, %v8204_v3  ;;  %v17525_v61 = vcombine.low %v8200_v46, %v8204_v3  ;;  %v17527_v19 = vcombine.low %v8201_v15, %v8205_v24  ;;  %v17558_v46 = vcombine.high %v8232_v39, %v8236_v40  ;;  %v8240_v3 = vld [vmem:[#allocation14 + $0x400] sm:$0xff] }
 0x5c0   :  { %11237 = vmatpush1.bf16.msra.mxu0 %v17477_v63  ;;  %v17528_v63 = vcombine.high %v8201_v15, %v8205_v24  ;;  %v8244_v15 = vld [vmem:[#allocation14 + $0x420] sm:$0xff]  ;;  %v8091_v24 = vmax.f32 %v18625_v16, 0.0  ;;  %v8273_v16 = vld [vmem:[#allocation14 + $0x508] sm:$0xff] }
 0x5c1   :  { %11401 = vmatpush1.bf16.msra.mxu1 %v17479_v0  ;;  %11238 = vmatprep.subr.bf16.mxu0 %v17486_v8  ;;  %v8208_v0 = vld [vmem:[#allocation14 + $0x300] sm:$0xff] }
 0x5c2   :  { %11402 = vmatprep.subr.bf16.mxu1 %v17488_v12  ;;  %v8212_v8 = vld [vmem:[#allocation14 + $0x320] sm:$0xff]  ;;  %v8209_v12 = vld [vmem:[#allocation14 + $0x308] sm:$0xff] }
 0x5c3   :  { %v17534_v21 = vcombine.high %v8208_v0, %v8212_v8  ;;  %v17533_v30 = vcombine.low %v8208_v0, %v8212_v8  ;;  %v17535_v59 = vcombine.low %v8209_v12, %v8213_v17  ;;  %v17566_v0 = vcombine.high %v8240_v3, %v8244_v15  ;;  %v8264_v37 = vld [vmem:[#allocation14 + $0x4c0] sm:$0xff] }
 0x5c4   :  { %11239 = vmatpush1.bf16.msra.mxu0 %v17485_v62  ;;  %v17536_v62 = vcombine.high %v8209_v12, %v8213_v17  ;;  %v19766_v12 = vadd.f32 %v8091_v24, %v19542_v6  ;;  %v8248_v17 = vld [vmem:[#allocation14 + $0x440] sm:$0xff] }
 0x5c5   :  { %11403 = vmatpush1.bf16.msra.mxu1 %v17487_v9  ;;  %11240 = vmatprep.subr.bf16.mxu0 %v17494_v26  ;;  %v8216_v9 = vld [vmem:[#allocation14 + $0x340] sm:$0xff] }
 0x5c6   :  { %11404 = vmatprep.subr.bf16.mxu1 %v17496_v29  ;;  %v8220_v26 = vld [vmem:[#allocation14 + $0x360] sm:$0xff]  ;;  %v8217_v29 = vld [vmem:[#allocation14 + $0x348] sm:$0xff]  ;;  %v19774_v6 = vpack.c.bf16 %v19766_v12, %v19766_v12 }
 0x5c7   :  { %v17541_v38 = vcombine.low %v8216_v9, %v8220_v26 }
 0x5c8   :  { %11241 = vmatpush1.bf16.msra.mxu0 %v17493_v34  ;;  %v17542_v34 = vcombine.high %v8216_v9, %v8220_v26 }
 0x5c9   :  { %11405 = vmatpush1.bf16.msra.mxu1 %v17495_v35  ;;  %11242 = vmatprep.subr.bf16.mxu0 %v17502_v44  ;;  %v17544_v35 = vcombine.high %v8217_v29, %v8221_v57  ;;  %v8224_v44 = vld [vmem:[#allocation14 + $0x380] sm:$0xff] }
 0x5ca   :  { %11406 = vmatprep.subr.bf16.mxu1 %v17504_v50  ;;  %v8228_v50 = vld [vmem:[#allocation14 + $0x3a0] sm:$0xff] }
 0x5cc   :  { %11243 = vmatpush1.bf16.msra.mxu0 %v17501_v28  ;;  %v18622_v28 = vadd.f32 %v19732_v49, %v4835_v32  ;;  %v8257_v32 = vld [vmem:[#allocation14 + $0x488] sm:$0xff] }
 0x5cd   :  { %11407 = vmatpush1.bf16.msra.mxu1 %v17503_v27  ;;  %11244 = vmatprep.subr.bf16.mxu0 %v17510_v10  ;;  %v17543_v27 = vcombine.low %v8217_v29, %v8221_v57  ;;  %v17550_v10 = vcombine.high %v8224_v44, %v8228_v50  ;;  %v8256_v29 = vld [vmem:[#allocation14 + $0x480] sm:$0xff] }
 0x5ce   :  { %11408 = vmatprep.subr.bf16.mxu1 %v17512_v2  ;;  %v17552_v2 = vcombine.high %v8225_v36, %v8229_v11  ;;  %v8260_v57 = vld [vmem:[#allocation14 + $0x4a0] sm:$0xff] }
 0x5d0   :  { %11245 = vmatpush1.bf16.msra.mxu0 %v17509_v33  ;;  %v8237_v33 = vld [vmem:[#allocation14 + $0x3e8] sm:$0xff] }
 0x5d1   :  { %11409 = vmatpush1.bf16.msra.mxu1 %v17511_v5  ;;  %11246 = vmatprep.subr.bf16.mxu0 %v17518_v18  ;;  %v17549_v5 = vcombine.low %v8224_v44, %v8228_v50  ;;  %v8088_v18 = vmax.f32 %v18622_v28, 0.0  ;;  %v17560_v49 = vcombine.high %v8233_v7, %v8237_v33  ;;  %v17582_v44 = vcombine.high %v8256_v29, %v8260_v57 }
 0x5d2   :  { %11410 = vmatprep.subr.bf16.mxu1 %v17520_v42  ;;  %v17551_v42 = vcombine.low %v8225_v36, %v8229_v11  ;;  %v8268_v36 = vld [vmem:[#allocation14 + $0x4e0] sm:$0xff]  ;;  %v8265_v11 = vld [vmem:[#allocation14 + $0x4c8] sm:$0xff]  ;;  %v17581_v28 = vcombine.low %v8256_v29, %v8260_v57 }
 0x5d3   :  { %v19763_v55 = vadd.f32 %v8088_v18, %v19534_v58  ;;  %v8297_v29 = vld [vmem:[#allocation14 + $0x5c8] sm:$0xff] }
 0x5d4   :  { %11247 = vmatpush1.bf16.msra.mxu0 %v17517_v51  ;;  %v8241_v51 = vld [vmem:[#allocation14 + $0x408] sm:$0xff] }
 0x5d5   :  { %11411 = vmatpush1.bf16.msra.mxu1 %v17519_v52  ;;  %11248 = vmatprep.subr.bf16.mxu0 %v17526_v60  ;;  %v8245_v52 = vld [vmem:[#allocation14 + $0x428] sm:$0xff]  ;;  %v17557_v60 = vcombine.low %v8232_v39, %v8236_v40  ;;  %v19770_v9 = vpack.c.bf16 %v19763_v55, %v19763_v55  ;;  %v8272_v39 = vld [vmem:[#allocation14 + $0x500] sm:$0xff] }
 0x5d6   :  { %11412 = vmatprep.subr.bf16.mxu1 %v17528_v63  ;;  %v17559_v63 = vcombine.low %v8233_v7, %v8237_v33  ;;  %v17568_v8 = vcombine.high %v8241_v51, %v8245_v52  ;;  %v17567_v58 = vcombine.low %v8241_v51, %v8245_v52  ;;  %v8276_v40 = vld [vmem:[#allocation14 + $0x520] sm:$0xff]  ;;  %v8277_v7 = vld [vmem:[#allocation14 + $0x528] sm:$0xff]  ;;  %v17589_v33 = vcombine.low %v8264_v37, %v8268_v36 }
 0x5d7   :  { %v17598_v18 = vcombine.high %v8272_v39, %v8276_v40  ;;  %v17597_v24 = vcombine.low %v8272_v39, %v8276_v40  ;;  %v17599_v51 = vcombine.low %v8273_v16, %v8277_v7  ;;  %v8301_v57 = vld [vmem:[#allocation14 + $0x5e8] sm:$0xff] }
 0x5d8   :  { %11249 = vmatpush1.bf16.msra.mxu0 %v17525_v61  ;;  %v8252_v61 = vld [vmem:[#allocation14 + $0x460] sm:$0xff]  ;;  %v8317_v39 = vld [vmem:[#allocation14 + $0x668] sm:$0xff] }
 0x5d9   :  { %11413 = vmatpush1.bf16.msra.mxu1 %v17527_v19  ;;  %11250 = vmatprep.subr.bf16.mxu0 %v17534_v21  ;;  %v17565_v19 = vcombine.low %v8240_v3, %v8244_v15  ;;  %v8249_v21 = vld [vmem:[#allocation14 + $0x448] sm:$0xff]  ;;  %v17574_v26 = vcombine.high %v8248_v17, %v8252_v61 }
 0x5da   :  { %11414 = vmatprep.subr.bf16.mxu1 %v17536_v62  ;;  %v8253_v62 = vld [vmem:[#allocation14 + $0x468] sm:$0xff] }
 0x5db   :  { %v8281_v3 = vld [vmem:[#allocation14 + $0x548] sm:$0xff] }
 0x5dc   :  { %11251 = vmatpush1.bf16.msra.mxu0 %v17533_v30  ;;  %v17576_v30 = vcombine.high %v8249_v21, %v8253_v62  ;;  %v8285_v15 = vld [vmem:[#allocation14 + $0x568] sm:$0xff] }
 0x5dd   :  { %11415 = vmatpush1.bf16.msra.mxu1 %v17535_v59  ;;  %11252 = vmatprep.subr.bf16.mxu0 %v17542_v34  ;;  %v8261_v59 = vld [vmem:[#allocation14 + $0x4a8] sm:$0xff]  ;;  %v17573_v34 = vcombine.low %v8248_v17, %v8252_v61 }
 0x5de   :  { %11416 = vmatprep.subr.bf16.mxu1 %v17544_v35  ;;  %v17575_v35 = vcombine.low %v8249_v21, %v8253_v62  ;;  %v17584_v50 = vcombine.high %v8257_v32, %v8261_v59  ;;  %v8293_v17 = vld [vmem:[#allocation14 + $0x5a8] sm:$0xff] }
 0x5e0   :  { %11253 = vmatpush1.bf16.msra.mxu0 %v17541_v38  ;;  %v8269_v38 = vld [vmem:[#allocation14 + $0x4e8] sm:$0xff] }
 0x5e1   :  { %11417 = vmatpush1.bf16.msra.mxu1 %v17543_v27  ;;  %11254 = vmatprep.subr.bf16.mxu0 %v17550_v10  ;;  %v17583_v27 = vcombine.low %v8257_v32, %v8261_v59  ;;  %v17590_v10 = vcombine.high %v8264_v37, %v8268_v36  ;;  %v8309_v37 = vld [vmem:[#allocation14 + $0x628] sm:$0xff] }
 0x5e2   :  { %11418 = vmatprep.subr.bf16.mxu1 %v17552_v2  ;;  %v17592_v2 = vcombine.high %v8265_v11, %v8269_v38 }
 0x5e4   :  { %11255 = vmatpush1.bf16.msra.mxu0 %v17549_v5  ;;  %v17591_v5 = vcombine.low %v8265_v11, %v8269_v38  ;;  %v17623_v11 = vcombine.low %v8297_v29, %v8301_v57 }
 0x5e5   :  { %11419 = vmatpush1.bf16.msra.mxu1 %v17551_v42  ;;  %11256 = vmatprep.subr.bf16.mxu0 %v17558_v46  ;;  %v17600_v42 = vcombine.high %v8273_v16, %v8277_v7  ;;  %v8280_v46 = vld [vmem:[#allocation14 + $0x540] sm:$0xff] }
 0x5e6   :  { %11420 = vmatprep.subr.bf16.mxu1 %v17560_v49  ;;  %v8284_v49 = vld [vmem:[#allocation14 + $0x560] sm:$0xff] }
 0x5e7   :  { %v17606_v52 = vcombine.high %v8280_v46, %v8284_v49  ;;  %v17605_v61 = vcombine.low %v8280_v46, %v8284_v49  ;;  %v8325_v46 = vld [vmem:[#allocation14 + $0x6a8] sm:$0xff] }
 0x5e8   :  { %11257 = vmatpush1.bf16.msra.mxu0 %v17557_v60  ;;  %v17608_v60 = vcombine.high %v8281_v3, %v8285_v15 }
 0x5e9   :  { %11421 = vmatpush1.bf16.msra.mxu1 %v17559_v63  ;;  %11267 = vmatprep.subr.bf16.mxu0 %v17566_v0  ;;  %v8288_v63 = vld [vmem:[#allocation14 + $0x580] sm:$0xff] }
 0x5ea   :  { %11431 = vmatprep.subr.bf16.mxu1 %v17568_v8  ;;  %v8292_v0 = vld [vmem:[#allocation14 + $0x5a0] sm:$0xff]  ;;  %v8289_v8 = vld [vmem:[#allocation14 + $0x588] sm:$0xff] }
 0x5eb   :  { %11259 = vmatmul.mubr.bf16.vlgmr.msra.gmra.mrb[24].mxu0 %v19770_v9  ;;  %v17614_v21 = vcombine.high %v8288_v63, %v8292_v0  ;;  %v17616_v62 = vcombine.high %v8289_v8, %v8293_v17  ;;  %v17615_v32 = vcombine.low %v8289_v8, %v8293_v17 }
 0x5ec   :  { %11423 = vmatmul.mubr.bf16.vlgmr.msra.gmra.mrb[24].mxu1 %v19770_v9  ;;  %11268 = vmatpush1.bf16.msra.mxu0 %v17565_v19  ;;  %v17607_v19 = vcombine.low %v8281_v3, %v8285_v15 }
 0x5ed   :  { %11299 = vmatprep.mubr.bf16.mxu0 %v19774_v6  ;;  %11432 = vmatpush1.bf16.msra.mxu1 %v17567_v58  ;;  %v8296_v58 = vld [vmem:[#allocation14 + $0x5c0] sm:$0xff] }
 0x5ee   :  { %11463 = vmatprep.mubr.bf16.mxu1 %v19774_v6  ;;  %11269 = vmatprep.subr.bf16.mxu0 %v17574_v26  ;;  %v8300_v26 = vld [vmem:[#allocation14 + $0x5e0] sm:$0xff] }
 0x5ef   :  { %11433 = vmatprep.subr.bf16.mxu1 %v17576_v30  ;;  %v17613_v30 = vcombine.low %v8288_v63, %v8292_v0  ;;  %v17622_v59 = vcombine.high %v8296_v58, %v8300_v26  ;;  %v17621_v36 = vcombine.low %v8296_v58, %v8300_v26  ;;  %v8333_v63 = vld [vmem:[#allocation14 + $0x6e8] sm:$0xff] }
 0x5f0   :  { %11270 = vmatpush1.bf16.msra.mxu0 %v17573_v34  ;;  %v17624_v34 = vcombine.high %v8297_v29, %v8301_v57  ;;  %v8341_v58 = vld [vmem:[#allocation14 + $0x728] sm:$0xff] }
 0x5f1   :  { %11434 = vmatpush1.bf16.msra.mxu1 %v17575_v35  ;;  %11271 = vmatprep.subr.bf16.mxu0 %v17582_v44  ;;  %v8304_v35 = vld [vmem:[#allocation14 + $0x600] sm:$0xff] }
 0x5f2   :  { %11435 = vmatprep.subr.bf16.mxu1 %v17584_v50  ;;  %v8308_v44 = vld [vmem:[#allocation14 + $0x620] sm:$0xff]  ;;  %v8305_v50 = vld [vmem:[#allocation14 + $0x608] sm:$0xff] }
 0x5f3   :  { %v17630_v38 = vcombine.high %v8304_v35, %v8308_v44  ;;  %v17629_v40 = vcombine.low %v8304_v35, %v8308_v44  ;;  %v17631_v16 = vcombine.low %v8305_v50, %v8309_v37  ;;  %v8349_v35 = vld [vmem:[#allocation14 + $0x768] sm:$0xff] }
 0x5f4   :  { %11272 = vmatpush1.bf16.msra.mxu0 %v17581_v28  ;;  %v17632_v28 = vcombine.high %v8305_v50, %v8309_v37  ;;  %v4843_v50 = vrot.slane %v19740_v25, %v19563_v1 }
 0x5f5   :  { %11436 = vmatpush1.bf16.msra.mxu1 %v17583_v27  ;;  %11273 = vmatprep.subr.bf16.mxu0 %v17590_v10  ;;  %v8312_v27 = vld [vmem:[#allocation14 + $0x640] sm:$0xff] }
 0x5f6   :  { %11437 = vmatprep.subr.bf16.mxu1 %v17592_v2  ;;  %v8316_v10 = vld [vmem:[#allocation14 + $0x660] sm:$0xff]  ;;  %v8313_v2 = vld [vmem:[#allocation14 + $0x648] sm:$0xff] }
 0x5f7   :  { %v17638_v7 = vcombine.high %v8312_v27, %v8316_v10  ;;  %v17637_v49 = vcombine.low %v8312_v27, %v8316_v10  ;;  %v17639_v3 = vcombine.low %v8313_v2, %v8317_v39  ;;  %v8353_v27 = vld [vmem:[#allocation14 + $0x788] sm:$0xff] }
 0x5f8   :  { %11274 = vmatpush1.bf16.msra.mxu0 %v17589_v33  ;;  %v17640_v33 = vcombine.high %v8313_v2, %v8317_v39  ;;  %v8357_v10 = vld [vmem:[#allocation14 + $0x7a8] sm:$0xff]  ;;  %v18624_v39 = vadd.f32 %v19734_v14, %v4843_v50  ;;  %v8368_v14 = vld [vmem:[#allocation14 + $0x800] sm:$0xff] }
 0x5f9   :  { %11438 = vmatpush1.bf16.msra.mxu1 %v17591_v5  ;;  %11275 = vmatprep.subr.bf16.mxu0 %v17598_v18  ;;  %v8320_v5 = vld [vmem:[#allocation14 + $0x680] sm:$0xff]  ;;  %v17680_v25 = vcombine.high %v8353_v27, %v8357_v10 }
 0x5fa   :  { %11439 = vmatprep.subr.bf16.mxu1 %v17600_v42  ;;  %v8324_v18 = vld [vmem:[#allocation14 + $0x6a0] sm:$0xff]  ;;  %v8321_v42 = vld [vmem:[#allocation14 + $0x688] sm:$0xff] }
 0x5fb   :  { %v17646_v15 = vcombine.high %v8320_v5, %v8324_v18  ;;  %v17645_v0 = vcombine.low %v8320_v5, %v8324_v18  ;;  %v17647_v8 = vcombine.low %v8321_v42, %v8325_v46  ;;  %v8361_v5 = vld [vmem:[#allocation14 + $0x7c8] sm:$0xff] }
 0x5fc   :  { %11276 = vmatpush1.bf16.msra.mxu0 %v17597_v24  ;;  %v17648_v24 = vcombine.high %v8321_v42, %v8325_v46  ;;  %v8365_v18 = vld [vmem:[#allocation14 + $0x7e8] sm:$0xff]  ;;  %v8090_v46 = vmax.f32 %v18624_v39, 0.0 }
 0x5fd   :  { %11440 = vmatpush1.bf16.msra.mxu1 %v17599_v51  ;;  %11277 = vmatprep.subr.bf16.mxu0 %v17606_v52  ;;  %v8328_v51 = vld [vmem:[#allocation14 + $0x6c0] sm:$0xff] }
 0x5fe   :  { %11441 = vmatprep.subr.bf16.mxu1 %v17608_v60  ;;  %v8332_v52 = vld [vmem:[#allocation14 + $0x6e0] sm:$0xff]  ;;  %v8329_v60 = vld [vmem:[#allocation14 + $0x6c8] sm:$0xff] }
 0x5ff   :  { %v17654_v17 = vcombine.high %v8328_v51, %v8332_v52  ;;  %v17653_v26 = vcombine.low %v8328_v51, %v8332_v52  ;;  %v17655_v29 = vcombine.low %v8329_v60, %v8333_v63  ;;  %v8369_v51 = vld [vmem:[#allocation14 + $0x808] sm:$0xff] }
 0x600   :  { %11278 = vmatpush1.bf16.msra.mxu0 %v17605_v61  ;;  %v17656_v61 = vcombine.high %v8329_v60, %v8333_v63  ;;  %v8373_v52 = vld [vmem:[#allocation14 + $0x828] sm:$0xff]  ;;  %v19784_v63 = vadd.f32 %v8090_v46, %v19578_v41  ;;  %v8408_v46 = vld [vmem:[#allocation14 + $0x940] sm:$0xff] }
 0x601   :  { %11442 = vmatpush1.bf16.msra.mxu1 %v17607_v19  ;;  %11279 = vmatprep.subr.bf16.mxu0 %v17614_v21  ;;  %v8336_v19 = vld [vmem:[#allocation14 + $0x700] sm:$0xff]  ;;  %v17695_v41 = vcombine.low %v8369_v51, %v8373_v52 }
 0x602   :  { %11443 = vmatprep.subr.bf16.mxu1 %v17616_v62  ;;  %v8340_v21 = vld [vmem:[#allocation14 + $0x720] sm:$0xff]  ;;  %v8337_v62 = vld [vmem:[#allocation14 + $0x708] sm:$0xff] }
 0x603   :  { %v17662_v57 = vcombine.high %v8336_v19, %v8340_v21  ;;  %v17661_v44 = vcombine.low %v8336_v19, %v8340_v21  ;;  %v17663_v37 = vcombine.low %v8337_v62, %v8341_v58  ;;  %v8380_v19 = vld [vmem:[#allocation14 + $0x860] sm:$0xff]  ;;  %v8377_v21 = vld [vmem:[#allocation14 + $0x848] sm:$0xff] }
 0x604   :  { %11280 = vmatpush1.bf16.msra.mxu0 %v17613_v30  ;;  %v17664_v30 = vcombine.high %v8337_v62, %v8341_v58  ;;  %v8381_v62 = vld [vmem:[#allocation14 + $0x868] sm:$0xff] }
 0x605   :  { %11444 = vmatpush1.bf16.msra.mxu1 %v17615_v32  ;;  %11281 = vmatprep.subr.bf16.mxu0 %v17622_v59  ;;  %v8344_v32 = vld [vmem:[#allocation14 + $0x740] sm:$0xff] }
 0x606   :  { %11445 = vmatprep.subr.bf16.mxu1 %v17624_v34  ;;  %v8348_v59 = vld [vmem:[#allocation14 + $0x760] sm:$0xff]  ;;  %v8345_v34 = vld [vmem:[#allocation14 + $0x748] sm:$0xff] }
 0x607   :  { %v17669_v2 = vcombine.low %v8344_v32, %v8348_v59 }
 0x608   :  { %11282 = vmatpush1.bf16.msra.mxu0 %v17621_v36  ;;  %v17670_v36 = vcombine.high %v8344_v32, %v8348_v59  ;;  %v8388_v32 = vld [vmem:[#allocation14 + $0x8a0] sm:$0xff]  ;;  %v8385_v59 = vld [vmem:[#allocation14 + $0x888] sm:$0xff] }
 0x609   :  { %11446 = vmatpush1.bf16.msra.mxu1 %v17623_v11  ;;  %11283 = vmatprep.subr.bf16.mxu0 %v17630_v38  ;;  %v17672_v11 = vcombine.high %v8345_v34, %v8349_v35  ;;  %v8352_v38 = vld [vmem:[#allocation14 + $0x780] sm:$0xff] }
 0x60a   :  { %11447 = vmatprep.subr.bf16.mxu1 %v17632_v28  ;;  %v8356_v28 = vld [vmem:[#allocation14 + $0x7a0] sm:$0xff] }
 0x60b   :  { %v17677_v42 = vcombine.low %v8352_v38, %v8356_v28 }
 0x60c   :  { %11284 = vmatpush1.bf16.msra.mxu0 %v17629_v40  ;;  %v17671_v40 = vcombine.low %v8345_v34, %v8349_v35  ;;  %v8389_v34 = vld [vmem:[#allocation14 + $0x8a8] sm:$0xff] }
 0x60d   :  { %11448 = vmatpush1.bf16.msra.mxu1 %v17631_v16  ;;  %11285 = vmatprep.subr.bf16.mxu0 %v17638_v7  ;;  %v17678_v16 = vcombine.high %v8352_v38, %v8356_v28  ;;  %v8360_v7 = vld [vmem:[#allocation14 + $0x7c0] sm:$0xff]  ;;  %v8393_v38 = vld [vmem:[#allocation14 + $0x8c8] sm:$0xff] }
 0x60e   :  { %11449 = vmatprep.subr.bf16.mxu1 %v17640_v33  ;;  %v8364_v33 = vld [vmem:[#allocation14 + $0x7e0] sm:$0xff]  ;;  %v8397_v28 = vld [vmem:[#allocation14 + $0x8e8] sm:$0xff] }
 0x60f   :  { %v17685_v60 = vcombine.low %v8360_v7, %v8364_v33  ;;  %v17720_v39 = vcombine.high %v8393_v38, %v8397_v28 }
 0x610   :  { %11286 = vmatpush1.bf16.msra.mxu0 %v17637_v49  ;;  %v17679_v49 = vcombine.low %v8353_v27, %v8357_v10  ;;  %v17711_v10 = vcombine.low %v8385_v59, %v8389_v34 }
 0x611   :  { %11450 = vmatpush1.bf16.msra.mxu1 %v17639_v3  ;;  %11287 = vmatprep.subr.bf16.mxu0 %v17646_v15  ;;  %v17686_v3 = vcombine.high %v8360_v7, %v8364_v33  ;;  %v17688_v15 = vcombine.high %v8361_v5, %v8365_v18  ;;  %v8405_v7 = vld [vmem:[#allocation14 + $0x928] sm:$0xff] }
 0x612   :  { %11451 = vmatprep.subr.bf16.mxu1 %v17648_v24  ;;  %v8372_v24 = vld [vmem:[#allocation14 + $0x820] sm:$0xff] }
 0x613   :  { %v17693_v58 = vcombine.low %v8368_v14, %v8372_v24 }
 0x614   :  { %11288 = vmatpush1.bf16.msra.mxu0 %v17645_v0  ;;  %v17687_v0 = vcombine.low %v8361_v5, %v8365_v18  ;;  %v17719_v5 = vcombine.low %v8393_v38, %v8397_v28 }
 0x615   :  { %11452 = vmatpush1.bf16.msra.mxu1 %v17647_v8  ;;  %11289 = vmatprep.subr.bf16.mxu0 %v17654_v17  ;;  %v17694_v8 = vcombine.high %v8368_v14, %v8372_v24  ;;  %v17696_v17 = vcombine.high %v8369_v51, %v8373_v52 }
 0x616   :  { %11453 = vmatprep.subr.bf16.mxu1 %v17656_v61  ;;  %v8376_v61 = vld [vmem:[#allocation14 + $0x840] sm:$0xff] }
 0x617   :  { %v17701_v35 = vcombine.low %v8376_v61, %v8380_v19 }
 0x618   :  { %11290 = vmatpush1.bf16.msra.mxu0 %v17653_v26  ;;  %v19788_v26 = vpack.c.bf16 %v19784_v63, %v19784_v63 }
 0x619   :  { %11454 = vmatpush1.bf16.msra.mxu1 %v17655_v29  ;;  %11291 = vmatprep.subr.bf16.mxu0 %v17662_v57  ;;  %v17702_v29 = vcombine.high %v8376_v61, %v8380_v19  ;;  %v17704_v57 = vcombine.high %v8377_v21, %v8381_v62 }
 0x61a   :  { %11455 = vmatprep.subr.bf16.mxu1 %v17664_v30  ;;  %v8384_v30 = vld [vmem:[#allocation14 + $0x880] sm:$0xff] }
 0x61b   :  { %v17710_v50 = vcombine.high %v8384_v30, %v8388_v32  ;;  %v17709_v27 = vcombine.low %v8384_v30, %v8388_v32 }
 0x61c   :  { %11292 = vmatpush1.bf16.msra.mxu0 %v17661_v44  ;;  %v17703_v44 = vcombine.low %v8377_v21, %v8381_v62 }
 0x61d   :  { %11456 = vmatpush1.bf16.msra.mxu1 %v17663_v37  ;;  %11293 = vmatprep.subr.bf16.mxu0 %v17670_v36  ;;  %v17712_v37 = vcombine.high %v8385_v59, %v8389_v34  ;;  %v8392_v36 = vld [vmem:[#allocation14 + $0x8c0] sm:$0xff] }
 0x61e   :  { %11457 = vmatprep.subr.bf16.mxu1 %v17672_v11  ;;  %v8396_v11 = vld [vmem:[#allocation14 + $0x8e0] sm:$0xff] }
 0x61f   :  { %v17717_v33 = vcombine.low %v8392_v36, %v8396_v11 }
 0x620   :  { %11294 = vmatpush1.bf16.msra.mxu0 %v17669_v2  ;;  %v17718_v2 = vcombine.high %v8392_v36, %v8396_v11 }
 0x621   :  { %11458 = vmatpush1.bf16.msra.mxu1 %v17671_v40  ;;  %11295 = vmatprep.subr.bf16.mxu0 %v17678_v16  ;;  %v8400_v40 = vld [vmem:[#allocation14 + $0x900] sm:$0xff] }
 0x622   :  { %11459 = vmatprep.subr.bf16.mxu1 %v17680_v25  ;;  %v8404_v16 = vld [vmem:[#allocation14 + $0x920] sm:$0xff]  ;;  %v8401_v25 = vld [vmem:[#allocation14 + $0x908] sm:$0xff] }
 0x623   :  { %v17726_v18 = vcombine.high %v8400_v40, %v8404_v16  ;;  %v17725_v14 = vcombine.low %v8400_v40, %v8404_v16  ;;  %v17727_v24 = vcombine.low %v8401_v25, %v8405_v7 }
 0x624   :  { %11296 = vmatpush1.bf16.msra.mxu0 %v17677_v42  ;;  %v17728_v42 = vcombine.high %v8401_v25, %v8405_v7 }
 0x625   :  { %11460 = vmatpush1.bf16.msra.mxu1 %v17679_v49  ;;  %11297 = vmatprep.subr.bf16.mxu0 %v17686_v3  ;;  %v8412_v49 = vld [vmem:[#allocation14 + $0x960] sm:$0xff]  ;;  %v8409_v3 = vld [vmem:[#allocation14 + $0x948] sm:$0xff] }
 0x626   :  { %11461 = vmatprep.subr.bf16.mxu1 %v17688_v15  ;;  %v8413_v15 = vld [vmem:[#allocation14 + $0x968] sm:$0xff]  ;;  %v17734_v51 = vcombine.high %v8408_v46, %v8412_v49  ;;  %v17733_v61 = vcombine.low %v8408_v46, %v8412_v49 }
 0x627   :  { %v17736_v52 = vcombine.high %v8409_v3, %v8413_v15  ;;  %v17735_v19 = vcombine.low %v8409_v3, %v8413_v15 }
 0x628   :  { %11298 = vmatpush1.bf16.msra.mxu0 %v17685_v60  ;;  %v8416_v60 = vld [vmem:[#allocation14 + $0x980] sm:$0xff] }
 0x629   :  { %11462 = vmatpush1.bf16.msra.mxu1 %v17687_v0  ;;  %11308 = vmatprep.subr.bf16.mxu0 %v17694_v8  ;;  %v8420_v0 = vld [vmem:[#allocation14 + $0x9a0] sm:$0xff]  ;;  %v8417_v8 = vld [vmem:[#allocation14 + $0x988] sm:$0xff] }
 0x62a   :  { %11472 = vmatprep.subr.bf16.mxu1 %v17696_v17  ;;  %v8421_v17 = vld [vmem:[#allocation14 + $0x9a8] sm:$0xff]  ;;  %v17742_v21 = vcombine.high %v8416_v60, %v8420_v0  ;;  %v17741_v30 = vcombine.low %v8416_v60, %v8420_v0 }
 0x62b   :  { %11300 = vmatmul.mubr.bf16.vlgmr.msra.gmra.mrb[24].mxu0 %v19788_v26  ;;  %v17744_v62 = vcombine.high %v8417_v8, %v8421_v17  ;;  %v17743_v32 = vcombine.low %v8417_v8, %v8421_v17 }
 0x62c   :  { %11464 = vmatmul.mubr.bf16.vlgmr.msra.gmra.mrb[24].mxu1 %v19788_v26  ;;  %11309 = vmatpush1.bf16.msra.mxu0 %v17693_v58  ;;  %v8424_v58 = vld [vmem:[#allocation14 + $0x9c0] sm:$0xff] }
 0x62d   :  { %11473 = vmatpush1.bf16.msra.mxu1 %v17695_v41  ;;  %11310 = vmatprep.subr.bf16.mxu0 %v17702_v29  ;;  %v8428_v41 = vld [vmem:[#allocation14 + $0x9e0] sm:$0xff]  ;;  %v8425_v29 = vld [vmem:[#allocation14 + $0x9c8] sm:$0xff] }
 0x62e   :  { %11474 = vmatprep.subr.bf16.mxu1 %v17704_v57  ;;  %v8429_v57 = vld [vmem:[#allocation14 + $0x9e8] sm:$0xff]  ;;  %v17750_v59 = vcombine.high %v8424_v58, %v8428_v41  ;;  %v17749_v36 = vcombine.low %v8424_v58, %v8428_v41 }
 0x62f   :  { %v17752_v34 = vcombine.high %v8425_v29, %v8429_v57  ;;  %v17751_v11 = vcombine.low %v8425_v29, %v8429_v57 }
 0x630   :  { %11311 = vmatpush1.bf16.msra.mxu0 %v17701_v35  ;;  %v8432_v35 = vld [vmem:[#allocation14 + $0xa00] sm:$0xff] }
 0x631   :  { %11475 = vmatpush1.bf16.msra.mxu1 %v17703_v44  ;;  %11312 = vmatprep.subr.bf16.mxu0 %v17710_v50  ;;  %v8436_v44 = vld [vmem:[#allocation14 + $0xa20] sm:$0xff]  ;;  %v8433_v50 = vld [vmem:[#allocation14 + $0xa08] sm:$0xff] }
 0x632   :  { %11476 = vmatprep.subr.bf16.mxu1 %v17712_v37  ;;  %v8437_v37 = vld [vmem:[#allocation14 + $0xa28] sm:$0xff]  ;;  %v17758_v38 = vcombine.high %v8432_v35, %v8436_v44  ;;  %v17757_v40 = vcombine.low %v8432_v35, %v8436_v44 }
 0x633   :  { %v17760_v28 = vcombine.high %v8433_v50, %v8437_v37  ;;  %v17759_v16 = vcombine.low %v8433_v50, %v8437_v37 }
 0x634   :  { %11313 = vmatpush1.bf16.msra.mxu0 %v17709_v27  ;;  %v8440_v27 = vld [vmem:[#allocation14 + $0xa40] sm:$0xff] }
 0x635   :  { %11477 = vmatpush1.bf16.msra.mxu1 %v17711_v10  ;;  %11314 = vmatprep.subr.bf16.mxu0 %v17718_v2  ;;  %v8444_v10 = vld [vmem:[#allocation14 + $0xa60] sm:$0xff]  ;;  %v8441_v2 = vld [vmem:[#allocation14 + $0xa48] sm:$0xff] }
 0x636   :  { %11478 = vmatprep.subr.bf16.mxu1 %v17720_v39  ;;  %v8445_v39 = vld [vmem:[#allocation14 + $0xa68] sm:$0xff]  ;;  %v17766_v25 = vcombine.high %v8440_v27, %v8444_v10  ;;  %v17765_v46 = vcombine.low %v8440_v27, %v8444_v10 }
 0x637   :  { %v17768_v7 = vcombine.high %v8441_v2, %v8445_v39  ;;  %v17767_v49 = vcombine.low %v8441_v2, %v8445_v39 }
 0x638   :  { %11315 = vmatpush1.bf16.msra.mxu0 %v17717_v33  ;;  %v8448_v33 = vld [vmem:[#allocation14 + $0xa80] sm:$0xff] }
 0x639   :  { %11479 = vmatpush1.bf16.msra.mxu1 %v17719_v5  ;;  %11316 = vmatprep.subr.bf16.mxu0 %v17726_v18  ;;  %v8452_v5 = vld [vmem:[#allocation14 + $0xaa0] sm:$0xff]  ;;  %v8449_v18 = vld [vmem:[#allocation14 + $0xa88] sm:$0xff] }
 0x63a   :  { %11480 = vmatprep.subr.bf16.mxu1 %v17728_v42  ;;  %v8453_v42 = vld [vmem:[#allocation14 + $0xaa8] sm:$0xff]  ;;  %v17774_v3 = vcombine.high %v8448_v33, %v8452_v5  ;;  %v17773_v60 = vcombine.low %v8448_v33, %v8452_v5 }
 0x63b   :  { %v17776_v15 = vcombine.high %v8449_v18, %v8453_v42  ;;  %v17775_v0 = vcombine.low %v8449_v18, %v8453_v42 }
 0x63c   :  { %11317 = vmatpush1.bf16.msra.mxu0 %v17725_v14  ;;  %v8456_v14 = vld [vmem:[#allocation14 + $0xac0] sm:$0xff] }
 0x63d   :  { %11481 = vmatpush1.bf16.msra.mxu1 %v17727_v24  ;;  %11318 = vmatprep.subr.bf16.mxu0 %v17734_v51  ;;  %v8460_v24 = vld [vmem:[#allocation14 + $0xae0] sm:$0xff]  ;;  %v8457_v51 = vld [vmem:[#allocation14 + $0xac8] sm:$0xff] }
 0x63e   :  { %11482 = vmatprep.subr.bf16.mxu1 %v17736_v52  ;;  %v8461_v52 = vld [vmem:[#allocation14 + $0xae8] sm:$0xff]  ;;  %v17782_v8 = vcombine.high %v8456_v14, %v8460_v24  ;;  %v17781_v58 = vcombine.low %v8456_v14, %v8460_v24 }
 0x63f   :  { %v17784_v17 = vcombine.high %v8457_v51, %v8461_v52  ;;  %v17783_v41 = vcombine.low %v8457_v51, %v8461_v52 }
 0x640   :  { %11319 = vmatpush1.bf16.msra.mxu0 %v17733_v61  ;;  %v8464_v61 = vld [vmem:[#allocation14 + $0xb00] sm:$0xff] }
 0x641   :  { %11483 = vmatpush1.bf16.msra.mxu1 %v17735_v19  ;;  %11320 = vmatprep.subr.bf16.mxu0 %v17742_v21  ;;  %v8468_v19 = vld [vmem:[#allocation14 + $0xb20] sm:$0xff]  ;;  %v8465_v21 = vld [vmem:[#allocation14 + $0xb08] sm:$0xff] }
 0x642   :  { %11484 = vmatprep.subr.bf16.mxu1 %v17744_v62  ;;  %v8469_v62 = vld [vmem:[#allocation14 + $0xb28] sm:$0xff]  ;;  %v17790_v29 = vcombine.high %v8464_v61, %v8468_v19  ;;  %v17789_v35 = vcombine.low %v8464_v61, %v8468_v19 }
 0x643   :  { %v17792_v57 = vcombine.high %v8465_v21, %v8469_v62  ;;  %v17791_v44 = vcombine.low %v8465_v21, %v8469_v62 }
 0x644   :  { %11321 = vmatpush1.bf16.msra.mxu0 %v17741_v30  ;;  %v8472_v30 = vld [vmem:[#allocation14 + $0xb40] sm:$0xff] }
 0x645   :  { %11485 = vmatpush1.bf16.msra.mxu1 %v17743_v32  ;;  %11322 = vmatprep.subr.bf16.mxu0 %v17750_v59  ;;  %v8476_v32 = vld [vmem:[#allocation14 + $0xb60] sm:$0xff]  ;;  %v8473_v59 = vld [vmem:[#allocation14 + $0xb48] sm:$0xff] }
 0x646   :  { %11486 = vmatprep.subr.bf16.mxu1 %v17752_v34  ;;  %v8477_v34 = vld [vmem:[#allocation14 + $0xb68] sm:$0xff]  ;;  %v17798_v50 = vcombine.high %v8472_v30, %v8476_v32  ;;  %v17797_v27 = vcombine.low %v8472_v30, %v8476_v32 }
 0x647   :  { %v17800_v37 = vcombine.high %v8473_v59, %v8477_v34  ;;  %v17799_v10 = vcombine.low %v8473_v59, %v8477_v34 }
 0x648   :  { %11323 = vmatpush1.bf16.msra.mxu0 %v17749_v36  ;;  %v8480_v36 = vld [vmem:[#allocation14 + $0xb80] sm:$0xff] }
 0x649   :  { %11487 = vmatpush1.bf16.msra.mxu1 %v17751_v11  ;;  %11324 = vmatprep.subr.bf16.mxu0 %v17758_v38  ;;  %v8484_v11 = vld [vmem:[#allocation14 + $0xba0] sm:$0xff]  ;;  %v8481_v38 = vld [vmem:[#allocation14 + $0xb88] sm:$0xff] }
 0x64a   :  { %11488 = vmatprep.subr.bf16.mxu1 %v17760_v28  ;;  %v8485_v28 = vld [vmem:[#allocation14 + $0xba8] sm:$0xff]  ;;  %v17806_v2 = vcombine.high %v8480_v36, %v8484_v11  ;;  %v17805_v33 = vcombine.low %v8480_v36, %v8484_v11  ;;  %v8504_v36 = vld [vmem:[#allocation14 + $0xc40] sm:$0xff] }
 0x64b   :  { %v17808_v39 = vcombine.high %v8481_v38, %v8485_v28  ;;  %v17807_v5 = vcombine.low %v8481_v38, %v8485_v28  ;;  %v8508_v38 = vld [vmem:[#allocation14 + $0xc60] sm:$0xff]  ;;  %v8505_v28 = vld [vmem:[#allocation14 + $0xc48] sm:$0xff] }
 0x64c   :  { %11325 = vmatpush1.bf16.msra.mxu0 %v17757_v40  ;;  %v8488_v40 = vld [vmem:[#allocation14 + $0xbc0] sm:$0xff] }
 0x64d   :  { %11489 = vmatpush1.bf16.msra.mxu1 %v17759_v16  ;;  %11326 = vmatprep.subr.bf16.mxu0 %v17766_v25  ;;  %v8492_v16 = vld [vmem:[#allocation14 + $0xbe0] sm:$0xff]  ;;  %v8489_v25 = vld [vmem:[#allocation14 + $0xbc8] sm:$0xff] }
 0x64e   :  { %11490 = vmatprep.subr.bf16.mxu1 %v17768_v7  ;;  %v8493_v7 = vld [vmem:[#allocation14 + $0xbe8] sm:$0xff]  ;;  %v17814_v18 = vcombine.high %v8488_v40, %v8492_v16  ;;  %v17813_v14 = vcombine.low %v8488_v40, %v8492_v16  ;;  %v8512_v40 = vld [vmem:[#allocation14 + $0xc80] sm:$0xff] }
 0x64f   :  { %v17816_v42 = vcombine.high %v8489_v25, %v8493_v7  ;;  %v17815_v24 = vcombine.low %v8489_v25, %v8493_v7  ;;  %v8516_v16 = vld [vmem:[#allocation14 + $0xca0] sm:$0xff]  ;;  %v8513_v25 = vld [vmem:[#allocation14 + $0xc88] sm:$0xff] }
 0x650   :  { %11327 = vmatpush1.bf16.msra.mxu0 %v17765_v46  ;;  %v8496_v46 = vld [vmem:[#allocation14 + $0xc00] sm:$0xff]  ;;  %v8517_v7 = vld [vmem:[#allocation14 + $0xca8] sm:$0xff] }
 0x651   :  { %11491 = vmatpush1.bf16.msra.mxu1 %v17767_v49  ;;  %11328 = vmatprep.subr.bf16.mxu0 %v17774_v3  ;;  %v8500_v49 = vld [vmem:[#allocation14 + $0xc20] sm:$0xff]  ;;  %v8497_v3 = vld [vmem:[#allocation14 + $0xc08] sm:$0xff] }
 0x652   :  { %11492 = vmatprep.subr.bf16.mxu1 %v17776_v15  ;;  %v8501_v15 = vld [vmem:[#allocation14 + $0xc28] sm:$0xff]  ;;  %v17822_v51 = vcombine.high %v8496_v46, %v8500_v49 }
 0x653   :  { %v17824_v52 = vcombine.high %v8497_v3, %v8501_v15 }
 0x654   :  { %11329 = vmatpush1.bf16.msra.mxu0 %v17773_v60  ;;  %v19792_v60 = vld [vmem:[#allocation13] sm:$0xff] }
 0x655   :  { %11493 = vmatpush1.bf16.msra.mxu1 %v17775_v0  ;;  %11330 = vmatprep.subr.bf16.mxu0 %v17782_v8  ;;  %v4851_v0 = vrot.slane %v19792_v60, %v19595_v4  ;;  %v4855_v8 = vrot.slane %v19792_v60, %v19566_v13 }
 0x656   :  { %11494 = vmatprep.subr.bf16.mxu1 %v17784_v17  ;;  %v4863_v17 = vrot.slane %v19792_v60, %v19598_v20 }
 0x658   :  { %11331 = vmatpush1.bf16.msra.mxu0 %v17781_v58 }
 0x659   :  { %11495 = vmatpush1.bf16.msra.mxu1 %v17783_v41  ;;  %11332 = vmatprep.subr.bf16.mxu0 %v17790_v29 }
 0x65a   :  { %11496 = vmatprep.subr.bf16.mxu1 %v17792_v57 }
 0x65c   :  { %11333 = vmatpush1.bf16.msra.mxu0 %v17789_v35 }
 0x65d   :  { %11497 = vmatpush1.bf16.msra.mxu1 %v17791_v44  ;;  %11334 = vmatprep.subr.bf16.mxu0 %v17798_v50 }
 0x65e   :  { %11498 = vmatprep.subr.bf16.mxu1 %v17800_v37 }
 0x660   :  { %11335 = vmatpush1.bf16.msra.mxu0 %v17797_v27  ;;  %v8509_v27 = vld [vmem:[#allocation14 + $0xc68] sm:$0xff] }
 0x661   :  { %11499 = vmatpush1.bf16.msra.mxu1 %v17799_v10  ;;  %11336 = vmatprep.subr.bf16.mxu0 %v17806_v2  ;;  %v17821_v2 = vcombine.low %v8496_v46, %v8500_v49  ;;  %v17840_v46 = vcombine.high %v8513_v25, %v8517_v7  ;;  %v8520_v49 = vld [vmem:[#allocation14 + $0xcc0] sm:$0xff] }
 0x662   :  { %11500 = vmatprep.subr.bf16.mxu1 %v17808_v39  ;;  %v17823_v39 = vcombine.low %v8497_v3, %v8501_v15  ;;  %v8524_v3 = vld [vmem:[#allocation14 + $0xce0] sm:$0xff]  ;;  %v8521_v15 = vld [vmem:[#allocation14 + $0xcc8] sm:$0xff] }
 0x664   :  { %11337 = vmatpush1.bf16.msra.mxu0 %v17805_v33 }
 0x665   :  { %11501 = vmatpush1.bf16.msra.mxu1 %v17807_v5  ;;  %11338 = vmatprep.subr.bf16.mxu0 %v17814_v18  ;;  %v17829_v5 = vcombine.low %v8504_v36, %v8508_v38  ;;  %v17831_v18 = vcombine.low %v8505_v28, %v8509_v27 }
 0x666   :  { %11502 = vmatprep.subr.bf16.mxu1 %v17816_v42  ;;  %v17838_v42 = vcombine.high %v8512_v40, %v8516_v16 }
 0x668   :  { %11339 = vmatpush1.bf16.msra.mxu0 %v17813_v14  ;;  %v8525_v14 = vld [vmem:[#allocation14 + $0xce8] sm:$0xff] }
 0x669   :  { %11503 = vmatpush1.bf16.msra.mxu1 %v17815_v24  ;;  %11349 = vmatprep.subr.bf16.mxu0 %v17822_v51  ;;  %v17837_v24 = vcombine.low %v8512_v40, %v8516_v16  ;;  %v17839_v51 = vcombine.low %v8513_v25, %v8517_v7  ;;  %v8552_v16 = vld [vmem:[#allocation14 + $0xdc0] sm:$0xff]  ;;  %v8553_v7 = vld [vmem:[#allocation14 + $0xdc8] sm:$0xff] }
 0x66a   :  { %11513 = vmatprep.subr.bf16.mxu1 %v17824_v52  ;;  %v17846_v52 = vcombine.high %v8520_v49, %v8524_v3  ;;  %v8556_v25 = vld [vmem:[#allocation14 + $0xde0] sm:$0xff] }
 0x67e   :  { %v7917_v61 = vpop.f32.mrb[20].mxu0 }
 0x67f   :  { %v18626_v19 = vadd.f32 %v7917_v61, %v4851_v0  ;;  %v19800_v21 = vpop.f32.mrb[20].mxu1  ;;  %v7919_v62 = vpop.f32.mrb[21].mxu0  ;;  %v17848_v0 = vcombine.high %v8521_v15, %v8525_v14  ;;  %v8529_v61 = vld [vmem:[#allocation14 + $0xd08] sm:$0xff] }
 0x680   :  { %v18627_v58 = vadd.f32 %v7919_v62, %v4855_v8  ;;  %v8083_v41 = vpop.f32.mrb[21].mxu1  ;;  %v7921_v29 = vpop.f32.mrb[22].mxu0  ;;  %v8528_v8 = vld [vmem:[#allocation14 + $0xd00] sm:$0xff]  ;;  %v17845_v62 = vcombine.low %v8520_v49, %v8524_v3 }
 0x681   :  { %v8092_v57 = vmax.f32 %v18626_v19, 0.0  ;;  %v18629_v30 = vadd.f32 %v8083_v41, %v4863_v17  ;;  %v8085_v32 = vpop.f32.mrb[22].mxu1  ;;  %v7922_v59 = vpop.f32.mrb[23].mxu0  ;;  %v8532_v17 = vld [vmem:[#allocation14 + $0xd20] sm:$0xff]  ;;  %v8533_v19 = vld [vmem:[#allocation14 + $0xd28] sm:$0xff] }
 0x682   :  { %v8093_v34 = vmax.f32 %v18627_v58, 0.0  ;;  %v8086_v35 = vpop.f32.mrb[23].mxu1  ;;  %v17847_v58 = vcombine.low %v8521_v15, %v8525_v14  ;;  %v17854_v41 = vcombine.high %v8528_v8, %v8532_v17  ;;  %v17856_v29 = vcombine.high %v8529_v61, %v8533_v19  ;;  %v8537_v32 = vld [vmem:[#allocation14 + $0xd48] sm:$0xff]  ;;  %v8560_v3 = vld [vmem:[#allocation14 + $0xe00] sm:$0xff] }
 0x683   :  { %v19803_v44 = vadd.f32 %v8092_v57, %v19606_v43  ;;  %v8095_v50 = vmax.f32 %v18629_v30, 0.0  ;;  %v8536_v57 = vld [vmem:[#allocation14 + $0xd40] sm:$0xff]  ;;  %v8541_v59 = vld [vmem:[#allocation14 + $0xd68] sm:$0xff]  ;;  %v17855_v35 = vcombine.low %v8529_v61, %v8533_v19 }
 0x684   :  { %v19806_v37 = vadd.f32 %v8093_v34, %v19580_v54  ;;  %v17830_v54 = vcombine.high %v8504_v36, %v8508_v38  ;;  %v8540_v30 = vld [vmem:[#allocation14 + $0xd60] sm:$0xff]  ;;  %v17853_v34 = vcombine.low %v8528_v8, %v8532_v17  ;;  %v17864_v36 = vcombine.high %v8537_v32, %v8541_v59  ;;  %v8561_v14 = vld [vmem:[#allocation14 + $0xe08] sm:$0xff] }
 0x685   :  { %v19809_v11 = vadd.f32 %v8095_v50, %v19608_v56  ;;  %v19817_v43 = vpack.c.bf16 %v19803_v44, %v19803_v44  ;;  %v17832_v56 = vcombine.high %v8505_v28, %v8509_v27  ;;  %v17862_v50 = vcombine.high %v8536_v57, %v8540_v30  ;;  %v8544_v38 = vld [vmem:[#allocation14 + $0xd80] sm:$0xff]  ;;  %v8545_v27 = vld [vmem:[#allocation14 + $0xd88] sm:$0xff] }
 0x686   :  { %v19813_v10 = vpack.c.bf16 %v19806_v37, %v19806_v37  ;;  %v8548_v28 = vld [vmem:[#allocation14 + $0xda0] sm:$0xff]  ;;  %v17863_v40 = vcombine.low %v8537_v32, %v8541_v59  ;;  %v8569_v19 = vld [vmem:[#allocation14 + $0xe48] sm:$0xff] }
 0x687   :  { %v19823_v33 = vpack.c.bf16 %v19809_v11, %v19809_v11  ;;  %v8564_v15 = vld [vmem:[#allocation14 + $0xe20] sm:$0xff]  ;;  %v8577_v59 = vld [vmem:[#allocation14 + $0xe88] sm:$0xff] }
 0x688   :  { %11340 = vmatprep.mubr.bf16.mxu0 %v19813_v10  ;;  %11504 = vmatprep.mubr.bf16.mxu1 %v19813_v10  ;;  %v8568_v17 = vld [vmem:[#allocation14 + $0xe40] sm:$0xff] }
 0x689   :  { %11341 = vmatmul.mubr.bf16.vlgmr.msra.gmra.mrb[24].mxu0 %v19817_v43  ;;  %11505 = vmatmul.mubr.bf16.vlgmr.msra.gmra.mrb[24].mxu1 %v19817_v43  ;;  %v8572_v61 = vld [vmem:[#allocation14 + $0xe60] sm:$0xff] }
 0x68a   :  { %11350 = vmatpush1.bf16.msra.mxu0 %v17821_v2  ;;  %11514 = vmatpush1.bf16.msra.mxu1 %v17823_v39  ;;  %v8549_v2 = vld [vmem:[#allocation14 + $0xda8] sm:$0xff]  ;;  %v17861_v39 = vcombine.low %v8536_v57, %v8540_v30  ;;  %v8576_v30 = vld [vmem:[#allocation14 + $0xe80] sm:$0xff] }
 0x68b   :  { %11381 = vmatprep.mubr.bf16.mxu0 %v19823_v33  ;;  %11545 = vmatprep.mubr.bf16.mxu1 %v19823_v33  ;;  %v8580_v32 = vld [vmem:[#allocation14 + $0xea0] sm:$0xff] }
 0x68c   :  { %11351 = vmatprep.subr.bf16.mxu0 %v17830_v54  ;;  %11515 = vmatprep.subr.bf16.mxu1 %v17832_v56  ;;  %v17870_v54 = vcombine.high %v8544_v38, %v8548_v28  ;;  %v17872_v56 = vcombine.high %v8545_v27, %v8549_v2 }
 0x68e   :  { %11352 = vmatpush1.bf16.msra.mxu0 %v17829_v5  ;;  %11516 = vmatpush1.bf16.msra.mxu1 %v17831_v18  ;;  %v8557_v5 = vld [vmem:[#allocation14 + $0xde8] sm:$0xff]  ;;  %v17869_v18 = vcombine.low %v8544_v38, %v8548_v28  ;;  %v8584_v28 = vld [vmem:[#allocation14 + $0xec0] sm:$0xff] }
 0x68f   :  { %11353 = vmatprep.subr.bf16.mxu0 %v17838_v42  ;;  %11517 = vmatprep.subr.bf16.mxu1 %v17840_v46  ;;  %v17871_v42 = vcombine.low %v8545_v27, %v8549_v2  ;;  %v17878_v46 = vcombine.high %v8552_v16, %v8556_v25  ;;  %v17880_v49 = vcombine.high %v8553_v7, %v8557_v5  ;;  %v8588_v27 = vld [vmem:[#allocation14 + $0xee0] sm:$0xff]  ;;  %v8585_v2 = vld [vmem:[#allocation14 + $0xec8] sm:$0xff] }
 0x692   :  { %11354 = vmatpush1.bf16.msra.mxu0 %v17837_v24  ;;  %11518 = vmatpush1.bf16.msra.mxu1 %v17839_v51  ;;  %v8565_v24 = vld [vmem:[#allocation14 + $0xe28] sm:$0xff]  ;;  %v17877_v51 = vcombine.low %v8552_v16, %v8556_v25  ;;  %v8592_v25 = vld [vmem:[#allocation14 + $0xf00] sm:$0xff] }
 0x693   :  { %11355 = vmatprep.subr.bf16.mxu0 %v17846_v52  ;;  %11519 = vmatprep.subr.bf16.mxu1 %v17848_v0  ;;  %v17879_v52 = vcombine.low %v8553_v7, %v8557_v5  ;;  %v17886_v0 = vcombine.high %v8560_v3, %v8564_v15  ;;  %v17888_v8 = vcombine.high %v8561_v14, %v8565_v24  ;;  %v8596_v7 = vld [vmem:[#allocation14 + $0xf20] sm:$0xff]  ;;  %v8593_v5 = vld [vmem:[#allocation14 + $0xf08] sm:$0xff] }
 0x696   :  { %11356 = vmatpush1.bf16.msra.mxu0 %v17845_v62  ;;  %11520 = vmatpush1.bf16.msra.mxu1 %v17847_v58  ;;  %v8573_v62 = vld [vmem:[#allocation14 + $0xe68] sm:$0xff]  ;;  %v17885_v58 = vcombine.low %v8560_v3, %v8564_v15  ;;  %v8600_v15 = vld [vmem:[#allocation14 + $0xf40] sm:$0xff] }
 0x697   :  { %11357 = vmatprep.subr.bf16.mxu0 %v17854_v41  ;;  %11521 = vmatprep.subr.bf16.mxu1 %v17856_v29  ;;  %v17887_v41 = vcombine.low %v8561_v14, %v8565_v24  ;;  %v17894_v29 = vcombine.high %v8568_v17, %v8572_v61  ;;  %v17896_v57 = vcombine.high %v8569_v19, %v8573_v62  ;;  %v8604_v14 = vld [vmem:[#allocation14 + $0xf60] sm:$0xff]  ;;  %v8601_v24 = vld [vmem:[#allocation14 + $0xf48] sm:$0xff] }
 0x69a   :  { %11358 = vmatpush1.bf16.msra.mxu0 %v17853_v34  ;;  %11522 = vmatpush1.bf16.msra.mxu1 %v17855_v35  ;;  %v8581_v34 = vld [vmem:[#allocation14 + $0xea8] sm:$0xff]  ;;  %v17893_v35 = vcombine.low %v8568_v17, %v8572_v61  ;;  %v17926_v17 = vcombine.high %v8600_v15, %v8604_v14 }
 0x69b   :  { %11359 = vmatprep.subr.bf16.mxu0 %v17862_v50  ;;  %11523 = vmatprep.subr.bf16.mxu1 %v17864_v36  ;;  %v17895_v50 = vcombine.low %v8569_v19, %v8573_v62  ;;  %v17902_v36 = vcombine.high %v8576_v30, %v8580_v32  ;;  %v17904_v38 = vcombine.high %v8577_v59, %v8581_v34  ;;  %v8608_v19 = vld [vmem:[#allocation14 + $0xf80] sm:$0xff] }
 0x69c   :  { %v8612_v62 = vld [vmem:[#allocation14 + $0xfa0] sm:$0xff] }
 0x69e   :  { %11360 = vmatpush1.bf16.msra.mxu0 %v17861_v39  ;;  %11524 = vmatpush1.bf16.msra.mxu1 %v17863_v40  ;;  %v8589_v39 = vld [vmem:[#allocation14 + $0xee8] sm:$0xff]  ;;  %v17901_v40 = vcombine.low %v8576_v30, %v8580_v32  ;;  %v17934_v32 = vcombine.high %v8608_v19, %v8612_v62 }
 0x69f   :  { %11361 = vmatprep.subr.bf16.mxu0 %v17870_v54  ;;  %11525 = vmatprep.subr.bf16.mxu1 %v17872_v56  ;;  %v17903_v54 = vcombine.low %v8577_v59, %v8581_v34  ;;  %v17910_v56 = vcombine.high %v8584_v28, %v8588_v27  ;;  %v17912_v16 = vcombine.high %v8585_v2, %v8589_v39  ;;  %v8616_v34 = vld [vmem:[#allocation14 + $0xfc0] sm:$0xff] }
 0x6a2   :  { %11362 = vmatpush1.bf16.msra.mxu0 %v17869_v18  ;;  %11526 = vmatpush1.bf16.msra.mxu1 %v17871_v42  ;;  %v8597_v18 = vld [vmem:[#allocation14 + $0xf28] sm:$0xff]  ;;  %v17909_v42 = vcombine.low %v8584_v28, %v8588_v27 }
 0x6a3   :  { %11363 = vmatprep.subr.bf16.mxu0 %v17878_v46  ;;  %11527 = vmatprep.subr.bf16.mxu1 %v17880_v49  ;;  %v17911_v46 = vcombine.low %v8585_v2, %v8589_v39  ;;  %v17918_v49 = vcombine.high %v8592_v25, %v8596_v7  ;;  %v17920_v3 = vcombine.high %v8593_v5, %v8597_v18  ;;  %v8114_v39 = vld [vmem:[#allocation14 + $0x10] sm:$0xff] }
 0x6a6   :  { %11364 = vmatpush1.bf16.msra.mxu0 %v17877_v51  ;;  %11528 = vmatpush1.bf16.msra.mxu1 %v17879_v52  ;;  %v8605_v51 = vld [vmem:[#allocation14 + $0xf68] sm:$0xff]  ;;  %v17917_v52 = vcombine.low %v8592_v25, %v8596_v7 }
 0x6a7   :  { %11365 = vmatprep.subr.bf16.mxu0 %v17886_v0  ;;  %11529 = vmatprep.subr.bf16.mxu1 %v17888_v8  ;;  %v17919_v0 = vcombine.low %v8593_v5, %v8597_v18  ;;  %v4859_v8 = vrot.slane %v19792_v60, %v19623_v22  ;;  %v17928_v61 = vcombine.high %v8601_v24, %v8605_v51  ;;  %v8620_v60 = vld [vmem:[#allocation14 + $0xfe0] sm:$0xff]  ;;  %v8122_v18 = vld [vmem:[#allocation14 + $0x50] sm:$0xff] }
 0x6a8   :  { %v17942_v27 = vcombine.high %v8616_v34, %v8620_v60 }
 0x6a9   :  { %v18628_v30 = vadd.f32 %v19800_v21, %v4859_v8  ;;  %v8115_v21 = vld [vmem:[#allocation14 + $0x18] sm:$0xff] }
 0x6aa   :  { %11366 = vmatpush1.bf16.msra.mxu0 %v17885_v58  ;;  %11530 = vmatpush1.bf16.msra.mxu1 %v17887_v41  ;;  %v8609_v58 = vld [vmem:[#allocation14 + $0xf88] sm:$0xff]  ;;  %v8135_v8 = vld [vmem:[#allocation14 + $0xb8] sm:$0xff] }
 0x6ab   :  { %11367 = vmatprep.subr.bf16.mxu0 %v17894_v29  ;;  %11531 = vmatprep.subr.bf16.mxu1 %v17896_v57  ;;  %v8613_v41 = vld [vmem:[#allocation14 + $0xfa8] sm:$0xff]  ;;  %v17925_v29 = vcombine.low %v8600_v15, %v8604_v14  ;;  %v17927_v57 = vcombine.low %v8601_v24, %v8605_v51  ;;  %v8094_v28 = vmax.f32 %v18628_v30, 0.0  ;;  %v8130_v51 = vld [vmem:[#allocation14 + $0x90] sm:$0xff] }
 0x6ac   :  { %v17936_v59 = vcombine.high %v8609_v58, %v8613_v41 }
 0x6ad   :  { %v19833_v25 = vadd.f32 %v8094_v28, %v19627_v31 }
 0x6ae   :  { %11368 = vmatpush1.bf16.msra.mxu0 %v17893_v35  ;;  %11532 = vmatpush1.bf16.msra.mxu1 %v17895_v50  ;;  %v8617_v35 = vld [vmem:[#allocation14 + $0xfc8] sm:$0xff] }
 0x6af   :  { %11369 = vmatprep.subr.bf16.mxu0 %v17902_v36  ;;  %11533 = vmatprep.subr.bf16.mxu1 %v17904_v38  ;;  %v8621_v50 = vld [vmem:[#allocation14 + $0xfe8] sm:$0xff]  ;;  %v17933_v36 = vcombine.low %v8608_v19, %v8612_v62  ;;  %v17935_v38 = vcombine.low %v8609_v58, %v8613_v41  ;;  %v19837_v15 = vpack.c.bf16 %v19833_v25, %v19833_v25  ;;  %v8138_v58 = vld [vmem:[#allocation14 + $0xd0] sm:$0xff] }
 0x6b0   :  { %v17944_v2 = vcombine.high %v8617_v35, %v8621_v50  ;;  %v8142_v41 = vld [vmem:[#allocation14 + $0xf0] sm:$0xff] }
 0x6b2   :  { %11370 = vmatpush1.bf16.msra.mxu0 %v17901_v40  ;;  %11534 = vmatpush1.bf16.msra.mxu1 %v17903_v54  ;;  %v8118_v40 = vld [vmem:[#allocation14 + $0x30] sm:$0xff]  ;;  %v8119_v54 = vld [vmem:[#allocation14 + $0x38] sm:$0xff] }
 0x6b3   :  { %11371 = vmatprep.subr.bf16.mxu0 %v17910_v56  ;;  %11535 = vmatprep.subr.bf16.mxu1 %v17912_v16  ;;  %v17941_v56 = vcombine.low %v8616_v34, %v8620_v60  ;;  %v17943_v16 = vcombine.low %v8617_v35, %v8621_v50  ;;  %v17442_v7 = vcombine.high %v8114_v39, %v8118_v40  ;;  %v8146_v60 = vld [vmem:[#allocation14 + $0x110] sm:$0xff]  ;;  %v8151_v50 = vld [vmem:[#allocation14 + $0x138] sm:$0xff] }
 0x6b4   :  { %v17444_v5 = vcombine.high %v8115_v21, %v8119_v54  ;;  %v17443_v14 = vcombine.low %v8115_v21, %v8119_v54  ;;  %v8150_v35 = vld [vmem:[#allocation14 + $0x130] sm:$0xff]  ;;  %v8159_v21 = vld [vmem:[#allocation14 + $0x178] sm:$0xff] }
 0x6b5   :  { %v17474_v28 = vcombine.high %v8146_v60, %v8150_v35  ;;  %v17473_v54 = vcombine.low %v8146_v60, %v8150_v35  ;;  %v8190_v60 = vld [vmem:[#allocation14 + $0x270] sm:$0xff]  ;;  %v8187_v35 = vld [vmem:[#allocation14 + $0x258] sm:$0xff] }
 0x6b6   :  { %11372 = vmatpush1.bf16.msra.mxu0 %v17909_v42  ;;  %11536 = vmatpush1.bf16.msra.mxu1 %v17911_v46  ;;  %v8126_v42 = vld [vmem:[#allocation14 + $0x70] sm:$0xff]  ;;  %v8123_v46 = vld [vmem:[#allocation14 + $0x58] sm:$0xff] }
 0x6b7   :  { %11373 = vmatprep.subr.bf16.mxu0 %v17918_v49  ;;  %11537 = vmatprep.subr.bf16.mxu1 %v17920_v3  ;;  %v8127_v49 = vld [vmem:[#allocation14 + $0x78] sm:$0xff]  ;;  %v17441_v3 = vcombine.low %v8114_v39, %v8118_v40  ;;  %v17450_v31 = vcombine.high %v8122_v18, %v8126_v42  ;;  %v8158_v39 = vld [vmem:[#allocation14 + $0x170] sm:$0xff] }
 0x6b8   :  { %v17452_v24 = vcombine.high %v8123_v46, %v8127_v49  ;;  %v8155_v40 = vld [vmem:[#allocation14 + $0x158] sm:$0xff] }
 0x6ba   :  { %11374 = vmatpush1.bf16.msra.mxu0 %v17917_v52  ;;  %11538 = vmatpush1.bf16.msra.mxu1 %v17919_v0  ;;  %v8134_v52 = vld [vmem:[#allocation14 + $0xb0] sm:$0xff]  ;;  %v8131_v0 = vld [vmem:[#allocation14 + $0x98] sm:$0xff] }
 0x6bb   :  { %11375 = vmatprep.subr.bf16.mxu0 %v17926_v17  ;;  %11539 = vmatprep.subr.bf16.mxu1 %v17928_v61  ;;  %v17449_v17 = vcombine.low %v8122_v18, %v8126_v42  ;;  %v17451_v61 = vcombine.low %v8123_v46, %v8127_v49  ;;  %v17458_v19 = vcombine.high %v8130_v51, %v8134_v52  ;;  %v8166_v18 = vld [vmem:[#allocation14 + $0x1b0] sm:$0xff]  ;;  %v8163_v42 = vld [vmem:[#allocation14 + $0x198] sm:$0xff] }
 0x6bc   :  { %v17460_v62 = vcombine.high %v8131_v0, %v8135_v8  ;;  %v17457_v30 = vcombine.low %v8130_v51, %v8134_v52  ;;  %v8167_v46 = vld [vmem:[#allocation14 + $0x1b8] sm:$0xff]  ;;  %v8174_v51 = vld [vmem:[#allocation14 + $0x1f0] sm:$0xff] }
 0x6bd   :  { %v8171_v52 = vld [vmem:[#allocation14 + $0x1d8] sm:$0xff] }
 0x6be   :  { %11376 = vmatpush1.bf16.msra.mxu0 %v17925_v29  ;;  %11540 = vmatpush1.bf16.msra.mxu1 %v17927_v57  ;;  %v8139_v29 = vld [vmem:[#allocation14 + $0xd8] sm:$0xff] }
 0x6bf   :  { %11377 = vmatprep.subr.bf16.mxu0 %v17934_v32  ;;  %11541 = vmatprep.subr.bf16.mxu1 %v17936_v59  ;;  %v8143_v57 = vld [vmem:[#allocation14 + $0xf8] sm:$0xff]  ;;  %v17459_v32 = vcombine.low %v8131_v0, %v8135_v8  ;;  %v17466_v59 = vcombine.high %v8138_v58, %v8142_v41 }
 0x6c0   :  { %v17468_v34 = vcombine.high %v8139_v29, %v8143_v57  ;;  %v8175_v0 = vld [vmem:[#allocation14 + $0x1f8] sm:$0xff] }
 0x6c2   :  { %11378 = vmatpush1.bf16.msra.mxu0 %v17933_v36  ;;  %11542 = vmatpush1.bf16.msra.mxu1 %v17935_v38  ;;  %v17465_v36 = vcombine.low %v8138_v58, %v8142_v41  ;;  %v17467_v38 = vcombine.low %v8139_v29, %v8143_v57  ;;  %v8182_v58 = vld [vmem:[#allocation14 + $0x230] sm:$0xff]  ;;  %v8179_v41 = vld [vmem:[#allocation14 + $0x218] sm:$0xff] }
 0x6c3   :  { %11379 = vmatprep.subr.bf16.mxu0 %v17942_v27  ;;  %11543 = vmatprep.subr.bf16.mxu1 %v17944_v2  ;;  %v8154_v2 = vld [vmem:[#allocation14 + $0x150] sm:$0xff]  ;;  %v8183_v29 = vld [vmem:[#allocation14 + $0x238] sm:$0xff] }
 0x6c4   :  { %v17481_v49 = vcombine.low %v8154_v2, %v8158_v39 }
 0x6c6   :  { %11380 = vmatpush1.bf16.msra.mxu0 %v17941_v56  ;;  %11544 = vmatpush1.bf16.msra.mxu1 %v17943_v16  ;;  %v17482_v16 = vcombine.high %v8154_v2, %v8158_v39  ;;  %v8198_v2 = vld [vmem:[#allocation14 + $0x2b0] sm:$0xff]  ;;  %v8195_v39 = vld [vmem:[#allocation14 + $0x298] sm:$0xff] }
 0x6c7   :  { %11554 = vmatprep.subr.bf16.mxu0 %v17442_v7  ;;  %11718 = vmatprep.subr.bf16.mxu1 %v17444_v5  ;;  %v17484_v7 = vcombine.high %v8155_v40, %v8159_v21  ;;  %v8162_v5 = vld [vmem:[#allocation14 + $0x190] sm:$0xff] }
 0x6c8   :  { %v17489_v8 = vcombine.low %v8162_v5, %v8166_v18 }
 0x6c9   :  { %11382 = vmatmul.mubr.bf16.vlgmr.msra.gmra.mrb[24].mxu0 %v19837_v15  ;;  %11546 = vmatmul.mubr.bf16.vlgmr.msra.gmra.mrb[24].mxu1 %v19837_v15 }
 0x6ca   :  { %11555 = vmatpush1.bf16.msra.mxu0 %v17441_v3  ;;  %11586 = vmatprep.mubr.bf16.mxu0 %v19750_v23  ;;  %v17483_v3 = vcombine.low %v8155_v40, %v8159_v21  ;;  %v8199_v40 = vld [vmem:[#allocation14 + $0x2b8] sm:$0xff] }
 0x6cb   :  { %11719 = vmatpush1.bf16.msra.mxu1 %v17443_v14  ;;  %11750 = vmatprep.mubr.bf16.mxu1 %v19750_v23  ;;  %v8147_v23 = vld [vmem:[#allocation14 + $0x118] sm:$0xff]  ;;  %v17490_v14 = vcombine.high %v8162_v5, %v8166_v18  ;;  %v8206_v5 = vld [vmem:[#allocation14 + $0x2f0] sm:$0xff] }
 0x6cc   :  { %11556 = vmatprep.subr.bf16.mxu0 %v17450_v31  ;;  %11720 = vmatprep.subr.bf16.mxu1 %v17452_v24  ;;  %v17476_v27 = vcombine.high %v8147_v23, %v8151_v50  ;;  %v17475_v56 = vcombine.low %v8147_v23, %v8151_v50  ;;  %v17492_v31 = vcombine.high %v8163_v42, %v8167_v46  ;;  %v8170_v24 = vld [vmem:[#allocation14 + $0x1d0] sm:$0xff]  ;;  %v8191_v23 = vld [vmem:[#allocation14 + $0x278] sm:$0xff] }
 0x6cd   :  { %v17497_v57 = vcombine.low %v8170_v24, %v8174_v51  ;;  %v8203_v18 = vld [vmem:[#allocation14 + $0x2d8] sm:$0xff] }
 0x6ce   :  { %11557 = vmatpush1.bf16.msra.mxu0 %v17449_v17  ;;  %v17491_v17 = vcombine.low %v8163_v42, %v8167_v46  ;;  %v8207_v42 = vld [vmem:[#allocation14 + $0x2f8] sm:$0xff] }
 0x6cf   :  { %11721 = vmatpush1.bf16.msra.mxu1 %v17451_v61  ;;  %11558 = vmatprep.subr.bf16.mxu0 %v17458_v19  ;;  %v17498_v61 = vcombine.high %v8170_v24, %v8174_v51  ;;  %v17500_v19 = vcombine.high %v8171_v52, %v8175_v0  ;;  %v8214_v24 = vld [vmem:[#allocation14 + $0x330] sm:$0xff]  ;;  %v8211_v51 = vld [vmem:[#allocation14 + $0x318] sm:$0xff] }
 0x6d0   :  { %11722 = vmatprep.subr.bf16.mxu1 %v17460_v62  ;;  %v8178_v62 = vld [vmem:[#allocation14 + $0x210] sm:$0xff] }
 0x6d1   :  { %v17505_v50 = vcombine.low %v8178_v62, %v8182_v58 }
 0x6d2   :  { %11559 = vmatpush1.bf16.msra.mxu0 %v17457_v30  ;;  %v17499_v30 = vcombine.low %v8171_v52, %v8175_v0  ;;  %v8215_v52 = vld [vmem:[#allocation14 + $0x338] sm:$0xff] }
 0x6d3   :  { %11723 = vmatpush1.bf16.msra.mxu1 %v17459_v32  ;;  %11560 = vmatprep.subr.bf16.mxu0 %v17466_v59  ;;  %v17506_v32 = vcombine.high %v8178_v62, %v8182_v58  ;;  %v17508_v59 = vcombine.high %v8179_v41, %v8183_v29  ;;  %v8222_v62 = vld [vmem:[#allocation14 + $0x370] sm:$0xff]  ;;  %v8219_v58 = vld [vmem:[#allocation14 + $0x358] sm:$0xff] }
 0x6d4   :  { %11724 = vmatprep.subr.bf16.mxu1 %v17468_v34  ;;  %v8186_v34 = vld [vmem:[#allocation14 + $0x250] sm:$0xff] }
 0x6d5   :  { %v17513_v21 = vcombine.low %v8186_v34, %v8190_v60 }
 0x6d6   :  { %11561 = vmatpush1.bf16.msra.mxu0 %v17465_v36  ;;  %v17507_v36 = vcombine.low %v8179_v41, %v8183_v29  ;;  %v8223_v41 = vld [vmem:[#allocation14 + $0x378] sm:$0xff] }
 0x6d7   :  { %11725 = vmatpush1.bf16.msra.mxu1 %v17467_v38  ;;  %11562 = vmatprep.subr.bf16.mxu0 %v17474_v28  ;;  %v17514_v38 = vcombine.high %v8186_v34, %v8190_v60  ;;  %v17516_v28 = vcombine.high %v8187_v35, %v8191_v23  ;;  %v8230_v34 = vld [vmem:[#allocation14 + $0x3b0] sm:$0xff]  ;;  %v8227_v60 = vld [vmem:[#allocation14 + $0x398] sm:$0xff] }
 0x6d8   :  { %11726 = vmatprep.subr.bf16.mxu1 %v17476_v27  ;;  %v8194_v27 = vld [vmem:[#allocation14 + $0x290] sm:$0xff] }
 0x6d9   :  { %v17521_v46 = vcombine.low %v8194_v27, %v8198_v2 }
 0x6da   :  { %11563 = vmatpush1.bf16.msra.mxu0 %v17473_v54  ;;  %v17515_v54 = vcombine.low %v8187_v35, %v8191_v23  ;;  %v8231_v35 = vld [vmem:[#allocation14 + $0x3b8] sm:$0xff] }
 0x6db   :  { %11727 = vmatpush1.bf16.msra.mxu1 %v17475_v56  ;;  %11564 = vmatprep.subr.bf16.mxu0 %v17482_v16  ;;  %v17522_v56 = vcombine.high %v8194_v27, %v8198_v2  ;;  %v17524_v16 = vcombine.high %v8195_v39, %v8199_v40  ;;  %v8238_v27 = vld [vmem:[#allocation14 + $0x3f0] sm:$0xff]  ;;  %v8235_v2 = vld [vmem:[#allocation14 + $0x3d8] sm:$0xff] }
 0x6dc   :  { %11728 = vmatprep.subr.bf16.mxu1 %v17484_v7  ;;  %v8202_v7 = vld [vmem:[#allocation14 + $0x2d0] sm:$0xff] }
 0x6dd   :  { %v17529_v0 = vcombine.low %v8202_v7, %v8206_v5 }
 0x6de   :  { %11565 = vmatpush1.bf16.msra.mxu0 %v17481_v49  ;;  %v17523_v49 = vcombine.low %v8195_v39, %v8199_v40  ;;  %v8239_v39 = vld [vmem:[#allocation14 + $0x3f8] sm:$0xff] }
 0x6df   :  { %11729 = vmatpush1.bf16.msra.mxu1 %v17483_v3  ;;  %11566 = vmatprep.subr.bf16.mxu0 %v17490_v14  ;;  %v17530_v3 = vcombine.high %v8202_v7, %v8206_v5  ;;  %v17532_v14 = vcombine.high %v8203_v18, %v8207_v42  ;;  %v8246_v7 = vld [vmem:[#allocation14 + $0x430] sm:$0xff]  ;;  %v8243_v5 = vld [vmem:[#allocation14 + $0x418] sm:$0xff] }
 0x6e0   :  { %11730 = vmatprep.subr.bf16.mxu1 %v17492_v31  ;;  %v8210_v31 = vld [vmem:[#allocation14 + $0x310] sm:$0xff] }
 0x6e1   :  { %v17537_v29 = vcombine.low %v8210_v31, %v8214_v24 }
 0x6e2   :  { %11567 = vmatpush1.bf16.msra.mxu0 %v17489_v8  ;;  %v17531_v8 = vcombine.low %v8203_v18, %v8207_v42  ;;  %v8247_v18 = vld [vmem:[#allocation14 + $0x438] sm:$0xff] }
 0x6e3   :  { %11731 = vmatpush1.bf16.msra.mxu1 %v17491_v17  ;;  %11568 = vmatprep.subr.bf16.mxu0 %v17498_v61  ;;  %v17538_v17 = vcombine.high %v8210_v31, %v8214_v24  ;;  %v17540_v61 = vcombine.high %v8211_v51, %v8215_v52  ;;  %v8254_v31 = vld [vmem:[#allocation14 + $0x470] sm:$0xff] }
 0x6e4   :  { %11732 = vmatprep.subr.bf16.mxu1 %v17500_v19  ;;  %v8218_v19 = vld [vmem:[#allocation14 + $0x350] sm:$0xff] }
 0x6e5   :  { %v17545_v23 = vcombine.low %v8218_v19, %v8222_v62 }
 0x6e6   :  { %11569 = vmatpush1.bf16.msra.mxu0 %v17497_v57  ;;  %v17539_v57 = vcombine.low %v8211_v51, %v8215_v52  ;;  %v8251_v51 = vld [vmem:[#allocation14 + $0x458] sm:$0xff] }
 0x6e7   :  { %11733 = vmatpush1.bf16.msra.mxu1 %v17499_v30  ;;  %11570 = vmatprep.subr.bf16.mxu0 %v17506_v32  ;;  %v17546_v30 = vcombine.high %v8218_v19, %v8222_v62  ;;  %v17548_v32 = vcombine.high %v8219_v58, %v8223_v41  ;;  %v8255_v52 = vld [vmem:[#allocation14 + $0x478] sm:$0xff] }
 0x6e8   :  { %11734 = vmatprep.subr.bf16.mxu1 %v17508_v59  ;;  %v8226_v59 = vld [vmem:[#allocation14 + $0x390] sm:$0xff]  ;;  %v17580_v19 = vcombine.high %v8251_v51, %v8255_v52  ;;  %v8259_v62 = vld [vmem:[#allocation14 + $0x498] sm:$0xff] }
 0x6e9   :  { %v17553_v40 = vcombine.low %v8226_v59, %v8230_v34 }
 0x6ea   :  { %11571 = vmatpush1.bf16.msra.mxu0 %v17505_v50  ;;  %v17547_v50 = vcombine.low %v8219_v58, %v8223_v41  ;;  %v8263_v58 = vld [vmem:[#allocation14 + $0x4b8] sm:$0xff] }
 0x6eb   :  { %11735 = vmatpush1.bf16.msra.mxu1 %v17507_v36  ;;  %11572 = vmatprep.subr.bf16.mxu0 %v17514_v38  ;;  %v17554_v36 = vcombine.high %v8226_v59, %v8230_v34  ;;  %v17556_v38 = vcombine.high %v8227_v60, %v8231_v35  ;;  %v8270_v59 = vld [vmem:[#allocation14 + $0x4f0] sm:$0xff]  ;;  %v8267_v34 = vld [vmem:[#allocation14 + $0x4d8] sm:$0xff] }
 0x6ec   :  { %11736 = vmatprep.subr.bf16.mxu1 %v17516_v28  ;;  %v8234_v28 = vld [vmem:[#allocation14 + $0x3d0] sm:$0xff] }
 0x6ed   :  { %v17561_v42 = vcombine.low %v8234_v28, %v8238_v27 }
 0x6ee   :  { %11573 = vmatpush1.bf16.msra.mxu0 %v17513_v21  ;;  %v17555_v21 = vcombine.low %v8227_v60, %v8231_v35  ;;  %v8271_v60 = vld [vmem:[#allocation14 + $0x4f8] sm:$0xff] }
 0x6ef   :  { %11737 = vmatpush1.bf16.msra.mxu1 %v17515_v54  ;;  %11574 = vmatprep.subr.bf16.mxu0 %v17522_v56  ;;  %v17562_v54 = vcombine.high %v8234_v28, %v8238_v27  ;;  %v17564_v56 = vcombine.high %v8235_v2, %v8239_v39  ;;  %v8275_v28 = vld [vmem:[#allocation14 + $0x518] sm:$0xff] }
 0x6f0   :  { %11738 = vmatprep.subr.bf16.mxu1 %v17524_v16  ;;  %v8242_v16 = vld [vmem:[#allocation14 + $0x410] sm:$0xff]  ;;  %v8279_v27 = vld [vmem:[#allocation14 + $0x538] sm:$0xff] }
 0x6f1   :  { %v17569_v24 = vcombine.low %v8242_v16, %v8246_v7 }
 0x6f2   :  { %11575 = vmatpush1.bf16.msra.mxu0 %v17521_v46  ;;  %v17563_v46 = vcombine.low %v8235_v2, %v8239_v39  ;;  %v17595_v2 = vcombine.low %v8267_v34, %v8271_v60 }
 0x6f3   :  { %11739 = vmatpush1.bf16.msra.mxu1 %v17523_v49  ;;  %11576 = vmatprep.subr.bf16.mxu0 %v17530_v3  ;;  %v17570_v49 = vcombine.high %v8242_v16, %v8246_v7  ;;  %v17572_v3 = vcombine.high %v8243_v5, %v8247_v18  ;;  %v8287_v16 = vld [vmem:[#allocation14 + $0x578] sm:$0xff] }
 0x6f4   :  { %11740 = vmatprep.subr.bf16.mxu1 %v17532_v14  ;;  %v8250_v14 = vld [vmem:[#allocation14 + $0x450] sm:$0xff] }
 0x6f5   :  { %v17577_v41 = vcombine.low %v8250_v14, %v8254_v31 }
 0x6f6   :  { %11577 = vmatpush1.bf16.msra.mxu0 %v17529_v0  ;;  %v17571_v0 = vcombine.low %v8243_v5, %v8247_v18  ;;  %v17603_v5 = vcombine.low %v8275_v28, %v8279_v27 }
 0x6f7   :  { %11741 = vmatpush1.bf16.msra.mxu1 %v17531_v8  ;;  %11578 = vmatprep.subr.bf16.mxu0 %v17538_v17  ;;  %v17578_v8 = vcombine.high %v8250_v14, %v8254_v31  ;;  %v8258_v17 = vld [vmem:[#allocation14 + $0x490] sm:$0xff]  ;;  %v8295_v14 = vld [vmem:[#allocation14 + $0x5b8] sm:$0xff] }
 0x6f8   :  { %11742 = vmatprep.subr.bf16.mxu1 %v17540_v61  ;;  %v8262_v61 = vld [vmem:[#allocation14 + $0x4b0] sm:$0xff] }
 0x6f9   :  { %v17585_v35 = vcombine.low %v8258_v17, %v8262_v61 }
 0x6fa   :  { %11579 = vmatpush1.bf16.msra.mxu0 %v17537_v29  ;;  %v17579_v29 = vcombine.low %v8251_v51, %v8255_v52 }
 0x6fb   :  { %11743 = vmatpush1.bf16.msra.mxu1 %v17539_v57  ;;  %11580 = vmatprep.subr.bf16.mxu0 %v17546_v30  ;;  %v17586_v57 = vcombine.high %v8258_v17, %v8262_v61  ;;  %v17588_v30 = vcombine.high %v8259_v62, %v8263_v58  ;;  %v8299_v17 = vld [vmem:[#allocation14 + $0x5d8] sm:$0xff] }
 0x6fc   :  { %11744 = vmatprep.subr.bf16.mxu1 %v17548_v32  ;;  %v8266_v32 = vld [vmem:[#allocation14 + $0x4d0] sm:$0xff]  ;;  %v8303_v61 = vld [vmem:[#allocation14 + $0x5f8] sm:$0xff] }
 0x6fe   :  { %11581 = vmatpush1.bf16.msra.mxu0 %v17545_v23  ;;  %v17594_v23 = vcombine.high %v8266_v32, %v8270_v59 }
 0x6ff   :  { %11745 = vmatpush1.bf16.msra.mxu1 %v17547_v50  ;;  %11582 = vmatprep.subr.bf16.mxu0 %v17554_v36  ;;  %v17596_v50 = vcombine.high %v8267_v34, %v8271_v60  ;;  %v8274_v36 = vld [vmem:[#allocation14 + $0x510] sm:$0xff]  ;;  %v17627_v34 = vcombine.low %v8299_v17, %v8303_v61 }
 0x700   :  { %11746 = vmatprep.subr.bf16.mxu1 %v17556_v38  ;;  %v8278_v38 = vld [vmem:[#allocation14 + $0x530] sm:$0xff] }
 0x701   :  { %v17602_v39 = vcombine.high %v8274_v36, %v8278_v38  ;;  %v17601_v7 = vcombine.low %v8274_v36, %v8278_v38  ;;  %v8319_v36 = vld [vmem:[#allocation14 + $0x678] sm:$0xff] }
 0x702   :  { %11583 = vmatpush1.bf16.msra.mxu0 %v17553_v40  ;;  %v17604_v40 = vcombine.high %v8275_v28, %v8279_v27 }
 0x703   :  { %11747 = vmatpush1.bf16.msra.mxu1 %v17555_v21  ;;  %11584 = vmatprep.subr.bf16.mxu0 %v17562_v54  ;;  %v8282_v21 = vld [vmem:[#allocation14 + $0x550] sm:$0xff] }
 0x704   :  { %11748 = vmatprep.subr.bf16.mxu1 %v17564_v56  ;;  %v8286_v54 = vld [vmem:[#allocation14 + $0x570] sm:$0xff]  ;;  %v8283_v56 = vld [vmem:[#allocation14 + $0x558] sm:$0xff] }
 0x705   :  { %v17610_v18 = vcombine.high %v8282_v21, %v8286_v54  ;;  %v17609_v31 = vcombine.low %v8282_v21, %v8286_v54  ;;  %v8327_v21 = vld [vmem:[#allocation14 + $0x6b8] sm:$0xff] }
 0x706   :  { %11585 = vmatpush1.bf16.msra.mxu0 %v17561_v42  ;;  %v17612_v42 = vcombine.high %v8283_v56, %v8287_v16 }
 0x707   :  { %11749 = vmatpush1.bf16.msra.mxu1 %v17563_v46  ;;  %11595 = vmatprep.subr.bf16.mxu0 %v17570_v49  ;;  %v8290_v46 = vld [vmem:[#allocation14 + $0x590] sm:$0xff] }
 0x708   :  { %11759 = vmatprep.subr.bf16.mxu1 %v17572_v3  ;;  %v8294_v49 = vld [vmem:[#allocation14 + $0x5b0] sm:$0xff]  ;;  %v8291_v3 = vld [vmem:[#allocation14 + $0x598] sm:$0xff] }
 0x709   :  { %11587 = vmatmul.mubr.bf16.vlgmr.msra.gmra.mrb[28].mxu0 %v19770_v9  ;;  %v17618_v51 = vcombine.high %v8290_v46, %v8294_v49  ;;  %v17620_v52 = vcombine.high %v8291_v3, %v8295_v14 }
 0x70a   :  { %11751 = vmatmul.mubr.bf16.vlgmr.msra.gmra.mrb[28].mxu1 %v19770_v9  ;;  %11596 = vmatpush1.bf16.msra.mxu0 %v17569_v24  ;;  %v17587_v9 = vcombine.low %v8259_v62, %v8263_v58  ;;  %v17611_v24 = vcombine.low %v8283_v56, %v8287_v16  ;;  %v17619_v62 = vcombine.low %v8291_v3, %v8295_v14 }
 0x70b   :  { %11627 = vmatprep.mubr.bf16.mxu0 %v19774_v6  ;;  %11760 = vmatpush1.bf16.msra.mxu1 %v17571_v0  ;;  %v8298_v0 = vld [vmem:[#allocation14 + $0x5d0] sm:$0xff] }
 0x70c   :  { %11791 = vmatprep.mubr.bf16.mxu1 %v19774_v6  ;;  %11597 = vmatprep.subr.bf16.mxu0 %v17578_v8  ;;  %v17593_v6 = vcombine.low %v8266_v32, %v8270_v59  ;;  %v8302_v8 = vld [vmem:[#allocation14 + $0x5f0] sm:$0xff]  ;;  %v8311_v32 = vld [vmem:[#allocation14 + $0x638] sm:$0xff] }
 0x70d   :  { %11761 = vmatprep.subr.bf16.mxu1 %v17580_v19  ;;  %v17617_v19 = vcombine.low %v8290_v46, %v8294_v49  ;;  %v17626_v58 = vcombine.high %v8298_v0, %v8302_v8  ;;  %v17625_v59 = vcombine.low %v8298_v0, %v8302_v8  ;;  %v8335_v46 = vld [vmem:[#allocation14 + $0x6f8] sm:$0xff] }
 0x70e   :  { %11598 = vmatpush1.bf16.msra.mxu0 %v17577_v41  ;;  %v17628_v41 = vcombine.high %v8299_v17, %v8303_v61  ;;  %v8343_v0 = vld [vmem:[#allocation14 + $0x738] sm:$0xff] }
 0x70f   :  { %11762 = vmatpush1.bf16.msra.mxu1 %v17579_v29  ;;  %11599 = vmatprep.subr.bf16.mxu0 %v17586_v57  ;;  %v8306_v29 = vld [vmem:[#allocation14 + $0x610] sm:$0xff] }
 0x710   :  { %11763 = vmatprep.subr.bf16.mxu1 %v17588_v30  ;;  %v8310_v57 = vld [vmem:[#allocation14 + $0x630] sm:$0xff]  ;;  %v8307_v30 = vld [vmem:[#allocation14 + $0x618] sm:$0xff] }
 0x711   :  { %v17634_v60 = vcombine.high %v8306_v29, %v8310_v57  ;;  %v17633_v38 = vcombine.low %v8306_v29, %v8310_v57  ;;  %v17635_v28 = vcombine.low %v8307_v30, %v8311_v32  ;;  %v8351_v29 = vld [vmem:[#allocation14 + $0x778] sm:$0xff] }
 0x712   :  { %11600 = vmatpush1.bf16.msra.mxu0 %v17585_v35  ;;  %v17636_v35 = vcombine.high %v8307_v30, %v8311_v32 }
 0x713   :  { %11764 = vmatpush1.bf16.msra.mxu1 %v17587_v9  ;;  %11601 = vmatprep.subr.bf16.mxu0 %v17594_v23  ;;  %v8314_v9 = vld [vmem:[#allocation14 + $0x650] sm:$0xff] }
 0x714   :  { %11765 = vmatprep.subr.bf16.mxu1 %v17596_v50  ;;  %v8318_v23 = vld [vmem:[#allocation14 + $0x670] sm:$0xff]  ;;  %v8315_v50 = vld [vmem:[#allocation14 + $0x658] sm:$0xff] }
 0x715   :  { %v17642_v27 = vcombine.high %v8314_v9, %v8318_v23  ;;  %v17641_v54 = vcombine.low %v8314_v9, %v8318_v23  ;;  %v17643_v56 = vcombine.low %v8315_v50, %v8319_v36  ;;  %v8359_v9 = vld [vmem:[#allocation14 + $0x7b8] sm:$0xff] }
 0x716   :  { %11602 = vmatpush1.bf16.msra.mxu0 %v17593_v6  ;;  %v17644_v6 = vcombine.high %v8315_v50, %v8319_v36 }
 0x717   :  { %11766 = vmatpush1.bf16.msra.mxu1 %v17595_v2  ;;  %11603 = vmatprep.subr.bf16.mxu0 %v17602_v39  ;;  %v8322_v2 = vld [vmem:[#allocation14 + $0x690] sm:$0xff] }
 0x718   :  { %11767 = vmatprep.subr.bf16.mxu1 %v17604_v40  ;;  %v8326_v39 = vld [vmem:[#allocation14 + $0x6b0] sm:$0xff]  ;;  %v8323_v40 = vld [vmem:[#allocation14 + $0x698] sm:$0xff] }
 0x719   :  { %v17650_v16 = vcombine.high %v8322_v2, %v8326_v39  ;;  %v17649_v49 = vcombine.low %v8322_v2, %v8326_v39  ;;  %v17651_v3 = vcombine.low %v8323_v40, %v8327_v21  ;;  %v8367_v2 = vld [vmem:[#allocation14 + $0x7f8] sm:$0xff] }
 0x71a   :  { %11604 = vmatpush1.bf16.msra.mxu0 %v17601_v7  ;;  %v17652_v7 = vcombine.high %v8323_v40, %v8327_v21 }
 0x71b   :  { %11768 = vmatpush1.bf16.msra.mxu1 %v17603_v5  ;;  %11605 = vmatprep.subr.bf16.mxu0 %v17610_v18  ;;  %v8330_v5 = vld [vmem:[#allocation14 + $0x6d0] sm:$0xff] }
 0x71c   :  { %11769 = vmatprep.subr.bf16.mxu1 %v17612_v42  ;;  %v8334_v18 = vld [vmem:[#allocation14 + $0x6f0] sm:$0xff]  ;;  %v8331_v42 = vld [vmem:[#allocation14 + $0x6d8] sm:$0xff] }
 0x71d   :  { %v17658_v14 = vcombine.high %v8330_v5, %v8334_v18  ;;  %v17657_v8 = vcombine.low %v8330_v5, %v8334_v18  ;;  %v17659_v17 = vcombine.low %v8331_v42, %v8335_v46  ;;  %v8375_v5 = vld [vmem:[#allocation14 + $0x838] sm:$0xff] }
 0x71e   :  { %11606 = vmatpush1.bf16.msra.mxu0 %v17609_v31  ;;  %v17660_v31 = vcombine.high %v8331_v42, %v8335_v46 }
 0x71f   :  { %11770 = vmatpush1.bf16.msra.mxu1 %v17611_v24  ;;  %11607 = vmatprep.subr.bf16.mxu0 %v17618_v51  ;;  %v8338_v24 = vld [vmem:[#allocation14 + $0x710] sm:$0xff] }
 0x720   :  { %11771 = vmatprep.subr.bf16.mxu1 %v17620_v52  ;;  %v8342_v51 = vld [vmem:[#allocation14 + $0x730] sm:$0xff]  ;;  %v8339_v52 = vld [vmem:[#allocation14 + $0x718] sm:$0xff] }
 0x721   :  { %v17666_v61 = vcombine.high %v8338_v24, %v8342_v51  ;;  %v17665_v57 = vcombine.low %v8338_v24, %v8342_v51  ;;  %v17667_v30 = vcombine.low %v8339_v52, %v8343_v0  ;;  %v8379_v24 = vld [vmem:[#allocation14 + $0x858] sm:$0xff] }
 0x722   :  { %11608 = vmatpush1.bf16.msra.mxu0 %v17617_v19  ;;  %v17668_v19 = vcombine.high %v8339_v52, %v8343_v0  ;;  %v8383_v51 = vld [vmem:[#allocation14 + $0x878] sm:$0xff] }
 0x723   :  { %11772 = vmatpush1.bf16.msra.mxu1 %v17619_v62  ;;  %11609 = vmatprep.subr.bf16.mxu0 %v17626_v58  ;;  %v8346_v62 = vld [vmem:[#allocation14 + $0x750] sm:$0xff] }
 0x724   :  { %11773 = vmatprep.subr.bf16.mxu1 %v17628_v41  ;;  %v8350_v58 = vld [vmem:[#allocation14 + $0x770] sm:$0xff]  ;;  %v8347_v41 = vld [vmem:[#allocation14 + $0x758] sm:$0xff] }
 0x725   :  { %v17674_v32 = vcombine.high %v8346_v62, %v8350_v58  ;;  %v17673_v23 = vcombine.low %v8346_v62, %v8350_v58  ;;  %v17675_v50 = vcombine.low %v8347_v41, %v8351_v29  ;;  %v8391_v62 = vld [vmem:[#allocation14 + $0x8b8] sm:$0xff] }
 0x726   :  { %11610 = vmatpush1.bf16.msra.mxu0 %v17625_v59  ;;  %v17676_v59 = vcombine.high %v8347_v41, %v8351_v29  ;;  %v17707_v41 = vcombine.low %v8379_v24, %v8383_v51 }
 0x727   :  { %11774 = vmatpush1.bf16.msra.mxu1 %v17627_v34  ;;  %11611 = vmatprep.subr.bf16.mxu0 %v17634_v60  ;;  %v8354_v34 = vld [vmem:[#allocation14 + $0x790] sm:$0xff] }
 0x728   :  { %11775 = vmatprep.subr.bf16.mxu1 %v17636_v35  ;;  %v8358_v60 = vld [vmem:[#allocation14 + $0x7b0] sm:$0xff]  ;;  %v8355_v35 = vld [vmem:[#allocation14 + $0x798] sm:$0xff] }
 0x729   :  { %v17682_v36 = vcombine.high %v8354_v34, %v8358_v60  ;;  %v17681_v39 = vcombine.low %v8354_v34, %v8358_v60  ;;  %v17683_v40 = vcombine.low %v8355_v35, %v8359_v9  ;;  %v8399_v34 = vld [vmem:[#allocation14 + $0x8f8] sm:$0xff] }
 0x72a   :  { %11612 = vmatpush1.bf16.msra.mxu0 %v17633_v38  ;;  %v17684_v38 = vcombine.high %v8355_v35, %v8359_v9 }
 0x72b   :  { %11776 = vmatpush1.bf16.msra.mxu1 %v17635_v28  ;;  %11613 = vmatprep.subr.bf16.mxu0 %v17642_v27  ;;  %v8362_v28 = vld [vmem:[#allocation14 + $0x7d0] sm:$0xff] }
 0x72c   :  { %11777 = vmatprep.subr.bf16.mxu1 %v17644_v6  ;;  %v8366_v27 = vld [vmem:[#allocation14 + $0x7f0] sm:$0xff]  ;;  %v8363_v6 = vld [vmem:[#allocation14 + $0x7d8] sm:$0xff] }
 0x72d   :  { %v17690_v21 = vcombine.high %v8362_v28, %v8366_v27  ;;  %v17689_v18 = vcombine.low %v8362_v28, %v8366_v27  ;;  %v17691_v42 = vcombine.low %v8363_v6, %v8367_v2 }
 0x72e   :  { %11614 = vmatpush1.bf16.msra.mxu0 %v17641_v54  ;;  %v17692_v54 = vcombine.high %v8363_v6, %v8367_v2  ;;  %v8410_v2 = vld [vmem:[#allocation14 + $0x950] sm:$0xff] }
 0x72f   :  { %11778 = vmatpush1.bf16.msra.mxu1 %v17643_v56  ;;  %11615 = vmatprep.subr.bf16.mxu0 %v17650_v16  ;;  %v8370_v56 = vld [vmem:[#allocation14 + $0x810] sm:$0xff] }
 0x730   :  { %11779 = vmatprep.subr.bf16.mxu1 %v17652_v7  ;;  %v8374_v16 = vld [vmem:[#allocation14 + $0x830] sm:$0xff]  ;;  %v8371_v7 = vld [vmem:[#allocation14 + $0x818] sm:$0xff] }
 0x731   :  { %v17698_v46 = vcombine.high %v8370_v56, %v8374_v16  ;;  %v17699_v52 = vcombine.low %v8371_v7, %v8375_v5 }
 0x732   :  { %11616 = vmatpush1.bf16.msra.mxu0 %v17649_v49  ;;  %v17700_v49 = vcombine.high %v8371_v7, %v8375_v5  ;;  %v8418_v5 = vld [vmem:[#allocation14 + $0x990] sm:$0xff] }
 0x733   :  { %11780 = vmatpush1.bf16.msra.mxu1 %v17651_v3  ;;  %11617 = vmatprep.subr.bf16.mxu0 %v17658_v14  ;;  %v8378_v3 = vld [vmem:[#allocation14 + $0x850] sm:$0xff] }
 0x734   :  { %11781 = vmatprep.subr.bf16.mxu1 %v17660_v31  ;;  %v8382_v14 = vld [vmem:[#allocation14 + $0x870] sm:$0xff]  ;;  %v17697_v31 = vcombine.low %v8370_v56, %v8374_v16 }
 0x735   :  { %v17706_v0 = vcombine.high %v8378_v3, %v8382_v14  ;;  %v17705_v58 = vcombine.low %v8378_v3, %v8382_v14 }
 0x736   :  { %11618 = vmatpush1.bf16.msra.mxu0 %v17657_v8  ;;  %v8386_v8 = vld [vmem:[#allocation14 + $0x890] sm:$0xff] }
 0x737   :  { %11782 = vmatpush1.bf16.msra.mxu1 %v17659_v17  ;;  %11619 = vmatprep.subr.bf16.mxu0 %v17666_v61  ;;  %v8390_v17 = vld [vmem:[#allocation14 + $0x8b0] sm:$0xff]  ;;  %v17708_v61 = vcombine.high %v8379_v24, %v8383_v51 }
 0x738   :  { %11783 = vmatprep.subr.bf16.mxu1 %v17668_v19  ;;  %v8387_v19 = vld [vmem:[#allocation14 + $0x898] sm:$0xff]  ;;  %v17714_v29 = vcombine.high %v8386_v8, %v8390_v17  ;;  %v17713_v60 = vcombine.low %v8386_v8, %v8390_v17  ;;  %v8426_v24 = vld [vmem:[#allocation14 + $0x9d0] sm:$0xff] }
 0x739   :  { %v8430_v51 = vld [vmem:[#allocation14 + $0x9f0] sm:$0xff] }
 0x73a   :  { %11620 = vmatpush1.bf16.msra.mxu0 %v17665_v57  ;;  %v17716_v57 = vcombine.high %v8387_v19, %v8391_v62 }
 0x73b   :  { %11784 = vmatpush1.bf16.msra.mxu1 %v17667_v30  ;;  %11621 = vmatprep.subr.bf16.mxu0 %v17674_v32  ;;  %v8394_v30 = vld [vmem:[#allocation14 + $0x8d0] sm:$0xff] }
 0x73c   :  { %11785 = vmatprep.subr.bf16.mxu1 %v17676_v59  ;;  %v8398_v32 = vld [vmem:[#allocation14 + $0x8f0] sm:$0xff]  ;;  %v8395_v59 = vld [vmem:[#allocation14 + $0x8d8] sm:$0xff] }
 0x73d   :  { %v17722_v35 = vcombine.high %v8394_v30, %v8398_v32  ;;  %v17724_v9 = vcombine.high %v8395_v59, %v8399_v34  ;;  %v17723_v28 = vcombine.low %v8395_v59, %v8399_v34  ;;  %v8442_v34 = vld [vmem:[#allocation14 + $0xa50] sm:$0xff] }
 0x73e   :  { %11622 = vmatpush1.bf16.msra.mxu0 %v17673_v23  ;;  %v8402_v23 = vld [vmem:[#allocation14 + $0x910] sm:$0xff] }
 0x73f   :  { %11786 = vmatpush1.bf16.msra.mxu1 %v17675_v50  ;;  %11623 = vmatprep.subr.bf16.mxu0 %v17682_v36  ;;  %v8406_v50 = vld [vmem:[#allocation14 + $0x930] sm:$0xff]  ;;  %v8403_v36 = vld [vmem:[#allocation14 + $0x918] sm:$0xff] }
 0x740   :  { %11787 = vmatprep.subr.bf16.mxu1 %v17684_v38  ;;  %v8407_v38 = vld [vmem:[#allocation14 + $0x938] sm:$0xff]  ;;  %v17730_v27 = vcombine.high %v8402_v23, %v8406_v50 }
 0x741   :  { %v17732_v6 = vcombine.high %v8403_v36, %v8407_v38  ;;  %v17731_v56 = vcombine.low %v8403_v36, %v8407_v38  ;;  %v8450_v38 = vld [vmem:[#allocation14 + $0xa90] sm:$0xff] }
 0x742   :  { %11624 = vmatpush1.bf16.msra.mxu0 %v17681_v39  ;;  %v8414_v39 = vld [vmem:[#allocation14 + $0x970] sm:$0xff] }
 0x743   :  { %11788 = vmatpush1.bf16.msra.mxu1 %v17683_v40  ;;  %11625 = vmatprep.subr.bf16.mxu0 %v17690_v21  ;;  %v8411_v40 = vld [vmem:[#allocation14 + $0x958] sm:$0xff]  ;;  %v17738_v16 = vcombine.high %v8410_v2, %v8414_v39 }
 0x744   :  { %11789 = vmatprep.subr.bf16.mxu1 %v17692_v54  ;;  %v8415_v21 = vld [vmem:[#allocation14 + $0x978] sm:$0xff]  ;;  %v17729_v54 = vcombine.low %v8402_v23, %v8406_v50 }
 0x745   :  { %v17740_v7 = vcombine.high %v8411_v40, %v8415_v21  ;;  %v17739_v3 = vcombine.low %v8411_v40, %v8415_v21  ;;  %v8458_v21 = vld [vmem:[#allocation14 + $0xad0] sm:$0xff] }
 0x746   :  { %11626 = vmatpush1.bf16.msra.mxu0 %v17689_v18  ;;  %v8422_v18 = vld [vmem:[#allocation14 + $0x9b0] sm:$0xff] }
 0x747   :  { %11790 = vmatpush1.bf16.msra.mxu1 %v17691_v42  ;;  %11636 = vmatprep.subr.bf16.mxu0 %v17698_v46  ;;  %v8419_v42 = vld [vmem:[#allocation14 + $0x998] sm:$0xff]  ;;  %v17746_v14 = vcombine.high %v8418_v5, %v8422_v18  ;;  %v17745_v8 = vcombine.low %v8418_v5, %v8422_v18 }
 0x748   :  { %11800 = vmatprep.subr.bf16.mxu1 %v17700_v49  ;;  %v8423_v46 = vld [vmem:[#allocation14 + $0x9b8] sm:$0xff]  ;;  %v17737_v49 = vcombine.low %v8410_v2, %v8414_v39 }
 0x749   :  { %11628 = vmatmul.mubr.bf16.vlgmr.msra.gmra.mrb[28].mxu0 %v19788_v26  ;;  %v17747_v17 = vcombine.low %v8419_v42, %v8423_v46 }
 0x74a   :  { %11792 = vmatmul.mubr.bf16.vlgmr.msra.gmra.mrb[28].mxu1 %v19788_v26  ;;  %11637 = vmatpush1.bf16.msra.mxu0 %v17697_v31  ;;  %v17715_v26 = vcombine.low %v8387_v19, %v8391_v62  ;;  %v17748_v31 = vcombine.high %v8419_v42, %v8423_v46  ;;  %v8434_v62 = vld [vmem:[#allocation14 + $0xa10] sm:$0xff] }
 0x74b   :  { %11668 = vmatprep.mubr.bf16.mxu0 %v19813_v10  ;;  %11801 = vmatpush1.bf16.msra.mxu1 %v17699_v52  ;;  %v8427_v52 = vld [vmem:[#allocation14 + $0x9d8] sm:$0xff]  ;;  %v8466_v46 = vld [vmem:[#allocation14 + $0xb10] sm:$0xff] }
 0x74c   :  { %11832 = vmatprep.mubr.bf16.mxu1 %v19813_v10  ;;  %11638 = vmatprep.subr.bf16.mxu0 %v17706_v0  ;;  %v17721_v10 = vcombine.low %v8394_v30, %v8398_v32  ;;  %v8431_v0 = vld [vmem:[#allocation14 + $0x9f8] sm:$0xff] }
 0x74d   :  { %11802 = vmatprep.subr.bf16.mxu1 %v17708_v61  ;;  %v17754_v61 = vcombine.high %v8426_v24, %v8430_v51  ;;  %v17756_v19 = vcombine.high %v8427_v52, %v8431_v0  ;;  %v17755_v30 = vcombine.low %v8427_v52, %v8431_v0  ;;  %v8474_v0 = vld [vmem:[#allocation14 + $0xb50] sm:$0xff] }
 0x74e   :  { %11639 = vmatpush1.bf16.msra.mxu0 %v17705_v58  ;;  %v8438_v58 = vld [vmem:[#allocation14 + $0xa30] sm:$0xff] }
 0x74f   :  { %11803 = vmatpush1.bf16.msra.mxu1 %v17707_v41  ;;  %11640 = vmatprep.subr.bf16.mxu0 %v17714_v29  ;;  %v8435_v41 = vld [vmem:[#allocation14 + $0xa18] sm:$0xff]  ;;  %v17762_v32 = vcombine.high %v8434_v62, %v8438_v58 }
 0x750   :  { %11804 = vmatprep.subr.bf16.mxu1 %v17716_v57  ;;  %v8439_v29 = vld [vmem:[#allocation14 + $0xa38] sm:$0xff]  ;;  %v17753_v57 = vcombine.low %v8426_v24, %v8430_v51 }
 0x751   :  { %v17764_v59 = vcombine.high %v8435_v41, %v8439_v29  ;;  %v17763_v23 = vcombine.low %v8435_v41, %v8439_v29  ;;  %v8482_v29 = vld [vmem:[#allocation14 + $0xb90] sm:$0xff] }
 0x752   :  { %11641 = vmatpush1.bf16.msra.mxu0 %v17713_v60  ;;  %v8446_v60 = vld [vmem:[#allocation14 + $0xa70] sm:$0xff] }
 0x753   :  { %11805 = vmatpush1.bf16.msra.mxu1 %v17715_v26  ;;  %11642 = vmatprep.subr.bf16.mxu0 %v17722_v35  ;;  %v8443_v26 = vld [vmem:[#allocation14 + $0xa58] sm:$0xff]  ;;  %v17770_v50 = vcombine.high %v8442_v34, %v8446_v60 }
 0x754   :  { %11806 = vmatprep.subr.bf16.mxu1 %v17724_v9  ;;  %v8447_v35 = vld [vmem:[#allocation14 + $0xa78] sm:$0xff]  ;;  %v17761_v9 = vcombine.low %v8434_v62, %v8438_v58 }
 0x755   :  { %v17772_v36 = vcombine.high %v8443_v26, %v8447_v35  ;;  %v17771_v2 = vcombine.low %v8443_v26, %v8447_v35  ;;  %v8490_v35 = vld [vmem:[#allocation14 + $0xbd0] sm:$0xff] }
 0x756   :  { %11643 = vmatpush1.bf16.msra.mxu0 %v17721_v10  ;;  %v8454_v10 = vld [vmem:[#allocation14 + $0xab0] sm:$0xff] }
 0x757   :  { %11807 = vmatpush1.bf16.msra.mxu1 %v17723_v28  ;;  %11644 = vmatprep.subr.bf16.mxu0 %v17730_v27  ;;  %v8451_v28 = vld [vmem:[#allocation14 + $0xa98] sm:$0xff]  ;;  %v17778_v39 = vcombine.high %v8450_v38, %v8454_v10 }
 0x758   :  { %11808 = vmatprep.subr.bf16.mxu1 %v17732_v6  ;;  %v8455_v27 = vld [vmem:[#allocation14 + $0xab8] sm:$0xff]  ;;  %v17769_v6 = vcombine.low %v8442_v34, %v8446_v60 }
 0x759   :  { %v17780_v40 = vcombine.high %v8451_v28, %v8455_v27  ;;  %v17779_v5 = vcombine.low %v8451_v28, %v8455_v27  ;;  %v8498_v27 = vld [vmem:[#allocation14 + $0xc10] sm:$0xff] }
 0x75a   :  { %11645 = vmatpush1.bf16.msra.mxu0 %v17729_v54  ;;  %v8462_v54 = vld [vmem:[#allocation14 + $0xaf0] sm:$0xff] }
 0x75b   :  { %11809 = vmatpush1.bf16.msra.mxu1 %v17731_v56  ;;  %11646 = vmatprep.subr.bf16.mxu0 %v17738_v16  ;;  %v8459_v56 = vld [vmem:[#allocation14 + $0xad8] sm:$0xff]  ;;  %v17786_v18 = vcombine.high %v8458_v21, %v8462_v54 }
 0x75c   :  { %11810 = vmatprep.subr.bf16.mxu1 %v17740_v7  ;;  %v8463_v16 = vld [vmem:[#allocation14 + $0xaf8] sm:$0xff]  ;;  %v17777_v7 = vcombine.low %v8450_v38, %v8454_v10 }
 0x75d   :  { %v17788_v42 = vcombine.high %v8459_v56, %v8463_v16  ;;  %v17787_v24 = vcombine.low %v8459_v56, %v8463_v16  ;;  %v8506_v16 = vld [vmem:[#allocation14 + $0xc50] sm:$0xff] }
 0x75e   :  { %11647 = vmatpush1.bf16.msra.mxu0 %v17737_v49  ;;  %v8470_v49 = vld [vmem:[#allocation14 + $0xb30] sm:$0xff] }
 0x75f   :  { %11811 = vmatpush1.bf16.msra.mxu1 %v17739_v3  ;;  %11648 = vmatprep.subr.bf16.mxu0 %v17746_v14  ;;  %v8467_v3 = vld [vmem:[#allocation14 + $0xb18] sm:$0xff]  ;;  %v17794_v51 = vcombine.high %v8466_v46, %v8470_v49 }
 0x760   :  { %11812 = vmatprep.subr.bf16.mxu1 %v17748_v31  ;;  %v8471_v14 = vld [vmem:[#allocation14 + $0xb38] sm:$0xff]  ;;  %v17785_v31 = vcombine.low %v8458_v21, %v8462_v54 }
 0x761   :  { %v17796_v52 = vcombine.high %v8467_v3, %v8471_v14  ;;  %v17795_v62 = vcombine.low %v8467_v3, %v8471_v14  ;;  %v8514_v3 = vld [vmem:[#allocation14 + $0xc90] sm:$0xff] }
 0x762   :  { %11649 = vmatpush1.bf16.msra.mxu0 %v17745_v8  ;;  %v8478_v8 = vld [vmem:[#allocation14 + $0xb70] sm:$0xff] }
 0x763   :  { %11813 = vmatpush1.bf16.msra.mxu1 %v17747_v17  ;;  %11650 = vmatprep.subr.bf16.mxu0 %v17754_v61  ;;  %v8475_v17 = vld [vmem:[#allocation14 + $0xb58] sm:$0xff]  ;;  %v17802_v58 = vcombine.high %v8474_v0, %v8478_v8  ;;  %v8518_v14 = vld [vmem:[#allocation14 + $0xcb0] sm:$0xff] }
 0x764   :  { %11814 = vmatprep.subr.bf16.mxu1 %v17756_v19  ;;  %v8479_v61 = vld [vmem:[#allocation14 + $0xb78] sm:$0xff]  ;;  %v17793_v19 = vcombine.low %v8466_v46, %v8470_v49 }
 0x765   :  { %v17804_v41 = vcombine.high %v8475_v17, %v8479_v61  ;;  %v17803_v34 = vcombine.low %v8475_v17, %v8479_v61  ;;  %v8522_v61 = vld [vmem:[#allocation14 + $0xcd0] sm:$0xff] }
 0x766   :  { %11651 = vmatpush1.bf16.msra.mxu0 %v17753_v57  ;;  %v8486_v57 = vld [vmem:[#allocation14 + $0xbb0] sm:$0xff] }
 0x767   :  { %11815 = vmatpush1.bf16.msra.mxu1 %v17755_v30  ;;  %11652 = vmatprep.subr.bf16.mxu0 %v17762_v32  ;;  %v8483_v30 = vld [vmem:[#allocation14 + $0xb98] sm:$0xff]  ;;  %v17810_v60 = vcombine.high %v8482_v29, %v8486_v57 }
 0x768   :  { %11816 = vmatprep.subr.bf16.mxu1 %v17764_v59  ;;  %v8487_v32 = vld [vmem:[#allocation14 + $0xbb8] sm:$0xff]  ;;  %v17801_v59 = vcombine.low %v8474_v0, %v8478_v8  ;;  %v17842_v8 = vcombine.high %v8514_v3, %v8518_v14 }
 0x769   :  { %v17812_v26 = vcombine.high %v8483_v30, %v8487_v32  ;;  %v17811_v38 = vcombine.low %v8483_v30, %v8487_v32  ;;  %v8530_v30 = vld [vmem:[#allocation14 + $0xd10] sm:$0xff] }
 0x76a   :  { %11653 = vmatpush1.bf16.msra.mxu0 %v17761_v9  ;;  %v8494_v9 = vld [vmem:[#allocation14 + $0xbf0] sm:$0xff] }
 0x76b   :  { %11817 = vmatpush1.bf16.msra.mxu1 %v17763_v23  ;;  %11654 = vmatprep.subr.bf16.mxu0 %v17770_v50  ;;  %v8491_v23 = vld [vmem:[#allocation14 + $0xbd8] sm:$0xff]  ;;  %v17818_v10 = vcombine.high %v8490_v35, %v8494_v9  ;;  %v8534_v32 = vld [vmem:[#allocation14 + $0xd30] sm:$0xff] }
 0x76c   :  { %11818 = vmatprep.subr.bf16.mxu1 %v17772_v36  ;;  %v8495_v50 = vld [vmem:[#allocation14 + $0xbf8] sm:$0xff]  ;;  %v17809_v36 = vcombine.low %v8482_v29, %v8486_v57 }
 0x76d   :  { %v17820_v28 = vcombine.high %v8491_v23, %v8495_v50  ;;  %v17819_v21 = vcombine.low %v8491_v23, %v8495_v50  ;;  %v8542_v23 = vld [vmem:[#allocation14 + $0xd70] sm:$0xff]  ;;  %v8539_v50 = vld [vmem:[#allocation14 + $0xd58] sm:$0xff] }
 0x76e   :  { %11655 = vmatpush1.bf16.msra.mxu0 %v17769_v6  ;;  %v8502_v6 = vld [vmem:[#allocation14 + $0xc30] sm:$0xff] }
 0x76f   :  { %11819 = vmatpush1.bf16.msra.mxu1 %v17771_v2  ;;  %11656 = vmatprep.subr.bf16.mxu0 %v17778_v39  ;;  %v8499_v2 = vld [vmem:[#allocation14 + $0xc18] sm:$0xff]  ;;  %v17826_v54 = vcombine.high %v8498_v27, %v8502_v6 }
 0x770   :  { %11820 = vmatprep.subr.bf16.mxu1 %v17780_v40  ;;  %v8503_v39 = vld [vmem:[#allocation14 + $0xc38] sm:$0xff]  ;;  %v17817_v40 = vcombine.low %v8490_v35, %v8494_v9  ;;  %v8538_v9 = vld [vmem:[#allocation14 + $0xd50] sm:$0xff] }
 0x771   :  { %v17828_v56 = vcombine.high %v8499_v2, %v8503_v39  ;;  %v17827_v46 = vcombine.low %v8499_v2, %v8503_v39  ;;  %v8550_v2 = vld [vmem:[#allocation14 + $0xdb0] sm:$0xff]  ;;  %v8547_v39 = vld [vmem:[#allocation14 + $0xd98] sm:$0xff] }
 0x772   :  { %11657 = vmatpush1.bf16.msra.mxu0 %v17777_v7  ;;  %v8510_v7 = vld [vmem:[#allocation14 + $0xc70] sm:$0xff] }
 0x773   :  { %11821 = vmatpush1.bf16.msra.mxu1 %v17779_v5  ;;  %11658 = vmatprep.subr.bf16.mxu0 %v17786_v18  ;;  %v17825_v5 = vcombine.low %v8498_v27, %v8502_v6  ;;  %v8507_v18 = vld [vmem:[#allocation14 + $0xc58] sm:$0xff]  ;;  %v17834_v49 = vcombine.high %v8506_v16, %v8510_v7  ;;  %v8546_v6 = vld [vmem:[#allocation14 + $0xd90] sm:$0xff] }
 0x774   :  { %11822 = vmatprep.subr.bf16.mxu1 %v17788_v42  ;;  %v8511_v42 = vld [vmem:[#allocation14 + $0xc78] sm:$0xff] }
 0x775   :  { %v17835_v0 = vcombine.low %v8507_v18, %v8511_v42 }
 0x776   :  { %11659 = vmatpush1.bf16.msra.mxu0 %v17785_v31  ;;  %v17836_v31 = vcombine.high %v8507_v18, %v8511_v42  ;;  %v8554_v18 = vld [vmem:[#allocation14 + $0xdd0] sm:$0xff] }
 0x777   :  { %11823 = vmatpush1.bf16.msra.mxu1 %v17787_v24  ;;  %11660 = vmatprep.subr.bf16.mxu0 %v17794_v51  ;;  %v8515_v24 = vld [vmem:[#allocation14 + $0xc98] sm:$0xff]  ;;  %v8558_v42 = vld [vmem:[#allocation14 + $0xdf0] sm:$0xff] }
 0x778   :  { %11824 = vmatprep.subr.bf16.mxu1 %v17796_v52  ;;  %v8519_v51 = vld [vmem:[#allocation14 + $0xcb8] sm:$0xff]  ;;  %v17833_v52 = vcombine.low %v8506_v16, %v8510_v7 }
 0x779   :  { %v17844_v17 = vcombine.high %v8515_v24, %v8519_v51 }
 0x77a   :  { %11661 = vmatpush1.bf16.msra.mxu0 %v17793_v19  ;;  %v8526_v19 = vld [vmem:[#allocation14 + $0xcf0] sm:$0xff] }
 0x77b   :  { %11825 = vmatpush1.bf16.msra.mxu1 %v17795_v62  ;;  %11662 = vmatprep.subr.bf16.mxu0 %v17802_v58  ;;  %v8523_v62 = vld [vmem:[#allocation14 + $0xcd8] sm:$0xff]  ;;  %v17850_v29 = vcombine.high %v8522_v61, %v8526_v19 }
 0x77c   :  { %11826 = vmatprep.subr.bf16.mxu1 %v17804_v41  ;;  %v8527_v58 = vld [vmem:[#allocation14 + $0xcf8] sm:$0xff]  ;;  %v17841_v41 = vcombine.low %v8514_v3, %v8518_v14 }
 0x77d   :  { %v17852_v57 = vcombine.high %v8523_v62, %v8527_v58  ;;  %v8555_v3 = vld [vmem:[#allocation14 + $0xdd8] sm:$0xff] }
 0x77e   :  { %11663 = vmatpush1.bf16.msra.mxu0 %v17801_v59  ;;  %v8531_v59 = vld [vmem:[#allocation14 + $0xd18] sm:$0xff] }
 0x77f   :  { %11827 = vmatpush1.bf16.msra.mxu1 %v17803_v34  ;;  %11664 = vmatprep.subr.bf16.mxu0 %v17810_v60  ;;  %v8535_v34 = vld [vmem:[#allocation14 + $0xd38] sm:$0xff]  ;;  %v17851_v60 = vcombine.low %v8523_v62, %v8527_v58  ;;  %v8566_v62 = vld [vmem:[#allocation14 + $0xe30] sm:$0xff] }
 0x780   :  { %11828 = vmatprep.subr.bf16.mxu1 %v17812_v26  ;;  %v17858_v26 = vcombine.high %v8530_v30, %v8534_v32  ;;  %v17860_v35 = vcombine.high %v8531_v59, %v8535_v34  ;;  %v8559_v14 = vld [vmem:[#allocation14 + $0xdf8] sm:$0xff] }
 0x781   :  { %v8563_v58 = vld [vmem:[#allocation14 + $0xe18] sm:$0xff] }
 0x782   :  { %11665 = vmatpush1.bf16.msra.mxu0 %v17809_v36  ;;  %v8543_v36 = vld [vmem:[#allocation14 + $0xd78] sm:$0xff] }
 0x783   :  { %11829 = vmatpush1.bf16.msra.mxu1 %v17811_v38  ;;  %11666 = vmatprep.subr.bf16.mxu0 %v17818_v10  ;;  %v17857_v38 = vcombine.low %v8530_v30, %v8534_v32  ;;  %v17859_v10 = vcombine.low %v8531_v59, %v8535_v34  ;;  %v17868_v27 = vcombine.high %v8539_v50, %v8543_v36  ;;  %v8570_v32 = vld [vmem:[#allocation14 + $0xe50] sm:$0xff]  ;;  %v8571_v34 = vld [vmem:[#allocation14 + $0xe58] sm:$0xff] }
 0x784   :  { %11830 = vmatprep.subr.bf16.mxu1 %v17820_v28  ;;  %v17866_v28 = vcombine.high %v8538_v9, %v8542_v23  ;;  %v8574_v59 = vld [vmem:[#allocation14 + $0xe70] sm:$0xff] }
 0x786   :  { %11667 = vmatpush1.bf16.msra.mxu0 %v17817_v40  ;;  %v8551_v40 = vld [vmem:[#allocation14 + $0xdb8] sm:$0xff] }
 0x787   :  { %11831 = vmatpush1.bf16.msra.mxu1 %v17819_v21  ;;  %11677 = vmatprep.subr.bf16.mxu0 %v17826_v54  ;;  %v17865_v21 = vcombine.low %v8538_v9, %v8542_v23  ;;  %v17867_v54 = vcombine.low %v8539_v50, %v8543_v36  ;;  %v8578_v23 = vld [vmem:[#allocation14 + $0xe90] sm:$0xff]  ;;  %v8579_v36 = vld [vmem:[#allocation14 + $0xe98] sm:$0xff] }
 0x788   :  { %11841 = vmatprep.subr.bf16.mxu1 %v17828_v56  ;;  %v17874_v56 = vcombine.high %v8546_v6, %v8550_v2  ;;  %v8582_v50 = vld [vmem:[#allocation14 + $0xeb0] sm:$0xff] }
 0x789   :  { %11669 = vmatmul.mubr.bf16.vlgmr.msra.gmra.mrb[28].mxu0 %v19817_v43 }
 0x78a   :  { %11833 = vmatmul.mubr.bf16.vlgmr.msra.gmra.mrb[28].mxu1 %v19817_v43  ;;  %11678 = vmatpush1.bf16.msra.mxu0 %v17825_v5  ;;  %v17843_v43 = vcombine.low %v8515_v24, %v8519_v51  ;;  %v17876_v5 = vcombine.high %v8547_v39, %v8551_v40  ;;  %v17873_v51 = vcombine.low %v8546_v6, %v8550_v2  ;;  %v8586_v2 = vld [vmem:[#allocation14 + $0xed0] sm:$0xff] }
 0x78b   :  { %11709 = vmatprep.mubr.bf16.mxu0 %v19823_v33  ;;  %11842 = vmatpush1.bf16.msra.mxu1 %v17827_v46 }
 0x78c   :  { %11873 = vmatprep.mubr.bf16.mxu1 %v19823_v33  ;;  %11679 = vmatprep.subr.bf16.mxu0 %v17834_v49  ;;  %v17849_v33 = vcombine.low %v8522_v61, %v8526_v19  ;;  %v17884_v61 = vcombine.high %v8555_v3, %v8559_v14  ;;  %v8562_v19 = vld [vmem:[#allocation14 + $0xe10] sm:$0xff] }
 0x78d   :  { %11843 = vmatprep.subr.bf16.mxu1 %v17836_v31 }
 0x78e   :  { %11680 = vmatpush1.bf16.msra.mxu0 %v17833_v52 }
 0x78f   :  { %11844 = vmatpush1.bf16.msra.mxu1 %v17835_v0  ;;  %11681 = vmatprep.subr.bf16.mxu0 %v17842_v8  ;;  %v17875_v8 = vcombine.low %v8547_v39, %v8551_v40  ;;  %v8590_v39 = vld [vmem:[#allocation14 + $0xef0] sm:$0xff]  ;;  %v8587_v40 = vld [vmem:[#allocation14 + $0xed8] sm:$0xff] }
 0x790   :  { %11845 = vmatprep.subr.bf16.mxu1 %v17844_v17  ;;  %v17882_v17 = vcombine.high %v8554_v18, %v8558_v42 }
 0x792   :  { %11682 = vmatpush1.bf16.msra.mxu0 %v17841_v41  ;;  %v8567_v41 = vld [vmem:[#allocation14 + $0xe38] sm:$0xff] }
 0x793   :  { %11846 = vmatpush1.bf16.msra.mxu1 %v17843_v43  ;;  %11683 = vmatprep.subr.bf16.mxu0 %v17850_v29  ;;  %v17881_v43 = vcombine.low %v8554_v18, %v8558_v42  ;;  %v17883_v29 = vcombine.low %v8555_v3, %v8559_v14  ;;  %v17892_v30 = vcombine.high %v8563_v58, %v8567_v41  ;;  %v8594_v42 = vld [vmem:[#allocation14 + $0xf10] sm:$0xff]  ;;  %v8595_v14 = vld [vmem:[#allocation14 + $0xf18] sm:$0xff] }
 0x794   :  { %11847 = vmatprep.subr.bf16.mxu1 %v17852_v57  ;;  %v17890_v57 = vcombine.high %v8562_v19, %v8566_v62  ;;  %v8598_v3 = vld [vmem:[#allocation14 + $0xf30] sm:$0xff] }
 0x796   :  { %11684 = vmatpush1.bf16.msra.mxu0 %v17849_v33  ;;  %v8575_v33 = vld [vmem:[#allocation14 + $0xe78] sm:$0xff] }
 0x797   :  { %11848 = vmatpush1.bf16.msra.mxu1 %v17851_v60  ;;  %11685 = vmatprep.subr.bf16.mxu0 %v17858_v26  ;;  %v17889_v60 = vcombine.low %v8562_v19, %v8566_v62  ;;  %v17891_v26 = vcombine.low %v8563_v58, %v8567_v41  ;;  %v17900_v9 = vcombine.high %v8571_v34, %v8575_v33  ;;  %v8607_v19 = vld [vmem:[#allocation14 + $0xf78] sm:$0xff] }
 0x798   :  { %11849 = vmatprep.subr.bf16.mxu1 %v17860_v35  ;;  %v17898_v35 = vcombine.high %v8570_v32, %v8574_v59  ;;  %v17921_v62 = vcombine.low %v8594_v42, %v8598_v3 }
 0x79a   :  { %11686 = vmatpush1.bf16.msra.mxu0 %v17857_v38  ;;  %v8583_v38 = vld [vmem:[#allocation14 + $0xeb8] sm:$0xff] }
 0x79b   :  { %11850 = vmatpush1.bf16.msra.mxu1 %v17859_v10  ;;  %11687 = vmatprep.subr.bf16.mxu0 %v17866_v28  ;;  %v17897_v10 = vcombine.low %v8570_v32, %v8574_v59  ;;  %v17899_v28 = vcombine.low %v8571_v34, %v8575_v33  ;;  %v17908_v6 = vcombine.high %v8579_v36, %v8583_v38  ;;  %v8615_v32 = vld [vmem:[#allocation14 + $0xfb8] sm:$0xff]  ;;  %v19863_v59 = vld [vmem:[#allocation16] sm:$0xff] }
 0x79c   :  { %v19855_v16 = vpop.f32.mrb[24].mxu0  ;;  %v19857_v7 = vpop.f32.mrb[24].mxu1  ;;  %11851 = vmatprep.subr.bf16.mxu1 %v17868_v27  ;;  %v17906_v27 = vcombine.high %v8578_v23, %v8582_v50 }
 0x79d   :  { %v19859_v46 = vpop.f32.mrb[25].mxu0  ;;  %v19861_v49 = vpop.f32.mrb[25].mxu1 }
 0x79e   :  { %v11387_v31 = vpop.f32.mrb[26].mxu0  ;;  %v11551_v24 = vpop.f32.mrb[26].mxu1  ;;  %11688 = vmatpush1.bf16.msra.mxu0 %v17865_v21  ;;  %v8591_v21 = vld [vmem:[#allocation14 + $0xef8] sm:$0xff] }
 0x79f   :  { %11852 = vmatpush1.bf16.msra.mxu1 %v17867_v54  ;;  %v11388_v52 = vpop.f32.mrb[27].mxu0  ;;  %v11552_v0 = vpop.f32.mrb[27].mxu1  ;;  %11689 = vmatprep.subr.bf16.mxu0 %v17874_v56  ;;  %v17905_v54 = vcombine.low %v8578_v23, %v8582_v50  ;;  %v17907_v56 = vcombine.low %v8579_v36, %v8583_v38  ;;  %v17916_v18 = vcombine.high %v8587_v40, %v8591_v21  ;;  %v8599_v31 = vld [vmem:[#allocation14 + $0xf38] sm:$0xff] }
 0x7a0   :  { %11853 = vmatprep.subr.bf16.mxu1 %v17876_v5  ;;  %v17914_v5 = vcombine.high %v8586_v2, %v8590_v39  ;;  %v17913_v24 = vcombine.low %v8586_v2, %v8590_v39  ;;  %v17922_v52 = vcombine.high %v8594_v42, %v8598_v3  ;;  %v17924_v0 = vcombine.high %v8595_v14, %v8599_v31  ;;  %v8619_v50 = vld [vmem:[#allocation14 + $0xfd8] sm:$0xff]  ;;  %v11902_v2 = vld [vmem:[#allocation17 + $0x20] sm:$0xff] }
 0x7a1   :  { %v17923_v58 = vcombine.low %v8595_v14, %v8599_v31  ;;  %v8633_v23 = vrot.slane %v19863_v59, %v19521_v47  ;;  %v8623_v36 = vld [vmem:[#allocation14 + $0xff8] sm:$0xff]  ;;  %v11906_v3 = vld [vmem:[#allocation17 + $0x40] sm:$0xff] }
 0x7a2   :  { %11690 = vmatpush1.bf16.msra.mxu0 %v17873_v51  ;;  %v17915_v51 = vcombine.low %v8587_v40, %v8591_v21  ;;  %v11899_v40 = vld [vmem:[#allocation17 + $0x8] sm:$0xff]  ;;  %v11910_v14 = vld [vmem:[#allocation17 + $0x60] sm:$0xff] }
 0x7a3   :  { %11854 = vmatpush1.bf16.msra.mxu1 %v17875_v8  ;;  %11691 = vmatprep.subr.bf16.mxu0 %v17882_v17  ;;  %v8602_v8 = vld [vmem:[#allocation14 + $0xf50] sm:$0xff]  ;;  %v18631_v39 = vadd.f32 %v19859_v46, %v8633_v23 }
 0x7a4   :  { %11855 = vmatprep.subr.bf16.mxu1 %v17884_v61  ;;  %v8606_v17 = vld [vmem:[#allocation14 + $0xf70] sm:$0xff]  ;;  %v8603_v61 = vld [vmem:[#allocation14 + $0xf58] sm:$0xff] }
 0x7a5   :  { %v17930_v41 = vcombine.high %v8602_v8, %v8606_v17  ;;  %v17929_v34 = vcombine.low %v8602_v8, %v8606_v17  ;;  %v17931_v33 = vcombine.low %v8603_v61, %v8607_v19  ;;  %v11903_v21 = vld [vmem:[#allocation17 + $0x28] sm:$0xff]  ;;  %v11883_v42 = vmax.f32 %v18631_v39, 0.0  ;;  %v11918_v8 = vld [vmem:[#allocation17 + $0xa0] sm:$0xff] }
 0x7a6   :  { %11692 = vmatpush1.bf16.msra.mxu0 %v17881_v43  ;;  %v17932_v43 = vcombine.high %v8603_v61, %v8607_v19  ;;  %v17951_v46 = vcombine.low %v11899_v40, %v11903_v21  ;;  %v11915_v19 = vld [vmem:[#allocation17 + $0x88] sm:$0xff] }
 0x7a7   :  { %11856 = vmatpush1.bf16.msra.mxu1 %v17883_v29  ;;  %11693 = vmatprep.subr.bf16.mxu0 %v17890_v57  ;;  %v8610_v29 = vld [vmem:[#allocation14 + $0xf90] sm:$0xff]  ;;  %v19868_v17 = vpack.c.bf16 %v11883_v42, %v11883_v42 }
 0x7a8   :  { %11857 = vmatprep.subr.bf16.mxu1 %v17892_v30  ;;  %v8614_v57 = vld [vmem:[#allocation14 + $0xfb0] sm:$0xff]  ;;  %v8611_v30 = vld [vmem:[#allocation14 + $0xf98] sm:$0xff] }
 0x7a9   :  { %v17937_v38 = vcombine.low %v8610_v29, %v8614_v57  ;;  %v11931_v23 = vld [vmem:[#allocation17 + $0x108] sm:$0xff] }
 0x7aa   :  { %11694 = vmatpush1.bf16.msra.mxu0 %v17889_v60  ;;  %v17938_v60 = vcombine.high %v8610_v29, %v8614_v57  ;;  %v11922_v57 = vld [vmem:[#allocation17 + $0xc0] sm:$0xff]  ;;  %v11943_v39 = vld [vmem:[#allocation17 + $0x168] sm:$0xff] }
 0x7ab   :  { %11858 = vmatpush1.bf16.msra.mxu1 %v17891_v26  ;;  %11695 = vmatprep.subr.bf16.mxu0 %v17898_v35  ;;  %v17940_v26 = vcombine.high %v8611_v30, %v8615_v32  ;;  %v8618_v35 = vld [vmem:[#allocation14 + $0xfd0] sm:$0xff] }
 0x7ac   :  { %11859 = vmatprep.subr.bf16.mxu1 %v17900_v9  ;;  %v8622_v9 = vld [vmem:[#allocation14 + $0xff0] sm:$0xff] }
 0x7ad   :  { %v11947_v42 = vld [vmem:[#allocation17 + $0x188] sm:$0xff] }
 0x7ae   :  { %11696 = vmatpush1.bf16.msra.mxu0 %v17897_v10  ;;  %v17939_v10 = vcombine.low %v8611_v30, %v8615_v32  ;;  %v11926_v30 = vld [vmem:[#allocation17 + $0xe0] sm:$0xff]  ;;  %v11923_v32 = vld [vmem:[#allocation17 + $0xc8] sm:$0xff] }
 0x7af   :  { %11860 = vmatpush1.bf16.msra.mxu1 %v17899_v28  ;;  %11697 = vmatprep.subr.bf16.mxu0 %v17906_v27  ;;  %v17946_v28 = vcombine.high %v8618_v35, %v8622_v9  ;;  %v17948_v27 = vcombine.high %v8619_v50, %v8623_v36 }
 0x7b0   :  { %11861 = vmatprep.subr.bf16.mxu1 %v17908_v6  ;;  %v11898_v6 = vld [vmem:[#allocation17] sm:$0xff] }
 0x7b1   :  { %v17949_v31 = vcombine.low %v11898_v6, %v11902_v2 }
 0x7b2   :  { %11698 = vmatpush1.bf16.msra.mxu0 %v17905_v54  ;;  %v17945_v54 = vcombine.low %v8618_v35, %v8622_v9  ;;  %v11930_v35 = vld [vmem:[#allocation17 + $0x100] sm:$0xff] }
 0x7b3   :  { %11862 = vmatpush1.bf16.msra.mxu1 %v17907_v56  ;;  %11699 = vmatprep.subr.bf16.mxu0 %v17914_v5  ;;  %v17947_v56 = vcombine.low %v8619_v50, %v8623_v36  ;;  %v17950_v5 = vcombine.high %v11898_v6, %v11902_v2  ;;  %v11934_v9 = vld [vmem:[#allocation17 + $0x120] sm:$0xff]  ;;  %v11935_v50 = vld [vmem:[#allocation17 + $0x128] sm:$0xff]  ;;  %v17973_v36 = vcombine.low %v11922_v57, %v11926_v30 }
 0x7b4   :  { %11863 = vmatprep.subr.bf16.mxu1 %v17916_v18  ;;  %v17952_v18 = vcombine.high %v11899_v40, %v11903_v21  ;;  %v11942_v6 = vld [vmem:[#allocation17 + $0x160] sm:$0xff]  ;;  %v11939_v2 = vld [vmem:[#allocation17 + $0x148] sm:$0xff]  ;;  %v17981_v40 = vcombine.low %v11930_v35, %v11934_v9  ;;  %v17983_v21 = vcombine.low %v11931_v23, %v11935_v50 }
 0x7b6   :  { %11700 = vmatpush1.bf16.msra.mxu0 %v17913_v24  ;;  %v11907_v24 = vld [vmem:[#allocation17 + $0x48] sm:$0xff] }
 0x7b7   :  { %11864 = vmatpush1.bf16.msra.mxu1 %v17915_v51  ;;  %11701 = vmatprep.subr.bf16.mxu0 %v17922_v52  ;;  %v11911_v51 = vld [vmem:[#allocation17 + $0x68] sm:$0xff]  ;;  %v17958_v52 = vcombine.high %v11906_v3, %v11910_v14 }
 0x7b8   :  { %11865 = vmatprep.subr.bf16.mxu1 %v17924_v0  ;;  %v11914_v0 = vld [vmem:[#allocation17 + $0x80] sm:$0xff]  ;;  %v17960_v61 = vcombine.high %v11907_v24, %v11911_v51 }
 0x7ba   :  { %11702 = vmatpush1.bf16.msra.mxu0 %v17921_v62  ;;  %v11919_v62 = vld [vmem:[#allocation17 + $0xa8] sm:$0xff] }
 0x7bb   :  { %11866 = vmatpush1.bf16.msra.mxu1 %v17923_v58  ;;  %11703 = vmatprep.subr.bf16.mxu0 %v17930_v41  ;;  %v17957_v58 = vcombine.low %v11906_v3, %v11910_v14  ;;  %v17959_v41 = vcombine.low %v11907_v24, %v11911_v51  ;;  %v17968_v29 = vcombine.high %v11915_v19, %v11919_v62  ;;  %v11951_v3 = vld [vmem:[#allocation17 + $0x1a8] sm:$0xff] }
 0x7bc   :  { %11867 = vmatprep.subr.bf16.mxu1 %v17932_v43  ;;  %v17966_v43 = vcombine.high %v11914_v0, %v11918_v8  ;;  %v18000_v51 = vcombine.high %v11947_v42, %v11951_v3 }
 0x7be   :  { %11704 = vmatpush1.bf16.msra.mxu0 %v17929_v34  ;;  %v11927_v34 = vld [vmem:[#allocation17 + $0xe8] sm:$0xff] }
 0x7bf   :  { %11868 = vmatpush1.bf16.msra.mxu1 %v17931_v33  ;;  %11705 = vmatprep.subr.bf16.mxu0 %v17938_v60  ;;  %v17965_v33 = vcombine.low %v11914_v0, %v11918_v8  ;;  %v17974_v60 = vcombine.high %v11922_v57, %v11926_v30  ;;  %v11955_v0 = vld [vmem:[#allocation17 + $0x1c8] sm:$0xff] }
 0x7c0   :  { %11869 = vmatprep.subr.bf16.mxu1 %v17940_v26  ;;  %v17976_v26 = vcombine.high %v11923_v32, %v11927_v34  ;;  %v11959_v8 = vld [vmem:[#allocation17 + $0x1e8] sm:$0xff] }
 0x7c1   :  { %v11967_v57 = vld [vmem:[#allocation17 + $0x228] sm:$0xff] }
 0x7c2   :  { %11706 = vmatpush1.bf16.msra.mxu0 %v17937_v38  ;;  %v17975_v38 = vcombine.low %v11923_v32, %v11927_v34  ;;  %v18007_v32 = vcombine.low %v11955_v0, %v11959_v8 }
 0x7c3   :  { %11870 = vmatpush1.bf16.msra.mxu1 %v17939_v10  ;;  %11707 = vmatprep.subr.bf16.mxu0 %v17946_v28  ;;  %v17982_v10 = vcombine.high %v11930_v35, %v11934_v9  ;;  %v17984_v28 = vcombine.high %v11931_v23, %v11935_v50  ;;  %v11975_v35 = vld [vmem:[#allocation17 + $0x268] sm:$0xff] }
 0x7c4   :  { %11871 = vmatprep.subr.bf16.mxu1 %v17948_v27  ;;  %v11938_v27 = vld [vmem:[#allocation17 + $0x140] sm:$0xff] }
 0x7c5   :  { %v17989_v14 = vcombine.low %v11938_v27, %v11942_v6 }
 0x7c6   :  { %11708 = vmatpush1.bf16.msra.mxu0 %v17945_v54  ;;  %v17990_v54 = vcombine.high %v11938_v27, %v11942_v6  ;;  %v11983_v27 = vld [vmem:[#allocation17 + $0x2a8] sm:$0xff] }
 0x7c7   :  { %11872 = vmatpush1.bf16.msra.mxu1 %v17947_v56  ;;  %15012 = vmatprep.subr.bf16.mxu0 %v17950_v5  ;;  %v17992_v56 = vcombine.high %v11939_v2, %v11943_v39  ;;  %v11946_v5 = vld [vmem:[#allocation17 + $0x180] sm:$0xff] }
 0x7c8   :  { %15176 = vmatprep.subr.bf16.mxu1 %v17952_v18  ;;  %v11950_v18 = vld [vmem:[#allocation17 + $0x1a0] sm:$0xff] }
 0x7c9   :  { %11710 = vmatmul.mubr.bf16.vlgmr.msra.gmra.mrb[28].mxu0 %v19837_v15  ;;  %v17998_v24 = vcombine.high %v11946_v5, %v11950_v18 }
 0x7ca   :  { %11874 = vmatmul.mubr.bf16.vlgmr.msra.gmra.mrb[28].mxu1 %v19837_v15  ;;  %15013 = vmatpush1.bf16.msra.mxu0 %v17949_v31  ;;  %v17967_v15 = vcombine.low %v11915_v19, %v11919_v62  ;;  %v17991_v31 = vcombine.low %v11939_v2, %v11943_v39  ;;  %v17999_v19 = vcombine.low %v11947_v42, %v11951_v3 }
 0x7cb   :  { %15044 = vmatprep.mubr.bf16.mxu0 %v19868_v17  ;;  %15177 = vmatpush1.bf16.msra.mxu1 %v17951_v46  ;;  %v11954_v46 = vld [vmem:[#allocation17 + $0x1c0] sm:$0xff] }
 0x7cc   :  { %15208 = vmatprep.mubr.bf16.mxu1 %v19868_v17  ;;  %15014 = vmatprep.subr.bf16.mxu0 %v17958_v52  ;;  %v11958_v52 = vld [vmem:[#allocation17 + $0x1e0] sm:$0xff] }
 0x7cd   :  { %15178 = vmatprep.subr.bf16.mxu1 %v17960_v61  ;;  %v17997_v61 = vcombine.low %v11946_v5, %v11950_v18  ;;  %v18006_v62 = vcombine.high %v11954_v46, %v11958_v52  ;;  %v18005_v30 = vcombine.low %v11954_v46, %v11958_v52  ;;  %v11991_v5 = vld [vmem:[#allocation17 + $0x2e8] sm:$0xff] }
 0x7ce   :  { %15015 = vmatpush1.bf16.msra.mxu0 %v17957_v58  ;;  %v18008_v58 = vcombine.high %v11955_v0, %v11959_v8  ;;  %v11999_v46 = vld [vmem:[#allocation17 + $0x328] sm:$0xff] }
 0x7cf   :  { %15179 = vmatpush1.bf16.msra.mxu1 %v17959_v41  ;;  %15016 = vmatprep.subr.bf16.mxu0 %v17966_v43  ;;  %v11962_v41 = vld [vmem:[#allocation17 + $0x200] sm:$0xff] }
 0x7d0   :  { %15180 = vmatprep.subr.bf16.mxu1 %v17968_v29  ;;  %v11966_v43 = vld [vmem:[#allocation17 + $0x220] sm:$0xff]  ;;  %v11963_v29 = vld [vmem:[#allocation17 + $0x208] sm:$0xff] }
 0x7d1   :  { %v18014_v34 = vcombine.high %v11962_v41, %v11966_v43  ;;  %v18013_v9 = vcombine.low %v11962_v41, %v11966_v43  ;;  %v18015_v23 = vcombine.low %v11963_v29, %v11967_v57  ;;  %v12007_v41 = vld [vmem:[#allocation17 + $0x368] sm:$0xff] }
 0x7d2   :  { %15017 = vmatpush1.bf16.msra.mxu0 %v17965_v33  ;;  %v18016_v33 = vcombine.high %v11963_v29, %v11967_v57 }
 0x7d3   :  { %15181 = vmatpush1.bf16.msra.mxu1 %v17967_v15  ;;  %15018 = vmatprep.subr.bf16.mxu0 %v17974_v60  ;;  %v11970_v15 = vld [vmem:[#allocation17 + $0x240] sm:$0xff] }
 0x7d4   :  { %15182 = vmatprep.subr.bf16.mxu1 %v17976_v26  ;;  %v11974_v60 = vld [vmem:[#allocation17 + $0x260] sm:$0xff]  ;;  %v11971_v26 = vld [vmem:[#allocation17 + $0x248] sm:$0xff] }
 0x7d5   :  { %v18022_v50 = vcombine.high %v11970_v15, %v11974_v60  ;;  %v18021_v6 = vcombine.low %v11970_v15, %v11974_v60  ;;  %v18023_v2 = vcombine.low %v11971_v26, %v11975_v35  ;;  %v12015_v15 = vld [vmem:[#allocation17 + $0x3a8] sm:$0xff] }
 0x7d6   :  { %15019 = vmatpush1.bf16.msra.mxu0 %v17973_v36  ;;  %v18024_v36 = vcombine.high %v11971_v26, %v11975_v35  ;;  %v8629_v26 = vrot.slane %v19863_v59, %v19516_v45 }
 0x7d7   :  { %15183 = vmatpush1.bf16.msra.mxu1 %v17975_v38  ;;  %15020 = vmatprep.subr.bf16.mxu0 %v17982_v10  ;;  %v11978_v38 = vld [vmem:[#allocation17 + $0x280] sm:$0xff] }
 0x7d8   :  { %15184 = vmatprep.subr.bf16.mxu1 %v17984_v28  ;;  %v11982_v10 = vld [vmem:[#allocation17 + $0x2a0] sm:$0xff]  ;;  %v11979_v28 = vld [vmem:[#allocation17 + $0x288] sm:$0xff] }
 0x7d9   :  { %v18030_v39 = vcombine.high %v11978_v38, %v11982_v10  ;;  %v18029_v18 = vcombine.low %v11978_v38, %v11982_v10  ;;  %v18031_v42 = vcombine.low %v11979_v28, %v11983_v27  ;;  %v8641_v38 = vrot.slane %v19863_v59, %v19524_v48  ;;  %v12019_v10 = vld [vmem:[#allocation17 + $0x3c8] sm:$0xff] }
 0x7da   :  { %15021 = vmatpush1.bf16.msra.mxu0 %v17981_v40  ;;  %v18032_v40 = vcombine.high %v11979_v28, %v11983_v27  ;;  %v12023_v28 = vld [vmem:[#allocation17 + $0x3e8] sm:$0xff] }
 0x7db   :  { %15185 = vmatpush1.bf16.msra.mxu1 %v17983_v21  ;;  %15022 = vmatprep.subr.bf16.mxu0 %v17990_v54  ;;  %v11986_v21 = vld [vmem:[#allocation17 + $0x2c0] sm:$0xff] }
 0x7dc   :  { %15186 = vmatprep.subr.bf16.mxu1 %v17992_v56  ;;  %v11990_v54 = vld [vmem:[#allocation17 + $0x2e0] sm:$0xff]  ;;  %v11987_v56 = vld [vmem:[#allocation17 + $0x2c8] sm:$0xff] }
 0x7dd   :  { %v18038_v3 = vcombine.high %v11986_v21, %v11990_v54  ;;  %v18037_v52 = vcombine.low %v11986_v21, %v11990_v54  ;;  %v18039_v0 = vcombine.low %v11987_v56, %v11991_v5  ;;  %v12026_v21 = vld [vmem:[#allocation17 + $0x400] sm:$0xff] }
 0x7de   :  { %15023 = vmatpush1.bf16.msra.mxu0 %v17989_v14  ;;  %v18040_v14 = vcombine.high %v11987_v56, %v11991_v5  ;;  %v12030_v54 = vld [vmem:[#allocation17 + $0x420] sm:$0xff]  ;;  %v18633_v56 = vadd.f32 %v19861_v49, %v8641_v38  ;;  %v12027_v5 = vld [vmem:[#allocation17 + $0x408] sm:$0xff] }
 0x7df   :  { %15187 = vmatpush1.bf16.msra.mxu1 %v17991_v31  ;;  %15024 = vmatprep.subr.bf16.mxu0 %v17998_v24  ;;  %v11994_v31 = vld [vmem:[#allocation17 + $0x300] sm:$0xff] }
 0x7e0   :  { %15188 = vmatprep.subr.bf16.mxu1 %v18000_v51  ;;  %v11998_v24 = vld [vmem:[#allocation17 + $0x320] sm:$0xff]  ;;  %v11995_v51 = vld [vmem:[#allocation17 + $0x308] sm:$0xff] }
 0x7e1   :  { %v18046_v8 = vcombine.high %v11994_v31, %v11998_v24  ;;  %v18045_v43 = vcombine.low %v11994_v31, %v11998_v24  ;;  %v18047_v29 = vcombine.low %v11995_v51, %v11999_v46  ;;  %v18078_v31 = vcombine.high %v12026_v21, %v12030_v54  ;;  %v12058_v38 = vld [vmem:[#allocation17 + $0x500] sm:$0xff] }
 0x7e2   :  { %15025 = vmatpush1.bf16.msra.mxu0 %v17997_v61  ;;  %v18048_v61 = vcombine.high %v11995_v51, %v11999_v46  ;;  %v11885_v24 = vmax.f32 %v18633_v56, 0.0  ;;  %v12034_v51 = vld [vmem:[#allocation17 + $0x440] sm:$0xff]  ;;  %v12067_v56 = vld [vmem:[#allocation17 + $0x548] sm:$0xff] }
 0x7e3   :  { %15189 = vmatpush1.bf16.msra.mxu1 %v17999_v19  ;;  %15026 = vmatprep.subr.bf16.mxu0 %v18006_v62  ;;  %v12002_v19 = vld [vmem:[#allocation17 + $0x340] sm:$0xff] }
 0x7e4   :  { %15190 = vmatprep.subr.bf16.mxu1 %v18008_v58  ;;  %v12006_v62 = vld [vmem:[#allocation17 + $0x360] sm:$0xff]  ;;  %v12003_v58 = vld [vmem:[#allocation17 + $0x348] sm:$0xff] }
 0x7e5   :  { %v18054_v57 = vcombine.high %v12002_v19, %v12006_v62  ;;  %v18053_v60 = vcombine.low %v12002_v19, %v12006_v62  ;;  %v18055_v35 = vcombine.low %v12003_v58, %v12007_v41  ;;  %v12038_v46 = vld [vmem:[#allocation17 + $0x460] sm:$0xff] }
 0x7e6   :  { %15027 = vmatpush1.bf16.msra.mxu0 %v18005_v30  ;;  %v18056_v30 = vcombine.high %v12003_v58, %v12007_v41  ;;  %v18086_v19 = vcombine.high %v12034_v51, %v12038_v46  ;;  %v12042_v62 = vld [vmem:[#allocation17 + $0x480] sm:$0xff]  ;;  %v19882_v41 = vpack.c.bf16 %v11885_v24, %v11885_v24  ;;  %v12075_v24 = vld [vmem:[#allocation17 + $0x588] sm:$0xff] }
 0x7e7   :  { %15191 = vmatpush1.bf16.msra.mxu1 %v18007_v32  ;;  %15028 = vmatprep.subr.bf16.mxu0 %v18014_v34  ;;  %v12010_v32 = vld [vmem:[#allocation17 + $0x380] sm:$0xff] }
 0x7e8   :  { %15192 = vmatprep.subr.bf16.mxu1 %v18016_v33  ;;  %v12014_v34 = vld [vmem:[#allocation17 + $0x3a0] sm:$0xff]  ;;  %v12011_v33 = vld [vmem:[#allocation17 + $0x388] sm:$0xff] }
 0x7e9   :  { %v18061_v27 = vcombine.low %v12010_v32, %v12014_v34  ;;  %v12046_v58 = vld [vmem:[#allocation17 + $0x4a0] sm:$0xff] }
 0x7ea   :  { %15029 = vmatpush1.bf16.msra.mxu0 %v18013_v9  ;;  %v18062_v9 = vcombine.high %v12010_v32, %v12014_v34  ;;  %v18094_v34 = vcombine.high %v12042_v62, %v12046_v58 }
 0x7eb   :  { %15193 = vmatpush1.bf16.msra.mxu1 %v18015_v23  ;;  %15030 = vmatprep.subr.bf16.mxu0 %v18022_v50  ;;  %v18064_v23 = vcombine.high %v12011_v33, %v12015_v15  ;;  %v12018_v50 = vld [vmem:[#allocation17 + $0x3c0] sm:$0xff] }
 0x7ec   :  { %15194 = vmatprep.subr.bf16.mxu1 %v18024_v36  ;;  %v12022_v36 = vld [vmem:[#allocation17 + $0x3e0] sm:$0xff] }
 0x7ee   :  { %15031 = vmatpush1.bf16.msra.mxu0 %v18021_v6  ;;  %v18630_v6 = vadd.f32 %v19855_v16, %v8629_v26  ;;  %v12051_v26 = vld [vmem:[#allocation17 + $0x4c8] sm:$0xff] }
 0x7ef   :  { %15195 = vmatpush1.bf16.msra.mxu1 %v18023_v2  ;;  %15032 = vmatprep.subr.bf16.mxu0 %v18030_v39  ;;  %v18063_v2 = vcombine.low %v12011_v33, %v12015_v15  ;;  %v18070_v39 = vcombine.high %v12018_v50, %v12022_v36  ;;  %v12050_v15 = vld [vmem:[#allocation17 + $0x4c0] sm:$0xff] }
 0x7f0   :  { %15196 = vmatprep.subr.bf16.mxu1 %v18032_v40  ;;  %v18072_v40 = vcombine.high %v12019_v10, %v12023_v28 }
 0x7f2   :  { %15033 = vmatpush1.bf16.msra.mxu0 %v18029_v18  ;;  %v12031_v18 = vld [vmem:[#allocation17 + $0x428] sm:$0xff] }
 0x7f3   :  { %15197 = vmatpush1.bf16.msra.mxu1 %v18031_v42  ;;  %15034 = vmatprep.subr.bf16.mxu0 %v18038_v3  ;;  %v18069_v42 = vcombine.low %v12018_v50, %v12022_v36  ;;  %v11882_v3 = vmax.f32 %v18630_v6, 0.0  ;;  %v18080_v16 = vcombine.high %v12027_v5, %v12031_v18  ;;  %v18079_v49 = vcombine.low %v12027_v5, %v12031_v18  ;;  %v12071_v5 = vld [vmem:[#allocation17 + $0x568] sm:$0xff] }
 0x7f4   :  { %15198 = vmatprep.subr.bf16.mxu1 %v18040_v14  ;;  %v18071_v14 = vcombine.low %v12019_v10, %v12023_v28  ;;  %v12062_v10 = vld [vmem:[#allocation17 + $0x520] sm:$0xff]  ;;  %v12059_v28 = vld [vmem:[#allocation17 + $0x508] sm:$0xff] }
 0x7f5   :  { %v18109_v18 = vcombine.low %v12058_v38, %v12062_v10 }
 0x7f6   :  { %15035 = vmatpush1.bf16.msra.mxu0 %v18037_v52  ;;  %v18077_v52 = vcombine.low %v12026_v21, %v12030_v54  ;;  %v12066_v21 = vld [vmem:[#allocation17 + $0x540] sm:$0xff] }
 0x7f7   :  { %15199 = vmatpush1.bf16.msra.mxu1 %v18039_v0  ;;  %15036 = vmatprep.subr.bf16.mxu0 %v18046_v8  ;;  %v12035_v0 = vld [vmem:[#allocation17 + $0x448] sm:$0xff]  ;;  %v12070_v54 = vld [vmem:[#allocation17 + $0x560] sm:$0xff] }
 0x7f8   :  { %15200 = vmatprep.subr.bf16.mxu1 %v18048_v61  ;;  %v12039_v8 = vld [vmem:[#allocation17 + $0x468] sm:$0xff]  ;;  %v19880_v61 = vpack.c.bf16 %v11882_v3, %v11882_v3  ;;  %v18118_v3 = vcombine.high %v12066_v21, %v12070_v54 }
 0x7f9   :  { %v18087_v32 = vcombine.low %v12035_v0, %v12039_v8 }
 0x7fa   :  { %15037 = vmatpush1.bf16.msra.mxu0 %v18045_v43  ;;  %v18088_v43 = vcombine.high %v12035_v0, %v12039_v8 }
 0x7fb   :  { %15201 = vmatpush1.bf16.msra.mxu1 %v18047_v29  ;;  %15038 = vmatprep.subr.bf16.mxu0 %v18054_v57  ;;  %v12043_v29 = vld [vmem:[#allocation17 + $0x488] sm:$0xff] }
 0x7fc   :  { %15202 = vmatprep.subr.bf16.mxu1 %v18056_v30  ;;  %v12047_v57 = vld [vmem:[#allocation17 + $0x4a8] sm:$0xff]  ;;  %v18085_v30 = vcombine.low %v12034_v51, %v12038_v46  ;;  %v18117_v46 = vcombine.low %v12066_v21, %v12070_v54 }
 0x7fd   :  { %v18096_v33 = vcombine.high %v12043_v29, %v12047_v57  ;;  %v12079_v51 = vld [vmem:[#allocation17 + $0x5a8] sm:$0xff] }
 0x7fe   :  { %15039 = vmatpush1.bf16.msra.mxu0 %v18053_v60  ;;  %v12054_v60 = vld [vmem:[#allocation17 + $0x4e0] sm:$0xff]  ;;  %v18128_v8 = vcombine.high %v12075_v24, %v12079_v51  ;;  %v12111_v21 = vld [vmem:[#allocation17 + $0x6a8] sm:$0xff] }
 0x7ff   :  { %15203 = vmatpush1.bf16.msra.mxu1 %v18055_v35  ;;  %15040 = vmatprep.subr.bf16.mxu0 %v18062_v9  ;;  %v12055_v35 = vld [vmem:[#allocation17 + $0x4e8] sm:$0xff]  ;;  %v18093_v9 = vcombine.low %v12042_v62, %v12046_v58  ;;  %v18102_v50 = vcombine.high %v12050_v15, %v12054_v60  ;;  %v18101_v6 = vcombine.low %v12050_v15, %v12054_v60 }
 0x800   :  { %15204 = vmatprep.subr.bf16.mxu1 %v18064_v23  ;;  %v18095_v23 = vcombine.low %v12043_v29, %v12047_v57  ;;  %v18104_v36 = vcombine.high %v12051_v26, %v12055_v35  ;;  %v12083_v62 = vld [vmem:[#allocation17 + $0x5c8] sm:$0xff]  ;;  %v18127_v29 = vcombine.low %v12075_v24, %v12079_v51 }
 0x801   :  { %v12087_v58 = vld [vmem:[#allocation17 + $0x5e8] sm:$0xff] }
 0x802   :  { %15041 = vmatpush1.bf16.msra.mxu0 %v18061_v27  ;;  %v12063_v27 = vld [vmem:[#allocation17 + $0x528] sm:$0xff] }
 0x803   :  { %15205 = vmatpush1.bf16.msra.mxu1 %v18063_v2  ;;  %15042 = vmatprep.subr.bf16.mxu0 %v18070_v39  ;;  %v18103_v2 = vcombine.low %v12051_v26, %v12055_v35  ;;  %v18110_v39 = vcombine.high %v12058_v38, %v12062_v10  ;;  %v12095_v15 = vld [vmem:[#allocation17 + $0x628] sm:$0xff]  ;;  %v18135_v26 = vcombine.low %v12083_v62, %v12087_v58 }
 0x804   :  { %15206 = vmatprep.subr.bf16.mxu1 %v18072_v40  ;;  %v18112_v40 = vcombine.high %v12059_v28, %v12063_v27  ;;  %v12103_v38 = vld [vmem:[#allocation17 + $0x668] sm:$0xff] }
 0x806   :  { %15043 = vmatpush1.bf16.msra.mxu0 %v18069_v42  ;;  %v18111_v42 = vcombine.low %v12059_v28, %v12063_v27 }
 0x807   :  { %15207 = vmatpush1.bf16.msra.mxu1 %v18071_v14  ;;  %15053 = vmatprep.subr.bf16.mxu0 %v18078_v31  ;;  %v18120_v14 = vcombine.high %v12067_v56, %v12071_v5  ;;  %v12074_v31 = vld [vmem:[#allocation17 + $0x580] sm:$0xff] }
 0x808   :  { %15217 = vmatprep.subr.bf16.mxu1 %v18080_v16  ;;  %v12078_v16 = vld [vmem:[#allocation17 + $0x5a0] sm:$0xff] }
 0x809   :  { %15045 = vmatmul.mubr.bf16.vlgmr.msra.gmra.mrb[32].mxu0 %v19880_v61  ;;  %v18126_v0 = vcombine.high %v12074_v31, %v12078_v16 }
 0x80a   :  { %15209 = vmatmul.mubr.bf16.vlgmr.msra.gmra.mrb[32].mxu1 %v19880_v61  ;;  %15054 = vmatpush1.bf16.msra.mxu0 %v18077_v52  ;;  %v18119_v52 = vcombine.low %v12067_v56, %v12071_v5 }
 0x80b   :  { %15085 = vmatprep.mubr.bf16.mxu0 %v19882_v41  ;;  %15218 = vmatpush1.bf16.msra.mxu1 %v18079_v49  ;;  %v12082_v49 = vld [vmem:[#allocation17 + $0x5c0] sm:$0xff] }
 0x80c   :  { %15249 = vmatprep.mubr.bf16.mxu1 %v19882_v41  ;;  %15055 = vmatprep.subr.bf16.mxu0 %v18086_v19  ;;  %v12086_v19 = vld [vmem:[#allocation17 + $0x5e0] sm:$0xff] }
 0x80d   :  { %15219 = vmatprep.subr.bf16.mxu1 %v18088_v43  ;;  %v18125_v43 = vcombine.low %v12074_v31, %v12078_v16  ;;  %v18134_v57 = vcombine.high %v12082_v49, %v12086_v19  ;;  %v18133_v60 = vcombine.low %v12082_v49, %v12086_v19  ;;  %v12119_v31 = vld [vmem:[#allocation17 + $0x6e8] sm:$0xff] }
 0x80e   :  { %15056 = vmatpush1.bf16.msra.mxu0 %v18085_v30  ;;  %v18136_v30 = vcombine.high %v12083_v62, %v12087_v58  ;;  %v12127_v49 = vld [vmem:[#allocation17 + $0x728] sm:$0xff] }
 0x80f   :  { %15220 = vmatpush1.bf16.msra.mxu1 %v18087_v32  ;;  %15057 = vmatprep.subr.bf16.mxu0 %v18094_v34  ;;  %v12090_v32 = vld [vmem:[#allocation17 + $0x600] sm:$0xff] }
 0x810   :  { %15221 = vmatprep.subr.bf16.mxu1 %v18096_v33  ;;  %v12094_v34 = vld [vmem:[#allocation17 + $0x620] sm:$0xff]  ;;  %v12091_v33 = vld [vmem:[#allocation17 + $0x608] sm:$0xff] }
 0x811   :  { %v18142_v35 = vcombine.high %v12090_v32, %v12094_v34  ;;  %v18141_v10 = vcombine.low %v12090_v32, %v12094_v34  ;;  %v18143_v28 = vcombine.low %v12091_v33, %v12095_v15  ;;  %v12135_v32 = vld [vmem:[#allocation17 + $0x768] sm:$0xff] }
 0x812   :  { %15058 = vmatpush1.bf16.msra.mxu0 %v18093_v9  ;;  %v18144_v9 = vcombine.high %v12091_v33, %v12095_v15 }
 0x813   :  { %15222 = vmatpush1.bf16.msra.mxu1 %v18095_v23  ;;  %15059 = vmatprep.subr.bf16.mxu0 %v18102_v50  ;;  %v12098_v23 = vld [vmem:[#allocation17 + $0x640] sm:$0xff] }
 0x814   :  { %15223 = vmatprep.subr.bf16.mxu1 %v18104_v36  ;;  %v12102_v50 = vld [vmem:[#allocation17 + $0x660] sm:$0xff]  ;;  %v12099_v36 = vld [vmem:[#allocation17 + $0x648] sm:$0xff] }
 0x815   :  { %v18150_v27 = vcombine.high %v12098_v23, %v12102_v50  ;;  %v18149_v54 = vcombine.low %v12098_v23, %v12102_v50  ;;  %v18151_v56 = vcombine.low %v12099_v36, %v12103_v38  ;;  %v12143_v23 = vld [vmem:[#allocation17 + $0x7a8] sm:$0xff] }
 0x816   :  { %15060 = vmatpush1.bf16.msra.mxu0 %v18101_v6  ;;  %v18152_v6 = vcombine.high %v12099_v36, %v12103_v38  ;;  %v8637_v36 = vrot.slane %v19863_v59, %v19563_v1 }
 0x817   :  { %15224 = vmatpush1.bf16.msra.mxu1 %v18103_v2  ;;  %15061 = vmatprep.subr.bf16.mxu0 %v18110_v39  ;;  %v12106_v2 = vld [vmem:[#allocation17 + $0x680] sm:$0xff] }
 0x818   :  { %15225 = vmatprep.subr.bf16.mxu1 %v18112_v40  ;;  %v12110_v39 = vld [vmem:[#allocation17 + $0x6a0] sm:$0xff]  ;;  %v12107_v40 = vld [vmem:[#allocation17 + $0x688] sm:$0xff] }
 0x819   :  { %v18158_v5 = vcombine.high %v12106_v2, %v12110_v39  ;;  %v18157_v16 = vcombine.low %v12106_v2, %v12110_v39  ;;  %v18159_v24 = vcombine.low %v12107_v40, %v12111_v21  ;;  %v12147_v2 = vld [vmem:[#allocation17 + $0x7c8] sm:$0xff] }
 0x81a   :  { %15062 = vmatpush1.bf16.msra.mxu0 %v18109_v18  ;;  %v18160_v18 = vcombine.high %v12107_v40, %v12111_v21  ;;  %v12151_v39 = vld [vmem:[#allocation17 + $0x7e8] sm:$0xff]  ;;  %v18632_v21 = vadd.f32 %v19857_v7, %v8637_v36  ;;  %v12162_v7 = vld [vmem:[#allocation17 + $0x840] sm:$0xff] }
 0x81b   :  { %15226 = vmatpush1.bf16.msra.mxu1 %v18111_v42  ;;  %15063 = vmatprep.subr.bf16.mxu0 %v18118_v3  ;;  %v12114_v42 = vld [vmem:[#allocation17 + $0x6c0] sm:$0xff]  ;;  %v18200_v59 = vcombine.high %v12147_v2, %v12151_v39 }
 0x81c   :  { %15227 = vmatprep.subr.bf16.mxu1 %v18120_v14  ;;  %v12118_v3 = vld [vmem:[#allocation17 + $0x6e0] sm:$0xff]  ;;  %v12115_v14 = vld [vmem:[#allocation17 + $0x6c8] sm:$0xff] }
 0x81d   :  { %v18166_v51 = vcombine.high %v12114_v42, %v12118_v3  ;;  %v18165_v19 = vcombine.low %v12114_v42, %v12118_v3  ;;  %v18167_v62 = vcombine.low %v12115_v14, %v12119_v31  ;;  %v12155_v42 = vld [vmem:[#allocation17 + $0x808] sm:$0xff] }
 0x81e   :  { %15064 = vmatpush1.bf16.msra.mxu0 %v18117_v46  ;;  %v18168_v46 = vcombine.high %v12115_v14, %v12119_v31  ;;  %v12159_v3 = vld [vmem:[#allocation17 + $0x828] sm:$0xff]  ;;  %v11884_v31 = vmax.f32 %v18632_v21, 0.0 }
 0x81f   :  { %15228 = vmatpush1.bf16.msra.mxu1 %v18119_v52  ;;  %15065 = vmatprep.subr.bf16.mxu0 %v18126_v0  ;;  %v12122_v52 = vld [vmem:[#allocation17 + $0x700] sm:$0xff] }
 0x820   :  { %15229 = vmatprep.subr.bf16.mxu1 %v18128_v8  ;;  %v12126_v0 = vld [vmem:[#allocation17 + $0x720] sm:$0xff]  ;;  %v12123_v8 = vld [vmem:[#allocation17 + $0x708] sm:$0xff] }
 0x821   :  { %v18174_v58 = vcombine.high %v12122_v52, %v12126_v0  ;;  %v18173_v34 = vcombine.low %v12122_v52, %v12126_v0  ;;  %v18175_v33 = vcombine.low %v12123_v8, %v12127_v49  ;;  %v12163_v52 = vld [vmem:[#allocation17 + $0x848] sm:$0xff] }
 0x822   :  { %15066 = vmatpush1.bf16.msra.mxu0 %v18125_v43  ;;  %v18176_v43 = vcombine.high %v12123_v8, %v12127_v49  ;;  %v12167_v0 = vld [vmem:[#allocation17 + $0x868] sm:$0xff]  ;;  %v19891_v49 = vpack.c.bf16 %v11884_v31, %v11884_v31  ;;  %v12202_v31 = vld [vmem:[#allocation17 + $0x980] sm:$0xff] }
 0x823   :  { %15230 = vmatpush1.bf16.msra.mxu1 %v18127_v29  ;;  %15067 = vmatprep.subr.bf16.mxu0 %v18134_v57  ;;  %v12130_v29 = vld [vmem:[#allocation17 + $0x740] sm:$0xff] }
 0x824   :  { %15231 = vmatprep.subr.bf16.mxu1 %v18136_v30  ;;  %v12134_v57 = vld [vmem:[#allocation17 + $0x760] sm:$0xff]  ;;  %v12131_v30 = vld [vmem:[#allocation17 + $0x748] sm:$0xff] }
 0x825   :  { %v18182_v15 = vcombine.high %v12130_v29, %v12134_v57  ;;  %v18181_v50 = vcombine.low %v12130_v29, %v12134_v57  ;;  %v18183_v38 = vcombine.low %v12131_v30, %v12135_v32  ;;  %v12174_v29 = vld [vmem:[#allocation17 + $0x8a0] sm:$0xff]  ;;  %v12171_v57 = vld [vmem:[#allocation17 + $0x888] sm:$0xff] }
 0x826   :  { %15068 = vmatpush1.bf16.msra.mxu0 %v18133_v60  ;;  %v18184_v60 = vcombine.high %v12131_v30, %v12135_v32  ;;  %v12175_v30 = vld [vmem:[#allocation17 + $0x8a8] sm:$0xff] }
 0x827   :  { %15232 = vmatpush1.bf16.msra.mxu1 %v18135_v26  ;;  %15069 = vmatprep.subr.bf16.mxu0 %v18142_v35  ;;  %v12138_v26 = vld [vmem:[#allocation17 + $0x780] sm:$0xff] }
 0x828   :  { %15233 = vmatprep.subr.bf16.mxu1 %v18144_v9  ;;  %v12142_v35 = vld [vmem:[#allocation17 + $0x7a0] sm:$0xff]  ;;  %v12139_v9 = vld [vmem:[#allocation17 + $0x788] sm:$0xff] }
 0x829   :  { %v18189_v40 = vcombine.low %v12138_v26, %v12142_v35 }
 0x82a   :  { %15070 = vmatpush1.bf16.msra.mxu0 %v18141_v10  ;;  %v18190_v10 = vcombine.high %v12138_v26, %v12142_v35  ;;  %v12182_v26 = vld [vmem:[#allocation17 + $0x8e0] sm:$0xff]  ;;  %v12179_v35 = vld [vmem:[#allocation17 + $0x8c8] sm:$0xff] }
 0x82b   :  { %15234 = vmatpush1.bf16.msra.mxu1 %v18143_v28  ;;  %15071 = vmatprep.subr.bf16.mxu0 %v18150_v27  ;;  %v18192_v28 = vcombine.high %v12139_v9, %v12143_v23  ;;  %v12146_v27 = vld [vmem:[#allocation17 + $0x7c0] sm:$0xff] }
 0x82c   :  { %15235 = vmatprep.subr.bf16.mxu1 %v18152_v6  ;;  %v12150_v6 = vld [vmem:[#allocation17 + $0x7e0] sm:$0xff] }
 0x82d   :  { %v18197_v14 = vcombine.low %v12146_v27, %v12150_v6 }
 0x82e   :  { %15072 = vmatpush1.bf16.msra.mxu0 %v18149_v54  ;;  %v18191_v54 = vcombine.low %v12139_v9, %v12143_v23  ;;  %v12183_v9 = vld [vmem:[#allocation17 + $0x8e8] sm:$0xff] }
 0x82f   :  { %15236 = vmatpush1.bf16.msra.mxu1 %v18151_v56  ;;  %15073 = vmatprep.subr.bf16.mxu0 %v18158_v5  ;;  %v18198_v56 = vcombine.high %v12146_v27, %v12150_v6  ;;  %v12154_v5 = vld [vmem:[#allocation17 + $0x800] sm:$0xff]  ;;  %v12187_v27 = vld [vmem:[#allocation17 + $0x908] sm:$0xff] }
 0x830   :  { %15237 = vmatprep.subr.bf16.mxu1 %v18160_v18  ;;  %v12158_v18 = vld [vmem:[#allocation17 + $0x820] sm:$0xff]  ;;  %v12191_v6 = vld [vmem:[#allocation17 + $0x928] sm:$0xff] }
 0x831   :  { %v18205_v8 = vcombine.low %v12154_v5, %v12158_v18  ;;  %v18240_v21 = vcombine.high %v12187_v27, %v12191_v6 }
 0x832   :  { %15074 = vmatpush1.bf16.msra.mxu0 %v18157_v16  ;;  %v18199_v16 = vcombine.low %v12147_v2, %v12151_v39  ;;  %v18231_v39 = vcombine.low %v12179_v35, %v12183_v9 }
 0x833   :  { %15238 = vmatpush1.bf16.msra.mxu1 %v18159_v24  ;;  %15075 = vmatprep.subr.bf16.mxu0 %v18166_v51  ;;  %v18206_v24 = vcombine.high %v12154_v5, %v12158_v18  ;;  %v18208_v51 = vcombine.high %v12155_v42, %v12159_v3  ;;  %v12199_v5 = vld [vmem:[#allocation17 + $0x968] sm:$0xff] }
 0x834   :  { %15239 = vmatprep.subr.bf16.mxu1 %v18168_v46  ;;  %v12166_v46 = vld [vmem:[#allocation17 + $0x860] sm:$0xff] }
 0x835   :  { %v18213_v32 = vcombine.low %v12162_v7, %v12166_v46 }
 0x836   :  { %15076 = vmatpush1.bf16.msra.mxu0 %v18165_v19  ;;  %v18207_v19 = vcombine.low %v12155_v42, %v12159_v3  ;;  %v18239_v42 = vcombine.low %v12187_v27, %v12191_v6 }
 0x837   :  { %15240 = vmatpush1.bf16.msra.mxu1 %v18167_v62  ;;  %15077 = vmatprep.subr.bf16.mxu0 %v18174_v58  ;;  %v18214_v62 = vcombine.high %v12162_v7, %v12166_v46  ;;  %v18216_v58 = vcombine.high %v12163_v52, %v12167_v0 }
 0x838   :  { %15241 = vmatprep.subr.bf16.mxu1 %v18176_v43  ;;  %v12170_v43 = vld [vmem:[#allocation17 + $0x880] sm:$0xff] }
 0x839   :  { %v18221_v23 = vcombine.low %v12170_v43, %v12174_v29 }
 0x83a   :  { %15078 = vmatpush1.bf16.msra.mxu0 %v18173_v34  ;;  %v18215_v34 = vcombine.low %v12163_v52, %v12167_v0 }
 0x83b   :  { %15242 = vmatpush1.bf16.msra.mxu1 %v18175_v33  ;;  %15079 = vmatprep.subr.bf16.mxu0 %v18182_v15  ;;  %v18222_v33 = vcombine.high %v12170_v43, %v12174_v29  ;;  %v18224_v15 = vcombine.high %v12171_v57, %v12175_v30 }
 0x83c   :  { %15243 = vmatprep.subr.bf16.mxu1 %v18184_v60  ;;  %v12178_v60 = vld [vmem:[#allocation17 + $0x8c0] sm:$0xff] }
 0x83d   :  { %v18230_v36 = vcombine.high %v12178_v60, %v12182_v26  ;;  %v18229_v2 = vcombine.low %v12178_v60, %v12182_v26 }
 0x83e   :  { %15080 = vmatpush1.bf16.msra.mxu0 %v18181_v50  ;;  %v18223_v50 = vcombine.low %v12171_v57, %v12175_v30 }
 0x83f   :  { %15244 = vmatpush1.bf16.msra.mxu1 %v18183_v38  ;;  %15081 = vmatprep.subr.bf16.mxu0 %v18190_v10  ;;  %v18232_v38 = vcombine.high %v12179_v35, %v12183_v9  ;;  %v12186_v10 = vld [vmem:[#allocation17 + $0x900] sm:$0xff] }
 0x840   :  { %15245 = vmatprep.subr.bf16.mxu1 %v18192_v28  ;;  %v12190_v28 = vld [vmem:[#allocation17 + $0x920] sm:$0xff] }
 0x841   :  { %v18237_v18 = vcombine.low %v12186_v10, %v12190_v28 }
 0x842   :  { %15082 = vmatpush1.bf16.msra.mxu0 %v18189_v40  ;;  %v18238_v40 = vcombine.high %v12186_v10, %v12190_v28 }
 0x843   :  { %15246 = vmatpush1.bf16.msra.mxu1 %v18191_v54  ;;  %15083 = vmatprep.subr.bf16.mxu0 %v18198_v56  ;;  %v12194_v54 = vld [vmem:[#allocation17 + $0x940] sm:$0xff] }
 0x844   :  { %15247 = vmatprep.subr.bf16.mxu1 %v18200_v59  ;;  %v12198_v56 = vld [vmem:[#allocation17 + $0x960] sm:$0xff]  ;;  %v12195_v59 = vld [vmem:[#allocation17 + $0x948] sm:$0xff] }
 0x845   :  { %v18246_v3 = vcombine.high %v12194_v54, %v12198_v56  ;;  %v18245_v7 = vcombine.low %v12194_v54, %v12198_v56  ;;  %v18247_v46 = vcombine.low %v12195_v59, %v12199_v5 }
 0x846   :  { %15084 = vmatpush1.bf16.msra.mxu0 %v18197_v14  ;;  %v18248_v14 = vcombine.high %v12195_v59, %v12199_v5 }
 0x847   :  { %15248 = vmatpush1.bf16.msra.mxu1 %v18199_v16  ;;  %15094 = vmatprep.subr.bf16.mxu0 %v18206_v24  ;;  %v12206_v16 = vld [vmem:[#allocation17 + $0x9a0] sm:$0xff]  ;;  %v12203_v24 = vld [vmem:[#allocation17 + $0x988] sm:$0xff] }
 0x848   :  { %15258 = vmatprep.subr.bf16.mxu1 %v18208_v51  ;;  %v12207_v51 = vld [vmem:[#allocation17 + $0x9a8] sm:$0xff]  ;;  %v18254_v52 = vcombine.high %v12202_v31, %v12206_v16  ;;  %v18253_v43 = vcombine.low %v12202_v31, %v12206_v16 }
 0x849   :  { %15086 = vmatmul.mubr.bf16.vlgmr.msra.gmra.mrb[32].mxu0 %v19891_v49  ;;  %v18256_v0 = vcombine.high %v12203_v24, %v12207_v51  ;;  %v18255_v29 = vcombine.low %v12203_v24, %v12207_v51 }
 0x84a   :  { %15250 = vmatmul.mubr.bf16.vlgmr.msra.gmra.mrb[32].mxu1 %v19891_v49  ;;  %15095 = vmatpush1.bf16.msra.mxu0 %v18205_v8  ;;  %v12210_v8 = vld [vmem:[#allocation17 + $0x9c0] sm:$0xff] }
 0x84b   :  { %15259 = vmatpush1.bf16.msra.mxu1 %v18207_v19  ;;  %15096 = vmatprep.subr.bf16.mxu0 %v18214_v62  ;;  %v12214_v19 = vld [vmem:[#allocation17 + $0x9e0] sm:$0xff]  ;;  %v12211_v62 = vld [vmem:[#allocation17 + $0x9c8] sm:$0xff] }
 0x84c   :  { %15260 = vmatprep.subr.bf16.mxu1 %v18216_v58  ;;  %v12215_v58 = vld [vmem:[#allocation17 + $0x9e8] sm:$0xff]  ;;  %v18262_v57 = vcombine.high %v12210_v8, %v12214_v19  ;;  %v18261_v60 = vcombine.low %v12210_v8, %v12214_v19 }
 0x84d   :  { %v18264_v30 = vcombine.high %v12211_v62, %v12215_v58  ;;  %v18263_v26 = vcombine.low %v12211_v62, %v12215_v58 }
 0x84e   :  { %15097 = vmatpush1.bf16.msra.mxu0 %v18213_v32  ;;  %v12218_v32 = vld [vmem:[#allocation17 + $0xa00] sm:$0xff] }
 0x84f   :  { %15261 = vmatpush1.bf16.msra.mxu1 %v18215_v34  ;;  %15098 = vmatprep.subr.bf16.mxu0 %v18222_v33  ;;  %v12222_v34 = vld [vmem:[#allocation17 + $0xa20] sm:$0xff]  ;;  %v12219_v33 = vld [vmem:[#allocation17 + $0xa08] sm:$0xff] }
 0x850   :  { %15262 = vmatprep.subr.bf16.mxu1 %v18224_v15  ;;  %v12223_v15 = vld [vmem:[#allocation17 + $0xa28] sm:$0xff]  ;;  %v18270_v35 = vcombine.high %v12218_v32, %v12222_v34  ;;  %v18269_v10 = vcombine.low %v12218_v32, %v12222_v34 }
 0x851   :  { %v18272_v9 = vcombine.high %v12219_v33, %v12223_v15  ;;  %v18271_v28 = vcombine.low %v12219_v33, %v12223_v15 }
 0x852   :  { %15099 = vmatpush1.bf16.msra.mxu0 %v18221_v23  ;;  %v12226_v23 = vld [vmem:[#allocation17 + $0xa40] sm:$0xff] }
 0x853   :  { %15263 = vmatpush1.bf16.msra.mxu1 %v18223_v50  ;;  %15100 = vmatprep.subr.bf16.mxu0 %v18230_v36  ;;  %v12230_v50 = vld [vmem:[#allocation17 + $0xa60] sm:$0xff]  ;;  %v12227_v36 = vld [vmem:[#allocation17 + $0xa48] sm:$0xff] }
 0x854   :  { %15264 = vmatprep.subr.bf16.mxu1 %v18232_v38  ;;  %v12231_v38 = vld [vmem:[#allocation17 + $0xa68] sm:$0xff]  ;;  %v18278_v27 = vcombine.high %v12226_v23, %v12230_v50  ;;  %v18277_v54 = vcombine.low %v12226_v23, %v12230_v50 }
 0x855   :  { %v18280_v6 = vcombine.high %v12227_v36, %v12231_v38  ;;  %v18279_v56 = vcombine.low %v12227_v36, %v12231_v38 }
 0x856   :  { %15101 = vmatpush1.bf16.msra.mxu0 %v18229_v2  ;;  %v12234_v2 = vld [vmem:[#allocation17 + $0xa80] sm:$0xff] }
 0x857   :  { %15265 = vmatpush1.bf16.msra.mxu1 %v18231_v39  ;;  %15102 = vmatprep.subr.bf16.mxu0 %v18238_v40  ;;  %v12238_v39 = vld [vmem:[#allocation17 + $0xaa0] sm:$0xff]  ;;  %v12235_v40 = vld [vmem:[#allocation17 + $0xa88] sm:$0xff] }
 0x858   :  { %15266 = vmatprep.subr.bf16.mxu1 %v18240_v21  ;;  %v12239_v21 = vld [vmem:[#allocation17 + $0xaa8] sm:$0xff]  ;;  %v18286_v59 = vcombine.high %v12234_v2, %v12238_v39  ;;  %v18285_v31 = vcombine.low %v12234_v2, %v12238_v39 }
 0x859   :  { %v18288_v5 = vcombine.high %v12235_v40, %v12239_v21  ;;  %v18287_v16 = vcombine.low %v12235_v40, %v12239_v21 }
 0x85a   :  { %15103 = vmatpush1.bf16.msra.mxu0 %v18237_v18  ;;  %v12242_v18 = vld [vmem:[#allocation17 + $0xac0] sm:$0xff] }
 0x85b   :  { %15267 = vmatpush1.bf16.msra.mxu1 %v18239_v42  ;;  %15104 = vmatprep.subr.bf16.mxu0 %v18246_v3  ;;  %v12246_v42 = vld [vmem:[#allocation17 + $0xae0] sm:$0xff]  ;;  %v12243_v3 = vld [vmem:[#allocation17 + $0xac8] sm:$0xff] }
 0x85c   :  { %15268 = vmatprep.subr.bf16.mxu1 %v18248_v14  ;;  %v12247_v14 = vld [vmem:[#allocation17 + $0xae8] sm:$0xff]  ;;  %v18294_v24 = vcombine.high %v12242_v18, %v12246_v42  ;;  %v18293_v8 = vcombine.low %v12242_v18, %v12246_v42 }
 0x85d   :  { %v18296_v51 = vcombine.high %v12243_v3, %v12247_v14  ;;  %v18295_v19 = vcombine.low %v12243_v3, %v12247_v14 }
 0x85e   :  { %15105 = vmatpush1.bf16.msra.mxu0 %v18245_v7  ;;  %v12250_v7 = vld [vmem:[#allocation17 + $0xb00] sm:$0xff] }
 0x85f   :  { %15269 = vmatpush1.bf16.msra.mxu1 %v18247_v46  ;;  %15106 = vmatprep.subr.bf16.mxu0 %v18254_v52  ;;  %v12254_v46 = vld [vmem:[#allocation17 + $0xb20] sm:$0xff]  ;;  %v12251_v52 = vld [vmem:[#allocation17 + $0xb08] sm:$0xff] }
 0x860   :  { %15270 = vmatprep.subr.bf16.mxu1 %v18256_v0  ;;  %v12255_v0 = vld [vmem:[#allocation17 + $0xb28] sm:$0xff]  ;;  %v18302_v62 = vcombine.high %v12250_v7, %v12254_v46  ;;  %v18301_v32 = vcombine.low %v12250_v7, %v12254_v46 }
 0x861   :  { %v18304_v58 = vcombine.high %v12251_v52, %v12255_v0  ;;  %v18303_v34 = vcombine.low %v12251_v52, %v12255_v0 }
 0x862   :  { %15107 = vmatpush1.bf16.msra.mxu0 %v18253_v43  ;;  %v12258_v43 = vld [vmem:[#allocation17 + $0xb40] sm:$0xff] }
 0x863   :  { %15271 = vmatpush1.bf16.msra.mxu1 %v18255_v29  ;;  %15108 = vmatprep.subr.bf16.mxu0 %v18262_v57  ;;  %v12262_v29 = vld [vmem:[#allocation17 + $0xb60] sm:$0xff]  ;;  %v12259_v57 = vld [vmem:[#allocation17 + $0xb48] sm:$0xff] }
 0x864   :  { %15272 = vmatprep.subr.bf16.mxu1 %v18264_v30  ;;  %v12263_v30 = vld [vmem:[#allocation17 + $0xb68] sm:$0xff]  ;;  %v18310_v33 = vcombine.high %v12258_v43, %v12262_v29  ;;  %v18309_v23 = vcombine.low %v12258_v43, %v12262_v29 }
 0x865   :  { %v18312_v15 = vcombine.high %v12259_v57, %v12263_v30  ;;  %v18311_v50 = vcombine.low %v12259_v57, %v12263_v30 }
 0x866   :  { %15109 = vmatpush1.bf16.msra.mxu0 %v18261_v60  ;;  %v12266_v60 = vld [vmem:[#allocation17 + $0xb80] sm:$0xff] }
 0x867   :  { %15273 = vmatpush1.bf16.msra.mxu1 %v18263_v26  ;;  %15110 = vmatprep.subr.bf16.mxu0 %v18270_v35  ;;  %v12270_v26 = vld [vmem:[#allocation17 + $0xba0] sm:$0xff]  ;;  %v12267_v35 = vld [vmem:[#allocation17 + $0xb88] sm:$0xff] }
 0x868   :  { %15274 = vmatprep.subr.bf16.mxu1 %v18272_v9  ;;  %v12271_v9 = vld [vmem:[#allocation17 + $0xba8] sm:$0xff]  ;;  %v18318_v36 = vcombine.high %v12266_v60, %v12270_v26  ;;  %v18317_v2 = vcombine.low %v12266_v60, %v12270_v26 }
 0x869   :  { %v18320_v38 = vcombine.high %v12267_v35, %v12271_v9  ;;  %v18319_v39 = vcombine.low %v12267_v35, %v12271_v9  ;;  %v12291_v60 = vld [vmem:[#allocation17 + $0xc48] sm:$0xff] }
 0x86a   :  { %15111 = vmatpush1.bf16.msra.mxu0 %v18269_v10  ;;  %v12274_v10 = vld [vmem:[#allocation17 + $0xbc0] sm:$0xff]  ;;  %v12295_v26 = vld [vmem:[#allocation17 + $0xc68] sm:$0xff] }
 0x86b   :  { %15275 = vmatpush1.bf16.msra.mxu1 %v18271_v28  ;;  %15112 = vmatprep.subr.bf16.mxu0 %v18278_v27  ;;  %v12278_v28 = vld [vmem:[#allocation17 + $0xbe0] sm:$0xff]  ;;  %v12275_v27 = vld [vmem:[#allocation17 + $0xbc8] sm:$0xff] }
 0x86c   :  { %15276 = vmatprep.subr.bf16.mxu1 %v18280_v6  ;;  %v12279_v6 = vld [vmem:[#allocation17 + $0xbe8] sm:$0xff]  ;;  %v18326_v40 = vcombine.high %v12274_v10, %v12278_v28  ;;  %v18325_v18 = vcombine.low %v12274_v10, %v12278_v28  ;;  %v18344_v10 = vcombine.high %v12291_v60, %v12295_v26  ;;  %v12302_v28 = vld [vmem:[#allocation17 + $0xca0] sm:$0xff] }
 0x86d   :  { %v18328_v21 = vcombine.high %v12275_v27, %v12279_v6  ;;  %v18327_v42 = vcombine.low %v12275_v27, %v12279_v6  ;;  %v12299_v27 = vld [vmem:[#allocation17 + $0xc88] sm:$0xff] }
 0x86e   :  { %15113 = vmatpush1.bf16.msra.mxu0 %v18277_v54  ;;  %v12282_v54 = vld [vmem:[#allocation17 + $0xc00] sm:$0xff]  ;;  %v12303_v6 = vld [vmem:[#allocation17 + $0xca8] sm:$0xff] }
 0x86f   :  { %15277 = vmatpush1.bf16.msra.mxu1 %v18279_v56  ;;  %15114 = vmatprep.subr.bf16.mxu0 %v18286_v59  ;;  %v12286_v56 = vld [vmem:[#allocation17 + $0xc20] sm:$0xff]  ;;  %v12283_v59 = vld [vmem:[#allocation17 + $0xc08] sm:$0xff] }
 0x870   :  { %15278 = vmatprep.subr.bf16.mxu1 %v18288_v5  ;;  %v12287_v5 = vld [vmem:[#allocation17 + $0xc28] sm:$0xff]  ;;  %v18334_v3 = vcombine.high %v12282_v54, %v12286_v56  ;;  %v18333_v9 = vcombine.low %v12282_v54, %v12286_v56  ;;  %v18352_v54 = vcombine.high %v12299_v27, %v12303_v6  ;;  %v12306_v56 = vld [vmem:[#allocation17 + $0xcc0] sm:$0xff] }
 0x871   :  { %v18336_v14 = vcombine.high %v12283_v59, %v12287_v5 }
 0x872   :  { %15115 = vmatpush1.bf16.msra.mxu0 %v18285_v31  ;;  %v19895_v31 = vld [vmem:[#allocation16] sm:$0xff] }
 0x873   :  { %15279 = vmatpush1.bf16.msra.mxu1 %v18287_v16  ;;  %15116 = vmatprep.subr.bf16.mxu0 %v18294_v24  ;;  %v8645_v16 = vrot.slane %v19895_v31, %v19595_v4  ;;  %v8649_v24 = vrot.slane %v19895_v31, %v19566_v13 }
 0x874   :  { %15280 = vmatprep.subr.bf16.mxu1 %v18296_v51  ;;  %v8657_v51 = vrot.slane %v19895_v31, %v19598_v20 }
 0x876   :  { %15117 = vmatpush1.bf16.msra.mxu0 %v18293_v8 }
 0x877   :  { %15281 = vmatpush1.bf16.msra.mxu1 %v18295_v19  ;;  %15118 = vmatprep.subr.bf16.mxu0 %v18302_v62 }
 0x878   :  { %15282 = vmatprep.subr.bf16.mxu1 %v18304_v58 }
 0x87a   :  { %15119 = vmatpush1.bf16.msra.mxu0 %v18301_v32 }
 0x87b   :  { %15283 = vmatpush1.bf16.msra.mxu1 %v18303_v34  ;;  %15120 = vmatprep.subr.bf16.mxu0 %v18310_v33  ;;  %v12290_v34 = vld [vmem:[#allocation17 + $0xc40] sm:$0xff] }
 0x87c   :  { %15284 = vmatprep.subr.bf16.mxu1 %v18312_v15  ;;  %v12294_v15 = vld [vmem:[#allocation17 + $0xc60] sm:$0xff] }
 0x87e   :  { %15121 = vmatpush1.bf16.msra.mxu0 %v18309_v23  ;;  %v18335_v23 = vcombine.low %v12283_v59, %v12287_v5  ;;  %v12310_v59 = vld [vmem:[#allocation17 + $0xce0] sm:$0xff]  ;;  %v12307_v5 = vld [vmem:[#allocation17 + $0xcc8] sm:$0xff] }
 0x87f   :  { %15285 = vmatpush1.bf16.msra.mxu1 %v18311_v50  ;;  %15122 = vmatprep.subr.bf16.mxu0 %v18318_v36  ;;  %v12298_v36 = vld [vmem:[#allocation17 + $0xc80] sm:$0xff] }
 0x880   :  { %15286 = vmatprep.subr.bf16.mxu1 %v18320_v38  ;;  %v18342_v38 = vcombine.high %v12290_v34, %v12294_v15 }
 0x882   :  { %15123 = vmatpush1.bf16.msra.mxu0 %v18317_v2 }
 0x883   :  { %15287 = vmatpush1.bf16.msra.mxu1 %v18319_v39  ;;  %15124 = vmatprep.subr.bf16.mxu0 %v18326_v40  ;;  %v18341_v39 = vcombine.low %v12290_v34, %v12294_v15  ;;  %v18343_v40 = vcombine.low %v12291_v60, %v12295_v26  ;;  %v12330_v15 = vld [vmem:[#allocation17 + $0xd80] sm:$0xff]  ;;  %v12331_v26 = vld [vmem:[#allocation17 + $0xd88] sm:$0xff] }
 0x884   :  { %15288 = vmatprep.subr.bf16.mxu1 %v18328_v21  ;;  %v18350_v21 = vcombine.high %v12298_v36, %v12302_v28  ;;  %v12334_v60 = vld [vmem:[#allocation17 + $0xda0] sm:$0xff] }
 0x886   :  { %15125 = vmatpush1.bf16.msra.mxu0 %v18325_v18  ;;  %v12311_v18 = vld [vmem:[#allocation17 + $0xce8] sm:$0xff] }
 0x887   :  { %15289 = vmatpush1.bf16.msra.mxu1 %v18327_v42  ;;  %15135 = vmatprep.subr.bf16.mxu0 %v18334_v3  ;;  %v18349_v42 = vcombine.low %v12298_v36, %v12302_v28  ;;  %v18351_v3 = vcombine.low %v12299_v27, %v12303_v6  ;;  %v12338_v28 = vld [vmem:[#allocation17 + $0xdc0] sm:$0xff]  ;;  %v12339_v6 = vld [vmem:[#allocation17 + $0xdc8] sm:$0xff] }
 0x888   :  { %15299 = vmatprep.subr.bf16.mxu1 %v18336_v14  ;;  %v18358_v14 = vcombine.high %v12306_v56, %v12310_v59  ;;  %v12342_v27 = vld [vmem:[#allocation17 + $0xde0] sm:$0xff] }
 0x89c   :  { %v11711_v7 = vpop.f32.mrb[28].mxu0 }
 0x89d   :  { %v18634_v46 = vadd.f32 %v11711_v7, %v8645_v16  ;;  %v19903_v52 = vpop.f32.mrb[28].mxu1  ;;  %v11713_v0 = vpop.f32.mrb[29].mxu0  ;;  %v18360_v16 = vcombine.high %v12307_v5, %v12311_v18  ;;  %v12315_v7 = vld [vmem:[#allocation17 + $0xd08] sm:$0xff] }
 0x89e   :  { %v18635_v8 = vadd.f32 %v11713_v0, %v8649_v24  ;;  %v11877_v19 = vpop.f32.mrb[29].mxu1  ;;  %v11715_v62 = vpop.f32.mrb[30].mxu0  ;;  %v12314_v24 = vld [vmem:[#allocation17 + $0xd00] sm:$0xff]  ;;  %v18357_v0 = vcombine.low %v12306_v56, %v12310_v59 }
 0x89f   :  { %v11886_v58 = vmax.f32 %v18634_v46, 0.0  ;;  %v18637_v43 = vadd.f32 %v11877_v19, %v8657_v51  ;;  %v11879_v29 = vpop.f32.mrb[30].mxu1  ;;  %v11716_v57 = vpop.f32.mrb[31].mxu0  ;;  %v12318_v51 = vld [vmem:[#allocation17 + $0xd20] sm:$0xff]  ;;  %v12319_v46 = vld [vmem:[#allocation17 + $0xd28] sm:$0xff] }
 0x8a0   :  { %v11887_v30 = vmax.f32 %v18635_v8, 0.0  ;;  %v11880_v32 = vpop.f32.mrb[31].mxu1  ;;  %v18359_v8 = vcombine.low %v12307_v5, %v12311_v18  ;;  %v18366_v19 = vcombine.high %v12314_v24, %v12318_v51  ;;  %v18368_v62 = vcombine.high %v12315_v7, %v12319_v46  ;;  %v12323_v29 = vld [vmem:[#allocation17 + $0xd48] sm:$0xff]  ;;  %v12346_v59 = vld [vmem:[#allocation17 + $0xe00] sm:$0xff] }
 0x8a1   :  { %v11889_v33 = vmax.f32 %v18637_v43, 0.0  ;;  %v19907_v50 = vpack.c.bf16 %v11886_v58, %v11886_v58  ;;  %v12322_v58 = vld [vmem:[#allocation17 + $0xd40] sm:$0xff]  ;;  %v12327_v57 = vld [vmem:[#allocation17 + $0xd68] sm:$0xff]  ;;  %v18367_v32 = vcombine.low %v12315_v7, %v12319_v46 }
 0x8a2   :  { %v19905_v35 = vpack.c.bf16 %v11887_v30, %v11887_v30  ;;  %v12326_v43 = vld [vmem:[#allocation17 + $0xd60] sm:$0xff]  ;;  %v18365_v30 = vcombine.low %v12314_v24, %v12318_v51  ;;  %v18375_v36 = vcombine.low %v12323_v29, %v12327_v57  ;;  %v12347_v18 = vld [vmem:[#allocation17 + $0xe08] sm:$0xff] }
 0x8a3   :  { %v19911_v2 = vpack.c.bf16 %v11889_v33, %v11889_v33  ;;  %v18374_v34 = vcombine.high %v12322_v58, %v12326_v43  ;;  %v18376_v33 = vcombine.high %v12323_v29, %v12327_v57  ;;  %v12350_v5 = vld [vmem:[#allocation17 + $0xe20] sm:$0xff]  ;;  %v12355_v46 = vld [vmem:[#allocation17 + $0xe48] sm:$0xff] }
 0x8a4   :  { %15126 = vmatprep.mubr.bf16.mxu0 %v19905_v35  ;;  %15290 = vmatprep.mubr.bf16.mxu1 %v19905_v35  ;;  %v12354_v51 = vld [vmem:[#allocation17 + $0xe40] sm:$0xff]  ;;  %v12363_v57 = vld [vmem:[#allocation17 + $0xe88] sm:$0xff] }
 0x8a5   :  { %15127 = vmatmul.mubr.bf16.vlgmr.msra.gmra.mrb[32].mxu0 %v19907_v50  ;;  %15291 = vmatmul.mubr.bf16.vlgmr.msra.gmra.mrb[32].mxu1 %v19907_v50  ;;  %v12358_v7 = vld [vmem:[#allocation17 + $0xe60] sm:$0xff] }
 0x8a6   :  { %15136 = vmatpush1.bf16.msra.mxu0 %v18333_v9  ;;  %15300 = vmatpush1.bf16.msra.mxu1 %v18335_v23  ;;  %v12335_v9 = vld [vmem:[#allocation17 + $0xda8] sm:$0xff]  ;;  %v18373_v23 = vcombine.low %v12322_v58, %v12326_v43  ;;  %v12362_v43 = vld [vmem:[#allocation17 + $0xe80] sm:$0xff] }
 0x8a7   :  { %15167 = vmatprep.mubr.bf16.mxu0 %v19911_v2  ;;  %15331 = vmatprep.mubr.bf16.mxu1 %v19911_v2  ;;  %v12366_v29 = vld [vmem:[#allocation17 + $0xea0] sm:$0xff] }
 0x8a8   :  { %15137 = vmatprep.subr.bf16.mxu0 %v18342_v38  ;;  %15301 = vmatprep.subr.bf16.mxu1 %v18344_v10  ;;  %v18382_v38 = vcombine.high %v12330_v15, %v12334_v60  ;;  %v18384_v10 = vcombine.high %v12331_v26, %v12335_v9 }
 0x8aa   :  { %15138 = vmatpush1.bf16.msra.mxu0 %v18341_v39  ;;  %15302 = vmatpush1.bf16.msra.mxu1 %v18343_v40  ;;  %v12343_v39 = vld [vmem:[#allocation17 + $0xde8] sm:$0xff]  ;;  %v18381_v40 = vcombine.low %v12330_v15, %v12334_v60  ;;  %v12370_v60 = vld [vmem:[#allocation17 + $0xec0] sm:$0xff] }
 0x8ab   :  { %15139 = vmatprep.subr.bf16.mxu0 %v18350_v21  ;;  %15303 = vmatprep.subr.bf16.mxu1 %v18352_v54  ;;  %v18383_v21 = vcombine.low %v12331_v26, %v12335_v9  ;;  %v18390_v54 = vcombine.high %v12338_v28, %v12342_v27  ;;  %v18392_v56 = vcombine.high %v12339_v6, %v12343_v39  ;;  %v12374_v26 = vld [vmem:[#allocation17 + $0xee0] sm:$0xff]  ;;  %v12371_v9 = vld [vmem:[#allocation17 + $0xec8] sm:$0xff] }
 0x8ae   :  { %15140 = vmatpush1.bf16.msra.mxu0 %v18349_v42  ;;  %15304 = vmatpush1.bf16.msra.mxu1 %v18351_v3  ;;  %v12351_v42 = vld [vmem:[#allocation17 + $0xe28] sm:$0xff]  ;;  %v18389_v3 = vcombine.low %v12338_v28, %v12342_v27  ;;  %v12378_v27 = vld [vmem:[#allocation17 + $0xf00] sm:$0xff] }
 0x8af   :  { %15141 = vmatprep.subr.bf16.mxu0 %v18358_v14  ;;  %15305 = vmatprep.subr.bf16.mxu1 %v18360_v16  ;;  %v18391_v14 = vcombine.low %v12339_v6, %v12343_v39  ;;  %v18398_v16 = vcombine.high %v12346_v59, %v12350_v5  ;;  %v18400_v24 = vcombine.high %v12347_v18, %v12351_v42  ;;  %v12382_v6 = vld [vmem:[#allocation17 + $0xf20] sm:$0xff]  ;;  %v12379_v39 = vld [vmem:[#allocation17 + $0xf08] sm:$0xff] }
 0x8b2   :  { %15142 = vmatpush1.bf16.msra.mxu0 %v18357_v0  ;;  %15306 = vmatpush1.bf16.msra.mxu1 %v18359_v8  ;;  %v12359_v0 = vld [vmem:[#allocation17 + $0xe68] sm:$0xff]  ;;  %v18397_v8 = vcombine.low %v12346_v59, %v12350_v5  ;;  %v12386_v5 = vld [vmem:[#allocation17 + $0xf40] sm:$0xff] }
 0x8b3   :  { %15143 = vmatprep.subr.bf16.mxu0 %v18366_v19  ;;  %15307 = vmatprep.subr.bf16.mxu1 %v18368_v62  ;;  %v18399_v19 = vcombine.low %v12347_v18, %v12351_v42  ;;  %v18406_v62 = vcombine.high %v12354_v51, %v12358_v7  ;;  %v18408_v58 = vcombine.high %v12355_v46, %v12359_v0  ;;  %v12390_v18 = vld [vmem:[#allocation17 + $0xf60] sm:$0xff]  ;;  %v12387_v42 = vld [vmem:[#allocation17 + $0xf48] sm:$0xff] }
 0x8b6   :  { %15144 = vmatpush1.bf16.msra.mxu0 %v18365_v30  ;;  %15308 = vmatpush1.bf16.msra.mxu1 %v18367_v32  ;;  %v12367_v30 = vld [vmem:[#allocation17 + $0xea8] sm:$0xff]  ;;  %v18405_v32 = vcombine.low %v12354_v51, %v12358_v7  ;;  %v12394_v7 = vld [vmem:[#allocation17 + $0xf80] sm:$0xff] }
 0x8b7   :  { %15145 = vmatprep.subr.bf16.mxu0 %v18374_v34  ;;  %15309 = vmatprep.subr.bf16.mxu1 %v18376_v33  ;;  %v18407_v34 = vcombine.low %v12355_v46, %v12359_v0  ;;  %v18414_v33 = vcombine.high %v12362_v43, %v12366_v29  ;;  %v18416_v15 = vcombine.high %v12363_v57, %v12367_v30  ;;  %v12398_v46 = vld [vmem:[#allocation17 + $0xfa0] sm:$0xff]  ;;  %v12395_v0 = vld [vmem:[#allocation17 + $0xf88] sm:$0xff] }
 0x8ba   :  { %15146 = vmatpush1.bf16.msra.mxu0 %v18373_v23  ;;  %15310 = vmatpush1.bf16.msra.mxu1 %v18375_v36  ;;  %v12375_v23 = vld [vmem:[#allocation17 + $0xee8] sm:$0xff]  ;;  %v18413_v36 = vcombine.low %v12362_v43, %v12366_v29  ;;  %v18446_v43 = vcombine.high %v12394_v7, %v12398_v46 }
 0x8bb   :  { %15147 = vmatprep.subr.bf16.mxu0 %v18382_v38  ;;  %15311 = vmatprep.subr.bf16.mxu1 %v18384_v10  ;;  %v18415_v38 = vcombine.low %v12363_v57, %v12367_v30  ;;  %v18422_v10 = vcombine.high %v12370_v60, %v12374_v26  ;;  %v18424_v28 = vcombine.high %v12371_v9, %v12375_v23  ;;  %v12402_v57 = vld [vmem:[#allocation17 + $0xfc0] sm:$0xff] }
 0x8bc   :  { %v12406_v30 = vld [vmem:[#allocation17 + $0xfe0] sm:$0xff] }
 0x8be   :  { %15148 = vmatpush1.bf16.msra.mxu0 %v18381_v40  ;;  %15312 = vmatpush1.bf16.msra.mxu1 %v18383_v21  ;;  %v12383_v40 = vld [vmem:[#allocation17 + $0xf28] sm:$0xff]  ;;  %v18421_v21 = vcombine.low %v12370_v60, %v12374_v26  ;;  %v18454_v26 = vcombine.high %v12402_v57, %v12406_v30 }
 0x8bf   :  { %15149 = vmatprep.subr.bf16.mxu0 %v18390_v54  ;;  %15313 = vmatprep.subr.bf16.mxu1 %v18392_v56  ;;  %v18423_v54 = vcombine.low %v12371_v9, %v12375_v23  ;;  %v18430_v56 = vcombine.high %v12378_v27, %v12382_v6  ;;  %v18432_v59 = vcombine.high %v12379_v39, %v12383_v40  ;;  %v11900_v23 = vld [vmem:[#allocation17 + $0x10] sm:$0xff] }
 0x8c2   :  { %15150 = vmatpush1.bf16.msra.mxu0 %v18389_v3  ;;  %15314 = vmatpush1.bf16.msra.mxu1 %v18391_v14  ;;  %v12391_v3 = vld [vmem:[#allocation17 + $0xf68] sm:$0xff]  ;;  %v18429_v14 = vcombine.low %v12378_v27, %v12382_v6 }
 0x8c3   :  { %15151 = vmatprep.subr.bf16.mxu0 %v18398_v16  ;;  %15315 = vmatprep.subr.bf16.mxu1 %v18400_v24  ;;  %v18431_v16 = vcombine.low %v12379_v39, %v12383_v40  ;;  %v18438_v24 = vcombine.high %v12386_v5, %v12390_v18  ;;  %v18440_v51 = vcombine.high %v12387_v42, %v12391_v3  ;;  %v11908_v40 = vld [vmem:[#allocation17 + $0x50] sm:$0xff] }
 0x8c6   :  { %15152 = vmatpush1.bf16.msra.mxu0 %v18397_v8  ;;  %15316 = vmatpush1.bf16.msra.mxu1 %v18399_v19  ;;  %v12399_v8 = vld [vmem:[#allocation17 + $0xfa8] sm:$0xff]  ;;  %v18437_v19 = vcombine.low %v12386_v5, %v12390_v18 }
 0x8c7   :  { %15153 = vmatprep.subr.bf16.mxu0 %v18406_v62  ;;  %15317 = vmatprep.subr.bf16.mxu1 %v18408_v58  ;;  %v18439_v62 = vcombine.low %v12387_v42, %v12391_v3  ;;  %v8653_v58 = vrot.slane %v19895_v31, %v19623_v22  ;;  %v18448_v29 = vcombine.high %v12395_v0, %v12399_v8  ;;  %v11904_v31 = vld [vmem:[#allocation17 + $0x30] sm:$0xff] }
 0x8c8   :  { %v17954_v6 = vcombine.high %v11900_v23, %v11904_v31  ;;  %v11916_v3 = vld [vmem:[#allocation17 + $0x90] sm:$0xff] }
 0x8c9   :  { %v18636_v60 = vadd.f32 %v19903_v52, %v8653_v58  ;;  %v11909_v52 = vld [vmem:[#allocation17 + $0x58] sm:$0xff] }
 0x8ca   :  { %15154 = vmatpush1.bf16.msra.mxu0 %v18405_v32  ;;  %15318 = vmatpush1.bf16.msra.mxu1 %v18407_v34  ;;  %v12403_v32 = vld [vmem:[#allocation17 + $0xfc8] sm:$0xff]  ;;  %v11929_v58 = vld [vmem:[#allocation17 + $0xf8] sm:$0xff] }
 0x8cb   :  { %15155 = vmatprep.subr.bf16.mxu0 %v18414_v33  ;;  %15319 = vmatprep.subr.bf16.mxu1 %v18416_v15  ;;  %v12407_v34 = vld [vmem:[#allocation17 + $0xfe8] sm:$0xff]  ;;  %v18445_v33 = vcombine.low %v12394_v7, %v12398_v46  ;;  %v18447_v15 = vcombine.low %v12395_v0, %v12399_v8  ;;  %v11888_v27 = vmax.f32 %v18636_v60, 0.0  ;;  %v11924_v8 = vld [vmem:[#allocation17 + $0xd0] sm:$0xff] }
 0x8cc   :  { %v18456_v9 = vcombine.high %v12403_v32, %v12407_v34 }
 0x8ce   :  { %15156 = vmatpush1.bf16.msra.mxu0 %v18413_v36  ;;  %15320 = vmatpush1.bf16.msra.mxu1 %v18415_v38  ;;  %v11901_v36 = vld [vmem:[#allocation17 + $0x18] sm:$0xff] }
 0x8cf   :  { %15157 = vmatprep.subr.bf16.mxu0 %v18422_v10  ;;  %15321 = vmatprep.subr.bf16.mxu1 %v18424_v28  ;;  %v11905_v38 = vld [vmem:[#allocation17 + $0x38] sm:$0xff]  ;;  %v18453_v10 = vcombine.low %v12402_v57, %v12406_v30  ;;  %v18455_v28 = vcombine.low %v12403_v32, %v12407_v34  ;;  %v11932_v32 = vld [vmem:[#allocation17 + $0x110] sm:$0xff] }
 0x8d0   :  { %v17956_v39 = vcombine.high %v11901_v36, %v11905_v38  ;;  %v17955_v5 = vcombine.low %v11901_v36, %v11905_v38  ;;  %v11936_v34 = vld [vmem:[#allocation17 + $0x130] sm:$0xff]  ;;  %v11941_v36 = vld [vmem:[#allocation17 + $0x158] sm:$0xff] }
 0x8d1   :  { %v11945_v38 = vld [vmem:[#allocation17 + $0x178] sm:$0xff] }
 0x8d2   :  { %15158 = vmatpush1.bf16.msra.mxu0 %v18421_v21  ;;  %15322 = vmatpush1.bf16.msra.mxu1 %v18423_v54  ;;  %v11912_v21 = vld [vmem:[#allocation17 + $0x70] sm:$0xff]  ;;  %v11913_v54 = vld [vmem:[#allocation17 + $0x78] sm:$0xff] }
 0x8d3   :  { %15159 = vmatprep.subr.bf16.mxu0 %v18430_v56  ;;  %15323 = vmatprep.subr.bf16.mxu1 %v18432_v59  ;;  %v17953_v56 = vcombine.low %v11900_v23, %v11904_v31  ;;  %v19920_v59 = vpack.c.bf16 %v11888_v27, %v11888_v27  ;;  %v17962_v18 = vcombine.high %v11908_v40, %v11912_v21  ;;  %v11940_v23 = vld [vmem:[#allocation17 + $0x150] sm:$0xff] }
 0x8d4   :  { %v17964_v42 = vcombine.high %v11909_v52, %v11913_v54  ;;  %v17963_v7 = vcombine.low %v11909_v52, %v11913_v54  ;;  %v11944_v31 = vld [vmem:[#allocation17 + $0x170] sm:$0xff]  ;;  %v11953_v52 = vld [vmem:[#allocation17 + $0x1b8] sm:$0xff] }
 0x8d5   :  { %v17994_v27 = vcombine.high %v11940_v23, %v11944_v31  ;;  %v17993_v54 = vcombine.low %v11940_v23, %v11944_v31  ;;  %v11984_v23 = vld [vmem:[#allocation17 + $0x2b0] sm:$0xff]  ;;  %v11981_v31 = vld [vmem:[#allocation17 + $0x298] sm:$0xff] }
 0x8d6   :  { %15160 = vmatpush1.bf16.msra.mxu0 %v18429_v14  ;;  %15324 = vmatpush1.bf16.msra.mxu1 %v18431_v16  ;;  %v11920_v14 = vld [vmem:[#allocation17 + $0xb0] sm:$0xff]  ;;  %v11917_v16 = vld [vmem:[#allocation17 + $0x98] sm:$0xff] }
 0x8d7   :  { %15161 = vmatprep.subr.bf16.mxu0 %v18438_v24  ;;  %15325 = vmatprep.subr.bf16.mxu1 %v18440_v51  ;;  %v11921_v24 = vld [vmem:[#allocation17 + $0xb8] sm:$0xff]  ;;  %v17961_v51 = vcombine.low %v11908_v40, %v11912_v21  ;;  %v17970_v46 = vcombine.high %v11916_v3, %v11920_v14  ;;  %v11952_v40 = vld [vmem:[#allocation17 + $0x1b0] sm:$0xff] }
 0x8d8   :  { %v17972_v0 = vcombine.high %v11917_v16, %v11921_v24  ;;  %v11949_v21 = vld [vmem:[#allocation17 + $0x198] sm:$0xff] }
 0x8da   :  { %15162 = vmatpush1.bf16.msra.mxu0 %v18437_v19  ;;  %15326 = vmatpush1.bf16.msra.mxu1 %v18439_v62  ;;  %v11928_v19 = vld [vmem:[#allocation17 + $0xf0] sm:$0xff]  ;;  %v11925_v62 = vld [vmem:[#allocation17 + $0xd8] sm:$0xff] }
 0x8db   :  { %15163 = vmatprep.subr.bf16.mxu0 %v18446_v43  ;;  %15327 = vmatprep.subr.bf16.mxu1 %v18448_v29  ;;  %v17969_v43 = vcombine.low %v11916_v3, %v11920_v14  ;;  %v17971_v29 = vcombine.low %v11917_v16, %v11921_v24  ;;  %v17978_v57 = vcombine.high %v11924_v8, %v11928_v19  ;;  %v11960_v3 = vld [vmem:[#allocation17 + $0x1f0] sm:$0xff]  ;;  %v11957_v14 = vld [vmem:[#allocation17 + $0x1d8] sm:$0xff] }
 0x8dc   :  { %v17980_v30 = vcombine.high %v11925_v62, %v11929_v58  ;;  %v17979_v60 = vcombine.low %v11925_v62, %v11929_v58  ;;  %v11961_v16 = vld [vmem:[#allocation17 + $0x1f8] sm:$0xff] }
 0x8dd   :  { %v11969_v62 = vld [vmem:[#allocation17 + $0x238] sm:$0xff] }
 0x8de   :  { %15164 = vmatpush1.bf16.msra.mxu0 %v18445_v33  ;;  %15328 = vmatpush1.bf16.msra.mxu1 %v18447_v15  ;;  %v11937_v33 = vld [vmem:[#allocation17 + $0x138] sm:$0xff]  ;;  %v17977_v15 = vcombine.low %v11924_v8, %v11928_v19  ;;  %v11968_v8 = vld [vmem:[#allocation17 + $0x230] sm:$0xff] }
 0x8df   :  { %15165 = vmatprep.subr.bf16.mxu0 %v18454_v26  ;;  %15329 = vmatprep.subr.bf16.mxu1 %v18456_v9  ;;  %v17986_v26 = vcombine.high %v11932_v32, %v11936_v34  ;;  %v11965_v19 = vld [vmem:[#allocation17 + $0x218] sm:$0xff] }
 0x8e2   :  { %15166 = vmatpush1.bf16.msra.mxu0 %v18453_v10  ;;  %15330 = vmatpush1.bf16.msra.mxu1 %v18455_v28  ;;  %v17985_v10 = vcombine.low %v11932_v32, %v11936_v34  ;;  %v11976_v32 = vld [vmem:[#allocation17 + $0x270] sm:$0xff]  ;;  %v11973_v34 = vld [vmem:[#allocation17 + $0x258] sm:$0xff] }
 0x8e3   :  { %15340 = vmatprep.subr.bf16.mxu0 %v17954_v6  ;;  %15504 = vmatprep.subr.bf16.mxu1 %v17956_v39  ;;  %v17996_v6 = vcombine.high %v11941_v36, %v11945_v38  ;;  %v11948_v39 = vld [vmem:[#allocation17 + $0x190] sm:$0xff] }
 0x8e4   :  { %v18001_v24 = vcombine.low %v11948_v39, %v11952_v40 }
 0x8e5   :  { %15168 = vmatmul.mubr.bf16.vlgmr.msra.gmra.mrb[32].mxu0 %v19920_v59  ;;  %15332 = vmatmul.mubr.bf16.vlgmr.msra.gmra.mrb[32].mxu1 %v19920_v59 }
 0x8e6   :  { %15341 = vmatpush1.bf16.msra.mxu0 %v17953_v56  ;;  %15372 = vmatprep.mubr.bf16.mxu0 %v19868_v17  ;;  %v17995_v56 = vcombine.low %v11941_v36, %v11945_v38  ;;  %v11985_v36 = vld [vmem:[#allocation17 + $0x2b8] sm:$0xff] }
 0x8e7   :  { %15505 = vmatpush1.bf16.msra.mxu1 %v17955_v5  ;;  %15536 = vmatprep.mubr.bf16.mxu1 %v19868_v17  ;;  %v11933_v17 = vld [vmem:[#allocation17 + $0x118] sm:$0xff]  ;;  %v18002_v5 = vcombine.high %v11948_v39, %v11952_v40  ;;  %v11992_v39 = vld [vmem:[#allocation17 + $0x2f0] sm:$0xff] }
 0x8e8   :  { %15342 = vmatprep.subr.bf16.mxu0 %v17962_v18  ;;  %15506 = vmatprep.subr.bf16.mxu1 %v17964_v42  ;;  %v17988_v9 = vcombine.high %v11933_v17, %v11937_v33  ;;  %v17987_v28 = vcombine.low %v11933_v17, %v11937_v33  ;;  %v18004_v18 = vcombine.high %v11949_v21, %v11953_v52  ;;  %v11956_v42 = vld [vmem:[#allocation17 + $0x1d0] sm:$0xff]  ;;  %v11977_v17 = vld [vmem:[#allocation17 + $0x278] sm:$0xff] }
 0x8e9   :  { %v18009_v58 = vcombine.low %v11956_v42, %v11960_v3  ;;  %v11989_v40 = vld [vmem:[#allocation17 + $0x2d8] sm:$0xff] }
 0x8ea   :  { %15343 = vmatpush1.bf16.msra.mxu0 %v17961_v51  ;;  %v18003_v51 = vcombine.low %v11949_v21, %v11953_v52  ;;  %v11993_v21 = vld [vmem:[#allocation17 + $0x2f8] sm:$0xff] }
 0x8eb   :  { %15507 = vmatpush1.bf16.msra.mxu1 %v17963_v7  ;;  %15344 = vmatprep.subr.bf16.mxu0 %v17970_v46  ;;  %v18010_v7 = vcombine.high %v11956_v42, %v11960_v3  ;;  %v18012_v46 = vcombine.high %v11957_v14, %v11961_v16  ;;  %v12000_v42 = vld [vmem:[#allocation17 + $0x330] sm:$0xff]  ;;  %v11997_v3 = vld [vmem:[#allocation17 + $0x318] sm:$0xff] }
 0x8ec   :  { %15508 = vmatprep.subr.bf16.mxu1 %v17972_v0  ;;  %v11964_v0 = vld [vmem:[#allocation17 + $0x210] sm:$0xff] }
 0x8ed   :  { %v18017_v33 = vcombine.low %v11964_v0, %v11968_v8 }
 0x8ee   :  { %15345 = vmatpush1.bf16.msra.mxu0 %v17969_v43  ;;  %v18011_v43 = vcombine.low %v11957_v14, %v11961_v16  ;;  %v12001_v14 = vld [vmem:[#allocation17 + $0x338] sm:$0xff] }
 0x8ef   :  { %15509 = vmatpush1.bf16.msra.mxu1 %v17971_v29  ;;  %15346 = vmatprep.subr.bf16.mxu0 %v17978_v57  ;;  %v18018_v29 = vcombine.high %v11964_v0, %v11968_v8  ;;  %v18020_v57 = vcombine.high %v11965_v19, %v11969_v62  ;;  %v12008_v0 = vld [vmem:[#allocation17 + $0x370] sm:$0xff]  ;;  %v12005_v8 = vld [vmem:[#allocation17 + $0x358] sm:$0xff] }
 0x8f0   :  { %15510 = vmatprep.subr.bf16.mxu1 %v17980_v30  ;;  %v11972_v30 = vld [vmem:[#allocation17 + $0x250] sm:$0xff] }
 0x8f1   :  { %v18025_v38 = vcombine.low %v11972_v30, %v11976_v32 }
 0x8f2   :  { %15347 = vmatpush1.bf16.msra.mxu0 %v17977_v15  ;;  %v18019_v15 = vcombine.low %v11965_v19, %v11969_v62  ;;  %v12009_v19 = vld [vmem:[#allocation17 + $0x378] sm:$0xff] }
 0x8f3   :  { %15511 = vmatpush1.bf16.msra.mxu1 %v17979_v60  ;;  %15348 = vmatprep.subr.bf16.mxu0 %v17986_v26  ;;  %v18026_v60 = vcombine.high %v11972_v30, %v11976_v32  ;;  %v18028_v26 = vcombine.high %v11973_v34, %v11977_v17  ;;  %v12016_v30 = vld [vmem:[#allocation17 + $0x3b0] sm:$0xff]  ;;  %v12013_v32 = vld [vmem:[#allocation17 + $0x398] sm:$0xff] }
 0x8f4   :  { %15512 = vmatprep.subr.bf16.mxu1 %v17988_v9  ;;  %v11980_v9 = vld [vmem:[#allocation17 + $0x290] sm:$0xff] }
 0x8f5   :  { %v18033_v52 = vcombine.low %v11980_v9, %v11984_v23 }
 0x8f6   :  { %15349 = vmatpush1.bf16.msra.mxu0 %v17985_v10  ;;  %v18027_v10 = vcombine.low %v11973_v34, %v11977_v17  ;;  %v12017_v34 = vld [vmem:[#allocation17 + $0x3b8] sm:$0xff] }
 0x8f7   :  { %15513 = vmatpush1.bf16.msra.mxu1 %v17987_v28  ;;  %15350 = vmatprep.subr.bf16.mxu0 %v17994_v27  ;;  %v18034_v28 = vcombine.high %v11980_v9, %v11984_v23  ;;  %v18036_v27 = vcombine.high %v11981_v31, %v11985_v36  ;;  %v12024_v9 = vld [vmem:[#allocation17 + $0x3f0] sm:$0xff]  ;;  %v12021_v23 = vld [vmem:[#allocation17 + $0x3d8] sm:$0xff] }
 0x8f8   :  { %15514 = vmatprep.subr.bf16.mxu1 %v17996_v6  ;;  %v11988_v6 = vld [vmem:[#allocation17 + $0x2d0] sm:$0xff] }
 0x8f9   :  { %v18041_v16 = vcombine.low %v11988_v6, %v11992_v39 }
 0x8fa   :  { %15351 = vmatpush1.bf16.msra.mxu0 %v17993_v54  ;;  %v18035_v54 = vcombine.low %v11981_v31, %v11985_v36  ;;  %v12025_v31 = vld [vmem:[#allocation17 + $0x3f8] sm:$0xff] }
 0x8fb   :  { %15515 = vmatpush1.bf16.msra.mxu1 %v17995_v56  ;;  %15352 = vmatprep.subr.bf16.mxu0 %v18002_v5  ;;  %v18042_v56 = vcombine.high %v11988_v6, %v11992_v39  ;;  %v18044_v5 = vcombine.high %v11989_v40, %v11993_v21  ;;  %v12032_v6 = vld [vmem:[#allocation17 + $0x430] sm:$0xff]  ;;  %v12029_v39 = vld [vmem:[#allocation17 + $0x418] sm:$0xff] }
 0x8fc   :  { %15516 = vmatprep.subr.bf16.mxu1 %v18004_v18  ;;  %v11996_v18 = vld [vmem:[#allocation17 + $0x310] sm:$0xff] }
 0x8fd   :  { %v18049_v62 = vcombine.low %v11996_v18, %v12000_v42 }
 0x8fe   :  { %15353 = vmatpush1.bf16.msra.mxu0 %v18001_v24  ;;  %v18043_v24 = vcombine.low %v11989_v40, %v11993_v21  ;;  %v12033_v40 = vld [vmem:[#allocation17 + $0x438] sm:$0xff] }
 0x8ff   :  { %15517 = vmatpush1.bf16.msra.mxu1 %v18003_v51  ;;  %15354 = vmatprep.subr.bf16.mxu0 %v18010_v7  ;;  %v18050_v51 = vcombine.high %v11996_v18, %v12000_v42  ;;  %v18052_v7 = vcombine.high %v11997_v3, %v12001_v14  ;;  %v12040_v18 = vld [vmem:[#allocation17 + $0x470] sm:$0xff] }
 0x900   :  { %15518 = vmatprep.subr.bf16.mxu1 %v18012_v46  ;;  %v12004_v46 = vld [vmem:[#allocation17 + $0x350] sm:$0xff] }
 0x901   :  { %v18057_v17 = vcombine.low %v12004_v46, %v12008_v0 }
 0x902   :  { %15355 = vmatpush1.bf16.msra.mxu0 %v18009_v58  ;;  %v18051_v58 = vcombine.low %v11997_v3, %v12001_v14  ;;  %v12037_v3 = vld [vmem:[#allocation17 + $0x458] sm:$0xff] }
 0x903   :  { %15519 = vmatpush1.bf16.msra.mxu1 %v18011_v43  ;;  %15356 = vmatprep.subr.bf16.mxu0 %v18018_v29  ;;  %v18058_v43 = vcombine.high %v12004_v46, %v12008_v0  ;;  %v18060_v29 = vcombine.high %v12005_v8, %v12009_v19  ;;  %v12041_v14 = vld [vmem:[#allocation17 + $0x478] sm:$0xff] }
 0x904   :  { %15520 = vmatprep.subr.bf16.mxu1 %v18020_v57  ;;  %v12012_v57 = vld [vmem:[#allocation17 + $0x390] sm:$0xff]  ;;  %v18092_v46 = vcombine.high %v12037_v3, %v12041_v14  ;;  %v12045_v0 = vld [vmem:[#allocation17 + $0x498] sm:$0xff] }
 0x905   :  { %v18065_v36 = vcombine.low %v12012_v57, %v12016_v30 }
 0x906   :  { %15357 = vmatpush1.bf16.msra.mxu0 %v18017_v33  ;;  %v18059_v33 = vcombine.low %v12005_v8, %v12009_v19  ;;  %v12049_v8 = vld [vmem:[#allocation17 + $0x4b8] sm:$0xff] }
 0x907   :  { %15521 = vmatpush1.bf16.msra.mxu1 %v18019_v15  ;;  %15358 = vmatprep.subr.bf16.mxu0 %v18026_v60  ;;  %v18066_v15 = vcombine.high %v12012_v57, %v12016_v30  ;;  %v18068_v60 = vcombine.high %v12013_v32, %v12017_v34  ;;  %v12056_v57 = vld [vmem:[#allocation17 + $0x4f0] sm:$0xff]  ;;  %v12053_v30 = vld [vmem:[#allocation17 + $0x4d8] sm:$0xff] }
 0x908   :  { %15522 = vmatprep.subr.bf16.mxu1 %v18028_v26  ;;  %v12020_v26 = vld [vmem:[#allocation17 + $0x3d0] sm:$0xff] }
 0x909   :  { %v18073_v21 = vcombine.low %v12020_v26, %v12024_v9 }
 0x90a   :  { %15359 = vmatpush1.bf16.msra.mxu0 %v18025_v38  ;;  %v18067_v38 = vcombine.low %v12013_v32, %v12017_v34  ;;  %v12057_v32 = vld [vmem:[#allocation17 + $0x4f8] sm:$0xff] }
 0x90b   :  { %15523 = vmatpush1.bf16.msra.mxu1 %v18027_v10  ;;  %15360 = vmatprep.subr.bf16.mxu0 %v18034_v28  ;;  %v18074_v10 = vcombine.high %v12020_v26, %v12024_v9  ;;  %v18076_v28 = vcombine.high %v12021_v23, %v12025_v31  ;;  %v12061_v26 = vld [vmem:[#allocation17 + $0x518] sm:$0xff] }
 0x90c   :  { %15524 = vmatprep.subr.bf16.mxu1 %v18036_v27  ;;  %v12028_v27 = vld [vmem:[#allocation17 + $0x410] sm:$0xff]  ;;  %v12065_v9 = vld [vmem:[#allocation17 + $0x538] sm:$0xff] }
 0x90d   :  { %v18081_v42 = vcombine.low %v12028_v27, %v12032_v6 }
 0x90e   :  { %15361 = vmatpush1.bf16.msra.mxu0 %v18033_v52  ;;  %v18075_v52 = vcombine.low %v12021_v23, %v12025_v31  ;;  %v18107_v23 = vcombine.low %v12053_v30, %v12057_v32 }
 0x90f   :  { %15525 = vmatpush1.bf16.msra.mxu1 %v18035_v54  ;;  %15362 = vmatprep.subr.bf16.mxu0 %v18042_v56  ;;  %v18082_v54 = vcombine.high %v12028_v27, %v12032_v6  ;;  %v18084_v56 = vcombine.high %v12029_v39, %v12033_v40  ;;  %v12073_v27 = vld [vmem:[#allocation17 + $0x578] sm:$0xff] }
 0x910   :  { %15526 = vmatprep.subr.bf16.mxu1 %v18044_v5  ;;  %v12036_v5 = vld [vmem:[#allocation17 + $0x450] sm:$0xff] }
 0x911   :  { %v18089_v19 = vcombine.low %v12036_v5, %v12040_v18 }
 0x912   :  { %15363 = vmatpush1.bf16.msra.mxu0 %v18041_v16  ;;  %v18083_v16 = vcombine.low %v12029_v39, %v12033_v40  ;;  %v18115_v39 = vcombine.low %v12061_v26, %v12065_v9 }
 0x913   :  { %15527 = vmatpush1.bf16.msra.mxu1 %v18043_v24  ;;  %15364 = vmatprep.subr.bf16.mxu0 %v18050_v51  ;;  %v18090_v24 = vcombine.high %v12036_v5, %v12040_v18  ;;  %v12044_v51 = vld [vmem:[#allocation17 + $0x490] sm:$0xff]  ;;  %v12081_v5 = vld [vmem:[#allocation17 + $0x5b8] sm:$0xff] }
 0x914   :  { %15528 = vmatprep.subr.bf16.mxu1 %v18052_v7  ;;  %v12048_v7 = vld [vmem:[#allocation17 + $0x4b0] sm:$0xff] }
 0x915   :  { %v18097_v34 = vcombine.low %v12044_v51, %v12048_v7 }
 0x916   :  { %15365 = vmatpush1.bf16.msra.mxu0 %v18049_v62  ;;  %v18091_v62 = vcombine.low %v12037_v3, %v12041_v14 }
 0x917   :  { %15529 = vmatpush1.bf16.msra.mxu1 %v18051_v58  ;;  %15366 = vmatprep.subr.bf16.mxu0 %v18058_v43  ;;  %v18098_v58 = vcombine.high %v12044_v51, %v12048_v7  ;;  %v18100_v43 = vcombine.high %v12045_v0, %v12049_v8  ;;  %v12085_v51 = vld [vmem:[#allocation17 + $0x5d8] sm:$0xff] }
 0x918   :  { %15530 = vmatprep.subr.bf16.mxu1 %v18060_v29  ;;  %v12052_v29 = vld [vmem:[#allocation17 + $0x4d0] sm:$0xff]  ;;  %v12089_v7 = vld [vmem:[#allocation17 + $0x5f8] sm:$0xff] }
 0x91a   :  { %15367 = vmatpush1.bf16.msra.mxu0 %v18057_v17  ;;  %v18106_v17 = vcombine.high %v12052_v29, %v12056_v57 }
 0x91b   :  { %15531 = vmatpush1.bf16.msra.mxu1 %v18059_v33  ;;  %15368 = vmatprep.subr.bf16.mxu0 %v18066_v15  ;;  %v18108_v33 = vcombine.high %v12053_v30, %v12057_v32  ;;  %v12060_v15 = vld [vmem:[#allocation17 + $0x510] sm:$0xff]  ;;  %v18139_v30 = vcombine.low %v12085_v51, %v12089_v7 }
 0x91c   :  { %15532 = vmatprep.subr.bf16.mxu1 %v18068_v60  ;;  %v12064_v60 = vld [vmem:[#allocation17 + $0x530] sm:$0xff] }
 0x91d   :  { %v18114_v31 = vcombine.high %v12060_v15, %v12064_v60  ;;  %v18113_v6 = vcombine.low %v12060_v15, %v12064_v60  ;;  %v12105_v15 = vld [vmem:[#allocation17 + $0x678] sm:$0xff] }
 0x91e   :  { %15369 = vmatpush1.bf16.msra.mxu0 %v18065_v36  ;;  %v18116_v36 = vcombine.high %v12061_v26, %v12065_v9 }
 0x91f   :  { %15533 = vmatpush1.bf16.msra.mxu1 %v18067_v38  ;;  %15370 = vmatprep.subr.bf16.mxu0 %v18074_v10  ;;  %v12068_v38 = vld [vmem:[#allocation17 + $0x550] sm:$0xff] }
 0x920   :  { %15534 = vmatprep.subr.bf16.mxu1 %v18076_v28  ;;  %v12072_v10 = vld [vmem:[#allocation17 + $0x570] sm:$0xff]  ;;  %v12069_v28 = vld [vmem:[#allocation17 + $0x558] sm:$0xff] }
 0x921   :  { %v18122_v40 = vcombine.high %v12068_v38, %v12072_v10  ;;  %v18121_v18 = vcombine.low %v12068_v38, %v12072_v10  ;;  %v12113_v38 = vld [vmem:[#allocation17 + $0x6b8] sm:$0xff] }
 0x922   :  { %15371 = vmatpush1.bf16.msra.mxu0 %v18073_v21  ;;  %v18124_v21 = vcombine.high %v12069_v28, %v12073_v27 }
 0x923   :  { %15535 = vmatpush1.bf16.msra.mxu1 %v18075_v52  ;;  %15381 = vmatprep.subr.bf16.mxu0 %v18082_v54  ;;  %v12076_v52 = vld [vmem:[#allocation17 + $0x590] sm:$0xff] }
 0x924   :  { %15545 = vmatprep.subr.bf16.mxu1 %v18084_v56  ;;  %v12080_v54 = vld [vmem:[#allocation17 + $0x5b0] sm:$0xff]  ;;  %v12077_v56 = vld [vmem:[#allocation17 + $0x598] sm:$0xff] }
 0x925   :  { %15373 = vmatmul.mubr.bf16.vlgmr.msra.gmra.mrb[36].mxu0 %v19880_v61  ;;  %v18130_v3 = vcombine.high %v12076_v52, %v12080_v54  ;;  %v18132_v14 = vcombine.high %v12077_v56, %v12081_v5 }
 0x926   :  { %15537 = vmatmul.mubr.bf16.vlgmr.msra.gmra.mrb[36].mxu1 %v19880_v61  ;;  %15382 = vmatpush1.bf16.msra.mxu0 %v18081_v42  ;;  %v18099_v61 = vcombine.low %v12045_v0, %v12049_v8  ;;  %v18123_v42 = vcombine.low %v12069_v28, %v12073_v27  ;;  %v18131_v0 = vcombine.low %v12077_v56, %v12081_v5 }
 0x927   :  { %15413 = vmatprep.mubr.bf16.mxu0 %v19882_v41  ;;  %15546 = vmatpush1.bf16.msra.mxu1 %v18083_v16  ;;  %v12084_v16 = vld [vmem:[#allocation17 + $0x5d0] sm:$0xff] }
 0x928   :  { %15577 = vmatprep.mubr.bf16.mxu1 %v19882_v41  ;;  %15383 = vmatprep.subr.bf16.mxu0 %v18090_v24  ;;  %v18105_v41 = vcombine.low %v12052_v29, %v12056_v57  ;;  %v12088_v24 = vld [vmem:[#allocation17 + $0x5f0] sm:$0xff]  ;;  %v12097_v29 = vld [vmem:[#allocation17 + $0x638] sm:$0xff] }
 0x929   :  { %15547 = vmatprep.subr.bf16.mxu1 %v18092_v46  ;;  %v18129_v46 = vcombine.low %v12076_v52, %v12080_v54  ;;  %v18138_v8 = vcombine.high %v12084_v16, %v12088_v24  ;;  %v18137_v57 = vcombine.low %v12084_v16, %v12088_v24  ;;  %v12121_v52 = vld [vmem:[#allocation17 + $0x6f8] sm:$0xff] }
 0x92a   :  { %15384 = vmatpush1.bf16.msra.mxu0 %v18089_v19  ;;  %v18140_v19 = vcombine.high %v12085_v51, %v12089_v7  ;;  %v12129_v16 = vld [vmem:[#allocation17 + $0x738] sm:$0xff] }
 0x92b   :  { %15548 = vmatpush1.bf16.msra.mxu1 %v18091_v62  ;;  %15385 = vmatprep.subr.bf16.mxu0 %v18098_v58  ;;  %v12092_v62 = vld [vmem:[#allocation17 + $0x610] sm:$0xff] }
 0x92c   :  { %15549 = vmatprep.subr.bf16.mxu1 %v18100_v43  ;;  %v12096_v58 = vld [vmem:[#allocation17 + $0x630] sm:$0xff]  ;;  %v12093_v43 = vld [vmem:[#allocation17 + $0x618] sm:$0xff] }
 0x92d   :  { %v18146_v32 = vcombine.high %v12092_v62, %v12096_v58  ;;  %v18145_v60 = vcombine.low %v12092_v62, %v12096_v58  ;;  %v18147_v26 = vcombine.low %v12093_v43, %v12097_v29  ;;  %v12137_v62 = vld [vmem:[#allocation17 + $0x778] sm:$0xff] }
 0x92e   :  { %15386 = vmatpush1.bf16.msra.mxu0 %v18097_v34  ;;  %v18148_v34 = vcombine.high %v12093_v43, %v12097_v29 }
 0x92f   :  { %15550 = vmatpush1.bf16.msra.mxu1 %v18099_v61  ;;  %15387 = vmatprep.subr.bf16.mxu0 %v18106_v17  ;;  %v12100_v61 = vld [vmem:[#allocation17 + $0x650] sm:$0xff] }
 0x930   :  { %15551 = vmatprep.subr.bf16.mxu1 %v18108_v33  ;;  %v12104_v17 = vld [vmem:[#allocation17 + $0x670] sm:$0xff]  ;;  %v12101_v33 = vld [vmem:[#allocation17 + $0x658] sm:$0xff] }
 0x931   :  { %v18154_v9 = vcombine.high %v12100_v61, %v12104_v17  ;;  %v18153_v10 = vcombine.low %v12100_v61, %v12104_v17  ;;  %v18155_v28 = vcombine.low %v12101_v33, %v12105_v15  ;;  %v12145_v61 = vld [vmem:[#allocation17 + $0x7b8] sm:$0xff] }
 0x932   :  { %15388 = vmatpush1.bf16.msra.mxu0 %v18105_v41  ;;  %v18156_v41 = vcombine.high %v12101_v33, %v12105_v15 }
 0x933   :  { %15552 = vmatpush1.bf16.msra.mxu1 %v18107_v23  ;;  %15389 = vmatprep.subr.bf16.mxu0 %v18114_v31  ;;  %v12108_v23 = vld [vmem:[#allocation17 + $0x690] sm:$0xff] }
 0x934   :  { %15553 = vmatprep.subr.bf16.mxu1 %v18116_v36  ;;  %v12112_v31 = vld [vmem:[#allocation17 + $0x6b0] sm:$0xff]  ;;  %v12109_v36 = vld [vmem:[#allocation17 + $0x698] sm:$0xff] }
 0x935   :  { %v18162_v27 = vcombine.high %v12108_v23, %v12112_v31  ;;  %v18161_v54 = vcombine.low %v12108_v23, %v12112_v31  ;;  %v18163_v56 = vcombine.low %v12109_v36, %v12113_v38  ;;  %v12153_v23 = vld [vmem:[#allocation17 + $0x7f8] sm:$0xff] }
 0x936   :  { %15390 = vmatpush1.bf16.msra.mxu0 %v18113_v6  ;;  %v18164_v6 = vcombine.high %v12109_v36, %v12113_v38 }
 0x937   :  { %15554 = vmatpush1.bf16.msra.mxu1 %v18115_v39  ;;  %15391 = vmatprep.subr.bf16.mxu0 %v18122_v40  ;;  %v12116_v39 = vld [vmem:[#allocation17 + $0x6d0] sm:$0xff] }
 0x938   :  { %15555 = vmatprep.subr.bf16.mxu1 %v18124_v21  ;;  %v12120_v40 = vld [vmem:[#allocation17 + $0x6f0] sm:$0xff]  ;;  %v12117_v21 = vld [vmem:[#allocation17 + $0x6d8] sm:$0xff] }
 0x939   :  { %v18170_v5 = vcombine.high %v12116_v39, %v12120_v40  ;;  %v18169_v24 = vcombine.low %v12116_v39, %v12120_v40  ;;  %v18171_v51 = vcombine.low %v12117_v21, %v12121_v52  ;;  %v12161_v39 = vld [vmem:[#allocation17 + $0x838] sm:$0xff] }
 0x93a   :  { %15392 = vmatpush1.bf16.msra.mxu0 %v18121_v18  ;;  %v18172_v18 = vcombine.high %v12117_v21, %v12121_v52 }
 0x93b   :  { %15556 = vmatpush1.bf16.msra.mxu1 %v18123_v42  ;;  %15393 = vmatprep.subr.bf16.mxu0 %v18130_v3  ;;  %v12124_v42 = vld [vmem:[#allocation17 + $0x710] sm:$0xff] }
 0x93c   :  { %15557 = vmatprep.subr.bf16.mxu1 %v18132_v14  ;;  %v12128_v3 = vld [vmem:[#allocation17 + $0x730] sm:$0xff]  ;;  %v12125_v14 = vld [vmem:[#allocation17 + $0x718] sm:$0xff] }
 0x93d   :  { %v18178_v7 = vcombine.high %v12124_v42, %v12128_v3  ;;  %v18177_v58 = vcombine.low %v12124_v42, %v12128_v3  ;;  %v18179_v43 = vcombine.low %v12125_v14, %v12129_v16  ;;  %v12165_v42 = vld [vmem:[#allocation17 + $0x858] sm:$0xff] }
 0x93e   :  { %15394 = vmatpush1.bf16.msra.mxu0 %v18129_v46  ;;  %v18180_v46 = vcombine.high %v12125_v14, %v12129_v16  ;;  %v12169_v3 = vld [vmem:[#allocation17 + $0x878] sm:$0xff] }
 0x93f   :  { %15558 = vmatpush1.bf16.msra.mxu1 %v18131_v0  ;;  %15395 = vmatprep.subr.bf16.mxu0 %v18138_v8  ;;  %v12132_v0 = vld [vmem:[#allocation17 + $0x750] sm:$0xff] }
 0x940   :  { %15559 = vmatprep.subr.bf16.mxu1 %v18140_v19  ;;  %v12136_v8 = vld [vmem:[#allocation17 + $0x770] sm:$0xff]  ;;  %v12133_v19 = vld [vmem:[#allocation17 + $0x758] sm:$0xff] }
 0x941   :  { %v18186_v29 = vcombine.high %v12132_v0, %v12136_v8  ;;  %v18185_v17 = vcombine.low %v12132_v0, %v12136_v8  ;;  %v18187_v33 = vcombine.low %v12133_v19, %v12137_v62  ;;  %v12177_v0 = vld [vmem:[#allocation17 + $0x8b8] sm:$0xff] }
 0x942   :  { %15396 = vmatpush1.bf16.msra.mxu0 %v18137_v57  ;;  %v18188_v57 = vcombine.high %v12133_v19, %v12137_v62  ;;  %v18219_v19 = vcombine.low %v12165_v42, %v12169_v3 }
 0x943   :  { %15560 = vmatpush1.bf16.msra.mxu1 %v18139_v30  ;;  %15397 = vmatprep.subr.bf16.mxu0 %v18146_v32  ;;  %v12140_v30 = vld [vmem:[#allocation17 + $0x790] sm:$0xff] }
 0x944   :  { %15561 = vmatprep.subr.bf16.mxu1 %v18148_v34  ;;  %v12144_v32 = vld [vmem:[#allocation17 + $0x7b0] sm:$0xff]  ;;  %v12141_v34 = vld [vmem:[#allocation17 + $0x798] sm:$0xff] }
 0x945   :  { %v18194_v15 = vcombine.high %v12140_v30, %v12144_v32  ;;  %v18193_v31 = vcombine.low %v12140_v30, %v12144_v32  ;;  %v18195_v36 = vcombine.low %v12141_v34, %v12145_v61  ;;  %v12185_v30 = vld [vmem:[#allocation17 + $0x8f8] sm:$0xff] }
 0x946   :  { %15398 = vmatpush1.bf16.msra.mxu0 %v18145_v60  ;;  %v18196_v60 = vcombine.high %v12141_v34, %v12145_v61 }
 0x947   :  { %15562 = vmatpush1.bf16.msra.mxu1 %v18147_v26  ;;  %15399 = vmatprep.subr.bf16.mxu0 %v18154_v9  ;;  %v12148_v26 = vld [vmem:[#allocation17 + $0x7d0] sm:$0xff] }
 0x948   :  { %15563 = vmatprep.subr.bf16.mxu1 %v18156_v41  ;;  %v12152_v9 = vld [vmem:[#allocation17 + $0x7f0] sm:$0xff]  ;;  %v12149_v41 = vld [vmem:[#allocation17 + $0x7d8] sm:$0xff] }
 0x949   :  { %v18202_v38 = vcombine.high %v12148_v26, %v12152_v9  ;;  %v18201_v40 = vcombine.low %v12148_v26, %v12152_v9  ;;  %v18203_v21 = vcombine.low %v12149_v41, %v12153_v23 }
 0x94a   :  { %15400 = vmatpush1.bf16.msra.mxu0 %v18153_v10  ;;  %v18204_v10 = vcombine.high %v12149_v41, %v12153_v23  ;;  %v12196_v23 = vld [vmem:[#allocation17 + $0x950] sm:$0xff] }
 0x94b   :  { %15564 = vmatpush1.bf16.msra.mxu1 %v18155_v28  ;;  %15401 = vmatprep.subr.bf16.mxu0 %v18162_v27  ;;  %v12156_v28 = vld [vmem:[#allocation17 + $0x810] sm:$0xff] }
 0x94c   :  { %15565 = vmatprep.subr.bf16.mxu1 %v18164_v6  ;;  %v12160_v27 = vld [vmem:[#allocation17 + $0x830] sm:$0xff]  ;;  %v12157_v6 = vld [vmem:[#allocation17 + $0x818] sm:$0xff] }
 0x94d   :  { %v18210_v52 = vcombine.high %v12156_v28, %v12160_v27  ;;  %v18211_v14 = vcombine.low %v12157_v6, %v12161_v39 }
 0x94e   :  { %15402 = vmatpush1.bf16.msra.mxu0 %v18161_v54  ;;  %v18212_v54 = vcombine.high %v12157_v6, %v12161_v39  ;;  %v12204_v39 = vld [vmem:[#allocation17 + $0x990] sm:$0xff] }
 0x94f   :  { %15566 = vmatpush1.bf16.msra.mxu1 %v18163_v56  ;;  %15403 = vmatprep.subr.bf16.mxu0 %v18170_v5  ;;  %v12164_v56 = vld [vmem:[#allocation17 + $0x850] sm:$0xff] }
 0x950   :  { %15567 = vmatprep.subr.bf16.mxu1 %v18172_v18  ;;  %v12168_v5 = vld [vmem:[#allocation17 + $0x870] sm:$0xff]  ;;  %v18209_v18 = vcombine.low %v12156_v28, %v12160_v27 }
 0x951   :  { %v18218_v16 = vcombine.high %v12164_v56, %v12168_v5  ;;  %v18217_v8 = vcombine.low %v12164_v56, %v12168_v5 }
 0x952   :  { %15404 = vmatpush1.bf16.msra.mxu0 %v18169_v24  ;;  %v12172_v24 = vld [vmem:[#allocation17 + $0x890] sm:$0xff] }
 0x953   :  { %15568 = vmatpush1.bf16.msra.mxu1 %v18171_v51  ;;  %15405 = vmatprep.subr.bf16.mxu0 %v18178_v7  ;;  %v12176_v51 = vld [vmem:[#allocation17 + $0x8b0] sm:$0xff]  ;;  %v18220_v7 = vcombine.high %v12165_v42, %v12169_v3 }
 0x954   :  { %15569 = vmatprep.subr.bf16.mxu1 %v18180_v46  ;;  %v12173_v46 = vld [vmem:[#allocation17 + $0x898] sm:$0xff]  ;;  %v18226_v62 = vcombine.high %v12172_v24, %v12176_v51  ;;  %v18225_v32 = vcombine.low %v12172_v24, %v12176_v51  ;;  %v12212_v42 = vld [vmem:[#allocation17 + $0x9d0] sm:$0xff] }
 0x955   :  { %v12216_v3 = vld [vmem:[#allocation17 + $0x9f0] sm:$0xff] }
 0x956   :  { %15406 = vmatpush1.bf16.msra.mxu0 %v18177_v58  ;;  %v18228_v58 = vcombine.high %v12173_v46, %v12177_v0 }
 0x957   :  { %15570 = vmatpush1.bf16.msra.mxu1 %v18179_v43  ;;  %15407 = vmatprep.subr.bf16.mxu0 %v18186_v29  ;;  %v12180_v43 = vld [vmem:[#allocation17 + $0x8d0] sm:$0xff] }
 0x958   :  { %15571 = vmatprep.subr.bf16.mxu1 %v18188_v57  ;;  %v12184_v29 = vld [vmem:[#allocation17 + $0x8f0] sm:$0xff]  ;;  %v12181_v57 = vld [vmem:[#allocation17 + $0x8d8] sm:$0xff] }
 0x959   :  { %v18234_v34 = vcombine.high %v12180_v43, %v12184_v29  ;;  %v18236_v61 = vcombine.high %v12181_v57, %v12185_v30  ;;  %v18235_v26 = vcombine.low %v12181_v57, %v12185_v30  ;;  %v12228_v30 = vld [vmem:[#allocation17 + $0xa50] sm:$0xff] }
 0x95a   :  { %15408 = vmatpush1.bf16.msra.mxu0 %v18185_v17  ;;  %v12188_v17 = vld [vmem:[#allocation17 + $0x910] sm:$0xff] }
 0x95b   :  { %15572 = vmatpush1.bf16.msra.mxu1 %v18187_v33  ;;  %15409 = vmatprep.subr.bf16.mxu0 %v18194_v15  ;;  %v12192_v33 = vld [vmem:[#allocation17 + $0x930] sm:$0xff]  ;;  %v12189_v15 = vld [vmem:[#allocation17 + $0x918] sm:$0xff] }
 0x95c   :  { %15573 = vmatprep.subr.bf16.mxu1 %v18196_v60  ;;  %v12193_v60 = vld [vmem:[#allocation17 + $0x938] sm:$0xff]  ;;  %v18242_v9 = vcombine.high %v12188_v17, %v12192_v33 }
 0x95d   :  { %v18244_v41 = vcombine.high %v12189_v15, %v12193_v60  ;;  %v18243_v28 = vcombine.low %v12189_v15, %v12193_v60  ;;  %v12236_v60 = vld [vmem:[#allocation17 + $0xa90] sm:$0xff] }
 0x95e   :  { %15410 = vmatpush1.bf16.msra.mxu0 %v18193_v31  ;;  %v12200_v31 = vld [vmem:[#allocation17 + $0x970] sm:$0xff] }
 0x95f   :  { %15574 = vmatpush1.bf16.msra.mxu1 %v18195_v36  ;;  %15411 = vmatprep.subr.bf16.mxu0 %v18202_v38  ;;  %v12197_v36 = vld [vmem:[#allocation17 + $0x958] sm:$0xff]  ;;  %v18250_v27 = vcombine.high %v12196_v23, %v12200_v31 }
 0x960   :  { %15575 = vmatprep.subr.bf16.mxu1 %v18204_v10  ;;  %v12201_v38 = vld [vmem:[#allocation17 + $0x978] sm:$0xff]  ;;  %v18241_v10 = vcombine.low %v12188_v17, %v12192_v33 }
 0x961   :  { %v18252_v6 = vcombine.high %v12197_v36, %v12201_v38  ;;  %v18251_v56 = vcombine.low %v12197_v36, %v12201_v38  ;;  %v12244_v38 = vld [vmem:[#allocation17 + $0xad0] sm:$0xff] }
 0x962   :  { %15412 = vmatpush1.bf16.msra.mxu0 %v18201_v40  ;;  %v12208_v40 = vld [vmem:[#allocation17 + $0x9b0] sm:$0xff] }
 0x963   :  { %15576 = vmatpush1.bf16.msra.mxu1 %v18203_v21  ;;  %15422 = vmatprep.subr.bf16.mxu0 %v18210_v52  ;;  %v12205_v21 = vld [vmem:[#allocation17 + $0x998] sm:$0xff]  ;;  %v18258_v5 = vcombine.high %v12204_v39, %v12208_v40  ;;  %v18257_v24 = vcombine.low %v12204_v39, %v12208_v40 }
 0x964   :  { %15586 = vmatprep.subr.bf16.mxu1 %v18212_v54  ;;  %v12209_v52 = vld [vmem:[#allocation17 + $0x9b8] sm:$0xff]  ;;  %v18249_v54 = vcombine.low %v12196_v23, %v12200_v31 }
 0x965   :  { %15414 = vmatmul.mubr.bf16.vlgmr.msra.gmra.mrb[36].mxu0 %v19891_v49  ;;  %v18259_v51 = vcombine.low %v12205_v21, %v12209_v52 }
 0x966   :  { %15578 = vmatmul.mubr.bf16.vlgmr.msra.gmra.mrb[36].mxu1 %v19891_v49  ;;  %15423 = vmatpush1.bf16.msra.mxu0 %v18209_v18  ;;  %v18227_v49 = vcombine.low %v12173_v46, %v12177_v0  ;;  %v18260_v18 = vcombine.high %v12205_v21, %v12209_v52  ;;  %v12220_v0 = vld [vmem:[#allocation17 + $0xa10] sm:$0xff] }
 0x967   :  { %15454 = vmatprep.mubr.bf16.mxu0 %v19905_v35  ;;  %15587 = vmatpush1.bf16.msra.mxu1 %v18211_v14  ;;  %v12213_v14 = vld [vmem:[#allocation17 + $0x9d8] sm:$0xff]  ;;  %v12252_v52 = vld [vmem:[#allocation17 + $0xb10] sm:$0xff] }
 0x968   :  { %15618 = vmatprep.mubr.bf16.mxu1 %v19905_v35  ;;  %15424 = vmatprep.subr.bf16.mxu0 %v18218_v16  ;;  %v18233_v35 = vcombine.low %v12180_v43, %v12184_v29  ;;  %v12217_v16 = vld [vmem:[#allocation17 + $0x9f8] sm:$0xff] }
 0x969   :  { %15588 = vmatprep.subr.bf16.mxu1 %v18220_v7  ;;  %v18266_v7 = vcombine.high %v12212_v42, %v12216_v3  ;;  %v18268_v46 = vcombine.high %v12213_v14, %v12217_v16  ;;  %v18267_v43 = vcombine.low %v12213_v14, %v12217_v16  ;;  %v12260_v16 = vld [vmem:[#allocation17 + $0xb50] sm:$0xff] }
 0x96a   :  { %15425 = vmatpush1.bf16.msra.mxu0 %v18217_v8  ;;  %v12224_v8 = vld [vmem:[#allocation17 + $0xa30] sm:$0xff] }
 0x96b   :  { %15589 = vmatpush1.bf16.msra.mxu1 %v18219_v19  ;;  %15426 = vmatprep.subr.bf16.mxu0 %v18226_v62  ;;  %v12221_v19 = vld [vmem:[#allocation17 + $0xa18] sm:$0xff]  ;;  %v18274_v29 = vcombine.high %v12220_v0, %v12224_v8 }
 0x96c   :  { %15590 = vmatprep.subr.bf16.mxu1 %v18228_v58  ;;  %v12225_v62 = vld [vmem:[#allocation17 + $0xa38] sm:$0xff]  ;;  %v18265_v58 = vcombine.low %v12212_v42, %v12216_v3 }
 0x96d   :  { %v18276_v57 = vcombine.high %v12221_v19, %v12225_v62  ;;  %v18275_v17 = vcombine.low %v12221_v19, %v12225_v62  ;;  %v12268_v62 = vld [vmem:[#allocation17 + $0xb90] sm:$0xff] }
 0x96e   :  { %15427 = vmatpush1.bf16.msra.mxu0 %v18225_v32  ;;  %v12232_v32 = vld [vmem:[#allocation17 + $0xa70] sm:$0xff] }
 0x96f   :  { %15591 = vmatpush1.bf16.msra.mxu1 %v18227_v49  ;;  %15428 = vmatprep.subr.bf16.mxu0 %v18234_v34  ;;  %v12229_v49 = vld [vmem:[#allocation17 + $0xa58] sm:$0xff]  ;;  %v18282_v33 = vcombine.high %v12228_v30, %v12232_v32 }
 0x970   :  { %15592 = vmatprep.subr.bf16.mxu1 %v18236_v61  ;;  %v12233_v34 = vld [vmem:[#allocation17 + $0xa78] sm:$0xff]  ;;  %v18273_v61 = vcombine.low %v12220_v0, %v12224_v8 }
 0x971   :  { %v18284_v15 = vcombine.high %v12229_v49, %v12233_v34  ;;  %v18283_v23 = vcombine.low %v12229_v49, %v12233_v34  ;;  %v12276_v34 = vld [vmem:[#allocation17 + $0xbd0] sm:$0xff] }
 0x972   :  { %15429 = vmatpush1.bf16.msra.mxu0 %v18233_v35  ;;  %v12240_v35 = vld [vmem:[#allocation17 + $0xab0] sm:$0xff] }
 0x973   :  { %15593 = vmatpush1.bf16.msra.mxu1 %v18235_v26  ;;  %15430 = vmatprep.subr.bf16.mxu0 %v18242_v9  ;;  %v12237_v26 = vld [vmem:[#allocation17 + $0xa98] sm:$0xff]  ;;  %v18290_v31 = vcombine.high %v12236_v60, %v12240_v35 }
 0x974   :  { %15594 = vmatprep.subr.bf16.mxu1 %v18244_v41  ;;  %v12241_v9 = vld [vmem:[#allocation17 + $0xab8] sm:$0xff]  ;;  %v18281_v41 = vcombine.low %v12228_v30, %v12232_v32 }
 0x975   :  { %v18292_v36 = vcombine.high %v12237_v26, %v12241_v9  ;;  %v18291_v39 = vcombine.low %v12237_v26, %v12241_v9  ;;  %v12284_v9 = vld [vmem:[#allocation17 + $0xc10] sm:$0xff] }
 0x976   :  { %15431 = vmatpush1.bf16.msra.mxu0 %v18241_v10  ;;  %v12248_v10 = vld [vmem:[#allocation17 + $0xaf0] sm:$0xff] }
 0x977   :  { %15595 = vmatpush1.bf16.msra.mxu1 %v18243_v28  ;;  %15432 = vmatprep.subr.bf16.mxu0 %v18250_v27  ;;  %v12245_v28 = vld [vmem:[#allocation17 + $0xad8] sm:$0xff]  ;;  %v18298_v40 = vcombine.high %v12244_v38, %v12248_v10 }
 0x978   :  { %15596 = vmatprep.subr.bf16.mxu1 %v18252_v6  ;;  %v12249_v27 = vld [vmem:[#allocation17 + $0xaf8] sm:$0xff]  ;;  %v18289_v6 = vcombine.low %v12236_v60, %v12240_v35 }
 0x979   :  { %v18300_v21 = vcombine.high %v12245_v28, %v12249_v27  ;;  %v18299_v42 = vcombine.low %v12245_v28, %v12249_v27  ;;  %v12292_v27 = vld [vmem:[#allocation17 + $0xc50] sm:$0xff] }
 0x97a   :  { %15433 = vmatpush1.bf16.msra.mxu0 %v18249_v54  ;;  %v12256_v54 = vld [vmem:[#allocation17 + $0xb30] sm:$0xff] }
 0x97b   :  { %15597 = vmatpush1.bf16.msra.mxu1 %v18251_v56  ;;  %15434 = vmatprep.subr.bf16.mxu0 %v18258_v5  ;;  %v12253_v56 = vld [vmem:[#allocation17 + $0xb18] sm:$0xff]  ;;  %v18306_v3 = vcombine.high %v12252_v52, %v12256_v54 }
 0x97c   :  { %15598 = vmatprep.subr.bf16.mxu1 %v18260_v18  ;;  %v12257_v5 = vld [vmem:[#allocation17 + $0xb38] sm:$0xff]  ;;  %v18297_v18 = vcombine.low %v12244_v38, %v12248_v10 }
 0x97d   :  { %v18308_v14 = vcombine.high %v12253_v56, %v12257_v5  ;;  %v18307_v0 = vcombine.low %v12253_v56, %v12257_v5  ;;  %v12300_v56 = vld [vmem:[#allocation17 + $0xc90] sm:$0xff] }
 0x97e   :  { %15435 = vmatpush1.bf16.msra.mxu0 %v18257_v24  ;;  %v12264_v24 = vld [vmem:[#allocation17 + $0xb70] sm:$0xff] }
 0x97f   :  { %15599 = vmatpush1.bf16.msra.mxu1 %v18259_v51  ;;  %15436 = vmatprep.subr.bf16.mxu0 %v18266_v7  ;;  %v12261_v51 = vld [vmem:[#allocation17 + $0xb58] sm:$0xff]  ;;  %v18314_v8 = vcombine.high %v12260_v16, %v12264_v24  ;;  %v12304_v5 = vld [vmem:[#allocation17 + $0xcb0] sm:$0xff] }
 0x980   :  { %15600 = vmatprep.subr.bf16.mxu1 %v18268_v46  ;;  %v12265_v7 = vld [vmem:[#allocation17 + $0xb78] sm:$0xff]  ;;  %v18305_v46 = vcombine.low %v12252_v52, %v12256_v54 }
 0x981   :  { %v18316_v19 = vcombine.high %v12261_v51, %v12265_v7  ;;  %v18315_v30 = vcombine.low %v12261_v51, %v12265_v7  ;;  %v12308_v7 = vld [vmem:[#allocation17 + $0xcd0] sm:$0xff] }
 0x982   :  { %15437 = vmatpush1.bf16.msra.mxu0 %v18265_v58  ;;  %v12272_v58 = vld [vmem:[#allocation17 + $0xbb0] sm:$0xff] }
 0x983   :  { %15601 = vmatpush1.bf16.msra.mxu1 %v18267_v43  ;;  %15438 = vmatprep.subr.bf16.mxu0 %v18274_v29  ;;  %v12269_v43 = vld [vmem:[#allocation17 + $0xb98] sm:$0xff]  ;;  %v18322_v32 = vcombine.high %v12268_v62, %v12272_v58 }
 0x984   :  { %15602 = vmatprep.subr.bf16.mxu1 %v18276_v57  ;;  %v12273_v29 = vld [vmem:[#allocation17 + $0xbb8] sm:$0xff]  ;;  %v18313_v57 = vcombine.low %v12260_v16, %v12264_v24  ;;  %v18354_v24 = vcombine.high %v12300_v56, %v12304_v5 }
 0x985   :  { %v18324_v49 = vcombine.high %v12269_v43, %v12273_v29  ;;  %v18323_v60 = vcombine.low %v12269_v43, %v12273_v29  ;;  %v12316_v43 = vld [vmem:[#allocation17 + $0xd10] sm:$0xff] }
 0x986   :  { %15439 = vmatpush1.bf16.msra.mxu0 %v18273_v61  ;;  %v12280_v61 = vld [vmem:[#allocation17 + $0xbf0] sm:$0xff] }
 0x987   :  { %15603 = vmatpush1.bf16.msra.mxu1 %v18275_v17  ;;  %15440 = vmatprep.subr.bf16.mxu0 %v18282_v33  ;;  %v12277_v17 = vld [vmem:[#allocation17 + $0xbd8] sm:$0xff]  ;;  %v18330_v35 = vcombine.high %v12276_v34, %v12280_v61  ;;  %v12320_v29 = vld [vmem:[#allocation17 + $0xd30] sm:$0xff] }
 0x988   :  { %15604 = vmatprep.subr.bf16.mxu1 %v18284_v15  ;;  %v12281_v33 = vld [vmem:[#allocation17 + $0xbf8] sm:$0xff]  ;;  %v18321_v15 = vcombine.low %v12268_v62, %v12272_v58 }
 0x989   :  { %v18332_v26 = vcombine.high %v12277_v17, %v12281_v33  ;;  %v18331_v38 = vcombine.low %v12277_v17, %v12281_v33  ;;  %v12328_v17 = vld [vmem:[#allocation17 + $0xd70] sm:$0xff]  ;;  %v12325_v33 = vld [vmem:[#allocation17 + $0xd58] sm:$0xff] }
 0x98a   :  { %15441 = vmatpush1.bf16.msra.mxu0 %v18281_v41  ;;  %v12288_v41 = vld [vmem:[#allocation17 + $0xc30] sm:$0xff] }
 0x98b   :  { %15605 = vmatpush1.bf16.msra.mxu1 %v18283_v23  ;;  %15442 = vmatprep.subr.bf16.mxu0 %v18290_v31  ;;  %v12285_v23 = vld [vmem:[#allocation17 + $0xc18] sm:$0xff]  ;;  %v18338_v10 = vcombine.high %v12284_v9, %v12288_v41 }
 0x98c   :  { %15606 = vmatprep.subr.bf16.mxu1 %v18292_v36  ;;  %v12289_v31 = vld [vmem:[#allocation17 + $0xc38] sm:$0xff]  ;;  %v18329_v36 = vcombine.low %v12276_v34, %v12280_v61  ;;  %v12324_v61 = vld [vmem:[#allocation17 + $0xd50] sm:$0xff] }
 0x98d   :  { %v18340_v28 = vcombine.high %v12285_v23, %v12289_v31  ;;  %v18339_v52 = vcombine.low %v12285_v23, %v12289_v31  ;;  %v12336_v23 = vld [vmem:[#allocation17 + $0xdb0] sm:$0xff]  ;;  %v12333_v31 = vld [vmem:[#allocation17 + $0xd98] sm:$0xff] }
 0x98e   :  { %15443 = vmatpush1.bf16.msra.mxu0 %v18289_v6  ;;  %v12296_v6 = vld [vmem:[#allocation17 + $0xc70] sm:$0xff] }
 0x98f   :  { %15607 = vmatpush1.bf16.msra.mxu1 %v18291_v39  ;;  %15444 = vmatprep.subr.bf16.mxu0 %v18298_v40  ;;  %v18337_v39 = vcombine.low %v12284_v9, %v12288_v41  ;;  %v12293_v40 = vld [vmem:[#allocation17 + $0xc58] sm:$0xff]  ;;  %v18346_v54 = vcombine.high %v12292_v27, %v12296_v6  ;;  %v12332_v41 = vld [vmem:[#allocation17 + $0xd90] sm:$0xff] }
 0x990   :  { %15608 = vmatprep.subr.bf16.mxu1 %v18300_v21  ;;  %v12297_v21 = vld [vmem:[#allocation17 + $0xc78] sm:$0xff] }
 0x991   :  { %v18347_v16 = vcombine.low %v12293_v40, %v12297_v21 }
 0x992   :  { %15445 = vmatpush1.bf16.msra.mxu0 %v18297_v18  ;;  %v18348_v18 = vcombine.high %v12293_v40, %v12297_v21  ;;  %v12340_v40 = vld [vmem:[#allocation17 + $0xdd0] sm:$0xff] }
 0x993   :  { %15609 = vmatpush1.bf16.msra.mxu1 %v18299_v42  ;;  %15446 = vmatprep.subr.bf16.mxu0 %v18306_v3  ;;  %v12301_v42 = vld [vmem:[#allocation17 + $0xc98] sm:$0xff]  ;;  %v12344_v21 = vld [vmem:[#allocation17 + $0xdf0] sm:$0xff] }
 0x994   :  { %15610 = vmatprep.subr.bf16.mxu1 %v18308_v14  ;;  %v12305_v3 = vld [vmem:[#allocation17 + $0xcb8] sm:$0xff]  ;;  %v18345_v14 = vcombine.low %v12292_v27, %v12296_v6 }
 0x995   :  { %v18356_v51 = vcombine.high %v12301_v42, %v12305_v3 }
 0x996   :  { %15447 = vmatpush1.bf16.msra.mxu0 %v18305_v46  ;;  %v12312_v46 = vld [vmem:[#allocation17 + $0xcf0] sm:$0xff] }
 0x997   :  { %15611 = vmatpush1.bf16.msra.mxu1 %v18307_v0  ;;  %15448 = vmatprep.subr.bf16.mxu0 %v18314_v8  ;;  %v12309_v0 = vld [vmem:[#allocation17 + $0xcd8] sm:$0xff]  ;;  %v18362_v62 = vcombine.high %v12308_v7, %v12312_v46 }
 0x998   :  { %15612 = vmatprep.subr.bf16.mxu1 %v18316_v19  ;;  %v12313_v8 = vld [vmem:[#allocation17 + $0xcf8] sm:$0xff]  ;;  %v18353_v19 = vcombine.low %v12300_v56, %v12304_v5 }
 0x999   :  { %v18364_v58 = vcombine.high %v12309_v0, %v12313_v8  ;;  %v12341_v56 = vld [vmem:[#allocation17 + $0xdd8] sm:$0xff] }
 0x99a   :  { %15449 = vmatpush1.bf16.msra.mxu0 %v18313_v57  ;;  %v12317_v57 = vld [vmem:[#allocation17 + $0xd18] sm:$0xff] }
 0x99b   :  { %15613 = vmatpush1.bf16.msra.mxu1 %v18315_v30  ;;  %15450 = vmatprep.subr.bf16.mxu0 %v18322_v32  ;;  %v12321_v30 = vld [vmem:[#allocation17 + $0xd38] sm:$0xff]  ;;  %v18363_v32 = vcombine.low %v12309_v0, %v12313_v8  ;;  %v12352_v0 = vld [vmem:[#allocation17 + $0xe30] sm:$0xff] }
 0x99c   :  { %15614 = vmatprep.subr.bf16.mxu1 %v18324_v49  ;;  %v18370_v49 = vcombine.high %v12316_v43, %v12320_v29  ;;  %v18372_v34 = vcombine.high %v12317_v57, %v12321_v30  ;;  %v12345_v5 = vld [vmem:[#allocation17 + $0xdf8] sm:$0xff] }
 0x99d   :  { %v12349_v8 = vld [vmem:[#allocation17 + $0xe18] sm:$0xff] }
 0x99e   :  { %15451 = vmatpush1.bf16.msra.mxu0 %v18321_v15  ;;  %v12329_v15 = vld [vmem:[#allocation17 + $0xd78] sm:$0xff] }
 0x99f   :  { %15615 = vmatpush1.bf16.msra.mxu1 %v18323_v60  ;;  %15452 = vmatprep.subr.bf16.mxu0 %v18330_v35  ;;  %v18369_v60 = vcombine.low %v12316_v43, %v12320_v29  ;;  %v18371_v35 = vcombine.low %v12317_v57, %v12321_v30  ;;  %v18380_v9 = vcombine.high %v12325_v33, %v12329_v15  ;;  %v12356_v29 = vld [vmem:[#allocation17 + $0xe50] sm:$0xff]  ;;  %v12357_v30 = vld [vmem:[#allocation17 + $0xe58] sm:$0xff] }
 0x9a0   :  { %15616 = vmatprep.subr.bf16.mxu1 %v18332_v26  ;;  %v18378_v26 = vcombine.high %v12324_v61, %v12328_v17  ;;  %v12360_v57 = vld [vmem:[#allocation17 + $0xe70] sm:$0xff] }
 0x9a2   :  { %15453 = vmatpush1.bf16.msra.mxu0 %v18329_v36  ;;  %v12337_v36 = vld [vmem:[#allocation17 + $0xdb8] sm:$0xff] }
 0x9a3   :  { %15617 = vmatpush1.bf16.msra.mxu1 %v18331_v38  ;;  %15463 = vmatprep.subr.bf16.mxu0 %v18338_v10  ;;  %v18377_v38 = vcombine.low %v12324_v61, %v12328_v17  ;;  %v18379_v10 = vcombine.low %v12325_v33, %v12329_v15  ;;  %v12364_v17 = vld [vmem:[#allocation17 + $0xe90] sm:$0xff]  ;;  %v12365_v15 = vld [vmem:[#allocation17 + $0xe98] sm:$0xff] }
 0x9a4   :  { %15627 = vmatprep.subr.bf16.mxu1 %v18340_v28  ;;  %v18386_v28 = vcombine.high %v12332_v41, %v12336_v23  ;;  %v12368_v33 = vld [vmem:[#allocation17 + $0xeb0] sm:$0xff] }
 0x9a5   :  { %15455 = vmatmul.mubr.bf16.vlgmr.msra.gmra.mrb[36].mxu0 %v19907_v50 }
 0x9a6   :  { %15619 = vmatmul.mubr.bf16.vlgmr.msra.gmra.mrb[36].mxu1 %v19907_v50  ;;  %15464 = vmatpush1.bf16.msra.mxu0 %v18337_v39  ;;  %v18355_v50 = vcombine.low %v12301_v42, %v12305_v3  ;;  %v18388_v39 = vcombine.high %v12333_v31, %v12337_v36  ;;  %v18385_v3 = vcombine.low %v12332_v41, %v12336_v23  ;;  %v12372_v23 = vld [vmem:[#allocation17 + $0xed0] sm:$0xff] }
 0x9a7   :  { %15495 = vmatprep.mubr.bf16.mxu0 %v19911_v2  ;;  %15628 = vmatpush1.bf16.msra.mxu1 %v18339_v52 }
 0x9a8   :  { %15659 = vmatprep.mubr.bf16.mxu1 %v19911_v2  ;;  %15465 = vmatprep.subr.bf16.mxu0 %v18346_v54  ;;  %v18361_v2 = vcombine.low %v12308_v7, %v12312_v46  ;;  %v18396_v7 = vcombine.high %v12341_v56, %v12345_v5  ;;  %v12348_v46 = vld [vmem:[#allocation17 + $0xe10] sm:$0xff] }
 0x9a9   :  { %15629 = vmatprep.subr.bf16.mxu1 %v18348_v18 }
 0x9aa   :  { %15466 = vmatpush1.bf16.msra.mxu0 %v18345_v14 }
 0x9ab   :  { %15630 = vmatpush1.bf16.msra.mxu1 %v18347_v16  ;;  %15467 = vmatprep.subr.bf16.mxu0 %v18354_v24  ;;  %v18387_v24 = vcombine.low %v12333_v31, %v12337_v36  ;;  %v12376_v31 = vld [vmem:[#allocation17 + $0xef0] sm:$0xff]  ;;  %v12373_v36 = vld [vmem:[#allocation17 + $0xed8] sm:$0xff] }
 0x9ac   :  { %15631 = vmatprep.subr.bf16.mxu1 %v18356_v51  ;;  %v18394_v51 = vcombine.high %v12340_v40, %v12344_v21 }
 0x9ae   :  { %15468 = vmatpush1.bf16.msra.mxu0 %v18353_v19  ;;  %v12353_v19 = vld [vmem:[#allocation17 + $0xe38] sm:$0xff] }
 0x9af   :  { %15632 = vmatpush1.bf16.msra.mxu1 %v18355_v50  ;;  %15469 = vmatprep.subr.bf16.mxu0 %v18362_v62  ;;  %v18393_v50 = vcombine.low %v12340_v40, %v12344_v21  ;;  %v18395_v62 = vcombine.low %v12341_v56, %v12345_v5  ;;  %v18404_v43 = vcombine.high %v12349_v8, %v12353_v19  ;;  %v12380_v21 = vld [vmem:[#allocation17 + $0xf10] sm:$0xff]  ;;  %v12381_v5 = vld [vmem:[#allocation17 + $0xf18] sm:$0xff] }
 0x9b0   :  { %15633 = vmatprep.subr.bf16.mxu1 %v18364_v58  ;;  %v18402_v58 = vcombine.high %v12348_v46, %v12352_v0  ;;  %v12384_v56 = vld [vmem:[#allocation17 + $0xf30] sm:$0xff] }
 0x9b2   :  { %15470 = vmatpush1.bf16.msra.mxu0 %v18361_v2  ;;  %v12361_v2 = vld [vmem:[#allocation17 + $0xe78] sm:$0xff] }
 0x9b3   :  { %15634 = vmatpush1.bf16.msra.mxu1 %v18363_v32  ;;  %15471 = vmatprep.subr.bf16.mxu0 %v18370_v49  ;;  %v18401_v32 = vcombine.low %v12348_v46, %v12352_v0  ;;  %v18403_v49 = vcombine.low %v12349_v8, %v12353_v19  ;;  %v18412_v61 = vcombine.high %v12357_v30, %v12361_v2  ;;  %v12393_v46 = vld [vmem:[#allocation17 + $0xf78] sm:$0xff]  ;;  %v19946_v0 = vld [vmem:[#allocation19] sm:$0xff] }
 0x9b4   :  { %15635 = vmatprep.subr.bf16.mxu1 %v18372_v34  ;;  %v18410_v34 = vcombine.high %v12356_v29, %v12360_v57  ;;  %v18433_v8 = vcombine.low %v12380_v21, %v12384_v56 }
 0x9b6   :  { %15472 = vmatpush1.bf16.msra.mxu0 %v18369_v60  ;;  %v12369_v60 = vld [vmem:[#allocation17 + $0xeb8] sm:$0xff] }
 0x9b7   :  { %15636 = vmatpush1.bf16.msra.mxu1 %v18371_v35  ;;  %15473 = vmatprep.subr.bf16.mxu0 %v18378_v26  ;;  %v18409_v35 = vcombine.low %v12356_v29, %v12360_v57  ;;  %v18411_v26 = vcombine.low %v12357_v30, %v12361_v2  ;;  %v18420_v41 = vcombine.high %v12365_v15, %v12369_v60  ;;  %v12397_v57 = vld [vmem:[#allocation17 + $0xf98] sm:$0xff] }
 0x9b8   :  { %v19938_v27 = vpop.f32.mrb[32].mxu0  ;;  %v19940_v6 = vpop.f32.mrb[32].mxu1  ;;  %15637 = vmatprep.subr.bf16.mxu1 %v18380_v9  ;;  %v18418_v9 = vcombine.high %v12364_v17, %v12368_v33  ;;  %v12419_v29 = vrot.slane %v19946_v0, %v19521_v47  ;;  %v12401_v30 = vld [vmem:[#allocation17 + $0xfb8] sm:$0xff]  ;;  %v12427_v2 = vrot.slane %v19946_v0, %v19524_v48 }
 0x9b9   :  { %v19942_v52 = vpop.f32.mrb[33].mxu0  ;;  %v19944_v54 = vpop.f32.mrb[33].mxu1  ;;  %v18451_v48 = vcombine.low %v12397_v57, %v12401_v30 }
 0x9ba   :  { %v15173_v18 = vpop.f32.mrb[34].mxu0  ;;  %v15337_v42 = vpop.f32.mrb[34].mxu1  ;;  %15474 = vmatpush1.bf16.msra.mxu0 %v18377_v38  ;;  %v12377_v38 = vld [vmem:[#allocation17 + $0xef8] sm:$0xff]  ;;  %v18641_v47 = vadd.f32 %v19944_v54, %v12427_v2  ;;  %v18880_v2 = vld [vmem:[#allocation20 + $0xa8] sm:$0xff]  }
 0x9bb   :  { %15638 = vmatpush1.bf16.msra.mxu1 %v18379_v10  ;;  %v15174_v14 = vpop.f32.mrb[35].mxu0  ;;  %v15338_v16 = vpop.f32.mrb[35].mxu1  ;;  %15475 = vmatprep.subr.bf16.mxu0 %v18386_v28  ;;  %v18417_v10 = vcombine.low %v12364_v17, %v12368_v33  ;;  %v18419_v28 = vcombine.low %v12365_v15, %v12369_v60  ;;  %v18428_v40 = vcombine.high %v12373_v36, %v12377_v38  ;;  %v12385_v18 = vld [vmem:[#allocation17 + $0xf38] sm:$0xff]  ;;  %v12404_v17 = vld [vmem:[#allocation17 + $0xfd0] sm:$0xff] }
 0x9bc   :  { %15639 = vmatprep.subr.bf16.mxu1 %v18388_v39  ;;  %v18426_v39 = vcombine.high %v12372_v23, %v12376_v31  ;;  %v18425_v42 = vcombine.low %v12372_v23, %v12376_v31  ;;  %v18434_v14 = vcombine.high %v12380_v21, %v12384_v56  ;;  %v18436_v16 = vcombine.high %v12381_v5, %v12385_v18  ;;  %v12408_v33 = vld [vmem:[#allocation17 + $0xff0] sm:$0xff]  ;;  %v12405_v60 = vld [vmem:[#allocation17 + $0xfd8] sm:$0xff] }
 0x9bd   :  { %v18435_v19 = vcombine.low %v12381_v5, %v12385_v18  ;;  %v18639_v15 = vadd.f32 %v19942_v52, %v12419_v29  ;;  %v15671_v31 = vmax.f32 %v18641_v47, 0.0  ;;  %v18857_v52 = vld [vmem:[#allocation20 + $0x40] sm:$0xff]   ;;  %v18861_v21 = vld [vmem:[#allocation20 + $0x48] sm:$0xff]  }
 0x9be   :  { %15476 = vmatpush1.bf16.msra.mxu0 %v18385_v3  ;;  %v18427_v3 = vcombine.low %v12373_v36, %v12377_v38  ;;  %v18457_v36 = vcombine.low %v12404_v17, %v12408_v33  ;;  %v18862_v5 = vld [vmem:[#allocation20 + $0xc8] sm:$0xff]  }
 0x9bf   :  { %15640 = vmatpush1.bf16.msra.mxu1 %v18387_v24  ;;  %15477 = vmatprep.subr.bf16.mxu0 %v18394_v51  ;;  %v12388_v24 = vld [vmem:[#allocation17 + $0xf50] sm:$0xff]  ;;  %v15669_v23 = vmax.f32 %v18639_v15, 0.0  ;;  %v18886_v15 = vld [vmem:[#allocation20 + $0xf8] sm:$0xff]  }
 0x9c0   :  { %15641 = vmatprep.subr.bf16.mxu1 %v18396_v7  ;;  %v12392_v51 = vld [vmem:[#allocation17 + $0xf70] sm:$0xff]  ;;  %v12389_v7 = vld [vmem:[#allocation17 + $0xf58] sm:$0xff] }
 0x9c1   :  { %v15677_v54 = vadd.f32 %v15669_v23, %v19746_v53  ;;  %v18864_v53 = vld [vmem:[#allocation20 + $0x88] sm:$0xff]  }
 0x9c2   :  { %15478 = vmatpush1.bf16.msra.mxu0 %v18393_v50  ;;  %v18442_v50 = vcombine.high %v12388_v24, %v12392_v51  ;;  %v18878_v29 = vld [vmem:[#allocation20 + $0xe8] sm:$0xff]  }
 0x9c3   :  { %15642 = vmatpush1.bf16.msra.mxu1 %v18395_v62  ;;  %15479 = vmatprep.subr.bf16.mxu0 %v18402_v58  ;;  %v18444_v62 = vcombine.high %v12389_v7, %v12393_v46  ;;  %v12396_v58 = vld [vmem:[#allocation17 + $0xf90] sm:$0xff]  ;;  %v15685_v56 = vpack.c.bf16 %v15677_v54, %v15677_v54  ;;  %v18900_v54 = vld [vmem:[#allocation20 + $0x190] sm:$0xff]  }
 0x9c4   :  { %15643 = vmatprep.subr.bf16.mxu1 %v18404_v43  ;;  %v12400_v43 = vld [vmem:[#allocation17 + $0xfb0] sm:$0xff] }
 0x9c5   :  { %v18893_v23 = vld [vmem:[#allocation20 + $0x148] sm:$0xff]  }
 0x9c6   :  { %15480 = vmatpush1.bf16.msra.mxu0 %v18401_v32  ;;  %v18441_v32 = vcombine.low %v12388_v24, %v12392_v51  ;;  %v18869_v24 = vld [vmem:[#allocation20 + $0x58] sm:$0xff]  }
 0x9c7   :  { %15644 = vmatpush1.bf16.msra.mxu1 %v18403_v49  ;;  %15481 = vmatprep.subr.bf16.mxu0 %v18410_v34  ;;  %v18443_v49 = vcombine.low %v12389_v7, %v12393_v46  ;;  %v18450_v34 = vcombine.high %v12396_v58, %v12400_v43  ;;  %v18870_v51 = vld [vmem:[#allocation20 + $0xd8] sm:$0xff]   ;;  %v18873_v46 = vld [vmem:[#allocation20 + $0x60] sm:$0xff]  }
 0x9c8   :  { %15645 = vmatprep.subr.bf16.mxu1 %v18412_v61  ;;  %v18452_v61 = vcombine.high %v12397_v57, %v12401_v30  ;;  %v18872_v7 = vld [vmem:[#allocation20 + $0x98] sm:$0xff]   ;;  %v18879_v57 = vld [vmem:[#allocation20 + $0x28] sm:$0xff]  }
 0x9ca   :  { %15482 = vmatpush1.bf16.msra.mxu0 %v18409_v35  ;;  %v12409_v35 = vld [vmem:[#allocation17 + $0xff8] sm:$0xff] }
 0x9cb   :  { %15646 = vmatpush1.bf16.msra.mxu1 %v18411_v26  ;;  %15483 = vmatprep.subr.bf16.mxu0 %v18418_v9  ;;  %v18449_v26 = vcombine.low %v12396_v58, %v12400_v43  ;;  %v18458_v9 = vcombine.high %v12404_v17, %v12408_v33  ;;  %v18459_v38 = vcombine.low %v12405_v60, %v12409_v35  ;;  %v18877_v58 = vld [vmem:[#allocation20 + $0x68] sm:$0xff]   ;;  %v18885_v17 = vld [vmem:[#allocation20 + $0x78] sm:$0xff]  }
 0x9cc   :  { %15647 = vmatprep.subr.bf16.mxu1 %v18420_v41  ;;  %v18460_v41 = vcombine.high %v12405_v60, %v12409_v35  ;;  %v12423_v43 = vrot.slane %v19946_v0, %v19563_v1  ;;  %v18884_v1 = vld [vmem:[#allocation20 + $0xb0] sm:$0xff]   ;;  %v18888_v35 = vld [vmem:[#allocation20 + $0xb8] sm:$0xff]  }
 0x9ce   :  { %15484 = vmatpush1.bf16.msra.mxu0 %v18417_v10  ;;  %v18858_v10 = vld [vmem:[#allocation20 + $0xc0] sm:$0xff]  }
 0x9cf   :  { %15648 = vmatpush1.bf16.msra.mxu1 %v18419_v28  ;;  %15485 = vmatprep.subr.bf16.mxu0 %v18426_v39  ;;  %v15679_v28 = vadd.f32 %v15671_v31, %v19766_v12  ;;  %v18859_v39 = vld [vmem:[#allocation20] sm:$0xff]   ;;  %v18865_v12 = vld [vmem:[#allocation20 + $0x50] sm:$0xff]  }
 0x9d0   :  { %15649 = vmatprep.subr.bf16.mxu1 %v18428_v40  ;;  %v18860_v40 = vld [vmem:[#allocation20 + $0x80] sm:$0xff]  }
 0x9d1   :  { %v15687_v18 = vpack.c.bf16 %v15679_v28, %v15679_v28  ;;  %v18901_v28 = vld [vmem:[#allocation20 + $0x158] sm:$0xff]  }
 0x9d2   :  { %15486 = vmatpush1.bf16.msra.mxu0 %v18425_v42  ;;  %v18863_v42 = vld [vmem:[#allocation20 + $0x8] sm:$0xff]  }
 0x9d3   :  { %15650 = vmatpush1.bf16.msra.mxu1 %v18427_v3  ;;  %15487 = vmatprep.subr.bf16.mxu0 %v18434_v14  ;;  %v18866_v3 = vld [vmem:[#allocation20 + $0xd0] sm:$0xff]  }
 0x9d4   :  { %15651 = vmatprep.subr.bf16.mxu1 %v18436_v16  ;;  %v18867_v14 = vld [vmem:[#allocation20 + $0x10] sm:$0xff]  }
 0x9d5   :  { %v18868_v16 = vld [vmem:[#allocation20 + $0x90] sm:$0xff]  }
 0x9d6   :  { %15488 = vmatpush1.bf16.msra.mxu0 %v18433_v8  ;;  %v18874_v8 = vld [vmem:[#allocation20 + $0xe0] sm:$0xff]  }
 0x9d7   :  { %15652 = vmatpush1.bf16.msra.mxu1 %v18435_v19  ;;  %15489 = vmatprep.subr.bf16.mxu0 %v18442_v50  ;;  %v18875_v19 = vld [vmem:[#allocation20 + $0x20] sm:$0xff]   ;;  %v12415_v50 = vrot.slane %v19946_v0, %v19516_v45  ;;  %v18882_v45 = vld [vmem:[#allocation20 + $0xf0] sm:$0xff]  }
 0x9d8   :  { %15653 = vmatprep.subr.bf16.mxu1 %v18444_v62  ;;  %v18876_v62 = vld [vmem:[#allocation20 + $0xa0] sm:$0xff]  }
 0x9d9   :  { %v18638_v30 = vadd.f32 %v19938_v27, %v12415_v50  ;;  %v18887_v27 = vld [vmem:[#allocation20 + $0x38] sm:$0xff]   ;;  %v12431_v50 = vrot.slane %v19946_v0, %v19595_v4 }
 0x9da   :  { %15490 = vmatpush1.bf16.msra.mxu0 %v18441_v32  ;;  %v18881_v32 = vld [vmem:[#allocation20 + $0x70] sm:$0xff]  }
 0x9db   :  { %15654 = vmatpush1.bf16.msra.mxu1 %v18443_v49  ;;  %15491 = vmatprep.subr.bf16.mxu0 %v18450_v34  ;;  %v18640_v49 = vadd.f32 %v19940_v6, %v12423_v43  ;;  %v18883_v34 = vld [vmem:[#allocation20 + $0x30] sm:$0xff]   ;;  %v18889_v6 = vld [vmem:[#allocation20 + $0x140] sm:$0xff]   ;;  %v12443_v43 = vrot.slane %v19946_v0, %v19598_v20 }
 0x9dc   :  { %15655 = vmatprep.subr.bf16.mxu1 %v18452_v61  ;;  %v15668_v61 = vmax.f32 %v18638_v30, 0.0 }
 0x9dd   :  { %v15670_v33 = vmax.f32 %v18640_v49, 0.0 }
 0x9de   :  { %15492 = vmatpush1.bf16.msra.mxu0 %v18449_v26  ;;  %v15676_v60 = vadd.f32 %v15668_v61, %v19763_v55  ;;  %v18890_v26 = vld [vmem:[#allocation20 + $0x1c0] sm:$0xff]   ;;  %v18895_v55 = vld [vmem:[#allocation20 + $0x108] sm:$0xff]  }
 0x9df   :  { %15656 = vmatpush1.bf16.msra.mxu1 %v18451_v48  ;;  %15493 = vmatprep.subr.bf16.mxu0 %v18458_v9  ;;  %v15678_v47 = vadd.f32 %v15670_v33, %v19784_v63  ;;  %v18891_v48 = vld [vmem:[#allocation20 + $0x100] sm:$0xff]   ;;  %v18897_v63 = vld [vmem:[#allocation20 + $0x150] sm:$0xff]  }
 0x9e0   :  { %15657 = vmatprep.subr.bf16.mxu1 %v18460_v41  ;;  %v15684_v9 = vpack.c.bf16 %v15676_v60, %v15676_v60  ;;  %v18892_v41 = vld [vmem:[#allocation20 + $0x180] sm:$0xff]  }
 0x9e1   :  { %v15686_v31 = vpack.c.bf16 %v15678_v47, %v15678_v47 }
 0x9e2   :  { %15494 = vmatpush1.bf16.msra.mxu0 %v18457_v36  ;;  %v18894_v36 = vld [vmem:[#allocation20 + $0x1c8] sm:$0xff]  }
 0x9e3   :  { %15658 = vmatpush1.bf16.msra.mxu1 %v18459_v38  ;;  %18526 = vmatprep.subr.bf16.mxu0 %v18857_v52  ;;  %v18896_v38 = vld [vmem:[#allocation20 + $0x188] sm:$0xff]   ;;  %v18898_v52 = vld [vmem:[#allocation20 + $0x1d0] sm:$0xff]  }
 0x9e4   :  { %18548 = vmatprep.subr.bf16.mxu1 %v18858_v10  ;;  %v18899_v10 = vld [vmem:[#allocation20 + $0x110] sm:$0xff]  }
 0x9e5   :  { %15496 = vmatmul.mubr.bf16.vlgmr.msra.gmra.mrb[36].mxu0 %v19920_v59 }
 0x9e6   :  { %15660 = vmatmul.mubr.bf16.vlgmr.msra.gmra.mrb[36].mxu1 %v19920_v59  ;;  %18527 = vmatpush3.bf16.msra.mxu0 %v18859_v39  ;;  %v18871_v59 = vld [vmem:[#allocation20 + $0x18] sm:$0xff]  }
 0x9e7   :  { %16243 = vmatprep.mubr.bf16.mxu0 %v15685_v56  ;;  %18549 = vmatpush3.bf16.msra.mxu1 %v18860_v40  ;;  %v18902_v39 = vld [vmem:[#allocation20 + $0x1d8] sm:$0xff]   ;;  %v18905_v56 = vld [vmem:[#allocation20 + $0x160] sm:$0xff]  }
 0x9e8   :  { %16283 = vmatprep.mubr.bf16.mxu1 %v15687_v18  ;;  %18528 = vmatprep.subr.bf16.mxu0 %v18861_v21  ;;  %v18903_v40 = vld [vmem:[#allocation20 + $0x118] sm:$0xff]   ;;  %v18907_v18 = vld [vmem:[#allocation20 + $0x120] sm:$0xff]  }
 0x9e9   :  { %18550 = vmatprep.subr.bf16.mxu1 %v18862_v5  ;;  %v18904_v21 = vld [vmem:[#allocation20 + $0x198] sm:$0xff]   ;;  %v18906_v5 = vld [vmem:[#allocation20 + $0x1e0] sm:$0xff]  }
 0x9ea   :  { %18529 = vmatpush3.bf16.msra.mxu0 %v18863_v42  ;;  %v18908_v42 = vld [vmem:[#allocation20 + $0x1a0] sm:$0xff]  }
 0x9eb   :  { %18551 = vmatpush3.bf16.msra.mxu1 %v18864_v53  ;;  %18530 = vmatprep.subr.bf16.mxu0 %v18865_v12  ;;  %v18909_v53 = vld [vmem:[#allocation20 + $0x168] sm:$0xff]  }
 0x9ec   :  { %18552 = vmatprep.subr.bf16.mxu1 %v18866_v3  ;;  %v18910_v12 = vld [vmem:[#allocation20 + $0x1e8] sm:$0xff]  }
 0x9ed   :  { %v18911_v3 = vld [vmem:[#allocation20 + $0x128] sm:$0xff]  }
 0x9ee   :  { %18531 = vmatpush3.bf16.msra.mxu0 %v18867_v14  ;;  %v18912_v14 = vld [vmem:[#allocation20 + $0x1a8] sm:$0xff]  }
 0x9ef   :  { %18553 = vmatpush3.bf16.msra.mxu1 %v18868_v16  ;;  %18532 = vmatprep.subr.bf16.mxu0 %v18869_v24  ;;  %v18913_v16 = vld [vmem:[#allocation20 + $0x170] sm:$0xff]  }
 0x9f0   :  { %18554 = vmatprep.subr.bf16.mxu1 %v18870_v51  ;;  %v18914_v24 = vld [vmem:[#allocation20 + $0x1f0] sm:$0xff]  }
 0x9f1   :  { %v18915_v51 = vld [vmem:[#allocation20 + $0x130] sm:$0xff]  }
 0x9f2   :  { %18533 = vmatpush3.bf16.msra.mxu0 %v18871_v59  ;;  %v18916_v59 = vld [vmem:[#allocation20 + $0x1b0] sm:$0xff]  }
 0x9f3   :  { %18555 = vmatpush3.bf16.msra.mxu1 %v18872_v7  ;;  %18534 = vmatprep.subr.bf16.mxu0 %v18873_v46  ;;  %v18917_v7 = vld [vmem:[#allocation20 + $0x178] sm:$0xff]  }
 0x9f4   :  { %18556 = vmatprep.subr.bf16.mxu1 %v18874_v8  ;;  %v18918_v46 = vld [vmem:[#allocation20 + $0x1f8] sm:$0xff]  }
 0x9f5   :  { %v18919_v8 = vld [vmem:[#allocation20 + $0x138] sm:$0xff]  }
 0x9f6   :  { %18535 = vmatpush3.bf16.msra.mxu0 %v18875_v19  ;;  %v18920_v19 = vld [vmem:[#allocation20 + $0x1b8] sm:$0xff]  }
 0x9f7   :  { %18557 = vmatpush3.bf16.msra.mxu1 %v18876_v62  ;;  %18536 = vmatprep.subr.bf16.mxu0 %v18877_v58  ;;  %v12439_v62 = vrot.slane %v19946_v0, %v19623_v22  ;;  %v12435_v58 = vrot.slane %v19946_v0, %v19566_v13 }
 0x9f8   :  { %18558 = vmatprep.subr.bf16.mxu1 %v18878_v29 }
 0x9fa   :  { %18537 = vmatpush3.bf16.msra.mxu0 %v18879_v57 }
 0x9fb   :  { %18559 = vmatpush3.bf16.msra.mxu1 %v18880_v2  ;;  %18538 = vmatprep.subr.bf16.mxu0 %v18881_v32 }
 0x9fc   :  { %18560 = vmatprep.subr.bf16.mxu1 %v18882_v45 }
 0x9fe   :  { %18539 = vmatpush3.bf16.msra.mxu0 %v18883_v34 }
 0x9ff   :  { %18561 = vmatpush3.bf16.msra.mxu1 %v18884_v1  ;;  %18540 = vmatprep.subr.bf16.mxu0 %v18885_v17 }
 0xa00   :  { %18562 = vmatprep.subr.bf16.mxu1 %v18886_v15 }
 0xa02   :  { %18541 = vmatpush3.bf16.msra.mxu0 %v18887_v27 }
 0xa03   :  { %18563 = vmatpush3.bf16.msra.mxu1 %v18888_v35  ;;  %18570 = vmatprep.subr.bf16.mxu0 %v18889_v6 }
 0xa04   :  { %18592 = vmatprep.subr.bf16.mxu1 %v18890_v26 }
 0xa05   :  { %16244 = vmatmul.mubr.bf16.vlgmr.msra.gmra.mrb[40].mxu0 %v15684_v9 }
 0xa06   :  { %16284 = vmatmul.mubr.bf16.vlgmr.msra.gmra.mrb[40].mxu1 %v15686_v31  ;;  %18571 = vmatpush3.bf16.msra.mxu0 %v18891_v48 }
 0xa07   :  { %18593 = vmatpush3.bf16.msra.mxu1 %v18892_v41  ;;  %18572 = vmatprep.subr.bf16.mxu0 %v18893_v23  ;;  %v18461_v41 = vld [vmem:[#allocation22] ss:$0 sm:$0xff] }
 0xa08   :  { %18594 = vmatprep.subr.bf16.mxu1 %v18894_v36 }
 0xa0a   :  { %18573 = vmatpush3.bf16.msra.mxu0 %v18895_v55 }
 0xa0b   :  { %18595 = vmatpush3.bf16.msra.mxu1 %v18896_v38  ;;  %18574 = vmatprep.subr.bf16.mxu0 %v18897_v63 }
 0xa0c   :  { %18596 = vmatprep.subr.bf16.mxu1 %v18898_v52 }
 0xa0e   :  { %18575 = vmatpush3.bf16.msra.mxu0 %v18899_v10 }
 0xa0f   :  { %18597 = vmatpush3.bf16.msra.mxu1 %v18900_v54  ;;  %18576 = vmatprep.subr.bf16.mxu0 %v18901_v28 }
 0xa10   :  { %18598 = vmatprep.subr.bf16.mxu1 %v18902_v39 }
 0xa12   :  { %18577 = vmatpush3.bf16.msra.mxu0 %v18903_v40 }
 0xa13   :  { %18599 = vmatpush3.bf16.msra.mxu1 %v18904_v21  ;;  %18578 = vmatprep.subr.bf16.mxu0 %v18905_v56 }
 0xa14   :  { %18600 = vmatprep.subr.bf16.mxu1 %v18906_v5 }
 0xa16   :  { %18579 = vmatpush3.bf16.msra.mxu0 %v18907_v18 }
 0xa17   :  { %18601 = vmatpush3.bf16.msra.mxu1 %v18908_v42  ;;  %18580 = vmatprep.subr.bf16.mxu0 %v18909_v53 }
 0xa18   :  { %18602 = vmatprep.subr.bf16.mxu1 %v18910_v12 }
 0xa1a   :  { %18581 = vmatpush3.bf16.msra.mxu0 %v18911_v3 }
 0xa1b   :  { %18603 = vmatpush3.bf16.msra.mxu1 %v18912_v14  ;;  %18582 = vmatprep.subr.bf16.mxu0 %v18913_v16 }
 0xa1c   :  { %18604 = vmatprep.subr.bf16.mxu1 %v18914_v24 }
 0xa1e   :  { %18583 = vmatpush3.bf16.msra.mxu0 %v18915_v51 }
 0xa1f   :  { %18605 = vmatpush3.bf16.msra.mxu1 %v18916_v59  ;;  %18584 = vmatprep.subr.bf16.mxu0 %v18917_v7 }
 0xa20   :  { %18606 = vmatprep.subr.bf16.mxu1 %v18918_v46 }
 0xa22   :  { %18585 = vmatpush3.bf16.msra.mxu0 %v18919_v8 }
 0xa23   :  { %18607 = vmatpush3.bf16.msra.mxu1 %v18920_v19 }
 0xab8   :  { %v15497_v29 = vpop.f32.mrb[36].mxu0 }
 0xab9   :  { %v18642_v57 = vadd.f32 %v15497_v29, %v12431_v50  ;;  %v15661_v30 = vpop.f32.mrb[36].mxu1  ;;  %v15499_v2 = vpop.f32.mrb[37].mxu0 }
 0xaba   :  { %v18644_v32 = vadd.f32 %v15661_v30, %v12439_v62  ;;  %v18643_v49 = vadd.f32 %v15499_v2, %v12435_v58  ;;  %v15663_v45 = vpop.f32.mrb[37].mxu1  ;;  %v15501_v34 = vpop.f32.mrb[38].mxu0 }
 0xabb   :  { %v15672_v61 = vmax.f32 %v18642_v57, 0.0  ;;  %v18645_v1 = vadd.f32 %v15663_v45, %v12443_v43  ;;  %v15665_v4 = vpop.f32.mrb[38].mxu1  ;;  %v15502_v17 = vpop.f32.mrb[39].mxu0 }
 0xabc   :  { %v15674_v33 = vmax.f32 %v18644_v32, 0.0  ;;  %v15673_v22 = vmax.f32 %v18643_v49, 0.0  ;;  %v15666_v15 = vpop.f32.mrb[39].mxu1 }
 0xabd   :  { %v15680_v13 = vadd.f32 %v15672_v61, %v19803_v44  ;;  %v15675_v27 = vmax.f32 %v18645_v1, 0.0 }
 0xabe   :  { %v15682_v20 = vadd.f32 %v15674_v33, %v19833_v25  ;;  %v15681_v0 = vadd.f32 %v15673_v22, %v19806_v37 }
 0xabf   :  { %v15683_v60 = vadd.f32 %v15675_v27, %v19809_v11  ;;  %v15688_v6 = vpack.c.bf16 %v15680_v13, %v15680_v13 }
 0xac0   :  { %v15689_v35 = vpack.c.bf16 %v15681_v0, %v15681_v0  ;;  %v15690_v26 = vpack.c.bf16 %v15682_v20, %v15682_v20 }
 0xac1   :  { %v15691_v47 = vpack.c.bf16 %v15683_v60, %v15683_v60 }
 0xac2   :  { %16323 = vmatprep.mubr.bf16.mxu0 %v15689_v35 }
 0xac3   :  { %16363 = vmatprep.mubr.bf16.mxu1 %v15691_v47  ;;  %16324 = vmatmul.mubr.bf16.vlgmr.msra.gmra.mrb[44].mxu0 %v15688_v6 }
 0xac4   :  { %16364 = vmatmul.mubr.bf16.vlgmr.msra.gmra.mrb[44].mxu1 %v15690_v26 }
 0xad8   :  { %v18542_v48 = vpop.f32.mrb[40].mxu0 }
 0xad9   :  { %v18564_v9 = vpop.f32.mrb[40].mxu1  ;;  %v18543_v23 = vpop.f32.mrb[41].mxu0 }
 0xada   :  { %v18544_v44 = vadd.f32 %v18543_v23, %v18542_v48  ;;  %v18565_v31 = vpop.f32.mrb[41].mxu1  ;;  %v18545_v36 = vpop.f32.mrb[42].mxu0 }
 0xadb   :  { %v18566_v25 = vadd.f32 %v18565_v31, %v18564_v9  ;;  %v18567_v55 = vpop.f32.mrb[42].mxu1  ;;  %v18546_v37 = vpop.f32.mrb[43].mxu0 }
 0xadc   :  { %v16246_v38 = vadd.f32 %v18544_v44, %v18461_v41  ;;  %v18568_v11 = vpop.f32.mrb[43].mxu1 }
 0xade   :  { %v16286_v63 = vadd.f32 %v18566_v25, %v16246_v38 }
 0xb96   :  { %v18586_v52 = vpop.f32.mrb[44].mxu0 }
 0xb97   :  { %v18608_v10 = vpop.f32.mrb[44].mxu1  ;;  %v18587_v54 = vpop.f32.mrb[45].mxu0 }
 0xb98   :  { %v18588_v28 = vadd.f32 %v18587_v54, %v18586_v52  ;;  %v18609_v39 = vpop.f32.mrb[45].mxu1  ;;  %v18589_v40 = vpop.f32.mrb[46].mxu0 }
 0xb99   :  { %v18610_v21 = vadd.f32 %v18609_v39, %v18608_v10  ;;  %v18611_v56 = vpop.f32.mrb[46].mxu1  ;;  %v18590_v5 = vpop.f32.mrb[47].mxu0 }
 0xb9a   :  { %v16326_v18 = vadd.f32 %v18588_v28, %v16286_v63  ;;  %v18612_v42 = vpop.f32.mrb[47].mxu1 }
 0xb9c   :  { %v16366_v53 = vadd.f32 %v18610_v21, %v16326_v18 }
 0xb9e   :  { %16371 = vst [vmem:[#allocation23] sm:$0xff] %v16366_v53 }
 0xb9f   :  { %19222 = shalt.err (!%p19219_p10)
}
 0xba0   :  { %s19223_s26 = scalar_lea.hbm %s20003_s13, 128 }
 0xba1   :  { %p19224_p11 = scmp.ne.s32.totalorder %s20003_s13, %s19223_s26  ;;  %p19227_p12 = scmp.lt.u32.totalorder %s19223_s26, %s20003_s13 }
 0xba3   :  { %p19229_p13 = pnand %p19227_p12, %p19224_p11 }
 0xba5   :  { %19232 = shalt.err (!%p19229_p13)
}
 0xba6   :  { %16381 = dma.vmem_to_hbm [thread:$0]  %s16379_s20, 128, %s20003_s13, [#allocation4]  }
 0xba7   :  { %19247 = dma.done.wait [#allocation4], 128  }
 0xba8   :  { %19248 = vsyncadd [#allocation4], 4294967168 }
 0xba9   :  { %16385 = vsyncpa [#allocation3], 1 }
 0xbaa   :  { %16386 = vsyncpa [#allocation6], 1 }
 0xbab   :  { %16387 = vsyncpa [#allocation9], 1 }
 0xbac   :  { %16388 = vsyncpa [#allocation12], 1 }
 0xbad   :  { %16389 = vsyncpa [#allocation15], 1 }
 0xbae   :  { %16390 = vsyncpa [#allocation18], 1 }
 0xbaf   :  { %16391 = vsyncpa [#allocation21], 1 }
 0xbb0   :  { %16392 = vsyncpa [#allocation4], 1 }

</bundles_post_ra>
